<compile_context>
chip_gen: v5e
topology: v5e:2x2
jax: 0.10.0
libtpu: 0.0.40
codegen_flags: <defaults>
</compile_context>

<pallas_src>
import functools

import numpy as np
import jax
import jax.numpy as jnp
from jax import lax
from jax.experimental import pallas as pl
from jax.experimental.pallas import tpu as pltpu


# ---------------- constant gather operators (shape-only, built at trace time) ----------------

def _gather_operators(H, W, stride, pad=1, k=3):
    """Per-tap 0/1 matrices G[t] of shape (H*W, Ho*Wo).

    Right-multiplying a (rows, H*W) activation (spatial flattened on lanes) by G[t]
    produces the tap (kh, kw) shifted + strided + zero-padded view used by an implicit
    im2col.  Exactly representable in bfloat16."""
    Ho = (H + 2 * pad - k) // stride + 1
    Wo = (W + 2 * pad - k) // stride + 1
    G = np.zeros((k * k, H * W, Ho * Wo), np.float32)
    ho = np.arange(Ho)[:, None]
    wo = np.arange(Wo)[None, :]
    dst = ho * Wo + wo                                   # (Ho, Wo)
    for kh in range(k):
        for kw in range(k):
            hi = stride * ho + kh - pad                  # (Ho, 1)
            wi = stride * wo + kw - pad                  # (1, Wo)
            valid = (hi >= 0) & (hi < H) & (wi >= 0) & (wi < W)
            src = hi * W + wi                            # (Ho, Wo)
            t = kh * k + kw
            G[t, src[valid], dst[valid]] = 1.0
    return Ho, Wo, G


def _block_diag_weights(w, n_batch):
    """(Cout, Cin, 3, 3) -> (9, N*Cout, N*Cin) = kron(I_N, W[:, :, kh, kw]) per tap.

    Block-diagonal over the batch so a single matmul mixes channels for every sample in
    the stacked (N*C, spatial) layout."""
    cout, cin = w.shape[0], w.shape[1]
    w_taps = jnp.transpose(w, (2, 3, 0, 1)).reshape(9, cout, cin)
    eye = jnp.eye(n_batch, dtype=w.dtype)
    blk = eye[None, :, None, :, None] * w_taps[:, None, :, None, :]
    return blk.reshape(9, n_batch * cout, n_batch * cin)


# ---------------- fused Pallas kernel: conv0 -> IN+ReLU+conv1 -> IN+ReLU+conv2 -> IN+ReLU ------

def _encoder_kernel(x_ref,
                    w0_ref, b0_ref, g0_ref,
                    w1_ref, b1_ref, g1_ref,
                    w2_ref, b2_ref, g2_ref,
                    skip0_ref, skip1_ref, out_ref):
    f32 = jnp.float32

    def conv3x3(a, w_ref, b_ref, g_ref):
        # a        : (N*Cin, Pin) f32, spatial flattened on lanes
        # g_ref[t] : (Pin, Pout) 0/1 gather operator (shift + stride + zero pad), bf16
        # w_ref[t] : (N*Cout, N*Cin) block-diagonal channel-mix weights for tap t, f32
        # b_ref    : (N*Cout, 1) bias
        acc = None
        for t in range(9):                               # fully unrolled; 9 taps
            g = g_ref[t].astype(f32)
            tap = jnp.dot(a, g, preferred_element_type=f32)              # MXU gather
            contrib = jnp.dot(w_ref[t], tap, preferred_element_type=f32)  # channel mix
            acc = contrib if acc is None else acc + contrib
        return acc + b_ref[...]

    def inorm_relu(y):
        # InstanceNorm2d(affine=False, eps=1e-5) + ReLU; rows are (n, c), lanes = spatial.
        mean = jnp.mean(y, axis=-1, keepdims=True)
        c = y - mean
        var = jnp.mean(c * c, axis=-1, keepdims=True)
        return jnp.maximum(c * lax.rsqrt(var + 1e-5), 0.0)

    x = x_ref[...].astype(f32)

    y0 = conv3x3(x, w0_ref, b0_ref, g0_ref)              # (N*8, 256)  block0 output
    skip0_ref[...] = y0

    y1 = conv3x3(inorm_relu(y0), w1_ref, b1_ref, g1_ref)  # (N*16, 64)  block1 output
    skip1_ref[...] = y1

    y2 = conv3x3(inorm_relu(y1), w2_ref, b2_ref, g2_ref)  # (N*32, 16)  block2 output
    out_ref[...] = inorm_relu(y2)                         # final IN + ReLU


# ---------------- encoder forward (single fused pallas_call) ----------------

@jax.jit
def encoder_forward(x, params):
    """Mirrors encoder.forward for this configuration: returns (out, skips)."""
    # TODO(synk): the `shortcut` residual module (skip=True path) is not among the
    # provided dependencies; this encoder instance uses skip=False so it is not needed.
    N, Cin, H, W = x.shape
    C0 = params["w0"].shape[0]
    C1 = params["w1"].shape[0]
    C2 = params["w2"].shape[0]

    # Shape-only gather operators (numpy at trace time -> executable constants).
    H1, W1, G0 = _gather_operators(H, W, stride=1)
    H2, W2, G1 = _gather_operators(H1, W1, stride=2)
    H3, W3, G2 = _gather_operators(H2, W2, stride=2)
    g0 = jnp.asarray(G0, jnp.bfloat16)   # 0/1 values are exact in bf16; halves the
    g1 = jnp.asarray(G1, jnp.bfloat16)   # dominant constant HBM read
    g2 = jnp.asarray(G2, jnp.bfloat16)

    # Kernel-layout parameters (tiny ops, fused into the same jit).
    w0b = _block_diag_weights(params["w0"], N)
    w1b = _block_diag_weights(params["w1"], N)
    w2b = _block_diag_weights(params["w2"], N)
    b0 = jnp.tile(params["b0"], N).reshape(N * C0, 1)
    b1 = jnp.tile(params["b1"], N).reshape(N * C1, 1)
    b2 = jnp.tile(params["b2"], N).reshape(N * C2, 1)

    x2 = x.reshape(N * Cin, H * W)       # NCHW-flat: rows=(n,c), lanes=spatial (free reshape)

    skip0, skip1, out = pl.pallas_call(
        _encoder_kernel,
        out_shape=(
            jax.ShapeDtypeStruct((N * C0, H1 * W1), jnp.float32),   # skip 0 (lane-dense: 256)
            jax.ShapeDtypeStruct((N * C1, H2 * W2), jnp.float32),   # skip 1
            jax.ShapeDtypeStruct((N * C2, H3 * W3), jnp.float32),   # final output
        ),
    )(x2, w0b, b0, g0, w1b, b1, g1, w2b, b2, g2)

    out = out.reshape(N, C2, H3, W3)
    skips = [skip0.reshape(N, C0, H1, W1), skip1.reshape(N, C1, H2, W2)]
    return out, skips


# ---------------- Pure-JAX reference (for verification) ----------------

def _ref_conv2d(x, w, b, stride, pad):
    y = lax.conv_general_dilated(
        x, w, (stride, stride), [(pad, pad), (pad, pad)],
        dimension_numbers=("NCHW", "OIHW", "NCHW"))
    return y + b[None, :, None, None]


def _ref_in_relu(x):
    m = x.mean(axis=(2, 3), keepdims=True)
    v = ((x - m) ** 2).mean(axis=(2, 3), keepdims=True)
    return jnp.maximum((x - m) * lax.rsqrt(v + 1e-5), 0.0)


def _ref_encoder(x, p):
    blocks = [
        lambda t: _ref_conv2d(t, p["w0"], p["b0"], 1, 1),
        lambda t: _ref_conv2d(_ref_in_relu(t), p["w1"], p["b1"], 2, 1),
        lambda t: _ref_conv2d(_ref_in_relu(t), p["w2"], p["b2"], 2, 1),
        lambda t: _ref_in_relu(t),
    ]
    skips = []
    size = x.shape
    out = x
    for fn in blocks:
        out_prev = out
        out = fn(out_prev)
        if out.shape[-1] != size[-1] or out.shape[-2] != size[-2]:
            size = out.shape
            skips.append(out_prev)
    return out, skips


# ---------------- Main ----------------

if __name__ == "__main__":
    key = jax.random.PRNGKey(0)
    N, Cin, H, W = 2, 4, 16, 16
    num_channels_list = [8, 16, 32]
    K = 3

    keys = jax.random.split(key, 8)

    def kaiming(k_, cout, cin, ksz):
        fan_in = cin * ksz * ksz
        return jax.random.normal(k_, (cout, cin, ksz, ksz), jnp.float32) * jnp.sqrt(2.0 / fan_in)

    params = {
        "w0": kaiming(keys[0], num_channels_list[0], Cin, K),
        "b0": 0.01 * jax.random.normal(keys[1], (num_channels_list[0],), jnp.float32),
        "w1": kaiming(keys[2], num_channels_list[1], num_channels_list[0], K),
        "b1": 0.01 * jax.random.normal(keys[3], (num_channels_list[1],), jnp.float32),
        "w2": kaiming(keys[4], num_channels_list[2], num_channels_list[1], K),
        "b2": 0.01 * jax.random.normal(keys[5], (num_channels_list[2],), jnp.float32),
    }

    x = jax.random.normal(keys[6], (N, Cin, H, W), jnp.float32)

    out, skips = encoder_forward(x, params)
    out = jax.block_until_ready(out)
    skips = [jax.block_until_ready(s) for s in skips]

    # Shape checks (matches PyTorch encoder with this config)
    assert out.shape == (N, num_channels_list[2], H // 4, W // 4), out.shape
    assert len(skips) == 2
    assert skips[0].shape == (N, num_channels_list[0], H, W)
    assert skips[1].shape == (N, num_channels_list[1], H // 2, W // 2)

    # Numerical check against pure-JAX reference
    ref_out, ref_skips = _ref_encoder(x, params)
    assert jnp.allclose(out, ref_out, atol=1e-4, rtol=1e-4)
    for a, b in zip(skips, ref_skips):
        assert jnp.allclose(a, b, atol=1e-4, rtol=1e-4)

    print("KERNEL_OK")
</pallas_src>

<mosaic_0001>
module attributes {stable_mosaic.version = 11 : i64} {
  func.func @_encoder_kernel(%arg0: memref<8x256xf32, #tpu.memory_space<vmem>>, %arg1: memref<9x16x8xf32, #tpu.memory_space<vmem>>, %arg2: memref<16x1xf32, #tpu.memory_space<vmem>>, %arg3: memref<9x256x256xbf16, #tpu.memory_space<vmem>>, %arg4: memref<9x32x16xf32, #tpu.memory_space<vmem>>, %arg5: memref<32x1xf32, #tpu.memory_space<vmem>>, %arg6: memref<9x256x64xbf16, #tpu.memory_space<vmem>>, %arg7: memref<9x64x32xf32, #tpu.memory_space<vmem>>, %arg8: memref<64x1xf32, #tpu.memory_space<vmem>>, %arg9: memref<9x64x16xbf16, #tpu.memory_space<vmem>>, %arg10: memref<16x256xf32, #tpu.memory_space<vmem>>, %arg11: memref<32x64xf32, #tpu.memory_space<vmem>>, %arg12: memref<64x16xf32, #tpu.memory_space<vmem>>) attributes {dimension_semantics = [], scalar_prefetch = 0 : i64, scratch_operands = 0 : i64, tpu.core_type = #tpu.core_type<tc>} {
    %c0 = arith.constant 0 : index
    %c0_0 = arith.constant 0 : index
    %0 = vector.load %arg0[%c0, %c0_0] : memref<8x256xf32, #tpu.memory_space<vmem>>, vector<8x256xf32>
    %c0_1 = arith.constant 0 : index
    %c0_2 = arith.constant 0 : index
    %c0_3 = arith.constant 0 : index
    %1 = vector.load %arg3[%c0_1, %c0_2, %c0_3] : memref<9x256x256xbf16, #tpu.memory_space<vmem>>, vector<1x256x256xbf16>
    %2 = vector.shape_cast %1 : vector<1x256x256xbf16> to vector<256x256xbf16>
    %3 = arith.extf %2 : vector<256x256xbf16> to vector<256x256xf32>
    %cst = arith.constant dense<0.000000e+00> : vector<8x256xf32>
    %4 = tpu.matmul %0, %3, %cst {dimension_numbers = #tpu.dot_dimension_numbers<[1], [0], [0], [1], [0, 0, 1, 1], [], []>} : vector<8x256xf32>, vector<256x256xf32>, vector<8x256xf32> -> vector<8x256xf32>
    %c0_4 = arith.constant 0 : index
    %c0_5 = arith.constant 0 : index
    %c0_6 = arith.constant 0 : index
    %5 = vector.load %arg1[%c0_4, %c0_5, %c0_6] : memref<9x16x8xf32, #tpu.memory_space<vmem>>, vector<1x16x8xf32>
    %6 = vector.shape_cast %5 : vector<1x16x8xf32> to vector<16x8xf32>
    %cst_7 = arith.constant dense<0.000000e+00> : vector<16x256xf32>
    %7 = tpu.matmul %6, %4, %cst_7 {dimension_numbers = #tpu.dot_dimension_numbers<[1], [0], [0], [1], [0, 0, 1, 1], [], []>} : vector<16x8xf32>, vector<8x256xf32>, vector<16x256xf32> -> vector<16x256xf32>
    %c1 = arith.constant 1 : index
    %c0_8 = arith.constant 0 : index
    %c0_9 = arith.constant 0 : index
    %8 = vector.load %arg3[%c1, %c0_8, %c0_9] : memref<9x256x256xbf16, #tpu.memory_space<vmem>>, vector<1x256x256xbf16>
    %9 = vector.shape_cast %8 : vector<1x256x256xbf16> to vector<256x256xbf16>
    %10 = arith.extf %9 : vector<256x256xbf16> to vector<256x256xf32>
    %cst_10 = arith.constant dense<0.000000e+00> : vector<8x256xf32>
    %11 = tpu.matmul %0, %10, %cst_10 {dimension_numbers = #tpu.dot_dimension_numbers<[1], [0], [0], [1], [0, 0, 1, 1], [], []>} : vector<8x256xf32>, vector<256x256xf32>, vector<8x256xf32> -> vector<8x256xf32>
    %c1_11 = arith.constant 1 : index
    %c0_12 = arith.constant 0 : index
    %c0_13 = arith.constant 0 : index
    %12 = vector.load %arg1[%c1_11, %c0_12, %c0_13] : memref<9x16x8xf32, #tpu.memory_space<vmem>>, vector<1x16x8xf32>
    %13 = vector.shape_cast %12 : vector<1x16x8xf32> to vector<16x8xf32>
    %cst_14 = arith.constant dense<0.000000e+00> : vector<16x256xf32>
    %14 = tpu.matmul %13, %11, %cst_14 {dimension_numbers = #tpu.dot_dimension_numbers<[1], [0], [0], [1], [0, 0, 1, 1], [], []>} : vector<16x8xf32>, vector<8x256xf32>, vector<16x256xf32> -> vector<16x256xf32>
    %15 = arith.addf %7, %14 : vector<16x256xf32>
    %c2 = arith.constant 2 : index
    %c0_15 = arith.constant 0 : index
    %c0_16 = arith.constant 0 : index
    %16 = vector.load %arg3[%c2, %c0_15, %c0_16] : memref<9x256x256xbf16, #tpu.memory_space<vmem>>, vector<1x256x256xbf16>
    %17 = vector.shape_cast %16 : vector<1x256x256xbf16> to vector<256x256xbf16>
    %18 = arith.extf %17 : vector<256x256xbf16> to vector<256x256xf32>
    %cst_17 = arith.constant dense<0.000000e+00> : vector<8x256xf32>
    %19 = tpu.matmul %0, %18, %cst_17 {dimension_numbers = #tpu.dot_dimension_numbers<[1], [0], [0], [1], [0, 0, 1, 1], [], []>} : vector<8x256xf32>, vector<256x256xf32>, vector<8x256xf32> -> vector<8x256xf32>
    %c2_18 = arith.constant 2 : index
    %c0_19 = arith.constant 0 : index
    %c0_20 = arith.constant 0 : index
    %20 = vector.load %arg1[%c2_18, %c0_19, %c0_20] : memref<9x16x8xf32, #tpu.memory_space<vmem>>, vector<1x16x8xf32>
    %21 = vector.shape_cast %20 : vector<1x16x8xf32> to vector<16x8xf32>
    %cst_21 = arith.constant dense<0.000000e+00> : vector<16x256xf32>
    %22 = tpu.matmul %21, %19, %cst_21 {dimension_numbers = #tpu.dot_dimension_numbers<[1], [0], [0], [1], [0, 0, 1, 1], [], []>} : vector<16x8xf32>, vector<8x256xf32>, vector<16x256xf32> -> vector<16x256xf32>
    %23 = arith.addf %15, %22 : vector<16x256xf32>
    %c3 = arith.constant 3 : index
    %c0_22 = arith.constant 0 : index
    %c0_23 = arith.constant 0 : index
    %24 = vector.load %arg3[%c3, %c0_22, %c0_23] : memref<9x256x256xbf16, #tpu.memory_space<vmem>>, vector<1x256x256xbf16>
    %25 = vector.shape_cast %24 : vector<1x256x256xbf16> to vector<256x256xbf16>
    %26 = arith.extf %25 : vector<256x256xbf16> to vector<256x256xf32>
    %cst_24 = arith.constant dense<0.000000e+00> : vector<8x256xf32>
    %27 = tpu.matmul %0, %26, %cst_24 {dimension_numbers = #tpu.dot_dimension_numbers<[1], [0], [0], [1], [0, 0, 1, 1], [], []>} : vector<8x256xf32>, vector<256x256xf32>, vector<8x256xf32> -> vector<8x256xf32>
    %c3_25 = arith.constant 3 : index
    %c0_26 = arith.constant 0 : index
    %c0_27 = arith.constant 0 : index
    %28 = vector.load %arg1[%c3_25, %c0_26, %c0_27] : memref<9x16x8xf32, #tpu.memory_space<vmem>>, vector<1x16x8xf32>
    %29 = vector.shape_cast %28 : vector<1x16x8xf32> to vector<16x8xf32>
    %cst_28 = arith.constant dense<0.000000e+00> : vector<16x256xf32>
    %30 = tpu.matmul %29, %27, %cst_28 {dimension_numbers = #tpu.dot_dimension_numbers<[1], [0], [0], [1], [0, 0, 1, 1], [], []>} : vector<16x8xf32>, vector<8x256xf32>, vector<16x256xf32> -> vector<16x256xf32>
    %31 = arith.addf %23, %30 : vector<16x256xf32>
    %c4 = arith.constant 4 : index
    %c0_29 = arith.constant 0 : index
    %c0_30 = arith.constant 0 : index
    %32 = vector.load %arg3[%c4, %c0_29, %c0_30] : memref<9x256x256xbf16, #tpu.memory_space<vmem>>, vector<1x256x256xbf16>
    %33 = vector.shape_cast %32 : vector<1x256x256xbf16> to vector<256x256xbf16>
    %34 = arith.extf %33 : vector<256x256xbf16> to vector<256x256xf32>
    %cst_31 = arith.constant dense<0.000000e+00> : vector<8x256xf32>
    %35 = tpu.matmul %0, %34, %cst_31 {dimension_numbers = #tpu.dot_dimension_numbers<[1], [0], [0], [1], [0, 0, 1, 1], [], []>} : vector<8x256xf32>, vector<256x256xf32>, vector<8x256xf32> -> vector<8x256xf32>
    %c4_32 = arith.constant 4 : index
    %c0_33 = arith.constant 0 : index
    %c0_34 = arith.constant 0 : index
    %36 = vector.load %arg1[%c4_32, %c0_33, %c0_34] : memref<9x16x8xf32, #tpu.memory_space<vmem>>, vector<1x16x8xf32>
    %37 = vector.shape_cast %36 : vector<1x16x8xf32> to vector<16x8xf32>
    %cst_35 = arith.constant dense<0.000000e+00> : vector<16x256xf32>
    %38 = tpu.matmul %37, %35, %cst_35 {dimension_numbers = #tpu.dot_dimension_numbers<[1], [0], [0], [1], [0, 0, 1, 1], [], []>} : vector<16x8xf32>, vector<8x256xf32>, vector<16x256xf32> -> vector<16x256xf32>
    %39 = arith.addf %31, %38 : vector<16x256xf32>
    %c5 = arith.constant 5 : index
    %c0_36 = arith.constant 0 : index
    %c0_37 = arith.constant 0 : index
    %40 = vector.load %arg3[%c5, %c0_36, %c0_37] : memref<9x256x256xbf16, #tpu.memory_space<vmem>>, vector<1x256x256xbf16>
    %41 = vector.shape_cast %40 : vector<1x256x256xbf16> to vector<256x256xbf16>
    %42 = arith.extf %41 : vector<256x256xbf16> to vector<256x256xf32>
    %cst_38 = arith.constant dense<0.000000e+00> : vector<8x256xf32>
    %43 = tpu.matmul %0, %42, %cst_38 {dimension_numbers = #tpu.dot_dimension_numbers<[1], [0], [0], [1], [0, 0, 1, 1], [], []>} : vector<8x256xf32>, vector<256x256xf32>, vector<8x256xf32> -> vector<8x256xf32>
    %c5_39 = arith.constant 5 : index
    %c0_40 = arith.constant 0 : index
    %c0_41 = arith.constant 0 : index
    %44 = vector.load %arg1[%c5_39, %c0_40, %c0_41] : memref<9x16x8xf32, #tpu.memory_space<vmem>>, vector<1x16x8xf32>
    %45 = vector.shape_cast %44 : vector<1x16x8xf32> to vector<16x8xf32>
    %cst_42 = arith.constant dense<0.000000e+00> : vector<16x256xf32>
    %46 = tpu.matmul %45, %43, %cst_42 {dimension_numbers = #tpu.dot_dimension_numbers<[1], [0], [0], [1], [0, 0, 1, 1], [], []>} : vector<16x8xf32>, vector<8x256xf32>, vector<16x256xf32> -> vector<16x256xf32>
    %47 = arith.addf %39, %46 : vector<16x256xf32>
    %c6 = arith.constant 6 : index
    %c0_43 = arith.constant 0 : index
    %c0_44 = arith.constant 0 : index
    %48 = vector.load %arg3[%c6, %c0_43, %c0_44] : memref<9x256x256xbf16, #tpu.memory_space<vmem>>, vector<1x256x256xbf16>
    %49 = vector.shape_cast %48 : vector<1x256x256xbf16> to vector<256x256xbf16>
    %50 = arith.extf %49 : vector<256x256xbf16> to vector<256x256xf32>
    %cst_45 = arith.constant dense<0.000000e+00> : vector<8x256xf32>
    %51 = tpu.matmul %0, %50, %cst_45 {dimension_numbers = #tpu.dot_dimension_numbers<[1], [0], [0], [1], [0, 0, 1, 1], [], []>} : vector<8x256xf32>, vector<256x256xf32>, vector<8x256xf32> -> vector<8x256xf32>
    %c6_46 = arith.constant 6 : index
    %c0_47 = arith.constant 0 : index
    %c0_48 = arith.constant 0 : index
    %52 = vector.load %arg1[%c6_46, %c0_47, %c0_48] : memref<9x16x8xf32, #tpu.memory_space<vmem>>, vector<1x16x8xf32>
    %53 = vector.shape_cast %52 : vector<1x16x8xf32> to vector<16x8xf32>
    %cst_49 = arith.constant dense<0.000000e+00> : vector<16x256xf32>
    %54 = tpu.matmul %53, %51, %cst_49 {dimension_numbers = #tpu.dot_dimension_numbers<[1], [0], [0], [1], [0, 0, 1, 1], [], []>} : vector<16x8xf32>, vector<8x256xf32>, vector<16x256xf32> -> vector<16x256xf32>
    %55 = arith.addf %47, %54 : vector<16x256xf32>
    %c7 = arith.constant 7 : index
    %c0_50 = arith.constant 0 : index
    %c0_51 = arith.constant 0 : index
    %56 = vector.load %arg3[%c7, %c0_50, %c0_51] : memref<9x256x256xbf16, #tpu.memory_space<vmem>>, vector<1x256x256xbf16>
    %57 = vector.shape_cast %56 : vector<1x256x256xbf16> to vector<256x256xbf16>
    %58 = arith.extf %57 : vector<256x256xbf16> to vector<256x256xf32>
    %cst_52 = arith.constant dense<0.000000e+00> : vector<8x256xf32>
    %59 = tpu.matmul %0, %58, %cst_52 {dimension_numbers = #tpu.dot_dimension_numbers<[1], [0], [0], [1], [0, 0, 1, 1], [], []>} : vector<8x256xf32>, vector<256x256xf32>, vector<8x256xf32> -> vector<8x256xf32>
    %c7_53 = arith.constant 7 : index
    %c0_54 = arith.constant 0 : index
    %c0_55 = arith.constant 0 : index
    %60 = vector.load %arg1[%c7_53, %c0_54, %c0_55] : memref<9x16x8xf32, #tpu.memory_space<vmem>>, vector<1x16x8xf32>
    %61 = vector.shape_cast %60 : vector<1x16x8xf32> to vector<16x8xf32>
    %cst_56 = arith.constant dense<0.000000e+00> : vector<16x256xf32>
    %62 = tpu.matmul %61, %59, %cst_56 {dimension_numbers = #tpu.dot_dimension_numbers<[1], [0], [0], [1], [0, 0, 1, 1], [], []>} : vector<16x8xf32>, vector<8x256xf32>, vector<16x256xf32> -> vector<16x256xf32>
    %63 = arith.addf %55, %62 : vector<16x256xf32>
    %c8 = arith.constant 8 : index
    %c0_57 = arith.constant 0 : index
    %c0_58 = arith.constant 0 : index
    %64 = vector.load %arg3[%c8, %c0_57, %c0_58] : memref<9x256x256xbf16, #tpu.memory_space<vmem>>, vector<1x256x256xbf16>
    %65 = vector.shape_cast %64 : vector<1x256x256xbf16> to vector<256x256xbf16>
    %66 = arith.extf %65 : vector<256x256xbf16> to vector<256x256xf32>
    %cst_59 = arith.constant dense<0.000000e+00> : vector<8x256xf32>
    %67 = tpu.matmul %0, %66, %cst_59 {dimension_numbers = #tpu.dot_dimension_numbers<[1], [0], [0], [1], [0, 0, 1, 1], [], []>} : vector<8x256xf32>, vector<256x256xf32>, vector<8x256xf32> -> vector<8x256xf32>
    %c8_60 = arith.constant 8 : index
    %c0_61 = arith.constant 0 : index
    %c0_62 = arith.constant 0 : index
    %68 = vector.load %arg1[%c8_60, %c0_61, %c0_62] : memref<9x16x8xf32, #tpu.memory_space<vmem>>, vector<1x16x8xf32>
    %69 = vector.shape_cast %68 : vector<1x16x8xf32> to vector<16x8xf32>
    %cst_63 = arith.constant dense<0.000000e+00> : vector<16x256xf32>
    %70 = tpu.matmul %69, %67, %cst_63 {dimension_numbers = #tpu.dot_dimension_numbers<[1], [0], [0], [1], [0, 0, 1, 1], [], []>} : vector<16x8xf32>, vector<8x256xf32>, vector<16x256xf32> -> vector<16x256xf32>
    %71 = arith.addf %63, %70 : vector<16x256xf32>
    %c0_64 = arith.constant 0 : index
    %c0_65 = arith.constant 0 : index
    %72 = vector.load %arg2[%c0_64, %c0_65] : memref<16x1xf32, #tpu.memory_space<vmem>>, vector<16x1xf32>
    %73 = vector.broadcast %72 : vector<16x1xf32> to vector<16x256xf32>
    %74 = arith.addf %71, %73 : vector<16x256xf32>
    %c0_66 = arith.constant 0 : index
    %c0_67 = arith.constant 0 : index
    %75 = vector.load %arg10[%c0_66, %c0_67] : memref<16x256xf32, #tpu.memory_space<vmem>>, vector<16x256xf32>
    tpu.vector_store %arg10[%c0_66, %c0_67], %74 {strides = array<i32>} : memref<16x256xf32, #tpu.memory_space<vmem>>, vector<16x256xf32>,
    %cst_68 = arith.constant dense<0.000000e+00> : vector<16xf32>
    %76 = vector.multi_reduction <add>, %74, %cst_68 [1] : vector<16x256xf32> to vector<16xf32>
    %77 = vector.shape_cast %76 : vector<16xf32> to vector<16x1xf32>
    %cst_69 = arith.constant 2.560000e+02 : f32
    %78 = vector.broadcast %cst_69 : f32 to vector<16x1xf32>
    %79 = arith.divf %77, %78 : vector<16x1xf32>
    %80 = vector.broadcast %79 : vector<16x1xf32> to vector<16x256xf32>
    %81 = arith.subf %74, %80 : vector<16x256xf32>
    %82 = arith.mulf %81, %81 : vector<16x256xf32>
    %cst_70 = arith.constant dense<0.000000e+00> : vector<16xf32>
    %83 = vector.multi_reduction <add>, %82, %cst_70 [1] : vector<16x256xf32> to vector<16xf32>
    %84 = vector.shape_cast %83 : vector<16xf32> to vector<16x1xf32>
    %cst_71 = arith.constant 2.560000e+02 : f32
    %85 = vector.broadcast %cst_71 : f32 to vector<16x1xf32>
    %86 = arith.divf %84, %85 : vector<16x1xf32>
    %cst_72 = arith.constant 9.99999974E-6 : f32
    %87 = vector.broadcast %cst_72 : f32 to vector<16x1xf32>
    %88 = arith.addf %86, %87 : vector<16x1xf32>
    %89 = math.rsqrt %88 : vector<16x1xf32>
    %90 = vector.broadcast %89 : vector<16x1xf32> to vector<16x256xf32>
    %91 = arith.mulf %81, %90 : vector<16x256xf32>
    %cst_73 = arith.constant 0.000000e+00 : f32
    %92 = vector.broadcast %cst_73 : f32 to vector<16x256xf32>
    %93 = arith.maximumf %91, %92 : vector<16x256xf32>
    %c0_74 = arith.constant 0 : index
    %c0_75 = arith.constant 0 : index
    %c0_76 = arith.constant 0 : index
    %94 = vector.load %arg6[%c0_74, %c0_75, %c0_76] : memref<9x256x64xbf16, #tpu.memory_space<vmem>>, vector<1x256x64xbf16>
    %95 = vector.shape_cast %94 : vector<1x256x64xbf16> to vector<256x64xbf16>
    %96 = arith.extf %95 : vector<256x64xbf16> to vector<256x64xf32>
    %cst_77 = arith.constant dense<0.000000e+00> : vector<16x64xf32>
    %97 = tpu.matmul %93, %96, %cst_77 {dimension_numbers = #tpu.dot_dimension_numbers<[1], [0], [0], [1], [0, 0, 1, 1], [], []>} : vector<16x256xf32>, vector<256x64xf32>, vector<16x64xf32> -> vector<16x64xf32>
    %c0_78 = arith.constant 0 : index
    %c0_79 = arith.constant 0 : index
    %c0_80 = arith.constant 0 : index
    %98 = vector.load %arg4[%c0_78, %c0_79, %c0_80] : memref<9x32x16xf32, #tpu.memory_space<vmem>>, vector<1x32x16xf32>
    %99 = vector.shape_cast %98 : vector<1x32x16xf32> to vector<32x16xf32>
    %cst_81 = arith.constant dense<0.000000e+00> : vector<32x64xf32>
    %100 = tpu.matmul %99, %97, %cst_81 {dimension_numbers = #tpu.dot_dimension_numbers<[1], [0], [0], [1], [0, 0, 1, 1], [], []>} : vector<32x16xf32>, vector<16x64xf32>, vector<32x64xf32> -> vector<32x64xf32>
    %c1_82 = arith.constant 1 : index
    %c0_83 = arith.constant 0 : index
    %c0_84 = arith.constant 0 : index
    %101 = vector.load %arg6[%c1_82, %c0_83, %c0_84] : memref<9x256x64xbf16, #tpu.memory_space<vmem>>, vector<1x256x64xbf16>
    %102 = vector.shape_cast %101 : vector<1x256x64xbf16> to vector<256x64xbf16>
    %103 = arith.extf %102 : vector<256x64xbf16> to vector<256x64xf32>
    %cst_85 = arith.constant dense<0.000000e+00> : vector<16x64xf32>
    %104 = tpu.matmul %93, %103, %cst_85 {dimension_numbers = #tpu.dot_dimension_numbers<[1], [0], [0], [1], [0, 0, 1, 1], [], []>} : vector<16x256xf32>, vector<256x64xf32>, vector<16x64xf32> -> vector<16x64xf32>
    %c1_86 = arith.constant 1 : index
    %c0_87 = arith.constant 0 : index
    %c0_88 = arith.constant 0 : index
    %105 = vector.load %arg4[%c1_86, %c0_87, %c0_88] : memref<9x32x16xf32, #tpu.memory_space<vmem>>, vector<1x32x16xf32>
    %106 = vector.shape_cast %105 : vector<1x32x16xf32> to vector<32x16xf32>
    %cst_89 = arith.constant dense<0.000000e+00> : vector<32x64xf32>
    %107 = tpu.matmul %106, %104, %cst_89 {dimension_numbers = #tpu.dot_dimension_numbers<[1], [0], [0], [1], [0, 0, 1, 1], [], []>} : vector<32x16xf32>, vector<16x64xf32>, vector<32x64xf32> -> vector<32x64xf32>
    %108 = arith.addf %100, %107 : vector<32x64xf32>
    %c2_90 = arith.constant 2 : index
    %c0_91 = arith.constant 0 : index
    %c0_92 = arith.constant 0 : index
    %109 = vector.load %arg6[%c2_90, %c0_91, %c0_92] : memref<9x256x64xbf16, #tpu.memory_space<vmem>>, vector<1x256x64xbf16>
    %110 = vector.shape_cast %109 : vector<1x256x64xbf16> to vector<256x64xbf16>
    %111 = arith.extf %110 : vector<256x64xbf16> to vector<256x64xf32>
    %cst_93 = arith.constant dense<0.000000e+00> : vector<16x64xf32>
    %112 = tpu.matmul %93, %111, %cst_93 {dimension_numbers = #tpu.dot_dimension_numbers<[1], [0], [0], [1], [0, 0, 1, 1], [], []>} : vector<16x256xf32>, vector<256x64xf32>, vector<16x64xf32> -> vector<16x64xf32>
    %c2_94 = arith.constant 2 : index
    %c0_95 = arith.constant 0 : index
    %c0_96 = arith.constant 0 : index
    %113 = vector.load %arg4[%c2_94, %c0_95, %c0_96] : memref<9x32x16xf32, #tpu.memory_space<vmem>>, vector<1x32x16xf32>
    %114 = vector.shape_cast %113 : vector<1x32x16xf32> to vector<32x16xf32>
    %cst_97 = arith.constant dense<0.000000e+00> : vector<32x64xf32>
    %115 = tpu.matmul %114, %112, %cst_97 {dimension_numbers = #tpu.dot_dimension_numbers<[1], [0], [0], [1], [0, 0, 1, 1], [], []>} : vector<32x16xf32>, vector<16x64xf32>, vector<32x64xf32> -> vector<32x64xf32>
    %116 = arith.addf %108, %115 : vector<32x64xf32>
    %c3_98 = arith.constant 3 : index
    %c0_99 = arith.constant 0 : index
    %c0_100 = arith.constant 0 : index
    %117 = vector.load %arg6[%c3_98, %c0_99, %c0_100] : memref<9x256x64xbf16, #tpu.memory_space<vmem>>, vector<1x256x64xbf16>
    %118 = vector.shape_cast %117 : vector<1x256x64xbf16> to vector<256x64xbf16>
    %119 = arith.extf %118 : vector<256x64xbf16> to vector<256x64xf32>
    %cst_101 = arith.constant dense<0.000000e+00> : vector<16x64xf32>
    %120 = tpu.matmul %93, %119, %cst_101 {dimension_numbers = #tpu.dot_dimension_numbers<[1], [0], [0], [1], [0, 0, 1, 1], [], []>} : vector<16x256xf32>, vector<256x64xf32>, vector<16x64xf32> -> vector<16x64xf32>
    %c3_102 = arith.constant 3 : index
    %c0_103 = arith.constant 0 : index
    %c0_104 = arith.constant 0 : index
    %121 = vector.load %arg4[%c3_102, %c0_103, %c0_104] : memref<9x32x16xf32, #tpu.memory_space<vmem>>, vector<1x32x16xf32>
    %122 = vector.shape_cast %121 : vector<1x32x16xf32> to vector<32x16xf32>
    %cst_105 = arith.constant dense<0.000000e+00> : vector<32x64xf32>
    %123 = tpu.matmul %122, %120, %cst_105 {dimension_numbers = #tpu.dot_dimension_numbers<[1], [0], [0], [1], [0, 0, 1, 1], [], []>} : vector<32x16xf32>, vector<16x64xf32>, vector<32x64xf32> -> vector<32x64xf32>
    %124 = arith.addf %116, %123 : vector<32x64xf32>
    %c4_106 = arith.constant 4 : index
    %c0_107 = arith.constant 0 : index
    %c0_108 = arith.constant 0 : index
    %125 = vector.load %arg6[%c4_106, %c0_107, %c0_108] : memref<9x256x64xbf16, #tpu.memory_space<vmem>>, vector<1x256x64xbf16>
    %126 = vector.shape_cast %125 : vector<1x256x64xbf16> to vector<256x64xbf16>
    %127 = arith.extf %126 : vector<256x64xbf16> to vector<256x64xf32>
    %cst_109 = arith.constant dense<0.000000e+00> : vector<16x64xf32>
    %128 = tpu.matmul %93, %127, %cst_109 {dimension_numbers = #tpu.dot_dimension_numbers<[1], [0], [0], [1], [0, 0, 1, 1], [], []>} : vector<16x256xf32>, vector<256x64xf32>, vector<16x64xf32> -> vector<16x64xf32>
    %c4_110 = arith.constant 4 : index
    %c0_111 = arith.constant 0 : index
    %c0_112 = arith.constant 0 : index
    %129 = vector.load %arg4[%c4_110, %c0_111, %c0_112] : memref<9x32x16xf32, #tpu.memory_space<vmem>>, vector<1x32x16xf32>
    %130 = vector.shape_cast %129 : vector<1x32x16xf32> to vector<32x16xf32>
    %cst_113 = arith.constant dense<0.000000e+00> : vector<32x64xf32>
    %131 = tpu.matmul %130, %128, %cst_113 {dimension_numbers = #tpu.dot_dimension_numbers<[1], [0], [0], [1], [0, 0, 1, 1], [], []>} : vector<32x16xf32>, vector<16x64xf32>, vector<32x64xf32> -> vector<32x64xf32>
    %132 = arith.addf %124, %131 : vector<32x64xf32>
    %c5_114 = arith.constant 5 : index
    %c0_115 = arith.constant 0 : index
    %c0_116 = arith.constant 0 : index
    %133 = vector.load %arg6[%c5_114, %c0_115, %c0_116] : memref<9x256x64xbf16, #tpu.memory_space<vmem>>, vector<1x256x64xbf16>
    %134 = vector.shape_cast %133 : vector<1x256x64xbf16> to vector<256x64xbf16>
    %135 = arith.extf %134 : vector<256x64xbf16> to vector<256x64xf32>
    %cst_117 = arith.constant dense<0.000000e+00> : vector<16x64xf32>
    %136 = tpu.matmul %93, %135, %cst_117 {dimension_numbers = #tpu.dot_dimension_numbers<[1], [0], [0], [1], [0, 0, 1, 1], [], []>} : vector<16x256xf32>, vector<256x64xf32>, vector<16x64xf32> -> vector<16x64xf32>
    %c5_118 = arith.constant 5 : index
    %c0_119 = arith.constant 0 : index
    %c0_120 = arith.constant 0 : index
    %137 = vector.load %arg4[%c5_118, %c0_119, %c0_120] : memref<9x32x16xf32, #tpu.memory_space<vmem>>, vector<1x32x16xf32>
    %138 = vector.shape_cast %137 : vector<1x32x16xf32> to vector<32x16xf32>
    %cst_121 = arith.constant dense<0.000000e+00> : vector<32x64xf32>
    %139 = tpu.matmul %138, %136, %cst_121 {dimension_numbers = #tpu.dot_dimension_numbers<[1], [0], [0], [1], [0, 0, 1, 1], [], []>} : vector<32x16xf32>, vector<16x64xf32>, vector<32x64xf32> -> vector<32x64xf32>
    %140 = arith.addf %132, %139 : vector<32x64xf32>
    %c6_122 = arith.constant 6 : index
    %c0_123 = arith.constant 0 : index
    %c0_124 = arith.constant 0 : index
    %141 = vector.load %arg6[%c6_122, %c0_123, %c0_124] : memref<9x256x64xbf16, #tpu.memory_space<vmem>>, vector<1x256x64xbf16>
    %142 = vector.shape_cast %141 : vector<1x256x64xbf16> to vector<256x64xbf16>
    %143 = arith.extf %142 : vector<256x64xbf16> to vector<256x64xf32>
    %cst_125 = arith.constant dense<0.000000e+00> : vector<16x64xf32>
    %144 = tpu.matmul %93, %143, %cst_125 {dimension_numbers = #tpu.dot_dimension_numbers<[1], [0], [0], [1], [0, 0, 1, 1], [], []>} : vector<16x256xf32>, vector<256x64xf32>, vector<16x64xf32> -> vector<16x64xf32>
    %c6_126 = arith.constant 6 : index
    %c0_127 = arith.constant 0 : index
    %c0_128 = arith.constant 0 : index
    %145 = vector.load %arg4[%c6_126, %c0_127, %c0_128] : memref<9x32x16xf32, #tpu.memory_space<vmem>>, vector<1x32x16xf32>
    %146 = vector.shape_cast %145 : vector<1x32x16xf32> to vector<32x16xf32>
    %cst_129 = arith.constant dense<0.000000e+00> : vector<32x64xf32>
    %147 = tpu.matmul %146, %144, %cst_129 {dimension_numbers = #tpu.dot_dimension_numbers<[1], [0], [0], [1], [0, 0, 1, 1], [], []>} : vector<32x16xf32>, vector<16x64xf32>, vector<32x64xf32> -> vector<32x64xf32>
    %148 = arith.addf %140, %147 : vector<32x64xf32>
    %c7_130 = arith.constant 7 : index
    %c0_131 = arith.constant 0 : index
    %c0_132 = arith.constant 0 : index
    %149 = vector.load %arg6[%c7_130, %c0_131, %c0_132] : memref<9x256x64xbf16, #tpu.memory_space<vmem>>, vector<1x256x64xbf16>
    %150 = vector.shape_cast %149 : vector<1x256x64xbf16> to vector<256x64xbf16>
    %151 = arith.extf %150 : vector<256x64xbf16> to vector<256x64xf32>
    %cst_133 = arith.constant dense<0.000000e+00> : vector<16x64xf32>
    %152 = tpu.matmul %93, %151, %cst_133 {dimension_numbers = #tpu.dot_dimension_numbers<[1], [0], [0], [1], [0, 0, 1, 1], [], []>} : vector<16x256xf32>, vector<256x64xf32>, vector<16x64xf32> -> vector<16x64xf32>
    %c7_134 = arith.constant 7 : index
    %c0_135 = arith.constant 0 : index
    %c0_136 = arith.constant 0 : index
    %153 = vector.load %arg4[%c7_134, %c0_135, %c0_136] : memref<9x32x16xf32, #tpu.memory_space<vmem>>, vector<1x32x16xf32>
    %154 = vector.shape_cast %153 : vector<1x32x16xf32> to vector<32x16xf32>
    %cst_137 = arith.constant dense<0.000000e+00> : vector<32x64xf32>
    %155 = tpu.matmul %154, %152, %cst_137 {dimension_numbers = #tpu.dot_dimension_numbers<[1], [0], [0], [1], [0, 0, 1, 1], [], []>} : vector<32x16xf32>, vector<16x64xf32>, vector<32x64xf32> -> vector<32x64xf32>
    %156 = arith.addf %148, %155 : vector<32x64xf32>
    %c8_138 = arith.constant 8 : index
    %c0_139 = arith.constant 0 : index
    %c0_140 = arith.constant 0 : index
    %157 = vector.load %arg6[%c8_138, %c0_139, %c0_140] : memref<9x256x64xbf16, #tpu.memory_space<vmem>>, vector<1x256x64xbf16>
    %158 = vector.shape_cast %157 : vector<1x256x64xbf16> to vector<256x64xbf16>
    %159 = arith.extf %158 : vector<256x64xbf16> to vector<256x64xf32>
    %cst_141 = arith.constant dense<0.000000e+00> : vector<16x64xf32>
    %160 = tpu.matmul %93, %159, %cst_141 {dimension_numbers = #tpu.dot_dimension_numbers<[1], [0], [0], [1], [0, 0, 1, 1], [], []>} : vector<16x256xf32>, vector<256x64xf32>, vector<16x64xf32> -> vector<16x64xf32>
    %c8_142 = arith.constant 8 : index
    %c0_143 = arith.constant 0 : index
    %c0_144 = arith.constant 0 : index
    %161 = vector.load %arg4[%c8_142, %c0_143, %c0_144] : memref<9x32x16xf32, #tpu.memory_space<vmem>>, vector<1x32x16xf32>
    %162 = vector.shape_cast %161 : vector<1x32x16xf32> to vector<32x16xf32>
    %cst_145 = arith.constant dense<0.000000e+00> : vector<32x64xf32>
    %163 = tpu.matmul %162, %160, %cst_145 {dimension_numbers = #tpu.dot_dimension_numbers<[1], [0], [0], [1], [0, 0, 1, 1], [], []>} : vector<32x16xf32>, vector<16x64xf32>, vector<32x64xf32> -> vector<32x64xf32>
    %164 = arith.addf %156, %163 : vector<32x64xf32>
    %c0_146 = arith.constant 0 : index
    %c0_147 = arith.constant 0 : index
    %165 = vector.load %arg5[%c0_146, %c0_147] : memref<32x1xf32, #tpu.memory_space<vmem>>, vector<32x1xf32>
    %166 = vector.broadcast %165 : vector<32x1xf32> to vector<32x64xf32>
    %167 = arith.addf %164, %166 : vector<32x64xf32>
    %c0_148 = arith.constant 0 : index
    %c0_149 = arith.constant 0 : index
    %168 = vector.load %arg11[%c0_148, %c0_149] : memref<32x64xf32, #tpu.memory_space<vmem>>, vector<32x64xf32>
    tpu.vector_store %arg11[%c0_148, %c0_149], %167 {strides = array<i32>} : memref<32x64xf32, #tpu.memory_space<vmem>>, vector<32x64xf32>,
    %cst_150 = arith.constant dense<0.000000e+00> : vector<32xf32>
    %169 = vector.multi_reduction <add>, %167, %cst_150 [1] : vector<32x64xf32> to vector<32xf32>
    %170 = vector.shape_cast %169 : vector<32xf32> to vector<32x1xf32>
    %cst_151 = arith.constant 6.400000e+01 : f32
    %171 = vector.broadcast %cst_151 : f32 to vector<32x1xf32>
    %172 = arith.divf %170, %171 : vector<32x1xf32>
    %173 = vector.broadcast %172 : vector<32x1xf32> to vector<32x64xf32>
    %174 = arith.subf %167, %173 : vector<32x64xf32>
    %175 = arith.mulf %174, %174 : vector<32x64xf32>
    %cst_152 = arith.constant dense<0.000000e+00> : vector<32xf32>
    %176 = vector.multi_reduction <add>, %175, %cst_152 [1] : vector<32x64xf32> to vector<32xf32>
    %177 = vector.shape_cast %176 : vector<32xf32> to vector<32x1xf32>
    %cst_153 = arith.constant 6.400000e+01 : f32
    %178 = vector.broadcast %cst_153 : f32 to vector<32x1xf32>
    %179 = arith.divf %177, %178 : vector<32x1xf32>
    %cst_154 = arith.constant 9.99999974E-6 : f32
    %180 = vector.broadcast %cst_154 : f32 to vector<32x1xf32>
    %181 = arith.addf %179, %180 : vector<32x1xf32>
    %182 = math.rsqrt %181 : vector<32x1xf32>
    %183 = vector.broadcast %182 : vector<32x1xf32> to vector<32x64xf32>
    %184 = arith.mulf %174, %183 : vector<32x64xf32>
    %cst_155 = arith.constant 0.000000e+00 : f32
    %185 = vector.broadcast %cst_155 : f32 to vector<32x64xf32>
    %186 = arith.maximumf %184, %185 : vector<32x64xf32>
    %c0_156 = arith.constant 0 : index
    %c0_157 = arith.constant 0 : index
    %c0_158 = arith.constant 0 : index
    %187 = vector.load %arg9[%c0_156, %c0_157, %c0_158] : memref<9x64x16xbf16, #tpu.memory_space<vmem>>, vector<1x64x16xbf16>
    %188 = vector.shape_cast %187 : vector<1x64x16xbf16> to vector<64x16xbf16>
    %189 = arith.extf %188 : vector<64x16xbf16> to vector<64x16xf32>
    %cst_159 = arith.constant dense<0.000000e+00> : vector<32x16xf32>
    %190 = tpu.matmul %186, %189, %cst_159 {dimension_numbers = #tpu.dot_dimension_numbers<[1], [0], [0], [1], [0, 0, 1, 1], [], []>} : vector<32x64xf32>, vector<64x16xf32>, vector<32x16xf32> -> vector<32x16xf32>
    %c0_160 = arith.constant 0 : index
    %c0_161 = arith.constant 0 : index
    %c0_162 = arith.constant 0 : index
    %191 = vector.load %arg7[%c0_160, %c0_161, %c0_162] : memref<9x64x32xf32, #tpu.memory_space<vmem>>, vector<1x64x32xf32>
    %192 = vector.shape_cast %191 : vector<1x64x32xf32> to vector<64x32xf32>
    %cst_163 = arith.constant dense<0.000000e+00> : vector<64x16xf32>
    %193 = tpu.matmul %192, %190, %cst_163 {dimension_numbers = #tpu.dot_dimension_numbers<[1], [0], [0], [1], [0, 0, 1, 1], [], []>} : vector<64x32xf32>, vector<32x16xf32>, vector<64x16xf32> -> vector<64x16xf32>
    %c1_164 = arith.constant 1 : index
    %c0_165 = arith.constant 0 : index
    %c0_166 = arith.constant 0 : index
    %194 = vector.load %arg9[%c1_164, %c0_165, %c0_166] : memref<9x64x16xbf16, #tpu.memory_space<vmem>>, vector<1x64x16xbf16>
    %195 = vector.shape_cast %194 : vector<1x64x16xbf16> to vector<64x16xbf16>
    %196 = arith.extf %195 : vector<64x16xbf16> to vector<64x16xf32>
    %cst_167 = arith.constant dense<0.000000e+00> : vector<32x16xf32>
    %197 = tpu.matmul %186, %196, %cst_167 {dimension_numbers = #tpu.dot_dimension_numbers<[1], [0], [0], [1], [0, 0, 1, 1], [], []>} : vector<32x64xf32>, vector<64x16xf32>, vector<32x16xf32> -> vector<32x16xf32>
    %c1_168 = arith.constant 1 : index
    %c0_169 = arith.constant 0 : index
    %c0_170 = arith.constant 0 : index
    %198 = vector.load %arg7[%c1_168, %c0_169, %c0_170] : memref<9x64x32xf32, #tpu.memory_space<vmem>>, vector<1x64x32xf32>
    %199 = vector.shape_cast %198 : vector<1x64x32xf32> to vector<64x32xf32>
    %cst_171 = arith.constant dense<0.000000e+00> : vector<64x16xf32>
    %200 = tpu.matmul %199, %197, %cst_171 {dimension_numbers = #tpu.dot_dimension_numbers<[1], [0], [0], [1], [0, 0, 1, 1], [], []>} : vector<64x32xf32>, vector<32x16xf32>, vector<64x16xf32> -> vector<64x16xf32>
    %201 = arith.addf %193, %200 : vector<64x16xf32>
    %c2_172 = arith.constant 2 : index
    %c0_173 = arith.constant 0 : index
    %c0_174 = arith.constant 0 : index
    %202 = vector.load %arg9[%c2_172, %c0_173, %c0_174] : memref<9x64x16xbf16, #tpu.memory_space<vmem>>, vector<1x64x16xbf16>
    %203 = vector.shape_cast %202 : vector<1x64x16xbf16> to vector<64x16xbf16>
    %204 = arith.extf %203 : vector<64x16xbf16> to vector<64x16xf32>
    %cst_175 = arith.constant dense<0.000000e+00> : vector<32x16xf32>
    %205 = tpu.matmul %186, %204, %cst_175 {dimension_numbers = #tpu.dot_dimension_numbers<[1], [0], [0], [1], [0, 0, 1, 1], [], []>} : vector<32x64xf32>, vector<64x16xf32>, vector<32x16xf32> -> vector<32x16xf32>
    %c2_176 = arith.constant 2 : index
    %c0_177 = arith.constant 0 : index
    %c0_178 = arith.constant 0 : index
    %206 = vector.load %arg7[%c2_176, %c0_177, %c0_178] : memref<9x64x32xf32, #tpu.memory_space<vmem>>, vector<1x64x32xf32>
    %207 = vector.shape_cast %206 : vector<1x64x32xf32> to vector<64x32xf32>
    %cst_179 = arith.constant dense<0.000000e+00> : vector<64x16xf32>
    %208 = tpu.matmul %207, %205, %cst_179 {dimension_numbers = #tpu.dot_dimension_numbers<[1], [0], [0], [1], [0, 0, 1, 1], [], []>} : vector<64x32xf32>, vector<32x16xf32>, vector<64x16xf32> -> vector<64x16xf32>
    %209 = arith.addf %201, %208 : vector<64x16xf32>
    %c3_180 = arith.constant 3 : index
    %c0_181 = arith.constant 0 : index
    %c0_182 = arith.constant 0 : index
    %210 = vector.load %arg9[%c3_180, %c0_181, %c0_182] : memref<9x64x16xbf16, #tpu.memory_space<vmem>>, vector<1x64x16xbf16>
    %211 = vector.shape_cast %210 : vector<1x64x16xbf16> to vector<64x16xbf16>
    %212 = arith.extf %211 : vector<64x16xbf16> to vector<64x16xf32>
    %cst_183 = arith.constant dense<0.000000e+00> : vector<32x16xf32>
    %213 = tpu.matmul %186, %212, %cst_183 {dimension_numbers = #tpu.dot_dimension_numbers<[1], [0], [0], [1], [0, 0, 1, 1], [], []>} : vector<32x64xf32>, vector<64x16xf32>, vector<32x16xf32> -> vector<32x16xf32>
    %c3_184 = arith.constant 3 : index
    %c0_185 = arith.constant 0 : index
    %c0_186 = arith.constant 0 : index
    %214 = vector.load %arg7[%c3_184, %c0_185, %c0_186] : memref<9x64x32xf32, #tpu.memory_space<vmem>>, vector<1x64x32xf32>
    %215 = vector.shape_cast %214 : vector<1x64x32xf32> to vector<64x32xf32>
    %cst_187 = arith.constant dense<0.000000e+00> : vector<64x16xf32>
    %216 = tpu.matmul %215, %213, %cst_187 {dimension_numbers = #tpu.dot_dimension_numbers<[1], [0], [0], [1], [0, 0, 1, 1], [], []>} : vector<64x32xf32>, vector<32x16xf32>, vector<64x16xf32> -> vector<64x16xf32>
    %217 = arith.addf %209, %216 : vector<64x16xf32>
    %c4_188 = arith.constant 4 : index
    %c0_189 = arith.constant 0 : index
    %c0_190 = arith.constant 0 : index
    %218 = vector.load %arg9[%c4_188, %c0_189, %c0_190] : memref<9x64x16xbf16, #tpu.memory_space<vmem>>, vector<1x64x16xbf16>
    %219 = vector.shape_cast %218 : vector<1x64x16xbf16> to vector<64x16xbf16>
    %220 = arith.extf %219 : vector<64x16xbf16> to vector<64x16xf32>
    %cst_191 = arith.constant dense<0.000000e+00> : vector<32x16xf32>
    %221 = tpu.matmul %186, %220, %cst_191 {dimension_numbers = #tpu.dot_dimension_numbers<[1], [0], [0], [1], [0, 0, 1, 1], [], []>} : vector<32x64xf32>, vector<64x16xf32>, vector<32x16xf32> -> vector<32x16xf32>
    %c4_192 = arith.constant 4 : index
    %c0_193 = arith.constant 0 : index
    %c0_194 = arith.constant 0 : index
    %222 = vector.load %arg7[%c4_192, %c0_193, %c0_194] : memref<9x64x32xf32, #tpu.memory_space<vmem>>, vector<1x64x32xf32>
    %223 = vector.shape_cast %222 : vector<1x64x32xf32> to vector<64x32xf32>
    %cst_195 = arith.constant dense<0.000000e+00> : vector<64x16xf32>
    %224 = tpu.matmul %223, %221, %cst_195 {dimension_numbers = #tpu.dot_dimension_numbers<[1], [0], [0], [1], [0, 0, 1, 1], [], []>} : vector<64x32xf32>, vector<32x16xf32>, vector<64x16xf32> -> vector<64x16xf32>
    %225 = arith.addf %217, %224 : vector<64x16xf32>
    %c5_196 = arith.constant 5 : index
    %c0_197 = arith.constant 0 : index
    %c0_198 = arith.constant 0 : index
    %226 = vector.load %arg9[%c5_196, %c0_197, %c0_198] : memref<9x64x16xbf16, #tpu.memory_space<vmem>>, vector<1x64x16xbf16>
    %227 = vector.shape_cast %226 : vector<1x64x16xbf16> to vector<64x16xbf16>
    %228 = arith.extf %227 : vector<64x16xbf16> to vector<64x16xf32>
    %cst_199 = arith.constant dense<0.000000e+00> : vector<32x16xf32>
    %229 = tpu.matmul %186, %228, %cst_199 {dimension_numbers = #tpu.dot_dimension_numbers<[1], [0], [0], [1], [0, 0, 1, 1], [], []>} : vector<32x64xf32>, vector<64x16xf32>, vector<32x16xf32> -> vector<32x16xf32>
    %c5_200 = arith.constant 5 : index
    %c0_201 = arith.constant 0 : index
    %c0_202 = arith.constant 0 : index
    %230 = vector.load %arg7[%c5_200, %c0_201, %c0_202] : memref<9x64x32xf32, #tpu.memory_space<vmem>>, vector<1x64x32xf32>
    %231 = vector.shape_cast %230 : vector<1x64x32xf32> to vector<64x32xf32>
    %cst_203 = arith.constant dense<0.000000e+00> : vector<64x16xf32>
    %232 = tpu.matmul %231, %229, %cst_203 {dimension_numbers = #tpu.dot_dimension_numbers<[1], [0], [0], [1], [0, 0, 1, 1], [], []>} : vector<64x32xf32>, vector<32x16xf32>, vector<64x16xf32> -> vector<64x16xf32>
    %233 = arith.addf %225, %232 : vector<64x16xf32>
    %c6_204 = arith.constant 6 : index
    %c0_205 = arith.constant 0 : index
    %c0_206 = arith.constant 0 : index
    %234 = vector.load %arg9[%c6_204, %c0_205, %c0_206] : memref<9x64x16xbf16, #tpu.memory_space<vmem>>, vector<1x64x16xbf16>
    %235 = vector.shape_cast %234 : vector<1x64x16xbf16> to vector<64x16xbf16>
    %236 = arith.extf %235 : vector<64x16xbf16> to vector<64x16xf32>
    %cst_207 = arith.constant dense<0.000000e+00> : vector<32x16xf32>
    %237 = tpu.matmul %186, %236, %cst_207 {dimension_numbers = #tpu.dot_dimension_numbers<[1], [0], [0], [1], [0, 0, 1, 1], [], []>} : vector<32x64xf32>, vector<64x16xf32>, vector<32x16xf32> -> vector<32x16xf32>
    %c6_208 = arith.constant 6 : index
    %c0_209 = arith.constant 0 : index
    %c0_210 = arith.constant 0 : index
    %238 = vector.load %arg7[%c6_208, %c0_209, %c0_210] : memref<9x64x32xf32, #tpu.memory_space<vmem>>, vector<1x64x32xf32>
    %239 = vector.shape_cast %238 : vector<1x64x32xf32> to vector<64x32xf32>
    %cst_211 = arith.constant dense<0.000000e+00> : vector<64x16xf32>
    %240 = tpu.matmul %239, %237, %cst_211 {dimension_numbers = #tpu.dot_dimension_numbers<[1], [0], [0], [1], [0, 0, 1, 1], [], []>} : vector<64x32xf32>, vector<32x16xf32>, vector<64x16xf32> -> vector<64x16xf32>
    %241 = arith.addf %233, %240 : vector<64x16xf32>
    %c7_212 = arith.constant 7 : index
    %c0_213 = arith.constant 0 : index
    %c0_214 = arith.constant 0 : index
    %242 = vector.load %arg9[%c7_212, %c0_213, %c0_214] : memref<9x64x16xbf16, #tpu.memory_space<vmem>>, vector<1x64x16xbf16>
    %243 = vector.shape_cast %242 : vector<1x64x16xbf16> to vector<64x16xbf16>
    %244 = arith.extf %243 : vector<64x16xbf16> to vector<64x16xf32>
    %cst_215 = arith.constant dense<0.000000e+00> : vector<32x16xf32>
    %245 = tpu.matmul %186, %244, %cst_215 {dimension_numbers = #tpu.dot_dimension_numbers<[1], [0], [0], [1], [0, 0, 1, 1], [], []>} : vector<32x64xf32>, vector<64x16xf32>, vector<32x16xf32> -> vector<32x16xf32>
    %c7_216 = arith.constant 7 : index
    %c0_217 = arith.constant 0 : index
    %c0_218 = arith.constant 0 : index
    %246 = vector.load %arg7[%c7_216, %c0_217, %c0_218] : memref<9x64x32xf32, #tpu.memory_space<vmem>>, vector<1x64x32xf32>
    %247 = vector.shape_cast %246 : vector<1x64x32xf32> to vector<64x32xf32>
    %cst_219 = arith.constant dense<0.000000e+00> : vector<64x16xf32>
    %248 = tpu.matmul %247, %245, %cst_219 {dimension_numbers = #tpu.dot_dimension_numbers<[1], [0], [0], [1], [0, 0, 1, 1], [], []>} : vector<64x32xf32>, vector<32x16xf32>, vector<64x16xf32> -> vector<64x16xf32>
    %249 = arith.addf %241, %248 : vector<64x16xf32>
    %c8_220 = arith.constant 8 : index
    %c0_221 = arith.constant 0 : index
    %c0_222 = arith.constant 0 : index
    %250 = vector.load %arg9[%c8_220, %c0_221, %c0_222] : memref<9x64x16xbf16, #tpu.memory_space<vmem>>, vector<1x64x16xbf16>
    %251 = vector.shape_cast %250 : vector<1x64x16xbf16> to vector<64x16xbf16>
    %252 = arith.extf %251 : vector<64x16xbf16> to vector<64x16xf32>
    %cst_223 = arith.constant dense<0.000000e+00> : vector<32x16xf32>
    %253 = tpu.matmul %186, %252, %cst_223 {dimension_numbers = #tpu.dot_dimension_numbers<[1], [0], [0], [1], [0, 0, 1, 1], [], []>} : vector<32x64xf32>, vector<64x16xf32>, vector<32x16xf32> -> vector<32x16xf32>
    %c8_224 = arith.constant 8 : index
    %c0_225 = arith.constant 0 : index
    %c0_226 = arith.constant 0 : index
    %254 = vector.load %arg7[%c8_224, %c0_225, %c0_226] : memref<9x64x32xf32, #tpu.memory_space<vmem>>, vector<1x64x32xf32>
    %255 = vector.shape_cast %254 : vector<1x64x32xf32> to vector<64x32xf32>
    %cst_227 = arith.constant dense<0.000000e+00> : vector<64x16xf32>
    %256 = tpu.matmul %255, %253, %cst_227 {dimension_numbers = #tpu.dot_dimension_numbers<[1], [0], [0], [1], [0, 0, 1, 1], [], []>} : vector<64x32xf32>, vector<32x16xf32>, vector<64x16xf32> -> vector<64x16xf32>
    %257 = arith.addf %249, %256 : vector<64x16xf32>
    %c0_228 = arith.constant 0 : index
    %c0_229 = arith.constant 0 : index
    %258 = vector.load %arg8[%c0_228, %c0_229] : memref<64x1xf32, #tpu.memory_space<vmem>>, vector<64x1xf32>
    %259 = vector.broadcast %258 : vector<64x1xf32> to vector<64x16xf32>
    %260 = arith.addf %257, %259 : vector<64x16xf32>
    %cst_230 = arith.constant dense<0.000000e+00> : vector<64xf32>
    %261 = vector.multi_reduction <add>, %260, %cst_230 [1] : vector<64x16xf32> to vector<64xf32>
    %262 = vector.shape_cast %261 : vector<64xf32> to vector<64x1xf32>
    %cst_231 = arith.constant 1.600000e+01 : f32
    %263 = vector.broadcast %cst_231 : f32 to vector<64x1xf32>
    %264 = arith.divf %262, %263 : vector<64x1xf32>
    %265 = vector.broadcast %264 : vector<64x1xf32> to vector<64x16xf32>
    %266 = arith.subf %260, %265 : vector<64x16xf32>
    %267 = arith.mulf %266, %266 : vector<64x16xf32>
    %cst_232 = arith.constant dense<0.000000e+00> : vector<64xf32>
    %268 = vector.multi_reduction <add>, %267, %cst_232 [1] : vector<64x16xf32> to vector<64xf32>
    %269 = vector.shape_cast %268 : vector<64xf32> to vector<64x1xf32>
    %cst_233 = arith.constant 1.600000e+01 : f32
    %270 = vector.broadcast %cst_233 : f32 to vector<64x1xf32>
    %271 = arith.divf %269, %270 : vector<64x1xf32>
    %cst_234 = arith.constant 9.99999974E-6 : f32
    %272 = vector.broadcast %cst_234 : f32 to vector<64x1xf32>
    %273 = arith.addf %271, %272 : vector<64x1xf32>
    %274 = math.rsqrt %273 : vector<64x1xf32>
    %275 = vector.broadcast %274 : vector<64x1xf32> to vector<64x16xf32>
    %276 = arith.mulf %266, %275 : vector<64x16xf32>
    %cst_235 = arith.constant 0.000000e+00 : f32
    %277 = vector.broadcast %cst_235 : f32 to vector<64x16xf32>
    %278 = arith.maximumf %276, %277 : vector<64x16xf32>
    %c0_236 = arith.constant 0 : index
    %c0_237 = arith.constant 0 : index
    %279 = vector.load %arg12[%c0_236, %c0_237] : memref<64x16xf32, #tpu.memory_space<vmem>>, vector<64x16xf32>
    tpu.vector_store %arg12[%c0_236, %c0_237], %278 {strides = array<i32>} : memref<64x16xf32, #tpu.memory_space<vmem>>, vector<64x16xf32>,
    return
  }
}

</mosaic_0001>

<bundles_post_ra>
// kernel: tile.28
= control target key start
LH: loop header
LB: loop body
LE: loop exit
PB: predicated region body
PF: predicated region fallthrough
CT: control target
= control target key end

     0   :  { %s22_s0 = inlined_call_operand.vmem [shape: f32[32], index: 0, kind: input, shape index: {}]   ;;  %s23_s1 = inlined_call_operand.vmem [shape: f32[2,32], index: 1, kind: output, shape index: {}]  }
   0x1   :  { %v4_v0 = vld [vmem:[%s22_s0] ss:$0 sm:$0xff] }
   0x2   :  { %5 = vst [vmem:[%s23_s1] sm:$0x3] %v4_v0 }

// kernel: tile.2
= control target key start
LH: loop header
LB: loop body
LE: loop exit
PB: predicated region body
PF: predicated region fallthrough
CT: control target
= control target key end

     0   :  { %s354_s8 = smov 125   ;;  %s355_s9 = smov 123   ;;  %vm7_vm0 = vcmask 7168   ;;  %s653_s0 = inlined_call_operand.vmem [shape: f32[2,32], index: 0, kind: input, shape index: {}]   ;;  %s654_s1 = inlined_call_operand.vmem [shape: f32[64,1], index: 1, kind: output, shape index: {}]  }
   0x1   :  { %v4_v0 = vld [vmem:[%s653_s0] sm:$0x3]  ;;  %s353_s0 = smov 127   ;;  %s356_s10 = smov 126  }
   0x2   :  { %5 = vst [vmem:[#allocation0] sm:$0x3] %v4_v0  ;;  %s357_s11 = smov 124   ;;  %s358_s12 = smov 122  }
   0x3   :  { %s359_s13 = smov 121   ;;  %s360_s14 = smov 120  }
   0x4   :  { %s361_s15 = smov 119   ;;  %s362_s16 = smov 118  }
   0x5   :  { %s363_s17 = smov 117   ;;  %s364_s18 = smov 116  }
   0x6   :  { %s365_s19 = smov 115   ;;  %s366_s20 = smov 114  }
   0x7   :  { %s367_s21 = smov 113   ;;  %s368_s22 = smov 112  }
   0x8   :  { %s369_s23 = smov 111   ;;  %s370_s24 = smov 110  }
   0x9   :  { %v11_v1 = vld [vmem:[#allocation0] sm:$0x3]   ;;  %s371_s25 = smov 109   ;;  %s372_s26 = smov 108  }
   0xa   :  { %v27_v2 = vld [vmem:[#allocation0] sm:$0x3]   ;;  %12 = vrot.lane.b32.xlu0 %v11_v1, %s353_s0  ;;  %s373_s27 = smov 107   ;;  %s374_s28 = smov 106  }
   0xb   :  { %28 = vrot.lane.b32.xlu1 %v27_v2, %s354_s8  ;;  %v43_v3 = vld [vmem:[#allocation0] sm:$0x3]   ;;  %s375_s29 = smov 105   ;;  %s376_s30 = smov 104  }
   0xc   :  { %44 = vrot.lane.b32.xlu2 %v43_v3, %s355_s9  ;;  %v19_v4 = vld [vmem:[#allocation0] sm:$0x3]   ;;  %s377_s2 = smov 103   ;;  %s378_s3 = smov 102  }
   0xd   :  { %v35_v5 = vld [vmem:[#allocation0] sm:$0x3]   ;;  %s379_s4 = smov 101   ;;  %s380_s5 = smov 100  }
   0xe   :  { %v51_v6 = vld [vmem:[#allocation0] sm:$0x3]   ;;  %s381_s6 = smov 99   ;;  %s382_s7 = smov 98  }
   0xf   :  { %v59_v7 = vld [vmem:[#allocation0] sm:$0x3]   ;;  %s383_s0 = smov 97  }
  0x10   :  { %v67_v8 = vld [vmem:[#allocation0] sm:$0x3]  }
  0x11   :  { %v75_v9 = vld [vmem:[#allocation0] sm:$0x3]  }
  0x12   :  { %20 = vrot.lane.b32.xlu0 %v19_v4, %s356_s10  ;;  %v83_v10 = vld [vmem:[#allocation0] sm:$0x3]  }
  0x13   :  { %36 = vrot.lane.b32.xlu1 %v35_v5, %s357_s11  ;;  %v91_v11 = vld [vmem:[#allocation0] sm:$0x3]  }
  0x14   :  { %52 = vrot.lane.b32.xlu2 %v51_v6, %s358_s12  ;;  %v99_v12 = vld [vmem:[#allocation0] sm:$0x3]  }
  0x15   :  { %v107_v13 = vld [vmem:[#allocation0] sm:$0x3]  }
  0x16   :  { %v115_v14 = vld [vmem:[#allocation0] sm:$0x3]  }
  0x17   :  { %v123_v15 = vld [vmem:[#allocation0] sm:$0x3]  }
  0x18   :  { %v131_v16 = vld [vmem:[#allocation0] sm:$0x3]  }
  0x19   :  { %v139_v17 = vld [vmem:[#allocation0] sm:$0x3]  }
  0x1a   :  { %60 = vrot.lane.b32.xlu0 %v59_v7, %s359_s13  ;;  %v147_v18 = vld [vmem:[#allocation0] sm:$0x3]  }
  0x1b   :  { %68 = vrot.lane.b32.xlu1 %v67_v8, %s360_s14  ;;  %v155_v19 = vld [vmem:[#allocation0] sm:$0x3]  }
  0x1c   :  { %76 = vrot.lane.b32.xlu2 %v75_v9, %s361_s15  ;;  %v163_v20 = vld [vmem:[#allocation0] sm:$0x3]  }
  0x1d   :  { %v171_v21 = vld [vmem:[#allocation0] sm:$0x3]  }
  0x1e   :  { %v179_v22 = vld [vmem:[#allocation0] sm:$0x3]  }
  0x1f   :  { %v187_v23 = vld [vmem:[#allocation0] sm:$0x3]  }
  0x20   :  { %v195_v24 = vld [vmem:[#allocation0] sm:$0x3]  }
  0x21   :  { %v203_v25 = vld [vmem:[#allocation0] sm:$0x3]  }
  0x22   :  { %84 = vrot.lane.b32.xlu0 %v83_v10, %s362_s16  ;;  %v211_v26 = vld [vmem:[#allocation0] sm:$0x3]  }
  0x23   :  { %92 = vrot.lane.b32.xlu1 %v91_v11, %s363_s17  ;;  %v219_v27 = vld [vmem:[#allocation0] sm:$0x3]  }
  0x24   :  { %100 = vrot.lane.b32.xlu2 %v99_v12, %s364_s18  ;;  %v227_v28 = vld [vmem:[#allocation0] sm:$0x3]  }
  0x25   :  { %v235_v29 = vld [vmem:[#allocation0] sm:$0x3]  }
  0x26   :  { %v243_v30 = vld [vmem:[#allocation0] sm:$0x3]  }
  0x27   :  { %v251_v31 = vld [vmem:[#allocation0] sm:$0x3]  }
  0x28   :  { %v6_v56 = vld [vmem:[#allocation0] sm:$0x3]  }
  0x29   :  { %8 = vst.msk [vmem:[%s654_s1] sm:$0x1] %vm7_vm0, %v6_v56  }
  0x2a   :  { %108 = vrot.lane.b32.xlu0 %v107_v13, %s365_s19  ;;  %259 = vst.msk [vmem:[%s654_s1 + $0x1f] sm:$0x2] %vm7_vm0, %v6_v56  }
  0x2b   :  { %116 = vrot.lane.b32.xlu1 %v115_v14, %s366_s20 }
  0x2c   :  { %124 = vrot.lane.b32.xlu2 %v123_v15, %s367_s21 }
  0x32   :  { %132 = vrot.lane.b32.xlu0 %v131_v16, %s368_s22 }
  0x33   :  { %140 = vrot.lane.b32.xlu1 %v139_v17, %s369_s23 }
  0x34   :  { %148 = vrot.lane.b32.xlu2 %v147_v18, %s370_s24 }
  0x3a   :  { %156 = vrot.lane.b32.xlu0 %v155_v19, %s371_s25 }
  0x3b   :  { %164 = vrot.lane.b32.xlu1 %v163_v20, %s372_s26 }
  0x3c   :  { %172 = vrot.lane.b32.xlu2 %v171_v21, %s373_s27 }
  0x42   :  { %180 = vrot.lane.b32.xlu0 %v179_v22, %s374_s28 }
  0x43   :  { %188 = vrot.lane.b32.xlu1 %v187_v23, %s375_s29 }
  0x44   :  { %196 = vrot.lane.b32.xlu2 %v195_v24, %s376_s30 }
  0x4a   :  { %204 = vrot.lane.b32.xlu0 %v203_v25, %s377_s2 }
  0x4b   :  { %212 = vrot.lane.b32.xlu1 %v211_v26, %s378_s3 }
  0x4c   :  { %220 = vrot.lane.b32.xlu2 %v219_v27, %s379_s4 }
  0x52   :  { %228 = vrot.lane.b32.xlu0 %v227_v28, %s380_s5 }
  0x53   :  { %236 = vrot.lane.b32.xlu1 %v235_v29, %s381_s6 }
  0x54   :  { %244 = vrot.lane.b32.xlu2 %v243_v30, %s382_s7 }
  0x5a   :  { %252 = vrot.lane.b32.xlu0 %v251_v31, %s383_s0 }
  0x66   :  { %v45_v32 = vpop.permute.xlu2 %44  }
  0x67   :  { %268 = vst.msk [vmem:[%s654_s1 + $0x5] sm:$0x1] %vm7_vm0, %v45_v32  }
  0x68   :  { %269 = vst.msk [vmem:[%s654_s1 + $0x24] sm:$0x2] %vm7_vm0, %v45_v32  }
  0x6e   :  { %v53_v33 = vpop.permute.xlu2 %52  }
  0x6f   :  { %270 = vst.msk [vmem:[%s654_s1 + $0x6] sm:$0x1] %vm7_vm0, %v53_v33  }
  0x70   :  { %271 = vst.msk [vmem:[%s654_s1 + $0x25] sm:$0x2] %vm7_vm0, %v53_v33  }
  0x76   :  { %v77_v34 = vpop.permute.xlu2 %76  }
  0x77   :  { %276 = vst.msk [vmem:[%s654_s1 + $0x9] sm:$0x1] %vm7_vm0, %v77_v34  }
  0x78   :  { %277 = vst.msk [vmem:[%s654_s1 + $0x28] sm:$0x2] %vm7_vm0, %v77_v34  }
  0x7c   :  { %v13_v35 = vpop.permute.xlu0 %12  }
  0x7d   :  { %v29_v36 = vpop.permute.xlu1 %28   ;;  %260 = vst.msk [vmem:[%s654_s1 + $0x1] sm:$0x1] %vm7_vm0, %v13_v35  }
  0x7e   :  { %261 = vst.msk [vmem:[%s654_s1 + $0x20] sm:$0x2] %vm7_vm0, %v13_v35   ;;  %v101_v37 = vpop.permute.xlu2 %100  }
  0x7f   :  { %264 = vst.msk [vmem:[%s654_s1 + $0x3] sm:$0x1] %vm7_vm0, %v29_v36  }
  0x80   :  { %265 = vst.msk [vmem:[%s654_s1 + $0x22] sm:$0x2] %vm7_vm0, %v29_v36  }
  0x81   :  { %282 = vst.msk [vmem:[%s654_s1 + $0xc] sm:$0x1] %vm7_vm0, %v101_v37  }
  0x82   :  { %283 = vst.msk [vmem:[%s654_s1 + $0x2b] sm:$0x2] %vm7_vm0, %v101_v37  }
  0x84   :  { %v21_v38 = vpop.permute.xlu0 %20  }
  0x85   :  { %v37_v39 = vpop.permute.xlu1 %36   ;;  %262 = vst.msk [vmem:[%s654_s1 + $0x2] sm:$0x1] %vm7_vm0, %v21_v38  }
  0x86   :  { %263 = vst.msk [vmem:[%s654_s1 + $0x21] sm:$0x2] %vm7_vm0, %v21_v38   ;;  %v125_v40 = vpop.permute.xlu2 %124  }
  0x87   :  { %266 = vst.msk [vmem:[%s654_s1 + $0x4] sm:$0x1] %vm7_vm0, %v37_v39  }
  0x88   :  { %267 = vst.msk [vmem:[%s654_s1 + $0x23] sm:$0x2] %vm7_vm0, %v37_v39  }
  0x89   :  { %288 = vst.msk [vmem:[%s654_s1 + $0xf] sm:$0x1] %vm7_vm0, %v125_v40  }
  0x8a   :  { %289 = vst.msk [vmem:[%s654_s1 + $0x2e] sm:$0x2] %vm7_vm0, %v125_v40  }
  0x8c   :  { %v61_v41 = vpop.permute.xlu0 %60  }
  0x8d   :  { %v69_v42 = vpop.permute.xlu1 %68   ;;  %272 = vst.msk [vmem:[%s654_s1 + $0x7] sm:$0x1] %vm7_vm0, %v61_v41  }
  0x8e   :  { %273 = vst.msk [vmem:[%s654_s1 + $0x26] sm:$0x2] %vm7_vm0, %v61_v41   ;;  %v149_v43 = vpop.permute.xlu2 %148  }
  0x8f   :  { %274 = vst.msk [vmem:[%s654_s1 + $0x8] sm:$0x1] %vm7_vm0, %v69_v42  }
  0x90   :  { %275 = vst.msk [vmem:[%s654_s1 + $0x27] sm:$0x2] %vm7_vm0, %v69_v42  }
  0x91   :  { %294 = vst.msk [vmem:[%s654_s1 + $0x12] sm:$0x1] %vm7_vm0, %v149_v43  }
  0x92   :  { %295 = vst.msk [vmem:[%s654_s1 + $0x31] sm:$0x2] %vm7_vm0, %v149_v43  }
  0x94   :  { %v85_v44 = vpop.permute.xlu0 %84  }
  0x95   :  { %v93_v45 = vpop.permute.xlu1 %92   ;;  %278 = vst.msk [vmem:[%s654_s1 + $0xa] sm:$0x1] %vm7_vm0, %v85_v44  }
  0x96   :  { %279 = vst.msk [vmem:[%s654_s1 + $0x29] sm:$0x2] %vm7_vm0, %v85_v44   ;;  %v173_v46 = vpop.permute.xlu2 %172  }
  0x97   :  { %280 = vst.msk [vmem:[%s654_s1 + $0xb] sm:$0x1] %vm7_vm0, %v93_v45  }
  0x98   :  { %281 = vst.msk [vmem:[%s654_s1 + $0x2a] sm:$0x2] %vm7_vm0, %v93_v45  }
  0x99   :  { %300 = vst.msk [vmem:[%s654_s1 + $0x15] sm:$0x1] %vm7_vm0, %v173_v46  }
  0x9a   :  { %301 = vst.msk [vmem:[%s654_s1 + $0x34] sm:$0x2] %vm7_vm0, %v173_v46  }
  0x9c   :  { %v109_v47 = vpop.permute.xlu0 %108  }
  0x9d   :  { %v117_v48 = vpop.permute.xlu1 %116   ;;  %284 = vst.msk [vmem:[%s654_s1 + $0xd] sm:$0x1] %vm7_vm0, %v109_v47  }
  0x9e   :  { %285 = vst.msk [vmem:[%s654_s1 + $0x2c] sm:$0x2] %vm7_vm0, %v109_v47   ;;  %v197_v49 = vpop.permute.xlu2 %196  }
  0x9f   :  { %286 = vst.msk [vmem:[%s654_s1 + $0xe] sm:$0x1] %vm7_vm0, %v117_v48  }
  0xa0   :  { %287 = vst.msk [vmem:[%s654_s1 + $0x2d] sm:$0x2] %vm7_vm0, %v117_v48  }
  0xa1   :  { %306 = vst.msk [vmem:[%s654_s1 + $0x18] sm:$0x1] %vm7_vm0, %v197_v49  }
  0xa2   :  { %307 = vst.msk [vmem:[%s654_s1 + $0x37] sm:$0x2] %vm7_vm0, %v197_v49  }
  0xa4   :  { %v133_v50 = vpop.permute.xlu0 %132  }
  0xa5   :  { %v141_v51 = vpop.permute.xlu1 %140   ;;  %290 = vst.msk [vmem:[%s654_s1 + $0x10] sm:$0x1] %vm7_vm0, %v133_v50  }
  0xa6   :  { %291 = vst.msk [vmem:[%s654_s1 + $0x2f] sm:$0x2] %vm7_vm0, %v133_v50   ;;  %v221_v52 = vpop.permute.xlu2 %220  }
  0xa7   :  { %292 = vst.msk [vmem:[%s654_s1 + $0x11] sm:$0x1] %vm7_vm0, %v141_v51  }
  0xa8   :  { %293 = vst.msk [vmem:[%s654_s1 + $0x30] sm:$0x2] %vm7_vm0, %v141_v51  }
  0xa9   :  { %312 = vst.msk [vmem:[%s654_s1 + $0x1b] sm:$0x1] %vm7_vm0, %v221_v52  }
  0xaa   :  { %313 = vst.msk [vmem:[%s654_s1 + $0x3a] sm:$0x2] %vm7_vm0, %v221_v52  }
  0xac   :  { %v157_v53 = vpop.permute.xlu0 %156  }
  0xad   :  { %v165_v54 = vpop.permute.xlu1 %164   ;;  %296 = vst.msk [vmem:[%s654_s1 + $0x13] sm:$0x1] %vm7_vm0, %v157_v53  }
  0xae   :  { %297 = vst.msk [vmem:[%s654_s1 + $0x32] sm:$0x2] %vm7_vm0, %v157_v53   ;;  %v245_v55 = vpop.permute.xlu2 %244  }
  0xaf   :  { %298 = vst.msk [vmem:[%s654_s1 + $0x14] sm:$0x1] %vm7_vm0, %v165_v54  }
  0xb0   :  { %299 = vst.msk [vmem:[%s654_s1 + $0x33] sm:$0x2] %vm7_vm0, %v165_v54  }
  0xb1   :  { %318 = vst.msk [vmem:[%s654_s1 + $0x1e] sm:$0x1] %vm7_vm0, %v245_v55  }
  0xb2   :  { %319 = vst.msk [vmem:[%s654_s1 + $0x3d] sm:$0x2] %vm7_vm0, %v245_v55  }
  0xb4   :  { %v181_v57 = vpop.permute.xlu0 %180  }
  0xb5   :  { %v189_v58 = vpop.permute.xlu1 %188   ;;  %302 = vst.msk [vmem:[%s654_s1 + $0x16] sm:$0x1] %vm7_vm0, %v181_v57  }
  0xb6   :  { %303 = vst.msk [vmem:[%s654_s1 + $0x35] sm:$0x2] %vm7_vm0, %v181_v57  }
  0xb7   :  { %304 = vst.msk [vmem:[%s654_s1 + $0x17] sm:$0x1] %vm7_vm0, %v189_v58  }
  0xb8   :  { %305 = vst.msk [vmem:[%s654_s1 + $0x36] sm:$0x2] %vm7_vm0, %v189_v58  }
  0xbc   :  { %v205_v59 = vpop.permute.xlu0 %204  }
  0xbd   :  { %v213_v60 = vpop.permute.xlu1 %212   ;;  %308 = vst.msk [vmem:[%s654_s1 + $0x19] sm:$0x1] %vm7_vm0, %v205_v59  }
  0xbe   :  { %309 = vst.msk [vmem:[%s654_s1 + $0x38] sm:$0x2] %vm7_vm0, %v205_v59  }
  0xbf   :  { %310 = vst.msk [vmem:[%s654_s1 + $0x1a] sm:$0x1] %vm7_vm0, %v213_v60  }
  0xc0   :  { %311 = vst.msk [vmem:[%s654_s1 + $0x39] sm:$0x2] %vm7_vm0, %v213_v60  }
  0xc4   :  { %v229_v61 = vpop.permute.xlu0 %228  }
  0xc5   :  { %v237_v62 = vpop.permute.xlu1 %236   ;;  %314 = vst.msk [vmem:[%s654_s1 + $0x1c] sm:$0x1] %vm7_vm0, %v229_v61  }
  0xc6   :  { %315 = vst.msk [vmem:[%s654_s1 + $0x3b] sm:$0x2] %vm7_vm0, %v229_v61  }
  0xc7   :  { %316 = vst.msk [vmem:[%s654_s1 + $0x1d] sm:$0x1] %vm7_vm0, %v237_v62  }
  0xc8   :  { %317 = vst.msk [vmem:[%s654_s1 + $0x3c] sm:$0x2] %vm7_vm0, %v237_v62  }
  0xcc   :  { %v253_v63 = vpop.permute.xlu0 %252  }
  0xcd   :  { %320 = vst.msk [vmem:[%s654_s1 + $0x1f] sm:$0x1] %vm7_vm0, %v253_v63  }
  0xce   :  { %321 = vst.msk [vmem:[%s654_s1 + $0x3e] sm:$0x2] %vm7_vm0, %v253_v63  }

// kernel: tile.23
= control target key start
LH: loop header
LB: loop body
LE: loop exit
PB: predicated region body
PF: predicated region fallthrough
CT: control target
= control target key end

     0   :  { %s22_s0 = inlined_call_operand.vmem [shape: f32[16], index: 0, kind: input, shape index: {}]   ;;  %s23_s1 = inlined_call_operand.vmem [shape: f32[2,16], index: 1, kind: output, shape index: {}]  }
   0x1   :  { %v4_v0 = vld [vmem:[%s22_s0] ss:$0 sm:$0xff] }
   0x2   :  { %5 = vst [vmem:[%s23_s1] sm:$0x3] %v4_v0 }

// kernel: tile.1
= control target key start
LH: loop header
LB: loop body
LE: loop exit
PB: predicated region body
PF: predicated region fallthrough
CT: control target
= control target key end

     0   :  { %s130_s8 = smov 127   ;;  %s131_s9 = smov 123   ;;  %vm7_vm0 = vcmask 7168   ;;  %s221_s0 = inlined_call_operand.vmem [shape: f32[2,16], index: 0, kind: input, shape index: {}]   ;;  %s222_s1 = inlined_call_operand.vmem [shape: f32[32,1], index: 1, kind: output, shape index: {}]  }
   0x1   :  { %v4_v0 = vld [vmem:[%s221_s0] sm:$0x3]  ;;  %s129_s0 = smov 125   ;;  %s132_s10 = smov 124  }
   0x2   :  { %5 = vst [vmem:[#allocation0] sm:$0x3] %v4_v0  ;;  %s133_s11 = smov 126   ;;  %s134_s12 = smov 122  }
   0x3   :  { %s135_s13 = smov 120   ;;  %s136_s14 = smov 121  }
   0x4   :  { %s137_s15 = smov 119   ;;  %s138_s16 = smov 117  }
   0x5   :  { %s139_s17 = smov 118   ;;  %s140_s18 = smov 116  }
   0x6   :  { %s141_s19 = smov 114   ;;  %s142_s20 = smov 115  }
   0x7   :  { %s143_s21 = smov 113  }
   0x9   :  { %v21_v1 = vld [vmem:[#allocation0] sm:$0x3]  }
   0xa   :  { %v9_v2 = vld [vmem:[#allocation0] sm:$0x3]   ;;  %22 = vrot.lane.b32.xlu1 %v21_v1, %s129_s0 }
   0xb   :  { %10 = vrot.lane.b32.xlu0 %v9_v2, %s130_s8  ;;  %v33_v3 = vld [vmem:[#allocation0] sm:$0x3]  }
   0xc   :  { %34 = vrot.lane.b32.xlu2 %v33_v3, %s131_s9  ;;  %v27_v4 = vld [vmem:[#allocation0] sm:$0x3]  }
   0xd   :  { %v15_v5 = vld [vmem:[#allocation0] sm:$0x3]  }
   0xe   :  { %v39_v6 = vld [vmem:[#allocation0] sm:$0x3]  }
   0xf   :  { %v51_v7 = vld [vmem:[#allocation0] sm:$0x3]  }
  0x10   :  { %v45_v8 = vld [vmem:[#allocation0] sm:$0x3]  }
  0x11   :  { %v57_v9 = vld [vmem:[#allocation0] sm:$0x3]  }
  0x12   :  { %28 = vrot.lane.b32.xlu1 %v27_v4, %s132_s10  ;;  %v69_v10 = vld [vmem:[#allocation0] sm:$0x3]  }
  0x13   :  { %16 = vrot.lane.b32.xlu0 %v15_v5, %s133_s11  ;;  %v63_v11 = vld [vmem:[#allocation0] sm:$0x3]  }
  0x14   :  { %40 = vrot.lane.b32.xlu2 %v39_v6, %s134_s12  ;;  %v75_v12 = vld [vmem:[#allocation0] sm:$0x3]  }
  0x15   :  { %v87_v13 = vld [vmem:[#allocation0] sm:$0x3]  }
  0x16   :  { %v81_v14 = vld [vmem:[#allocation0] sm:$0x3]  }
  0x17   :  { %v93_v15 = vld [vmem:[#allocation0] sm:$0x3]  }
  0x18   :  { %v6_v21 = vld [vmem:[#allocation0] sm:$0x3]  }
  0x19   :  { %8 = vst.msk [vmem:[%s222_s1] ss:$16 sm:$0x3] %vm7_vm0, %v6_v21  }
  0x1a   :  { %52 = vrot.lane.b32.xlu1 %v51_v7, %s135_s13 }
  0x1b   :  { %46 = vrot.lane.b32.xlu0 %v45_v8, %s136_s14 }
  0x1c   :  { %58 = vrot.lane.b32.xlu2 %v57_v9, %s137_s15 }
  0x22   :  { %70 = vrot.lane.b32.xlu1 %v69_v10, %s138_s16 }
  0x23   :  { %64 = vrot.lane.b32.xlu0 %v63_v11, %s139_s17 }
  0x24   :  { %76 = vrot.lane.b32.xlu2 %v75_v12, %s140_s18 }
  0x2a   :  { %88 = vrot.lane.b32.xlu1 %v87_v13, %s141_s19 }
  0x2b   :  { %82 = vrot.lane.b32.xlu0 %v81_v14, %s142_s20 }
  0x2c   :  { %94 = vrot.lane.b32.xlu2 %v93_v15, %s143_s21 }
  0x66   :  { %v35_v16 = vpop.permute.xlu2 %34  }
  0x67   :  { %103 = vst.msk [vmem:[%s222_s1 + $0x5] ss:$16 sm:$0x3] %vm7_vm0, %v35_v16  }
  0x6e   :  { %v41_v17 = vpop.permute.xlu2 %40  }
  0x6f   :  { %104 = vst.msk [vmem:[%s222_s1 + $0x6] ss:$16 sm:$0x3] %vm7_vm0, %v41_v17  }
  0x76   :  { %v59_v18 = vpop.permute.xlu2 %58  }
  0x77   :  { %107 = vst.msk [vmem:[%s222_s1 + $0x9] ss:$16 sm:$0x3] %vm7_vm0, %v59_v18  }
  0x7c   :  { %v23_v19 = vpop.permute.xlu1 %22  }
  0x7d   :  { %v11_v20 = vpop.permute.xlu0 %10   ;;  %101 = vst.msk [vmem:[%s222_s1 + $0x3] ss:$16 sm:$0x3] %vm7_vm0, %v23_v19  }
  0x7e   :  { %99 = vst.msk [vmem:[%s222_s1 + $0x1] ss:$16 sm:$0x3] %vm7_vm0, %v11_v20   ;;  %v77_v22 = vpop.permute.xlu2 %76  }
  0x7f   :  { %110 = vst.msk [vmem:[%s222_s1 + $0xc] ss:$16 sm:$0x3] %vm7_vm0, %v77_v22  }
  0x84   :  { %v29_v23 = vpop.permute.xlu1 %28  }
  0x85   :  { %v17_v24 = vpop.permute.xlu0 %16   ;;  %102 = vst.msk [vmem:[%s222_s1 + $0x4] ss:$16 sm:$0x3] %vm7_vm0, %v29_v23  }
  0x86   :  { %100 = vst.msk [vmem:[%s222_s1 + $0x2] ss:$16 sm:$0x3] %vm7_vm0, %v17_v24   ;;  %v95_v25 = vpop.permute.xlu2 %94  }
  0x87   :  { %113 = vst.msk [vmem:[%s222_s1 + $0xf] ss:$16 sm:$0x3] %vm7_vm0, %v95_v25  }
  0x8c   :  { %v53_v26 = vpop.permute.xlu1 %52  }
  0x8d   :  { %v47_v27 = vpop.permute.xlu0 %46   ;;  %106 = vst.msk [vmem:[%s222_s1 + $0x8] ss:$16 sm:$0x3] %vm7_vm0, %v53_v26  }
  0x8e   :  { %105 = vst.msk [vmem:[%s222_s1 + $0x7] ss:$16 sm:$0x3] %vm7_vm0, %v47_v27  }
  0x94   :  { %v71_v28 = vpop.permute.xlu1 %70  }
  0x95   :  { %v65_v29 = vpop.permute.xlu0 %64   ;;  %109 = vst.msk [vmem:[%s222_s1 + $0xb] ss:$16 sm:$0x3] %vm7_vm0, %v71_v28  }
  0x96   :  { %108 = vst.msk [vmem:[%s222_s1 + $0xa] ss:$16 sm:$0x3] %vm7_vm0, %v65_v29  }
  0x9c   :  { %v89_v30 = vpop.permute.xlu1 %88  }
  0x9d   :  { %v83_v31 = vpop.permute.xlu0 %82   ;;  %112 = vst.msk [vmem:[%s222_s1 + $0xe] ss:$16 sm:$0x3] %vm7_vm0, %v89_v30  }
  0x9e   :  { %111 = vst.msk [vmem:[%s222_s1 + $0xd] ss:$16 sm:$0x3] %vm7_vm0, %v83_v31  }

// kernel: tile.18
= control target key start
LH: loop header
LB: loop body
LE: loop exit
PB: predicated region body
PF: predicated region fallthrough
CT: control target
= control target key end

     0   :  { %s22_s0 = inlined_call_operand.vmem [shape: f32[8], index: 0, kind: input, shape index: {}]   ;;  %s23_s1 = inlined_call_operand.vmem [shape: f32[2,8], index: 1, kind: output, shape index: {}]  }
   0x1   :  { %v4_v0 = vld [vmem:[%s22_s0] ss:$0 sm:$0xff] }
   0x2   :  { %5 = vst [vmem:[%s23_s1] sm:$0x3] %v4_v0 }

// kernel: tile.0
= control target key start
LH: loop header
LB: loop body
LE: loop exit
PB: predicated region body
PF: predicated region fallthrough
CT: control target
= control target key end

     0   :  { %s66_s8 = smov 125   ;;  %s67_s9 = smov 123   ;;  %vm7_vm0 = vcmask 7168   ;;  %s117_s0 = inlined_call_operand.vmem [shape: f32[2,8], index: 0, kind: input, shape index: {}]   ;;  %s118_s1 = inlined_call_operand.vmem [shape: f32[16,1], index: 1, kind: output, shape index: {}]  }
   0x1   :  { %v4_v0 = vld [vmem:[%s117_s0] sm:$0x3]  ;;  %s65_s0 = smov 127   ;;  %s68_s10 = smov 126  }
   0x2   :  { %5 = vst [vmem:[#allocation0] sm:$0x3] %v4_v0  ;;  %s69_s11 = smov 124   ;;  %s70_s12 = smov 122  }
   0x3   :  { %s71_s13 = smov 121  }
   0x9   :  { %v9_v1 = vld [vmem:[#allocation0] sm:$0x3]  }
   0xa   :  { %v21_v2 = vld [vmem:[#allocation0] sm:$0x3]   ;;  %10 = vrot.lane.b32.xlu0 %v9_v1, %s65_s0 }
   0xb   :  { %22 = vrot.lane.b32.xlu1 %v21_v2, %s66_s8  ;;  %v33_v3 = vld [vmem:[#allocation0] sm:$0x3]  }
   0xc   :  { %34 = vrot.lane.b32.xlu2 %v33_v3, %s67_s9  ;;  %v15_v4 = vld [vmem:[#allocation0] sm:$0x3]  }
   0xd   :  { %v27_v5 = vld [vmem:[#allocation0] sm:$0x3]  }
   0xe   :  { %v39_v6 = vld [vmem:[#allocation0] sm:$0x3]  }
   0xf   :  { %v45_v7 = vld [vmem:[#allocation0] sm:$0x3]  }
  0x10   :  { %v6_v8 = vld [vmem:[#allocation0] sm:$0x3]  }
  0x11   :  { %8 = vst.msk [vmem:[%s118_s1] ss:$8 sm:$0x3] %vm7_vm0, %v6_v8  }
  0x12   :  { %16 = vrot.lane.b32.xlu0 %v15_v4, %s68_s10 }
  0x13   :  { %28 = vrot.lane.b32.xlu1 %v27_v5, %s69_s11 }
  0x14   :  { %40 = vrot.lane.b32.xlu2 %v39_v6, %s70_s12 }
  0x1a   :  { %46 = vrot.lane.b32.xlu0 %v45_v7, %s71_s13 }
  0x66   :  { %v35_v9 = vpop.permute.xlu2 %34  }
  0x67   :  { %55 = vst.msk [vmem:[%s118_s1 + $0x5] ss:$8 sm:$0x3] %vm7_vm0, %v35_v9  }
  0x6e   :  { %v41_v10 = vpop.permute.xlu2 %40  }
  0x6f   :  { %56 = vst.msk [vmem:[%s118_s1 + $0x6] ss:$8 sm:$0x3] %vm7_vm0, %v41_v10  }
  0x7c   :  { %v11_v11 = vpop.permute.xlu0 %10  }
  0x7d   :  { %v23_v12 = vpop.permute.xlu1 %22   ;;  %51 = vst.msk [vmem:[%s118_s1 + $0x1] ss:$8 sm:$0x3] %vm7_vm0, %v11_v11  }
  0x7e   :  { %53 = vst.msk [vmem:[%s118_s1 + $0x3] ss:$8 sm:$0x3] %vm7_vm0, %v23_v12  }
  0x84   :  { %v17_v13 = vpop.permute.xlu0 %16  }
  0x85   :  { %v29_v14 = vpop.permute.xlu1 %28   ;;  %52 = vst.msk [vmem:[%s118_s1 + $0x2] ss:$8 sm:$0x3] %vm7_vm0, %v17_v13  }
  0x86   :  { %54 = vst.msk [vmem:[%s118_s1 + $0x4] ss:$8 sm:$0x3] %vm7_vm0, %v29_v14  }
  0x8c   :  { %v47_v15 = vpop.permute.xlu0 %46  }
  0x8d   :  { %57 = vst.msk [vmem:[%s118_s1 + $0x7] ss:$8 sm:$0x3] %vm7_vm0, %v47_v15  }

// kernel: encoder_forward.1
= control target key start
LH: loop header
LB: loop body
LE: loop exit
PB: predicated region body
PF: predicated region fallthrough
CT: control target
= control target key end

     0   :  { %vm398_vm0 = vcmask 64512   ;;  %vm2466_vm8 = vcmask 130048   ;;  %vm3704_vm9 = vcmask 523264   ;;  %s10602_s3 = inlined_call_operand.vmem [shape: bf16[9,256,256], index: 3, kind: input, shape index: {}]   ;;  %s10603_s0 = inlined_call_operand.vmem [shape: f32[8,256], index: 0, kind: input, shape index: {}]   ;;  %s10604_s1 = inlined_call_operand.vmem [shape: f32[9,16,8], index: 1, kind: input, shape index: {}]   ;;  %s10605_s2 = inlined_call_operand.vmem [shape: f32[16,1], index: 2, kind: input, shape index: {}]   ;;  %s10606_s5 = inlined_call_operand.vmem [shape: f32[32,1], index: 5, kind: input, shape index: {}]   ;;  %s10607_s10 = inlined_call_operand.vmem [shape: f32[16,256], index: 10, kind: output, shape index: {0}]   ;;  %s10608_s6 = inlined_call_operand.vmem [shape: bf16[9,256,64], index: 6, kind: input, shape index: {}]   ;;  %s10609_s4 = inlined_call_operand.vmem [shape: f32[9,32,16], index: 4, kind: input, shape index: {}]   ;;  %s10610_s11 = inlined_call_operand.vmem [shape: f32[32,64], index: 11, kind: output, shape index: {1}]   ;;  %s10611_s8 = inlined_call_operand.vmem [shape: f32[64,1], index: 8, kind: input, shape index: {}]   ;;  %s10612_s9 = inlined_call_operand.vmem [shape: bf16[9,64,16], index: 9, kind: input, shape index: {}]   ;;  %s10613_s7 = inlined_call_operand.vmem [shape: f32[9,64,32], index: 7, kind: input, shape index: {}]   ;;  %s10614_s12 = inlined_call_operand.vmem [shape: f32[64,16], index: 12, kind: output, shape index: {2}]  }
   0x1   :  { %v55_v0 = vld [vmem:[%s10602_s3 + $0x78] sm:$0xff]  ;;  %v54_v2 = vld [vmem:[%s10602_s3 + $0x70] sm:$0xff]  ;;  %v53_v7 = vld [vmem:[%s10602_s3 + $0x68] sm:$0xff] }
   0x2   :  { %v71_v1 = vld [vmem:[%s10602_s3 + $0xf8] sm:$0xff]  ;;  %v103_v3 = vunpack.c.h.bf16 %v55_v0  ;;  %v101_v5 = vunpack.c.h.bf16 %v54_v2  ;;  %v70_v6 = vld [vmem:[%s10602_s3 + $0xf0] sm:$0xff]  ;;  %v69_v8 = vld [vmem:[%s10602_s3 + $0xe8] sm:$0xff]  ;;  %v102_v9 = vunpack.c.l.bf16 %v55_v0  ;;  %v99_v14 = vunpack.c.h.bf16 %v53_v7 }
   0x3   :  { %v135_v4 = vunpack.c.h.bf16 %v71_v1  ;;  %v133_v10 = vunpack.c.h.bf16 %v70_v6  ;;  %v134_v11 = vunpack.c.l.bf16 %v71_v1  ;;  %v52_v12 = vld [vmem:[%s10602_s3 + $0x60] sm:$0xff]  ;;  %v131_v15 = vunpack.c.h.bf16 %v69_v8  ;;  %v51_v18 = vld [vmem:[%s10602_s3 + $0x58] sm:$0xff]  ;;  %v50_v24 = vld [vmem:[%s10602_s3 + $0x50] sm:$0xff] }
   0x4   :  { %v68_v13 = vld [vmem:[%s10602_s3 + $0xe0] sm:$0xff]  ;;  %176 = vmatpush.msra.mxu2 %v103_v3  ;;  %v100_v16 = vunpack.c.l.bf16 %v54_v2  ;;  %v132_v17 = vunpack.c.l.bf16 %v70_v6  ;;  %136 = vmatpush.msra.mxu0 %v102_v9  ;;  %v67_v19 = vld [vmem:[%s10602_s3 + $0xd8] sm:$0xff]  ;;  %v98_v20 = vunpack.c.l.bf16 %v53_v7  ;;  %v130_v21 = vunpack.c.l.bf16 %v69_v8  ;;  %v66_v25 = vld [vmem:[%s10602_s3 + $0xd0] sm:$0xff] }
   0x5   :  { %196 = vmatpush.msra.mxu3 %v135_v4  ;;  %156 = vmatpush.msra.mxu1 %v134_v11  ;;  %v97_v22 = vunpack.c.h.bf16 %v52_v12  ;;  %v129_v23 = vunpack.c.h.bf16 %v68_v13  ;;  %v96_v26 = vunpack.c.l.bf16 %v52_v12  ;;  %v128_v27 = vunpack.c.l.bf16 %v68_v13  ;;  %v49_v30 = vld [vmem:[%s10602_s3 + $0x48] sm:$0xff]  ;;  %v48_v36 = vld [vmem:[%s10602_s3 + $0x40] sm:$0xff]  ;;  %v47_v42 = vld [vmem:[%s10602_s3 + $0x38] sm:$0xff] }
   0x6   :  { %177 = vmatpush.msra.mxu2 %v101_v5  ;;  %137 = vmatpush.msra.mxu0 %v100_v16  ;;  %v95_v28 = vunpack.c.h.bf16 %v51_v18  ;;  %v127_v29 = vunpack.c.h.bf16 %v67_v19  ;;  %v65_v31 = vld [vmem:[%s10602_s3 + $0xc8] sm:$0xff]  ;;  %v94_v32 = vunpack.c.l.bf16 %v51_v18  ;;  %v126_v33 = vunpack.c.l.bf16 %v67_v19  ;;  %v64_v37 = vld [vmem:[%s10602_s3 + $0xc0] sm:$0xff]  ;;  %v63_v43 = vld [vmem:[%s10602_s3 + $0xb8] sm:$0xff] }
   0x7   :  { %197 = vmatpush.msra.mxu3 %v133_v10  ;;  %157 = vmatpush.msra.mxu1 %v132_v17  ;;  %v93_v34 = vunpack.c.h.bf16 %v50_v24  ;;  %v125_v35 = vunpack.c.h.bf16 %v66_v25  ;;  %v92_v38 = vunpack.c.l.bf16 %v50_v24  ;;  %v124_v39 = vunpack.c.l.bf16 %v66_v25  ;;  %v46_v48 = vld [vmem:[%s10602_s3 + $0x30] sm:$0xff]  ;;  %v45_v54 = vld [vmem:[%s10602_s3 + $0x28] sm:$0xff]  ;;  %v44_v60 = vld [vmem:[%s10602_s3 + $0x20] sm:$0xff] }
   0x8   :  { %178 = vmatpush.msra.mxu2 %v99_v14  ;;  %138 = vmatpush.msra.mxu0 %v98_v20  ;;  %v91_v40 = vunpack.c.h.bf16 %v49_v30  ;;  %v123_v41 = vunpack.c.h.bf16 %v65_v31  ;;  %v90_v44 = vunpack.c.l.bf16 %v49_v30  ;;  %v122_v45 = vunpack.c.l.bf16 %v65_v31  ;;  %v62_v49 = vld [vmem:[%s10602_s3 + $0xb0] sm:$0xff]  ;;  %v61_v55 = vld [vmem:[%s10602_s3 + $0xa8] sm:$0xff]  ;;  %v60_v61 = vld [vmem:[%s10602_s3 + $0xa0] sm:$0xff] }
   0x9   :  { %198 = vmatpush.msra.mxu3 %v131_v15  ;;  %158 = vmatpush.msra.mxu1 %v130_v21  ;;  %v89_v46 = vunpack.c.h.bf16 %v48_v36  ;;  %v121_v47 = vunpack.c.h.bf16 %v64_v37  ;;  %v88_v50 = vunpack.c.l.bf16 %v48_v36  ;;  %v120_v51 = vunpack.c.l.bf16 %v64_v37  ;;  %v43_v2 = vld [vmem:[%s10602_s3 + $0x18] sm:$0xff]  ;;  %v42_v8 = vld [vmem:[%s10602_s3 + $0x10] sm:$0xff]  ;;  %v41_v14 = vld [vmem:[%s10602_s3 + $0x8] sm:$0xff] }
   0xa   :  { %179 = vmatpush.msra.mxu2 %v97_v22  ;;  %139 = vmatpush.msra.mxu0 %v96_v26  ;;  %v87_v52 = vunpack.c.h.bf16 %v47_v42  ;;  %v119_v53 = vunpack.c.h.bf16 %v63_v43  ;;  %v86_v56 = vunpack.c.l.bf16 %v47_v42  ;;  %v118_v57 = vunpack.c.l.bf16 %v63_v43  ;;  %v59_v3 = vld [vmem:[%s10602_s3 + $0x98] sm:$0xff]  ;;  %v58_v9 = vld [vmem:[%s10602_s3 + $0x90] sm:$0xff]  ;;  %v57_v15 = vld [vmem:[%s10602_s3 + $0x88] sm:$0xff] }
   0xb   :  { %199 = vmatpush.msra.mxu3 %v129_v23  ;;  %159 = vmatpush.msra.mxu1 %v128_v27  ;;  %v85_v58 = vunpack.c.h.bf16 %v46_v48  ;;  %v117_v59 = vunpack.c.h.bf16 %v62_v49  ;;  %v84_v62 = vunpack.c.l.bf16 %v46_v48  ;;  %v116_v63 = vunpack.c.l.bf16 %v62_v49  ;;  %v40_v20 = vld [vmem:[%s10602_s3] sm:$0xff]  ;;  %v5237_v26 = vld [vmem:[%s10602_s3 + $0x178] sm:$0xff] }
   0xc   :  { %180 = vmatpush.msra.mxu2 %v95_v28  ;;  %140 = vmatpush.msra.mxu0 %v94_v32  ;;  %v83_v0 = vunpack.c.h.bf16 %v45_v54  ;;  %v115_v1 = vunpack.c.h.bf16 %v61_v55  ;;  %v82_v4 = vunpack.c.l.bf16 %v45_v54  ;;  %v114_v5 = vunpack.c.l.bf16 %v61_v55  ;;  %v56_v21 = vld [vmem:[%s10602_s3 + $0x80] sm:$0xff]  ;;  %v5253_v27 = vld [vmem:[%s10602_s3 + $0x1f8] sm:$0xff]  ;;  %v5236_v32 = vld [vmem:[%s10602_s3 + $0x170] sm:$0xff] }
   0xd   :  { %200 = vmatpush.msra.mxu3 %v127_v29  ;;  %160 = vmatpush.msra.mxu1 %v126_v33  ;;  %v81_v6 = vunpack.c.h.bf16 %v44_v60  ;;  %v113_v7 = vunpack.c.h.bf16 %v60_v61  ;;  %v80_v10 = vunpack.c.l.bf16 %v44_v60  ;;  %v112_v11 = vunpack.c.l.bf16 %v60_v61  ;;  %v5252_v33 = vld [vmem:[%s10602_s3 + $0x1f0] sm:$0xff] }
   0xe   :  { %181 = vmatpush.msra.mxu2 %v93_v34  ;;  %141 = vmatpush.msra.mxu0 %v92_v38  ;;  %v79_v12 = vunpack.c.h.bf16 %v43_v2  ;;  %v111_v13 = vunpack.c.h.bf16 %v59_v3  ;;  %v78_v16 = vunpack.c.l.bf16 %v43_v2  ;;  %v110_v17 = vunpack.c.l.bf16 %v59_v3  ;;  %v7215_v34 = vld [vmem:[%s10603_s0] sm:$0xff]  ;;  %v5235_v38 = vld [vmem:[%s10602_s3 + $0x168] sm:$0xff] }
   0xf   :  { %201 = vmatpush.msra.mxu3 %v125_v35  ;;  %161 = vmatpush.msra.mxu1 %v124_v39  ;;  %v77_v18 = vunpack.c.h.bf16 %v42_v8  ;;  %v109_v19 = vunpack.c.h.bf16 %v58_v9  ;;  %v76_v22 = vunpack.c.l.bf16 %v42_v8  ;;  %v108_v23 = vunpack.c.l.bf16 %v58_v9  ;;  %v7220_v35 = vld [vmem:[%s10603_s0 + $0x8] sm:$0xff] }
  0x10   :  { %182 = vmatpush.msra.mxu2 %v91_v40  ;;  %142 = vmatpush.msra.mxu0 %v90_v44  ;;  %v75_v24 = vunpack.c.h.bf16 %v41_v14  ;;  %v107_v25 = vunpack.c.h.bf16 %v57_v15  ;;  %v74_v28 = vunpack.c.l.bf16 %v41_v14  ;;  %v106_v29 = vunpack.c.l.bf16 %v57_v15  ;;  %v5251_v39 = vld [vmem:[%s10602_s3 + $0x1e8] sm:$0xff]  ;;  %v5234_v44 = vld [vmem:[%s10602_s3 + $0x160] sm:$0xff] }
  0x11   :  { %202 = vmatpush.msra.mxu3 %v123_v41  ;;  %162 = vmatpush.msra.mxu1 %v122_v45  ;;  %v73_v30 = vunpack.c.h.bf16 %v40_v20  ;;  %v105_v31 = vunpack.c.h.bf16 %v56_v21  ;;  %v282_v36 = vunpack.c.h.bf16 %v5237_v26  ;;  %v314_v37 = vunpack.c.h.bf16 %v5253_v27  ;;  %v5250_v45 = vld [vmem:[%s10602_s3 + $0x1e0] sm:$0xff] }
  0x12   :  { %183 = vmatpush.msra.mxu2 %v89_v46  ;;  %143 = vmatpush.msra.mxu0 %v88_v50  ;;  %v72_v40 = vunpack.c.l.bf16 %v40_v20  ;;  %v104_v41 = vunpack.c.l.bf16 %v56_v21  ;;  %v280_v42 = vunpack.c.h.bf16 %v5236_v32  ;;  %v312_v43 = vunpack.c.h.bf16 %v5252_v33  ;;  %v5233_v50 = vld [vmem:[%s10602_s3 + $0x158] sm:$0xff] }
  0x13   :  { %203 = vmatpush.msra.mxu3 %v121_v47  ;;  %163 = vmatpush.msra.mxu1 %v120_v51  ;;  %v278_v46 = vunpack.c.h.bf16 %v5235_v38  ;;  %v310_v47 = vunpack.c.h.bf16 %v5251_v39  ;;  %v281_v48 = vunpack.c.l.bf16 %v5237_v26  ;;  %v313_v49 = vunpack.c.l.bf16 %v5253_v27  ;;  %v5249_v51 = vld [vmem:[%s10602_s3 + $0x1d8] sm:$0xff] }
  0x14   :  { %184 = vmatpush.msra.mxu2 %v87_v52  ;;  %144 = vmatpush.msra.mxu0 %v86_v56  ;;  %v276_v52 = vunpack.c.h.bf16 %v5234_v44  ;;  %v279_v54 = vunpack.c.l.bf16 %v5236_v32  ;;  %v311_v55 = vunpack.c.l.bf16 %v5252_v33  ;;  %v5232_v56 = vld [vmem:[%s10602_s3 + $0x150] sm:$0xff]  ;;  %v277_v60 = vunpack.c.l.bf16 %v5235_v38 }
  0x15   :  { %204 = vmatpush.msra.mxu3 %v119_v53  ;;  %164 = vmatpush.msra.mxu1 %v118_v57  ;;  %v308_v53 = vunpack.c.h.bf16 %v5250_v45  ;;  %v5248_v57 = vld [vmem:[%s10602_s3 + $0x1d0] sm:$0xff]  ;;  %v309_v61 = vunpack.c.l.bf16 %v5251_v39  ;;  %v275_v2 = vunpack.c.l.bf16 %v5234_v44  ;;  %v307_v3 = vunpack.c.l.bf16 %v5250_v45 }
  0x16   :  { %185 = vmatpush.msra.mxu2 %v85_v58  ;;  %145 = vmatpush.msra.mxu0 %v84_v62  ;;  %v274_v58 = vunpack.c.h.bf16 %v5233_v50  ;;  %v5231_v62 = vld [vmem:[%s10602_s3 + $0x148] sm:$0xff]  ;;  %v273_v8 = vunpack.c.l.bf16 %v5233_v50  ;;  %v305_v9 = vunpack.c.l.bf16 %v5249_v51  ;;  %v271_v14 = vunpack.c.l.bf16 %v5232_v56 }
  0x17   :  { %205 = vmatpush.msra.mxu3 %v117_v59  ;;  %165 = vmatpush.msra.mxu1 %v116_v63  ;;  %v306_v59 = vunpack.c.h.bf16 %v5249_v51  ;;  %v5247_v63 = vld [vmem:[%s10602_s3 + $0x1c8] sm:$0xff]  ;;  %v303_v15 = vunpack.c.l.bf16 %v5248_v57  ;;  %v269_v20 = vunpack.c.l.bf16 %v5231_v62 }
  0x18   :  { %186 = vmatpush.msra.mxu2 %v83_v0  ;;  %146 = vmatpush.msra.mxu0 %v82_v4  ;;  %v272_v0 = vunpack.c.h.bf16 %v5232_v56  ;;  %v5230_v4 = vld [vmem:[%s10602_s3 + $0x140] sm:$0xff]  ;;  %v301_v21 = vunpack.c.l.bf16 %v5247_v63 }
  0x19   :  { %206 = vmatpush.msra.mxu3 %v115_v1  ;;  %166 = vmatpush.msra.mxu1 %v114_v5  ;;  %v304_v1 = vunpack.c.h.bf16 %v5248_v57  ;;  %v5246_v5 = vld [vmem:[%s10602_s3 + $0x1c0] sm:$0xff]  ;;  %v267_v26 = vunpack.c.l.bf16 %v5230_v4 }
  0x1a   :  { %187 = vmatpush.msra.mxu2 %v81_v6  ;;  %147 = vmatpush.msra.mxu0 %v80_v10  ;;  %v270_v6 = vunpack.c.h.bf16 %v5231_v62  ;;  %v5229_v10 = vld [vmem:[%s10602_s3 + $0x138] sm:$0xff]  ;;  %v299_v27 = vunpack.c.l.bf16 %v5246_v5 }
  0x1b   :  { %207 = vmatpush.msra.mxu3 %v113_v7  ;;  %167 = vmatpush.msra.mxu1 %v112_v11  ;;  %v302_v7 = vunpack.c.h.bf16 %v5247_v63  ;;  %v5245_v11 = vld [vmem:[%s10602_s3 + $0x1b8] sm:$0xff]  ;;  %v265_v32 = vunpack.c.l.bf16 %v5229_v10 }
  0x1c   :  { %188 = vmatpush.msra.mxu2 %v79_v12  ;;  %148 = vmatpush.msra.mxu0 %v78_v16  ;;  %v268_v12 = vunpack.c.h.bf16 %v5230_v4  ;;  %v5228_v16 = vld [vmem:[%s10602_s3 + $0x130] sm:$0xff]  ;;  %v297_v33 = vunpack.c.l.bf16 %v5245_v11  ;;  %v7317_v4 = vld [vmem:[%s10602_s3 + $0x278] sm:$0xff] }
  0x1d   :  { %208 = vmatpush.msra.mxu3 %v111_v13  ;;  %168 = vmatpush.msra.mxu1 %v110_v17  ;;  %v300_v13 = vunpack.c.h.bf16 %v5246_v5  ;;  %v5244_v17 = vld [vmem:[%s10602_s3 + $0x1b0] sm:$0xff]  ;;  %v7322_v5 = vld [vmem:[%s10602_s3 + $0x2f8] sm:$0xff] }
  0x1e   :  { %189 = vmatpush.msra.mxu2 %v77_v18  ;;  %149 = vmatpush.msra.mxu0 %v76_v22  ;;  %v266_v18 = vunpack.c.h.bf16 %v5229_v10  ;;  %v5227_v22 = vld [vmem:[%s10602_s3 + $0x128] sm:$0xff] }
  0x1f   :  { %209 = vmatpush.msra.mxu3 %v109_v19  ;;  %169 = vmatpush.msra.mxu1 %v108_v23  ;;  %v298_v19 = vunpack.c.h.bf16 %v5245_v11  ;;  %v5243_v23 = vld [vmem:[%s10602_s3 + $0x1a8] sm:$0xff]  ;;  %v7333_v11 = vld [vmem:[%s10602_s3 + $0x2f0] sm:$0xff] }
  0x20   :  { %190 = vmatpush.msra.mxu2 %v75_v24  ;;  %150 = vmatpush.msra.mxu0 %v74_v28  ;;  %v264_v24 = vunpack.c.h.bf16 %v5228_v16  ;;  %v5226_v28 = vld [vmem:[%s10602_s3 + $0x120] sm:$0xff] }
  0x21   :  { %210 = vmatpush.msra.mxu3 %v107_v25  ;;  %170 = vmatpush.msra.mxu1 %v106_v29  ;;  %v296_v25 = vunpack.c.h.bf16 %v5244_v17  ;;  %v5242_v29 = vld [vmem:[%s10602_s3 + $0x1a0] sm:$0xff]  ;;  %v260_v38 = vunpack.c.h.bf16 %v5226_v28 }
  0x22   :  { %191 = vmatpush.msra.mxu2 %v73_v30  ;;  %151 = vmatpush.msra.mxu0 %v72_v40  ;;  %v262_v30 = vunpack.c.h.bf16 %v5227_v22  ;;  %v292_v39 = vunpack.c.h.bf16 %v5242_v29  ;;  %v263_v40 = vunpack.c.l.bf16 %v5228_v16 }
  0x23   :  { %211 = vmatpush.msra.mxu3 %v105_v31  ;;  %192 = vmatmul.f32.vlgmr.msra.gmra.mxu2 %v7215_v34  ;;  %v294_v31 = vunpack.c.h.bf16 %v5243_v23 }
  0x24   :  { %212 = vmatmul.f32.vlgmr.msra.gmra.mxu3 %v7220_v35  ;;  %355 = vmatpush.msrb.mxu2 %v282_v36  ;;  %v5225_v36 = vld [vmem:[%s10602_s3 + $0x118] sm:$0xff] }
  0x25   :  { %375 = vmatpush.msrb.mxu3 %v314_v37  ;;  %171 = vmatpush.msra.mxu1 %v104_v41  ;;  %v5241_v37 = vld [vmem:[%s10602_s3 + $0x198] sm:$0xff]  ;;  %v295_v41 = vunpack.c.l.bf16 %v5244_v17  ;;  %v258_v44 = vunpack.c.h.bf16 %v5225_v36  ;;  %v216_v17 = vld [vmem:[%s10604_s1] sm:$0xff] }
  0x26   :  { %356 = vmatpush.msrb.mxu2 %v280_v42  ;;  %152 = vmatmul.f32.vlgmr.msra.gmra.mxu0 %v7215_v34  ;;  %v5224_v42 = vld [vmem:[%s10602_s3 + $0x110] sm:$0xff]  ;;  %v290_v45 = vunpack.c.h.bf16 %v5241_v37 }
  0x27   :  { %376 = vmatpush.msrb.mxu3 %v312_v43  ;;  %172 = vmatmul.f32.vlgmr.msra.gmra.mxu1 %v7220_v35  ;;  %v5240_v43 = vld [vmem:[%s10602_s3 + $0x190] sm:$0xff]  ;;  %v256_v50 = vunpack.c.h.bf16 %v5224_v42  ;;  %v255_v62 = vunpack.c.l.bf16 %v5224_v42  ;;  %v7413_v42 = vld [vmem:[%s10602_s3 + $0x2c0] sm:$0xff] }
  0x28   :  { %357 = vmatpush.msrb.mxu2 %v278_v46  ;;  %315 = vmatpush.msrb.mxu0 %v281_v48  ;;  %v261_v46 = vunpack.c.l.bf16 %v5227_v22  ;;  %v5223_v48 = vld [vmem:[%s10602_s3 + $0x108] sm:$0xff]  ;;  %v288_v51 = vunpack.c.h.bf16 %v5240_v43  ;;  %v287_v63 = vunpack.c.l.bf16 %v5240_v43  ;;  %v7418_v43 = vld [vmem:[%s10602_s3 + $0x238] sm:$0xff] }
  0x29   :  { %377 = vmatpush.msrb.mxu3 %v310_v47  ;;  %335 = vmatpush.msrb.mxu1 %v313_v49  ;;  %v293_v47 = vunpack.c.l.bf16 %v5243_v23  ;;  %v5239_v49 = vld [vmem:[%s10602_s3 + $0x188] sm:$0xff]  ;;  %v254_v56 = vunpack.c.h.bf16 %v5223_v48  ;;  %v7360_v23 = vld [vmem:[%s10602_s3 + $0x2e0] sm:$0xff] }
  0x2a   :  { %358 = vmatpush.msrb.mxu2 %v276_v52  ;;  %316 = vmatpush.msrb.mxu0 %v279_v54  ;;  %v259_v52 = vunpack.c.l.bf16 %v5226_v28  ;;  %v5222_v54 = vld [vmem:[%s10602_s3 + $0x100] sm:$0xff]  ;;  %v286_v57 = vunpack.c.h.bf16 %v5239_v49  ;;  %v7378_v28 = vld [vmem:[%s10602_s3 + $0x250] sm:$0xff] }
  0x2b   :  { %378 = vmatpush.msrb.mxu3 %v308_v53  ;;  %336 = vmatpush.msrb.mxu1 %v311_v55  ;;  %v291_v53 = vunpack.c.l.bf16 %v5242_v29  ;;  %v5238_v55 = vld [vmem:[%s10602_s3 + $0x180] sm:$0xff]  ;;  %v593_v29 = vunpack.c.h.bf16 %v7360_v23 }
  0x2c   :  { %359 = vmatpush.msrb.mxu2 %v274_v58  ;;  %317 = vmatpush.msrb.mxu0 %v277_v60  ;;  %v257_v58 = vunpack.c.l.bf16 %v5225_v36  ;;  %v252_v60 = vunpack.c.h.bf16 %v5222_v54  ;;  %v557_v36 = vunpack.c.h.bf16 %v7378_v28 }
  0x2d   :  { %379 = vmatpush.msrb.mxu3 %v306_v59  ;;  %337 = vmatpush.msrb.mxu1 %v309_v61  ;;  %v289_v59 = vunpack.c.l.bf16 %v5241_v37  ;;  %v284_v61 = vunpack.c.h.bf16 %v5238_v55  ;;  %v217_v37 = vld [vmem:[%s10604_s1 + $0x8] sm:$0xff] }
  0x2e   :  { %360 = vmatpush.msrb.mxu2 %v272_v0  ;;  %318 = vmatpush.msrb.mxu0 %v275_v2  ;;  %v253_v0 = vunpack.c.l.bf16 %v5223_v48  ;;  %v251_v2 = vunpack.c.l.bf16 %v5222_v54  ;;  %v585_v48 = vunpack.c.h.bf16 %v7413_v42  ;;  %v7451_v54 = vld [vmem:[%s10602_s3 + $0x2a8] sm:$0xff] }
  0x2f   :  { %380 = vmatpush.msrb.mxu3 %v304_v1  ;;  %338 = vmatpush.msrb.mxu1 %v307_v3  ;;  %v285_v1 = vunpack.c.l.bf16 %v5239_v49  ;;  %v283_v3 = vunpack.c.l.bf16 %v5238_v55  ;;  %v551_v49 = vunpack.c.h.bf16 %v7418_v43  ;;  %v7456_v55 = vld [vmem:[%s10602_s3 + $0x220] sm:$0xff] }
  0x30   :  { %361 = vmatpush.msrb.mxu2 %v270_v6  ;;  %319 = vmatpush.msrb.mxu0 %v273_v8  ;;  %v7327_v6 = vld [vmem:[%s10602_s3 + $0x270] sm:$0xff] }
  0x31   :  { %381 = vmatpush.msrb.mxu3 %v302_v7  ;;  %339 = vmatpush.msrb.mxu1 %v305_v9  ;;  %v567_v9 = vunpack.c.h.bf16 %v7317_v4  ;;  %v565_v16 = vunpack.c.h.bf16 %v7327_v6 }
  0x32   :  { %362 = vmatpush.msrb.mxu2 %v268_v12  ;;  %320 = vmatpush.msrb.mxu0 %v271_v14  ;;  %v7338_v12 = vld [vmem:[%s10602_s3 + $0x268] sm:$0xff] }
  0x33   :  { %382 = vmatpush.msrb.mxu3 %v300_v13  ;;  %340 = vmatpush.msrb.mxu1 %v303_v15  ;;  %v599_v15 = vunpack.c.h.bf16 %v7322_v5  ;;  %v563_v22 = vunpack.c.h.bf16 %v7338_v12 }
  0x34   :  { %363 = vmatpush.msrb.mxu2 %v266_v18  ;;  %321 = vmatpush.msrb.mxu0 %v269_v20  ;;  %v7353_v20 = vld [vmem:[%s10602_s3 + $0x260] sm:$0xff] }
  0x35   :  { %383 = vmatpush.msrb.mxu3 %v298_v19  ;;  %341 = vmatpush.msrb.mxu1 %v301_v21  ;;  %v7348_v19 = vld [vmem:[%s10602_s3 + $0x2e8] sm:$0xff]  ;;  %v597_v21 = vunpack.c.h.bf16 %v7333_v11 }
  0x36   :  { %364 = vmatpush.msrb.mxu2 %v264_v24  ;;  %322 = vmatpush.msrb.mxu0 %v267_v26  ;;  %v7365_v24 = vld [vmem:[%s10602_s3 + $0x258] sm:$0xff]  ;;  %v561_v26 = vunpack.c.h.bf16 %v7353_v20 }
  0x37   :  { %384 = vmatpush.msrb.mxu3 %v296_v25  ;;  %342 = vmatpush.msrb.mxu1 %v299_v27  ;;  %v595_v25 = vunpack.c.h.bf16 %v7348_v19  ;;  %v7373_v27 = vld [vmem:[%s10602_s3 + $0x2d8] sm:$0xff] }
  0x38   :  { %365 = vmatpush.msrb.mxu2 %v262_v30  ;;  %323 = vmatpush.msrb.mxu0 %v265_v32  ;;  %v559_v30 = vunpack.c.h.bf16 %v7365_v24  ;;  %v7391_v32 = vld [vmem:[%s10602_s3 + $0x248] sm:$0xff] }
  0x39   :  { %385 = vmatpush.msrb.mxu3 %v294_v31  ;;  %343 = vmatpush.msrb.mxu1 %v297_v33  ;;  %v7386_v31 = vld [vmem:[%s10602_s3 + $0x2d0] sm:$0xff]  ;;  %v591_v33 = vunpack.c.h.bf16 %v7373_v27 }
  0x3a   :  { %366 = vmatpush.msrb.mxu2 %v260_v38  ;;  %324 = vmatpush.msrb.mxu0 %v263_v40  ;;  %v7401_v38 = vld [vmem:[%s10602_s3 + $0x2c8] sm:$0xff]  ;;  %v589_v40 = vunpack.c.h.bf16 %v7386_v31 }
  0x3b   :  { %386 = vmatpush.msrb.mxu3 %v292_v39  ;;  %344 = vmatpush.msrb.mxu1 %v295_v41  ;;  %v7406_v39 = vld [vmem:[%s10602_s3 + $0x240] sm:$0xff]  ;;  %v555_v41 = vunpack.c.h.bf16 %v7391_v32 }
  0x3c   :  { %367 = vmatpush.msrb.mxu2 %v258_v44  ;;  %325 = vmatpush.msrb.mxu0 %v261_v46  ;;  %v587_v44 = vunpack.c.h.bf16 %v7401_v38  ;;  %v7426_v46 = vld [vmem:[%s10602_s3 + $0x2b8] sm:$0xff] }
  0x3d   :  { %387 = vmatpush.msrb.mxu3 %v290_v45  ;;  %345 = vmatpush.msrb.mxu1 %v293_v47  ;;  %v553_v45 = vunpack.c.h.bf16 %v7406_v39  ;;  %v7431_v47 = vld [vmem:[%s10602_s3 + $0x230] sm:$0xff] }
  0x3e   :  { %368 = vmatpush.msrb.mxu2 %v256_v50  ;;  %326 = vmatpush.msrb.mxu0 %v259_v52  ;;  %v7439_v50 = vld [vmem:[%s10602_s3 + $0x2b0] sm:$0xff]  ;;  %v583_v52 = vunpack.c.h.bf16 %v7426_v46 }
  0x3f   :  { %388 = vmatpush.msrb.mxu3 %v288_v51  ;;  %346 = vmatpush.msrb.mxu1 %v291_v53  ;;  %v7444_v51 = vld [vmem:[%s10602_s3 + $0x228] sm:$0xff]  ;;  %v549_v53 = vunpack.c.h.bf16 %v7431_v47 }
  0x40   :  { %369 = vmatpush.msrb.mxu2 %v254_v56  ;;  %327 = vmatpush.msrb.mxu0 %v257_v58  ;;  %v581_v56 = vunpack.c.h.bf16 %v7439_v50  ;;  %v7463_v58 = vld [vmem:[%s10602_s3 + $0x2a0] sm:$0xff] }
  0x41   :  { %389 = vmatpush.msrb.mxu3 %v286_v57  ;;  %347 = vmatpush.msrb.mxu1 %v289_v59  ;;  %v547_v57 = vunpack.c.h.bf16 %v7444_v51  ;;  %v7468_v59 = vld [vmem:[%s10602_s3 + $0x218] sm:$0xff] }
  0x42   :  { %370 = vmatpush.msrb.mxu2 %v252_v60  ;;  %328 = vmatpush.msrb.mxu0 %v255_v62  ;;  %v579_v60 = vunpack.c.h.bf16 %v7451_v54  ;;  %v7475_v62 = vld [vmem:[%s10602_s3 + $0x298] sm:$0xff] }
  0x43   :  { %390 = vmatpush.msrb.mxu3 %v284_v61  ;;  %371 = vmatmul.f32.vlgmr.msrb.gmra.mxu2 %v7215_v34  ;;  %v545_v61 = vunpack.c.h.bf16 %v7456_v55 }
  0x44   :  { %391 = vmatmul.f32.vlgmr.msrb.gmra.mxu3 %v7220_v35  ;;  %348 = vmatpush.msrb.mxu1 %v287_v63  ;;  %v7480_v63 = vld [vmem:[%s10602_s3 + $0x210] sm:$0xff] }
  0x45   :  { %329 = vmatpush.msrb.mxu0 %v253_v0  ;;  %v577_v0 = vunpack.c.h.bf16 %v7463_v58 }
  0x46   :  { %349 = vmatpush.msrb.mxu1 %v285_v1  ;;  %v543_v1 = vunpack.c.h.bf16 %v7468_v59 }
  0x47   :  { %330 = vmatpush.msrb.mxu0 %v251_v2  ;;  %v7487_v2 = vld [vmem:[%s10602_s3 + $0x290] sm:$0xff] }
  0x48   :  { %350 = vmatpush.msrb.mxu1 %v283_v3  ;;  %331 = vmatmul.f32.vlgmr.msrb.gmra.mxu0 %v7215_v34  ;;  %v7492_v3 = vld [vmem:[%s10602_s3 + $0x208] sm:$0xff] }
  0x49   :  { %351 = vmatmul.f32.vlgmr.msrb.gmra.mxu1 %v7220_v35 }
  0xa3   :  { %v153_v7 = vpop.f32.mrf.mxu0 }
  0xa4   :  { %v173_v8 = vpop.f32.mrf.mxu1 }
  0xa5   :  { %v174_v10 = vadd.f32 %v173_v8, %v153_v7  ;;  %v575_v7 = vunpack.c.h.bf16 %v7475_v62  ;;  %v541_v8 = vunpack.c.h.bf16 %v7480_v63 }
  0xa6   :  { %v193_v13 = vpop.f32.mrf.mxu2 }
  0xa7   :  { %v213_v14 = vpop.f32.mrf.mxu3  ;;  %472 = vmatpush.msra.mxu2 %v174_v10  ;;  %v7504_v10 = vld [vmem:[%s10602_s3 + $0x200] sm:$0xff] }
  0xa8   :  { %v214_v18 = vadd.f32 %v213_v14, %v193_v13  ;;  %5260 = vmatmul.msk.f32.vlgmr.msra.gmra.mxu2 %vm398_vm0, %v216_v17  ;;  %v573_v13 = vunpack.c.h.bf16 %v7487_v2  ;;  %v539_v14 = vunpack.c.h.bf16 %v7492_v3 }
  0xa9   :  { %640 = vmatpush.msrb.mxu2 %v567_v9  ;;  %v7499_v9 = vld [vmem:[%s10602_s3 + $0x288] sm:$0xff] }
  0xaa   :  { %495 = vmatpush.msra.mxu3 %v214_v18  ;;  %v537_v18 = vunpack.c.h.bf16 %v7504_v10 }
  0xab   :  { %641 = vmatpush.msrb.mxu2 %v565_v16  ;;  %5262 = vmatmul.msk.f32.vlgmr.msra.gmra.mxu3 %vm398_vm0, %v216_v17  ;;  %v7516_v16 = vld [vmem:[%s10602_s3 + $0x378] sm:$0xff]  ;;  %v571_v17 = vunpack.c.h.bf16 %v7499_v9 }
  0xac   :  { %660 = vmatpush.msrb.mxu3 %v599_v15  ;;  %v7511_v15 = vld [vmem:[%s10602_s3 + $0x280] sm:$0xff] }
  0xad   :  { %642 = vmatpush.msrb.mxu2 %v563_v22  ;;  %v802_v22 = vunpack.c.l.bf16 %v7516_v16 }
  0xae   :  { %661 = vmatpush.msrb.mxu3 %v597_v21  ;;  %v569_v21 = vunpack.c.h.bf16 %v7511_v15 }
  0xaf   :  { %643 = vmatpush.msrb.mxu2 %v561_v26  ;;  %v7530_v26 = vld [vmem:[%s10602_s3 + $0x370] sm:$0xff] }
  0xb0   :  { %662 = vmatpush.msrb.mxu3 %v595_v25  ;;  %5261 = vmatmul.msk.f32.gmra.mxu2 %vm398_vm0, %v217_v37  ;;  %v7525_v25 = vld [vmem:[%s10602_s3 + $0x3f8] sm:$0xff] }
  0xb1   :  { %644 = vmatpush.msrb.mxu2 %v559_v30 }
  0xb2   :  { %663 = vmatpush.msrb.mxu3 %v593_v29 }
  0xb3   :  { %645 = vmatpush.msrb.mxu2 %v557_v36  ;;  %5263 = vmatmul.msk.f32.gmra.mxu3 %vm398_vm0, %v217_v37  ;;  %v7536_v36 = vld [vmem:[%s10602_s3 + $0x3f0] sm:$0xff] }
  0xb4   :  { %664 = vmatpush.msrb.mxu3 %v591_v33  ;;  %v566_v33 = vunpack.c.l.bf16 %v7317_v4 }
  0xb5   :  { %646 = vmatpush.msrb.mxu2 %v555_v41 }
  0xb6   :  { %665 = vmatpush.msrb.mxu3 %v589_v40 }
  0xb7   :  { %647 = vmatpush.msrb.mxu2 %v553_v45  ;;  %v834_v45 = vunpack.c.l.bf16 %v7525_v25 }
  0xb8   :  { %666 = vmatpush.msrb.mxu3 %v587_v44  ;;  %v598_v44 = vunpack.c.l.bf16 %v7322_v5  ;;  %v7551_v5 = vld [vmem:[%s10602_s3 + $0x3e8] sm:$0xff] }
  0xb9   :  { %648 = vmatpush.msrb.mxu2 %v551_v49  ;;  %v564_v49 = vunpack.c.l.bf16 %v7327_v6  ;;  %v562_v6 = vunpack.c.l.bf16 %v7338_v12  ;;  %v560_v12 = vunpack.c.l.bf16 %v7353_v20  ;;  %v558_v20 = vunpack.c.l.bf16 %v7365_v24 }
  0xba   :  { %667 = vmatpush.msrb.mxu3 %v585_v48  ;;  %v7544_v48 = vld [vmem:[%s10602_s3 + $0x368] sm:$0xff]  ;;  %v556_v24 = vunpack.c.l.bf16 %v7378_v28  ;;  %v554_v28 = vunpack.c.l.bf16 %v7391_v32  ;;  %v584_v32 = vunpack.c.l.bf16 %v7413_v42  ;;  %v550_v42 = vunpack.c.l.bf16 %v7418_v43 }
  0xbb   :  { %649 = vmatpush.msrb.mxu2 %v549_v53  ;;  %v596_v53 = vunpack.c.l.bf16 %v7333_v11  ;;  %v594_v11 = vunpack.c.l.bf16 %v7348_v19  ;;  %v592_v19 = vunpack.c.l.bf16 %v7360_v23  ;;  %v590_v23 = vunpack.c.l.bf16 %v7373_v27 }
  0xbc   :  { %668 = vmatpush.msrb.mxu3 %v583_v52  ;;  %v800_v52 = vunpack.c.l.bf16 %v7530_v26  ;;  %v588_v27 = vunpack.c.l.bf16 %v7386_v31  ;;  %v586_v31 = vunpack.c.l.bf16 %v7401_v38  ;;  %v7638_v38 = vld [vmem:[%s10602_s3 + $0x3b8] sm:$0xff]  ;;  %v548_v43 = vunpack.c.l.bf16 %v7431_v47 }
  0xbd   :  { %650 = vmatpush.msrb.mxu2 %v547_v57  ;;  %v7559_v57 = vld [vmem:[%s10602_s3 + $0x360] sm:$0xff] }
  0xbe   :  { %669 = vmatpush.msrb.mxu3 %v581_v56  ;;  %v832_v56 = vunpack.c.l.bf16 %v7536_v36 }
  0xbf   :  { %651 = vmatpush.msrb.mxu2 %v545_v61  ;;  %v7566_v61 = vld [vmem:[%s10602_s3 + $0x3e0] sm:$0xff] }
  0xc0   :  { %670 = vmatpush.msrb.mxu3 %v579_v60  ;;  %v798_v60 = vunpack.c.l.bf16 %v7544_v48 }
  0xc1   :  { %652 = vmatpush.msrb.mxu2 %v543_v1  ;;  %v7573_v1 = vld [vmem:[%s10602_s3 + $0x358] sm:$0xff] }
  0xc2   :  { %671 = vmatpush.msrb.mxu3 %v577_v0  ;;  %v830_v0 = vunpack.c.l.bf16 %v7551_v5 }
  0xc3   :  { %653 = vmatpush.msrb.mxu2 %v541_v8  ;;  %v7580_v8 = vld [vmem:[%s10602_s3 + $0x3d8] sm:$0xff] }
  0xc4   :  { %672 = vmatpush.msrb.mxu3 %v575_v7  ;;  %v796_v7 = vunpack.c.l.bf16 %v7559_v57 }
  0xc5   :  { %654 = vmatpush.msrb.mxu2 %v539_v14  ;;  %v332_v29 = vpop.f32.mrf.mxu0  ;;  %v7587_v14 = vld [vmem:[%s10602_s3 + $0x350] sm:$0xff] }
  0xc6   :  { %673 = vmatpush.msrb.mxu3 %v573_v13  ;;  %v352_v30 = vpop.f32.mrf.mxu1  ;;  %v372_v40 = vpop.f32.mrf.mxu2  ;;  %v828_v13 = vunpack.c.l.bf16 %v7566_v61 }
  0xc7   :  { %655 = vmatpush.msrb.mxu2 %v537_v18  ;;  %v353_v37 = vadd.f32 %v352_v30, %v332_v29  ;;  %v392_v41 = vpop.f32.mrf.mxu3  ;;  %v7594_v18 = vld [vmem:[%s10602_s3 + $0x3d0] sm:$0xff]  ;;  %v792_v29 = vunpack.c.l.bf16 %v7587_v14  ;;  %v7608_v30 = vld [vmem:[%s10602_s3 + $0x3c8] sm:$0xff] }
  0xc8   :  { %674 = vmatpush.msrb.mxu3 %v571_v17  ;;  %656 = vmatmul.f32.vlgmr.msrb.gmra.mxu2 %v7215_v34  ;;  %v393_v4 = vadd.f32 %v392_v41, %v372_v40  ;;  %v794_v17 = vunpack.c.l.bf16 %v7573_v1  ;;  %v7622_v41 = vld [vmem:[%s10602_s3 + $0x3c0] sm:$0xff] }
  0xc9   :  { %836 = vmatpush.msra.mxu2 %v802_v22  ;;  %420 = vmatpush.msra.mxu0 %v353_v37  ;;  %v7601_v22 = vld [vmem:[%s10602_s3 + $0x348] sm:$0xff]  ;;  %v7615_v37 = vld [vmem:[%s10602_s3 + $0x340] sm:$0xff] }
  0xca   :  { %675 = vmatpush.msrb.mxu3 %v569_v21  ;;  %443 = vmatpush.msra.mxu1 %v393_v4  ;;  %v826_v21 = vunpack.c.l.bf16 %v7580_v8  ;;  %v790_v40 = vunpack.c.l.bf16 %v7601_v22  ;;  %v788_v4 = vunpack.c.l.bf16 %v7615_v37 }
  0xcb   :  { %676 = vmatmul.f32.vlgmr.msrb.gmra.mxu3 %v7220_v35  ;;  %600 = vmatpush.msrb.mxu0 %v566_v33  ;;  %v824_v33 = vunpack.c.l.bf16 %v7594_v18 }
  0xcc   :  { %620 = vmatpush.msrb.mxu1 %v598_v44  ;;  %856 = vmatpush.msra.mxu3 %v834_v45  ;;  %v822_v44 = vunpack.c.l.bf16 %v7608_v30  ;;  %v552_v45 = vunpack.c.l.bf16 %v7406_v39  ;;  %v5254_v39 = vld [vmem:[%s10604_s1 + $0x10] sm:$0xff] }
  0xcd   :  { %601 = vmatpush.msrb.mxu0 %v564_v49  ;;  %837 = vmatpush.msra.mxu2 %v800_v52  ;;  %v820_v49 = vunpack.c.l.bf16 %v7622_v41  ;;  %v7633_v52 = vld [vmem:[%s10602_s3 + $0x338] sm:$0xff] }
  0xce   :  { %621 = vmatpush.msrb.mxu1 %v596_v53  ;;  %857 = vmatpush.msra.mxu3 %v832_v56  ;;  %v582_v53 = vunpack.c.l.bf16 %v7426_v46  ;;  %v7648_v56 = vld [vmem:[%s10602_s3 + $0x330] sm:$0xff]  ;;  %v580_v46 = vunpack.c.l.bf16 %v7439_v50  ;;  %v546_v50 = vunpack.c.l.bf16 %v7444_v51  ;;  %v544_v51 = vunpack.c.l.bf16 %v7456_v55  ;;  %v5255_v55 = vld [vmem:[%s10604_s1 + $0x18] sm:$0xff] }
  0xcf   :  { %602 = vmatpush.msrb.mxu0 %v562_v6  ;;  %838 = vmatpush.msra.mxu2 %v798_v60  ;;  %v7653_v6 = vld [vmem:[%s10602_s3 + $0x3b0] sm:$0xff]  ;;  %v786_v60 = vunpack.c.l.bf16 %v7633_v52 }
  0xd0   :  { %622 = vmatpush.msrb.mxu1 %v594_v11  ;;  %858 = vmatpush.msra.mxu3 %v830_v0  ;;  %v818_v11 = vunpack.c.l.bf16 %v7638_v38  ;;  %v7662_v0 = vld [vmem:[%s10602_s3 + $0x328] sm:$0xff]  ;;  %v816_v47 = vunpack.c.l.bf16 %v7653_v6 }
  0xd1   :  { %603 = vmatpush.msrb.mxu0 %v560_v12  ;;  %839 = vmatpush.msra.mxu2 %v796_v7  ;;  %v7667_v12 = vld [vmem:[%s10602_s3 + $0x3a8] sm:$0xff]  ;;  %v784_v7 = vunpack.c.l.bf16 %v7648_v56 }
  0xd2   :  { %623 = vmatpush.msrb.mxu1 %v592_v19  ;;  %859 = vmatpush.msra.mxu3 %v828_v13  ;;  %v578_v19 = vunpack.c.l.bf16 %v7451_v54  ;;  %v7678_v13 = vld [vmem:[%s10602_s3 + $0x320] sm:$0xff]  ;;  %v576_v54 = vunpack.c.l.bf16 %v7463_v58  ;;  %v542_v58 = vunpack.c.l.bf16 %v7468_v59  ;;  %v540_v59 = vunpack.c.l.bf16 %v7480_v63 }
  0xd3   :  { %604 = vmatpush.msrb.mxu0 %v558_v20  ;;  %840 = vmatpush.msra.mxu2 %v794_v17  ;;  %v7683_v20 = vld [vmem:[%s10602_s3 + $0x3a0] sm:$0xff]  ;;  %v782_v17 = vunpack.c.l.bf16 %v7662_v0 }
  0xd4   :  { %624 = vmatpush.msrb.mxu1 %v590_v23  ;;  %860 = vmatpush.msra.mxu3 %v826_v21  ;;  %v814_v23 = vunpack.c.l.bf16 %v7667_v12  ;;  %v780_v21 = vunpack.c.l.bf16 %v7678_v13 }
  0xd5   :  { %605 = vmatpush.msrb.mxu0 %v556_v24  ;;  %841 = vmatpush.msra.mxu2 %v792_v29  ;;  %v812_v24 = vunpack.c.l.bf16 %v7683_v20  ;;  %v7694_v29 = vld [vmem:[%s10602_s3 + $0x318] sm:$0xff] }
  0xd6   :  { %625 = vmatpush.msrb.mxu1 %v588_v27  ;;  %861 = vmatpush.msra.mxu3 %v824_v33  ;;  %v7699_v27 = vld [vmem:[%s10602_s3 + $0x398] sm:$0xff]  ;;  %v574_v33 = vunpack.c.l.bf16 %v7475_v62  ;;  %v572_v62 = vunpack.c.l.bf16 %v7487_v2  ;;  %v538_v2 = vunpack.c.l.bf16 %v7492_v3  ;;  %v536_v3 = vunpack.c.l.bf16 %v7504_v10 }
  0xd7   :  { %606 = vmatpush.msrb.mxu0 %v554_v28  ;;  %842 = vmatpush.msra.mxu2 %v790_v40  ;;  %v7709_v28 = vld [vmem:[%s10602_s3 + $0x310] sm:$0xff] }
  0xd8   :  { %626 = vmatpush.msrb.mxu1 %v586_v31  ;;  %862 = vmatpush.msra.mxu3 %v822_v44  ;;  %v7714_v40 = vld [vmem:[%s10602_s3 + $0x390] sm:$0xff]  ;;  %v778_v31 = vunpack.c.l.bf16 %v7694_v29  ;;  %v810_v44 = vunpack.c.l.bf16 %v7699_v27 }
  0xd9   :  { %607 = vmatpush.msrb.mxu0 %v552_v45  ;;  %843 = vmatpush.msra.mxu2 %v788_v4  ;;  %v7723_v45 = vld [vmem:[%s10602_s3 + $0x308] sm:$0xff]  ;;  %v808_v63 = vunpack.c.l.bf16 %v7714_v40 }
  0xda   :  { %627 = vmatpush.msrb.mxu1 %v584_v32  ;;  %863 = vmatpush.msra.mxu3 %v820_v49  ;;  %v7728_v4 = vld [vmem:[%s10602_s3 + $0x388] sm:$0xff]  ;;  %v776_v32 = vunpack.c.l.bf16 %v7709_v28  ;;  %v570_v49 = vunpack.c.l.bf16 %v7499_v9  ;;  %v568_v9 = vunpack.c.l.bf16 %v7511_v15 }
  0xdb   :  { %5256 = vmatmul.msk.f32.vlgmr.msra.gmra.mxu0 %vm398_vm0, %v5254_v39  ;;  %5258 = vmatmul.msk.f32.vlgmr.msra.gmra.mxu1 %vm398_vm0, %v5254_v39  ;;  %v7739_v39 = vld [vmem:[%s10602_s3 + $0x300] sm:$0xff] }
  0xdc   :  { %608 = vmatpush.msrb.mxu0 %v550_v42  ;;  %628 = vmatpush.msrb.mxu1 %v582_v53  ;;  %v7744_v42 = vld [vmem:[%s10602_s3 + $0x380] sm:$0xff]  ;;  %v774_v53 = vunpack.c.l.bf16 %v7723_v45 }
  0xdd   :  { %844 = vmatpush.msra.mxu2 %v786_v60  ;;  %864 = vmatpush.msra.mxu3 %v818_v11  ;;  %v806_v60 = vunpack.c.l.bf16 %v7728_v4  ;;  %v772_v11 = vunpack.c.l.bf16 %v7739_v39 }
  0xde   :  { %609 = vmatpush.msrb.mxu0 %v548_v43  ;;  %629 = vmatpush.msrb.mxu1 %v580_v46  ;;  %v804_v43 = vunpack.c.l.bf16 %v7744_v42 }
  0xdf   :  { %845 = vmatpush.msra.mxu2 %v784_v7  ;;  %865 = vmatpush.msra.mxu3 %v816_v47 }
  0xe0   :  { %610 = vmatpush.msrb.mxu0 %v546_v50  ;;  %630 = vmatpush.msrb.mxu1 %v578_v19 }
  0xe1   :  { %846 = vmatpush.msra.mxu2 %v782_v17  ;;  %866 = vmatpush.msra.mxu3 %v814_v23  ;;  %v5296_v17 = vld [vmem:[%s10604_s1 + $0x20] sm:$0xff]  ;;  %v835_v23 = vunpack.c.h.bf16 %v7525_v25 }
  0xe2   :  { %611 = vmatpush.msrb.mxu0 %v544_v51  ;;  %631 = vmatpush.msrb.mxu1 %v576_v54  ;;  %v829_v51 = vunpack.c.h.bf16 %v7566_v61  ;;  %v7775_v54 = vld [vmem:[%s10604_s1 + $0x28] sm:$0xff]  ;;  %v821_v61 = vunpack.c.h.bf16 %v7622_v41  ;;  %v809_v41 = vunpack.c.h.bf16 %v7714_v40 }
  0xe3   :  { %847 = vmatpush.msra.mxu2 %v780_v21  ;;  %867 = vmatpush.msra.mxu3 %v812_v24  ;;  %v827_v21 = vunpack.c.h.bf16 %v7580_v8  ;;  %v817_v8 = vunpack.c.h.bf16 %v7653_v6  ;;  %v807_v6 = vunpack.c.h.bf16 %v7728_v4  ;;  %v799_v4 = vunpack.c.h.bf16 %v7544_v48 }
  0xe4   :  { %5257 = vmatmul.msk.f32.gmra.mxu0 %vm398_vm0, %v5255_v55  ;;  %5259 = vmatmul.msk.f32.gmra.mxu1 %vm398_vm0, %v5255_v55  ;;  %v819_v55 = vunpack.c.h.bf16 %v7638_v38 }
  0xe5   :  { %612 = vmatpush.msrb.mxu0 %v542_v58  ;;  %632 = vmatpush.msrb.mxu1 %v574_v33 }
  0xe6   :  { %848 = vmatpush.msra.mxu2 %v778_v31  ;;  %868 = vmatpush.msra.mxu3 %v810_v44  ;;  %v813_v31 = vunpack.c.h.bf16 %v7683_v20  ;;  %v7803_v20 = vld [vmem:[%s10602_s3 + $0x4f8] sm:$0xff] }
  0xe7   :  { %613 = vmatpush.msrb.mxu0 %v540_v59  ;;  %633 = vmatpush.msrb.mxu1 %v572_v62  ;;  %v803_v62 = vunpack.c.h.bf16 %v7516_v16  ;;  %v1070_v40 = vunpack.c.l.bf16 %v7803_v20  ;;  %v7811_v16 = vld [vmem:[%s10602_s3 + $0x4f0] sm:$0xff] }
  0xe8   :  { %849 = vmatpush.msra.mxu2 %v776_v32  ;;  %869 = vmatpush.msra.mxu3 %v808_v63  ;;  %v1068_v32 = vunpack.c.l.bf16 %v7811_v16 }
  0xe9   :  { %614 = vmatpush.msrb.mxu0 %v538_v2  ;;  %634 = vmatpush.msrb.mxu1 %v570_v49  ;;  %v797_v49 = vunpack.c.h.bf16 %v7559_v57  ;;  %v7836_v57 = vld [vmem:[%s10602_s3 + $0x4e0] sm:$0xff] }
  0xea   :  { %850 = vmatpush.msra.mxu2 %v774_v53  ;;  %870 = vmatpush.msra.mxu3 %v806_v60  ;;  %v7830_v53 = vld [vmem:[%s10604_s1 + $0x30] sm:$0xff] }
  0xeb   :  { %615 = vmatpush.msrb.mxu0 %v536_v3  ;;  %635 = vmatpush.msrb.mxu1 %v568_v9  ;;  %v795_v3 = vunpack.c.h.bf16 %v7573_v1  ;;  %v1064_v9 = vunpack.c.l.bf16 %v7836_v57 }
  0xec   :  { %851 = vmatpush.msra.mxu2 %v772_v11  ;;  %871 = vmatpush.msra.mxu3 %v804_v43  ;;  %v7843_v11 = vld [vmem:[%s10602_s3 + $0x4d8] sm:$0xff]  ;;  %v793_v43 = vunpack.c.h.bf16 %v7587_v14  ;;  %v7861_v14 = vld [vmem:[%s10602_s3 + $0x4c8] sm:$0xff] }
  0xed   :  { %616 = vmatmul.f32.vlgmr.msrb.gmra.mxu0 %v7215_v34  ;;  %636 = vmatmul.f32.vlgmr.msrb.gmra.mxu1 %v7220_v35  ;;  %v1062_v1 = vunpack.c.l.bf16 %v7843_v11 }
  0xee   :  { %852 = vmatmul.f32.vlgmr.msra.gmra.mxu2 %v7215_v34  ;;  %872 = vmatmul.f32.vlgmr.msra.gmra.mxu3 %v7220_v35  ;;  %v833_v34 = vunpack.c.h.bf16 %v7536_v36  ;;  %v831_v35 = vunpack.c.h.bf16 %v7551_v5  ;;  %v825_v36 = vunpack.c.h.bf16 %v7594_v18  ;;  %v823_v5 = vunpack.c.h.bf16 %v7608_v30 }
  0xef   :  { %v815_v18 = vunpack.c.h.bf16 %v7667_v12  ;;  %v811_v30 = vunpack.c.h.bf16 %v7699_v27  ;;  %v805_v12 = vunpack.c.h.bf16 %v7744_v42  ;;  %v801_v27 = vunpack.c.h.bf16 %v7530_v26  ;;  %v7818_v26 = vld [vmem:[%s10602_s3 + $0x4e8] sm:$0xff] }
  0xf0   :  { %v7824_v42 = vld [vmem:[%s10603_s0 + $0x8] sm:$0xff]  ;;  %v1066_v60 = vunpack.c.l.bf16 %v7818_v26 }
 0x12b   :  { %v7756_v10 = vpop.f32.mrf.mxu2 }
 0x12e   :  { %v7758_v15 = vpop.f32.mrf.mxu3 }
 0x133   :  { %v7760_v46 = vpop.f32.mrf.mxu2 }
 0x136   :  { %v7762_v7 = vpop.f32.mrf.mxu3 }
 0x14b   :  { %v657_v47 = vpop.f32.mrf.mxu2 }
 0x14e   :  { %v677_v50 = vpop.f32.mrf.mxu3 }
 0x14f   :  { %v678_v19 = vadd.f32 %v677_v50, %v657_v47  ;;  %v7854_v47 = vld [vmem:[%s10602_s3 + $0x4d0] sm:$0xff]  ;;  %v791_v50 = vunpack.c.h.bf16 %v7601_v22  ;;  %v7873_v22 = vld [vmem:[%s10602_s3 + $0x4c0] sm:$0xff] }
 0x151   :  { %727 = vmatpush.msra.mxu1 %v678_v19  ;;  %v1060_v19 = vunpack.c.l.bf16 %v7854_v47 }
 0x152   :  { %5300 = vmatmul.msk.f32.vlgmr.msra.gmra.mxu1 %vm398_vm0, %v5296_v17 }
 0x153   :  { %896 = vmatpush.msrb.mxu1 %v835_v23  ;;  %v7867_v23 = vld [vmem:[%s10604_s1 + $0x38] sm:$0xff] }
 0x155   :  { %897 = vmatpush.msrb.mxu1 %v833_v34  ;;  %v1058_v34 = vunpack.c.l.bf16 %v7861_v14 }
 0x157   :  { %898 = vmatpush.msrb.mxu1 %v831_v35  ;;  %v787_v35 = vunpack.c.h.bf16 %v7633_v52  ;;  %v7889_v52 = vld [vmem:[%s10602_s3 + $0x4b0] sm:$0xff] }
 0x158   :  { %v7778_v25 = vpop.f32.mrf.mxu0  ;;  %v7780_v24 = vpop.f32.mrf.mxu1 }
 0x159   :  { %899 = vmatpush.msrb.mxu1 %v829_v51  ;;  %v1056_v51 = vunpack.c.l.bf16 %v7873_v22 }
 0x15a   :  { %5301 = vmatmul.msk.f32.gmra.mxu1 %vm398_vm0, %v7775_v54 }
 0x15b   :  { %900 = vmatpush.msrb.mxu1 %v827_v21 }
 0x15d   :  { %901 = vmatpush.msrb.mxu1 %v825_v36  ;;  %v783_v36 = vunpack.c.h.bf16 %v7662_v0  ;;  %v779_v0 = vunpack.c.h.bf16 %v7694_v29  ;;  %v775_v29 = vunpack.c.h.bf16 %v7723_v45  ;;  %v7935_v45 = vld [vmem:[%s10602_s3 + $0x470] sm:$0xff] }
 0x15f   :  { %902 = vmatpush.msrb.mxu1 %v823_v5  ;;  %v1052_v5 = vunpack.c.l.bf16 %v7889_v52 }
 0x161   :  { %903 = vmatpush.msrb.mxu1 %v821_v61  ;;  %v7789_v58 = vpop.f32.mrf.mxu0  ;;  %v7791_v33 = vpop.f32.mrf.mxu1  ;;  %v7896_v61 = vld [vmem:[%s10602_s3 + $0x4a8] sm:$0xff] }
 0x163   :  { %904 = vmatpush.msrb.mxu1 %v819_v55  ;;  %v1050_v55 = vunpack.c.l.bf16 %v7896_v61 }
 0x165   :  { %905 = vmatpush.msrb.mxu1 %v817_v8  ;;  %v7903_v8 = vld [vmem:[%s10602_s3 + $0x4a0] sm:$0xff] }
 0x167   :  { %906 = vmatpush.msrb.mxu1 %v815_v18  ;;  %v1048_v18 = vunpack.c.l.bf16 %v7903_v8 }
 0x169   :  { %907 = vmatpush.msrb.mxu1 %v813_v31  ;;  %v7910_v31 = vld [vmem:[%s10602_s3 + $0x498] sm:$0xff] }
 0x16a   :  { %v617_v38 = vpop.f32.mrf.mxu0  ;;  %v637_v44 = vpop.f32.mrf.mxu1 }
 0x16b   :  { %908 = vmatpush.msrb.mxu1 %v811_v30  ;;  %v638_v59 = vadd.f32 %v637_v44, %v617_v38  ;;  %v1046_v30 = vunpack.c.l.bf16 %v7910_v31  ;;  %v7923_v38 = vld [vmem:[%s10602_s3 + $0x478] sm:$0xff] }
 0x16d   :  { %909 = vmatpush.msrb.mxu1 %v809_v41  ;;  %704 = vmatpush.msra.mxu0 %v638_v59  ;;  %v7917_v41 = vld [vmem:[%s10602_s3 + $0x490] sm:$0xff] }
 0x16e   :  { %5298 = vmatmul.msk.f32.vlgmr.msra.gmra.mxu0 %vm398_vm0, %v5296_v17  ;;  %v789_v17 = vunpack.c.h.bf16 %v7615_v37  ;;  %v7880_v37 = vld [vmem:[%s10602_s3 + $0x4b8] sm:$0xff]  ;;  %v1044_v44 = vunpack.c.l.bf16 %v7917_v41 }
 0x16f   :  { %910 = vmatpush.msrb.mxu1 %v807_v6  ;;  %876 = vmatpush.msrb.mxu0 %v803_v62  ;;  %v1054_v21 = vunpack.c.l.bf16 %v7880_v37  ;;  %v773_v6 = vunpack.c.h.bf16 %v7739_v39  ;;  %v7941_v62 = vld [vmem:[%s10602_s3 + $0x480] sm:$0xff]  ;;  %v5353_v39 = vld [vmem:[%s10602_s3 + $0x468] sm:$0xff] }
 0x171   :  { %911 = vmatpush.msrb.mxu1 %v805_v12  ;;  %v853_v63 = vpop.f32.mrf.mxu2  ;;  %v873_v2 = vpop.f32.mrf.mxu3  ;;  %877 = vmatpush.msrb.mxu0 %v801_v27  ;;  %v1038_v12 = vunpack.c.l.bf16 %v7923_v38  ;;  %v1040_v27 = vunpack.c.l.bf16 %v7941_v62 }
 0x172   :  { %912 = vmatmul.f32.vlgmr.msrb.gmra.mxu1 %v7824_v42  ;;  %v874_v48 = vadd.f32 %v873_v2, %v853_v63  ;;  %v1034_v63 = vunpack.c.l.bf16 %v5353_v39  ;;  %v5351_v2 = vld [vmem:[%s10602_s3 + $0x458] sm:$0xff] }
 0x173   :  { %1092 = vmatpush.msra.mxu1 %v1070_v40  ;;  %878 = vmatpush.msrb.mxu0 %v799_v4  ;;  %v1036_v40 = vunpack.c.l.bf16 %v7935_v45  ;;  %v7952_v4 = vld [vmem:[%s10603_s0] sm:$0xff] }
 0x174   :  { %940 = vmatpush.msrb.mxu2 %v874_v48  ;;  %v5350_v48 = vld [vmem:[%s10602_s3 + $0x450] sm:$0xff] }
 0x175   :  { %1093 = vmatpush.msra.mxu1 %v1068_v32  ;;  %879 = vmatpush.msrb.mxu0 %v797_v49  ;;  %v5352_v32 = vld [vmem:[%s10602_s3 + $0x460] sm:$0xff] }
 0x176   :  { %5336 = vmatmul.msk.f32.vlgmr.msrb.gmra.mxu2 %vm398_vm0, %v7830_v53  ;;  %5299 = vmatmul.msk.f32.gmra.mxu0 %vm398_vm0, %v7775_v54  ;;  %v785_v54 = vunpack.c.h.bf16 %v7648_v56  ;;  %v781_v56 = vunpack.c.h.bf16 %v7678_v13  ;;  %v777_v13 = vunpack.c.h.bf16 %v7709_v28  ;;  %v7929_v28 = vld [vmem:[%s10602_s3 + $0x488] sm:$0xff]  ;;  %v1032_v49 = vunpack.c.l.bf16 %v5352_v32 }
 0x177   :  { %1094 = vmatpush.msra.mxu1 %v1066_v60  ;;  %880 = vmatpush.msrb.mxu0 %v795_v3  ;;  %v1042_v59 = vunpack.c.l.bf16 %v7929_v28  ;;  %v1030_v60 = vunpack.c.l.bf16 %v5351_v2  ;;  %v5349_v3 = vld [vmem:[%s10602_s3 + $0x448] sm:$0xff] }
 0x179   :  { %1095 = vmatpush.msra.mxu1 %v1064_v9  ;;  %881 = vmatpush.msrb.mxu0 %v793_v43  ;;  %v1028_v9 = vunpack.c.l.bf16 %v5350_v48  ;;  %v5348_v43 = vld [vmem:[%s10602_s3 + $0x440] sm:$0xff] }
 0x17b   :  { %1096 = vmatpush.msra.mxu1 %v1062_v1  ;;  %882 = vmatpush.msrb.mxu0 %v791_v50  ;;  %v1026_v1 = vunpack.c.l.bf16 %v5349_v3  ;;  %v5347_v50 = vld [vmem:[%s10602_s3 + $0x438] sm:$0xff] }
 0x17d   :  { %1097 = vmatpush.msra.mxu1 %v1060_v19  ;;  %883 = vmatpush.msrb.mxu0 %v789_v17  ;;  %v1024_v19 = vunpack.c.l.bf16 %v5348_v43  ;;  %v5346_v17 = vld [vmem:[%s10602_s3 + $0x430] sm:$0xff] }
 0x17e   :  { %5337 = vmatmul.msk.f32.gmra.mxu2 %vm398_vm0, %v7867_v23 }
 0x17f   :  { %1098 = vmatpush.msra.mxu1 %v1058_v34  ;;  %884 = vmatpush.msrb.mxu0 %v787_v35  ;;  %v1022_v34 = vunpack.c.l.bf16 %v5347_v50  ;;  %v5345_v35 = vld [vmem:[%s10602_s3 + $0x428] sm:$0xff] }
 0x181   :  { %1099 = vmatpush.msra.mxu1 %v1056_v51  ;;  %885 = vmatpush.msrb.mxu0 %v785_v54  ;;  %v1020_v51 = vunpack.c.l.bf16 %v5346_v17  ;;  %v5344_v54 = vld [vmem:[%s10602_s3 + $0x420] sm:$0xff] }
 0x183   :  { %1100 = vmatpush.msra.mxu1 %v1054_v21  ;;  %886 = vmatpush.msrb.mxu0 %v783_v36  ;;  %v1018_v21 = vunpack.c.l.bf16 %v5345_v35  ;;  %v5343_v36 = vld [vmem:[%s10602_s3 + $0x418] sm:$0xff] }
 0x185   :  { %1101 = vmatpush.msra.mxu1 %v1052_v5  ;;  %887 = vmatpush.msrb.mxu0 %v781_v56  ;;  %v1016_v5 = vunpack.c.l.bf16 %v5344_v54  ;;  %v5342_v56 = vld [vmem:[%s10602_s3 + $0x410] sm:$0xff] }
 0x187   :  { %1102 = vmatpush.msra.mxu1 %v1050_v55  ;;  %888 = vmatpush.msrb.mxu0 %v779_v0  ;;  %v1014_v55 = vunpack.c.l.bf16 %v5343_v36  ;;  %v5341_v0 = vld [vmem:[%s10602_s3 + $0x408] sm:$0xff] }
 0x189   :  { %1103 = vmatpush.msra.mxu1 %v1048_v18  ;;  %889 = vmatpush.msrb.mxu0 %v777_v13  ;;  %v1012_v18 = vunpack.c.l.bf16 %v5342_v56  ;;  %v5340_v13 = vld [vmem:[%s10602_s3 + $0x400] sm:$0xff] }
 0x18b   :  { %1104 = vmatpush.msra.mxu1 %v1046_v30  ;;  %890 = vmatpush.msrb.mxu0 %v775_v29  ;;  %v1010_v30 = vunpack.c.l.bf16 %v5341_v0  ;;  %v1008_v29 = vunpack.c.l.bf16 %v5340_v13 }
 0x18d   :  { %1105 = vmatpush.msra.mxu1 %v1044_v44  ;;  %891 = vmatpush.msrb.mxu0 %v773_v6  ;;  %v1039_v44 = vunpack.c.h.bf16 %v7923_v38  ;;  %v1037_v6 = vunpack.c.h.bf16 %v7935_v45  ;;  %v1023_v38 = vunpack.c.h.bf16 %v5347_v50  ;;  %v1021_v45 = vunpack.c.h.bf16 %v5346_v17 }
 0x18e   :  { %892 = vmatmul.f32.vlgmr.msrb.gmra.mxu0 %v7952_v4  ;;  %v1071_v50 = vunpack.c.h.bf16 %v7803_v20  ;;  %v1009_v17 = vunpack.c.h.bf16 %v5340_v13  ;;  %v8020_v20 = vld [vmem:[%s10602_s3 + $0x570] sm:$0xff] }
 0x18f   :  { %1106 = vmatpush.msra.mxu1 %v1042_v59  ;;  %1072 = vmatpush.msra.mxu0 %v1038_v12  ;;  %v1035_v59 = vunpack.c.h.bf16 %v5353_v39  ;;  %v1033_v12 = vunpack.c.h.bf16 %v5352_v32  ;;  %v1019_v39 = vunpack.c.h.bf16 %v5345_v35  ;;  %v8010_v35 = vld [vmem:[%s10602_s3 + $0x578] sm:$0xff] }
 0x190   :  { %1112 = vmatpush.msra.mxu2 %v1039_v44  ;;  %v1057_v44 = vunpack.c.h.bf16 %v7873_v22  ;;  %v1053_v22 = vunpack.c.h.bf16 %v7889_v52  ;;  %v1049_v52 = vunpack.c.h.bf16 %v7903_v8  ;;  %v1045_v8 = vunpack.c.h.bf16 %v7917_v41  ;;  %v8118_v41 = vld [vmem:[%s10602_s3 + $0x508] sm:$0xff] }
 0x191   :  { %1107 = vmatpush.msra.mxu1 %v1040_v27  ;;  %1073 = vmatpush.msra.mxu0 %v1036_v40  ;;  %v1031_v27 = vunpack.c.h.bf16 %v5351_v2  ;;  %v1017_v2 = vunpack.c.h.bf16 %v5344_v54  ;;  %v1274_v54 = vunpack.c.l.bf16 %v8010_v35 }
 0x192   :  { %1108 = vmatmul.f32.vlgmr.msra.gmra.mxu1 %v7824_v42  ;;  %1113 = vmatpush.msra.mxu2 %v1037_v6  ;;  %v8064_v6 = vld [vmem:[%s10602_s3 + $0x540] sm:$0xff] }
 0x193   :  { %1074 = vmatpush.msra.mxu0 %v1034_v63  ;;  %v1029_v63 = vunpack.c.h.bf16 %v5350_v48  ;;  %v1015_v48 = vunpack.c.h.bf16 %v5343_v36  ;;  %v1067_v36 = vunpack.c.h.bf16 %v7818_v26  ;;  %v1063_v26 = vunpack.c.h.bf16 %v7843_v11  ;;  %v8050_v11 = vld [vmem:[%s10602_s3 + $0x550] sm:$0xff] }
 0x194   :  { %1114 = vmatpush.msra.mxu2 %v1035_v59  ;;  %v1260_v59 = vunpack.c.l.bf16 %v8064_v6 }
 0x195   :  { %1075 = vmatpush.msra.mxu0 %v1032_v49 }
 0x196   :  { %1115 = vmatpush.msra.mxu2 %v1033_v12  ;;  %v8071_v12 = vld [vmem:[%s10602_s3 + $0x538] sm:$0xff] }
 0x197   :  { %1076 = vmatpush.msra.mxu0 %v1030_v60  ;;  %v1027_v60 = vunpack.c.h.bf16 %v5349_v3  ;;  %v1011_v3 = vunpack.c.h.bf16 %v5341_v0 }
 0x198   :  { %1116 = vmatpush.msra.mxu2 %v1031_v27  ;;  %v1258_v27 = vunpack.c.l.bf16 %v8071_v12 }
 0x199   :  { %1077 = vmatpush.msra.mxu0 %v1028_v9  ;;  %v1025_v9 = vunpack.c.h.bf16 %v5348_v43 }
 0x19a   :  { %1117 = vmatpush.msra.mxu2 %v1029_v63  ;;  %v8078_v63 = vld [vmem:[%s10602_s3 + $0x530] sm:$0xff] }
 0x19b   :  { %1078 = vmatpush.msra.mxu0 %v1026_v1 }
 0x19c   :  { %1118 = vmatpush.msra.mxu2 %v1027_v60  ;;  %v1256_v60 = vunpack.c.l.bf16 %v8078_v63 }
 0x19d   :  { %1079 = vmatpush.msra.mxu0 %v1024_v19  ;;  %v1013_v19 = vunpack.c.h.bf16 %v5342_v56 }
 0x19e   :  { %1119 = vmatpush.msra.mxu2 %v1025_v9  ;;  %v8085_v9 = vld [vmem:[%s10602_s3 + $0x528] sm:$0xff] }
 0x19f   :  { %1080 = vmatpush.msra.mxu0 %v1022_v34 }
 0x1a0   :  { %1120 = vmatpush.msra.mxu2 %v1023_v38  ;;  %v1254_v38 = vunpack.c.l.bf16 %v8085_v9 }
 0x1a1   :  { %1081 = vmatpush.msra.mxu0 %v1020_v51 }
 0x1a2   :  { %1121 = vmatpush.msra.mxu2 %v1021_v45  ;;  %v8092_v45 = vld [vmem:[%s10602_s3 + $0x520] sm:$0xff] }
 0x1a3   :  { %1082 = vmatpush.msra.mxu0 %v1018_v21  ;;  %v1069_v21 = vunpack.c.h.bf16 %v7811_v16  ;;  %v8027_v16 = vld [vmem:[%s10602_s3 + $0x568] sm:$0xff] }
 0x1a4   :  { %1122 = vmatpush.msra.mxu2 %v1019_v39  ;;  %v1270_v56 = vunpack.c.l.bf16 %v8027_v16  ;;  %v1252_v39 = vunpack.c.l.bf16 %v8092_v45 }
 0x1a5   :  { %1083 = vmatpush.msra.mxu0 %v1016_v5  ;;  %v1272_v5 = vunpack.c.l.bf16 %v8020_v20 }
 0x1a6   :  { %1123 = vmatpush.msra.mxu2 %v1017_v2  ;;  %v8099_v2 = vld [vmem:[%s10602_s3 + $0x518] sm:$0xff] }
 0x1a7   :  { %1084 = vmatpush.msra.mxu0 %v1014_v55  ;;  %v8034_v55 = vld [vmem:[%s10602_s3 + $0x560] sm:$0xff] }
 0x1a8   :  { %1124 = vmatpush.msra.mxu2 %v1015_v48  ;;  %v1268_v0 = vunpack.c.l.bf16 %v8034_v55  ;;  %v1250_v48 = vunpack.c.l.bf16 %v8099_v2 }
 0x1a9   :  { %1085 = vmatpush.msra.mxu0 %v1012_v18  ;;  %v8041_v18 = vld [vmem:[%s10602_s3 + $0x558] sm:$0xff] }
 0x1aa   :  { %1125 = vmatpush.msra.mxu2 %v1013_v19  ;;  %v1266_v13 = vunpack.c.l.bf16 %v8041_v18  ;;  %v8106_v19 = vld [vmem:[%s10602_s3 + $0x510] sm:$0xff] }
 0x1ab   :  { %1086 = vmatpush.msra.mxu0 %v1010_v30  ;;  %v1059_v30 = vunpack.c.h.bf16 %v7861_v14  ;;  %v1055_v14 = vunpack.c.h.bf16 %v7880_v37  ;;  %v1051_v37 = vunpack.c.h.bf16 %v7896_v61  ;;  %v1047_v61 = vunpack.c.h.bf16 %v7910_v31 }
 0x1ac   :  { %1126 = vmatpush.msra.mxu2 %v1011_v3  ;;  %v1043_v31 = vunpack.c.h.bf16 %v7929_v28  ;;  %v1246_v28 = vunpack.c.l.bf16 %v8118_v41 }
 0x1ad   :  { %1087 = vmatpush.msra.mxu0 %v1008_v29  ;;  %v1264_v29 = vunpack.c.l.bf16 %v8050_v11 }
 0x1ae   :  { %1088 = vmatmul.f32.vlgmr.msra.gmra.mxu0 %v7952_v4  ;;  %1127 = vmatpush.msra.mxu2 %v1009_v17  ;;  %v8125_v17 = vld [vmem:[%s10602_s3 + $0x5f0] sm:$0xff] }
 0x1af   :  { %1128 = vmatmul.f32.vlgmr.msra.gmra.mxu2 %v7952_v4 }
 0x1b0   :  { %1308 = vmatpush.msrb.mxu2 %v1274_v54  ;;  %v8130_v54 = vld [vmem:[%s10602_s3 + $0x500] sm:$0xff] }
 0x1b2   :  { %1309 = vmatpush.msrb.mxu2 %v1272_v5  ;;  %v1244_v5 = vunpack.c.l.bf16 %v8130_v54 }
 0x1b4   :  { %1310 = vmatpush.msrb.mxu2 %v1270_v56  ;;  %v1304_v56 = vunpack.c.l.bf16 %v8125_v17 }
 0x1b6   :  { %1311 = vmatpush.msrb.mxu2 %v1268_v0 }
 0x1b8   :  { %1312 = vmatpush.msrb.mxu2 %v1266_v13 }
 0x1ba   :  { %1313 = vmatpush.msrb.mxu2 %v1264_v29  ;;  %v8169_v29 = vld [vmem:[%s10604_s1 + $0x48] sm:$0xff] }
 0x1cf   :  { %v7998_v40 = vpop.f32.mrf.mxu1 }
 0x1d7   :  { %v8002_v1 = vpop.f32.mrf.mxu1 }
 0x1d8   :  { %10615 = vst [vmem:[#allocation2_spill] sm:$0xff] %v8002_v1 }
 0x1eb   :  { %v8000_v49 = vpop.f32.mrf.mxu0 }
 0x1ef   :  { %v913_v34 = vpop.f32.mrf.mxu1 }
 0x1f3   :  { %v8004_v32 = vpop.f32.mrf.mxu0 }
 0x20b   :  { %v893_v43 = vpop.f32.mrf.mxu0 }
 0x20c   :  { %v914_v51 = vadd.f32 %v913_v34, %v893_v43  ;;  %v1248_v34 = vunpack.c.l.bf16 %v8106_v19  ;;  %v8113_v43 = vld [vmem:[%s10602_s3 + $0x5f8] sm:$0xff] }
 0x20e   :  { %963 = vmatpush.msrb.mxu3 %v914_v51  ;;  %v1041_v51 = vunpack.c.h.bf16 %v7941_v62  ;;  %v8135_v62 = vld [vmem:[%s10604_s1 + $0x40] sm:$0xff] }
 0x20f   :  { %5338 = vmatmul.msk.f32.vlgmr.msrb.gmra.mxu3 %vm398_vm0, %v7830_v53  ;;  %v1065_v53 = vunpack.c.h.bf16 %v7836_v57  ;;  %v1061_v57 = vunpack.c.h.bf16 %v7854_v47  ;;  %v8057_v47 = vld [vmem:[%s10602_s3 + $0x548] sm:$0xff]  ;;  %v1109_v3 = vpop.f32.mrf.mxu1 }
 0x210   :  { %1132 = vmatpush.msra.mxu3 %v1071_v50 }
 0x212   :  { %1133 = vmatpush.msra.mxu3 %v1069_v21 }
 0x214   :  { %1134 = vmatpush.msra.mxu3 %v1067_v36  ;;  %v1306_v36 = vunpack.c.l.bf16 %v8113_v43 }
 0x216   :  { %1135 = vmatpush.msra.mxu3 %v1065_v53  ;;  %v8142_v53 = vld [vmem:[%s10602_s3 + $0x5e8] sm:$0xff] }
 0x217   :  { %5339 = vmatmul.msk.f32.gmra.mxu3 %vm398_vm0, %v7867_v23  ;;  %v1262_v23 = vunpack.c.l.bf16 %v8057_v47  ;;  %v1302_v0 = vunpack.c.l.bf16 %v8142_v53 }
 0x218   :  { %1136 = vmatpush.msra.mxu3 %v1063_v26  ;;  %v8151_v26 = vld [vmem:[%s10602_s3 + $0x5e0] sm:$0xff] }
 0x219   :  { %1314 = vmatpush.msrb.mxu2 %v1262_v23  ;;  %v1300_v13 = vunpack.c.l.bf16 %v8151_v26  ;;  %v8175_v23 = vld [vmem:[%s10602_s3 + $0x5c8] sm:$0xff] }
 0x21a   :  { %1137 = vmatpush.msra.mxu3 %v1061_v57  ;;  %v8157_v57 = vld [vmem:[%s10602_s3 + $0x5d8] sm:$0xff] }
 0x21b   :  { %1315 = vmatpush.msrb.mxu2 %v1260_v59  ;;  %v8183_v59 = vld [vmem:[%s10602_s3 + $0x5c0] sm:$0xff] }
 0x21c   :  { %1138 = vmatpush.msra.mxu3 %v1059_v30  ;;  %v8164_v30 = vld [vmem:[%s10602_s3 + $0x5d0] sm:$0xff] }
 0x21d   :  { %1316 = vmatpush.msrb.mxu2 %v1258_v27  ;;  %v8189_v27 = vld [vmem:[%s10602_s3 + $0x5b8] sm:$0xff] }
 0x21e   :  { %1139 = vmatpush.msra.mxu3 %v1057_v44  ;;  %v1298_v44 = vunpack.c.l.bf16 %v8157_v57 }
 0x21f   :  { %1317 = vmatpush.msrb.mxu2 %v1256_v60  ;;  %v8195_v60 = vld [vmem:[%s10602_s3 + $0x5b0] sm:$0xff] }
 0x220   :  { %1140 = vmatpush.msra.mxu3 %v1055_v14  ;;  %v1296_v14 = vunpack.c.l.bf16 %v8164_v30 }
 0x221   :  { %1318 = vmatpush.msrb.mxu2 %v1254_v38  ;;  %v8201_v38 = vld [vmem:[%s10602_s3 + $0x5a8] sm:$0xff] }
 0x222   :  { %1141 = vmatpush.msra.mxu3 %v1053_v22  ;;  %v1294_v22 = vunpack.c.l.bf16 %v8175_v23 }
 0x223   :  { %1319 = vmatpush.msrb.mxu2 %v1252_v39  ;;  %v8207_v39 = vld [vmem:[%s10602_s3 + $0x5a0] sm:$0xff] }
 0x224   :  { %1142 = vmatpush.msra.mxu3 %v1051_v37  ;;  %v1292_v37 = vunpack.c.l.bf16 %v8183_v59 }
 0x225   :  { %1320 = vmatpush.msrb.mxu2 %v1250_v48  ;;  %v8213_v48 = vld [vmem:[%s10602_s3 + $0x598] sm:$0xff] }
 0x226   :  { %1143 = vmatpush.msra.mxu3 %v1049_v52  ;;  %v1290_v52 = vunpack.c.l.bf16 %v8189_v27 }
 0x227   :  { %1321 = vmatpush.msrb.mxu2 %v1248_v34  ;;  %v8219_v34 = vld [vmem:[%s10602_s3 + $0x590] sm:$0xff] }
 0x228   :  { %1144 = vmatpush.msra.mxu3 %v1047_v61  ;;  %v1288_v61 = vunpack.c.l.bf16 %v8195_v60 }
 0x229   :  { %1322 = vmatpush.msrb.mxu2 %v1246_v28  ;;  %v1280_v28 = vunpack.c.l.bf16 %v8219_v34 }
 0x22a   :  { %1145 = vmatpush.msra.mxu3 %v1045_v8  ;;  %v1286_v8 = vunpack.c.l.bf16 %v8201_v38 }
 0x22b   :  { %v1089_v50 = vpop.f32.mrf.mxu0  ;;  %1323 = vmatpush.msrb.mxu2 %v1244_v5  ;;  %v1275_v5 = vunpack.c.h.bf16 %v8010_v35  ;;  %v1263_v35 = vunpack.c.h.bf16 %v8057_v47  ;;  %v1251_v47 = vunpack.c.h.bf16 %v8099_v2 }
 0x22c   :  { %v1110_v21 = vadd.f32 %v1109_v3, %v1089_v50  ;;  %1146 = vmatpush.msra.mxu3 %v1043_v31  ;;  %1324 = vmatmul.f32.vlgmr.msrb.gmra.mxu2 %v7952_v4  ;;  %v1284_v31 = vunpack.c.l.bf16 %v8207_v39  ;;  %v1282_v3 = vunpack.c.l.bf16 %v8213_v48  ;;  %v8231_v50 = vld [vmem:[%s10602_s3 + $0x580] sm:$0xff] }
 0x22e   :  { %1147 = vmatpush.msra.mxu3 %v1041_v51  ;;  %1176 = vmatpush.msrb.mxu0 %v1110_v21  ;;  %v8225_v51 = vld [vmem:[%s10602_s3 + $0x588] sm:$0xff] }
 0x22f   :  { %1148 = vmatmul.f32.vlgmr.msra.gmra.mxu3 %v7824_v42  ;;  %5374 = vmatmul.msk.f32.vlgmr.msrb.gmra.mxu0 %vm398_vm0, %v8135_v62  ;;  %v1278_v21 = vunpack.c.l.bf16 %v8225_v51 }
 0x230   :  { %1328 = vmatpush.msrb.mxu3 %v1306_v36  ;;  %v1276_v36 = vunpack.c.l.bf16 %v8231_v50  ;;  %1348 = vmatpush.msra.mxu0 %v1275_v5  ;;  %v8295_v5 = vld [vmem:[%s10602_s3 + $0x658] sm:$0xff] }
 0x232   :  { %1329 = vmatpush.msrb.mxu3 %v1304_v56  ;;  %v1273_v56 = vunpack.c.h.bf16 %v8020_v20  ;;  %v1261_v20 = vunpack.c.h.bf16 %v8064_v6  ;;  %v1249_v6 = vunpack.c.h.bf16 %v8106_v19  ;;  %v1305_v19 = vunpack.c.h.bf16 %v8125_v17  ;;  %v8281_v17 = vld [vmem:[%s10602_s3 + $0x668] sm:$0xff] }
 0x234   :  { %1330 = vmatpush.msrb.mxu3 %v1302_v0  ;;  %1349 = vmatpush.msra.mxu0 %v1273_v56  ;;  %v1271_v0 = vunpack.c.h.bf16 %v8027_v16  ;;  %v1259_v16 = vunpack.c.h.bf16 %v8071_v12  ;;  %v1502_v56 = vunpack.c.l.bf16 %v8295_v5 }
 0x236   :  { %1331 = vmatpush.msrb.mxu3 %v1300_v13  ;;  %1350 = vmatpush.msra.mxu0 %v1271_v0  ;;  %v1269_v13 = vunpack.c.h.bf16 %v8034_v55  ;;  %v1257_v55 = vunpack.c.h.bf16 %v8078_v63  ;;  %v1247_v63 = vunpack.c.h.bf16 %v8118_v41  ;;  %v1303_v41 = vunpack.c.h.bf16 %v8142_v53 }
 0x237   :  { %5375 = vmatmul.msk.f32.gmra.mxu0 %vm398_vm0, %v8169_v29  ;;  %v1299_v53 = vunpack.c.h.bf16 %v8157_v57  ;;  %v8304_v57 = vld [vmem:[%s10602_s3 + $0x650] sm:$0xff]  ;;  %v1295_v0 = vunpack.c.h.bf16 %v8175_v23  ;;  %v1291_v23 = vunpack.c.h.bf16 %v8189_v27  ;;  %v1287_v27 = vunpack.c.h.bf16 %v8201_v38 }
 0x238   :  { %1332 = vmatpush.msrb.mxu3 %v1298_v44  ;;  %1351 = vmatpush.msra.mxu0 %v1269_v13  ;;  %v1267_v44 = vunpack.c.h.bf16 %v8041_v18  ;;  %v1500_v13 = vunpack.c.l.bf16 %v8304_v57  ;;  %v1283_v38 = vunpack.c.h.bf16 %v8213_v48  ;;  %v1279_v48 = vunpack.c.h.bf16 %v8225_v51 }
 0x23a   :  { %1333 = vmatpush.msrb.mxu3 %v1296_v14  ;;  %v8241_v14 = vpop.f32.mrf.mxu2  ;;  %1352 = vmatpush.msra.mxu0 %v1267_v44  ;;  %v1293_v44 = vunpack.c.h.bf16 %v8183_v59  ;;  %v1289_v59 = vunpack.c.h.bf16 %v8195_v60  ;;  %v1285_v60 = vunpack.c.h.bf16 %v8207_v39  ;;  %v1281_v39 = vunpack.c.h.bf16 %v8219_v34  ;;  %v8372_v34 = vld [vmem:[%s10602_s3 + $0x608] sm:$0xff] }
 0x23b   :  { %v1482_v51 = vunpack.c.l.bf16 %v8372_v34 }
 0x23c   :  { %1334 = vmatpush.msrb.mxu3 %v1294_v22  ;;  %v1265_v22 = vunpack.c.h.bf16 %v8050_v11 }
 0x23e   :  { %1335 = vmatpush.msrb.mxu3 %v1292_v37  ;;  %1353 = vmatpush.msra.mxu0 %v1265_v22  ;;  %v8318_v22 = vld [vmem:[%s10602_s3 + $0x640] sm:$0xff] }
 0x240   :  { %1336 = vmatpush.msrb.mxu3 %v1290_v52  ;;  %1354 = vmatpush.msra.mxu0 %v1263_v35  ;;  %v1255_v52 = vunpack.c.h.bf16 %v8085_v9  ;;  %v1245_v9 = vunpack.c.h.bf16 %v8130_v54  ;;  %v1496_v35 = vunpack.c.l.bf16 %v8318_v22 }
 0x242   :  { %1337 = vmatpush.msrb.mxu3 %v1288_v61  ;;  %1355 = vmatpush.msra.mxu0 %v1261_v20  ;;  %v8250_v18 = vpop.f32.mrf.mxu2  ;;  %v1253_v61 = vunpack.c.h.bf16 %v8092_v45  ;;  %v8264_v45 = vld [vmem:[%s10602_s3 + $0x678] sm:$0xff] }
 0x243   :  { %v1510_v2 = vunpack.c.l.bf16 %v8264_v45  ;;  %v8325_v20 = vld [vmem:[%s10602_s3 + $0x638] sm:$0xff] }
 0x244   :  { %1338 = vmatpush.msrb.mxu3 %v1286_v8  ;;  %1356 = vmatpush.msra.mxu0 %v1259_v16  ;;  %v1494_v16 = vunpack.c.l.bf16 %v8325_v20 }
 0x246   :  { %1339 = vmatpush.msrb.mxu3 %v1284_v31  ;;  %1357 = vmatpush.msra.mxu0 %v1257_v55  ;;  %v8332_v55 = vld [vmem:[%s10602_s3 + $0x630] sm:$0xff] }
 0x248   :  { %1340 = vmatpush.msrb.mxu3 %v1282_v3  ;;  %1358 = vmatpush.msra.mxu0 %v1255_v52  ;;  %v1307_v3 = vunpack.c.h.bf16 %v8113_v43  ;;  %v8274_v43 = vld [vmem:[%s10602_s3 + $0x670] sm:$0xff]  ;;  %v1492_v52 = vunpack.c.l.bf16 %v8332_v55 }
 0x249   :  { %v1508_v54 = vunpack.c.l.bf16 %v8274_v43 }
 0x24a   :  { %1341 = vmatpush.msrb.mxu3 %v1280_v28  ;;  %1359 = vmatpush.msra.mxu0 %v1253_v61  ;;  %v1129_v12 = vpop.f32.mrf.mxu2  ;;  %v1506_v28 = vunpack.c.l.bf16 %v8281_v17  ;;  %v8339_v61 = vld [vmem:[%s10602_s3 + $0x628] sm:$0xff] }
 0x24c   :  { %1342 = vmatpush.msrb.mxu3 %v1278_v21  ;;  %1360 = vmatpush.msra.mxu0 %v1251_v47  ;;  %v8288_v21 = vld [vmem:[%s10602_s3 + $0x660] sm:$0xff]  ;;  %v1490_v47 = vunpack.c.l.bf16 %v8339_v61 }
 0x24e   :  { %1343 = vmatpush.msrb.mxu3 %v1276_v36  ;;  %1361 = vmatpush.msra.mxu0 %v1249_v6  ;;  %v1504_v36 = vunpack.c.l.bf16 %v8288_v21  ;;  %v8346_v6 = vld [vmem:[%s10602_s3 + $0x620] sm:$0xff] }
 0x24f   :  { %1344 = vmatmul.f32.vlgmr.msrb.gmra.mxu3 %v7824_v42 }
 0x250   :  { %1362 = vmatpush.msra.mxu0 %v1247_v63  ;;  %v8353_v63 = vld [vmem:[%s10602_s3 + $0x618] sm:$0xff] }
 0x252   :  { %1363 = vmatpush.msra.mxu0 %v1245_v9 }
 0x253   :  { %1364 = vmatmul.f32.vlgmr.msra.gmra.mxu0 %v7952_v4 }
 0x254   :  { %1544 = vmatpush.msrb.mxu0 %v1510_v2  ;;  %v8367_v2 = vld [vmem:[%s10602_s3 + $0x6f8] sm:$0xff] }
 0x256   :  { %1545 = vmatpush.msrb.mxu0 %v1508_v54  ;;  %v8379_v54 = vld [vmem:[%s10602_s3 + $0x6f0] sm:$0xff] }
 0x258   :  { %1546 = vmatpush.msrb.mxu0 %v1506_v28 }
 0x25a   :  { %1547 = vmatpush.msrb.mxu0 %v1504_v36 }
 0x25c   :  { %1548 = vmatpush.msrb.mxu0 %v1502_v56  ;;  %v1540_v56 = vunpack.c.l.bf16 %v8379_v54 }
 0x25e   :  { %1549 = vmatpush.msrb.mxu0 %v1500_v13 }
 0x292   :  { %v8244_v37 = vpop.f32.mrf.mxu3 }
 0x29a   :  { %v8253_v11 = vpop.f32.mrf.mxu3 }
 0x29b   :  { %10616 = vst [vmem:[#allocation3_spill] sm:$0xff] %v8253_v11 }
 0x2af   :  { %v1325_v9 = vpop.f32.mrf.mxu2 }
 0x2b2   :  { %v1149_v8 = vpop.f32.mrf.mxu3 }
 0x2b3   :  { %v1150_v31 = vadd.f32 %v1149_v8, %v1129_v12  ;;  %v1488_v12 = vunpack.c.l.bf16 %v8346_v6  ;;  %v1486_v8 = vunpack.c.l.bf16 %v8353_v63 }
 0x2b5   :  { %1199 = vmatpush.msrb.mxu1 %v1150_v31  ;;  %v8360_v31 = vld [vmem:[%s10602_s3 + $0x610] sm:$0xff] }
 0x2b6   :  { %5376 = vmatmul.msk.f32.vlgmr.msrb.gmra.mxu1 %vm398_vm0, %v8135_v62  ;;  %v1301_v62 = vunpack.c.h.bf16 %v8151_v26  ;;  %v1297_v26 = vunpack.c.h.bf16 %v8164_v30  ;;  %v8311_v30 = vld [vmem:[%s10602_s3 + $0x648] sm:$0xff] }
 0x2b7   :  { %1368 = vmatpush.msra.mxu1 %v1307_v3  ;;  %v1484_v3 = vunpack.c.l.bf16 %v8360_v31 }
 0x2b9   :  { %1369 = vmatpush.msra.mxu1 %v1305_v19  ;;  %v1277_v19 = vunpack.c.h.bf16 %v8231_v50  ;;  %v8389_v50 = vld [vmem:[%s10604_s1 + $0x50] sm:$0xff] }
 0x2bb   :  { %1370 = vmatpush.msra.mxu1 %v1303_v41 }
 0x2bd   :  { %1371 = vmatpush.msra.mxu1 %v1301_v62  ;;  %v8384_v62 = vld [vmem:[%s10602_s3 + $0x600] sm:$0xff] }
 0x2be   :  { %5377 = vmatmul.msk.f32.gmra.mxu1 %vm398_vm0, %v8169_v29  ;;  %v1498_v29 = vunpack.c.l.bf16 %v8311_v30  ;;  %v1480_v36 = vunpack.c.l.bf16 %v8384_v62 }
 0x2bf   :  { %1372 = vmatpush.msra.mxu1 %v1299_v53  ;;  %v1542_v53 = vunpack.c.l.bf16 %v8367_v2 }
 0x2c0   :  { %1550 = vmatpush.msrb.mxu0 %v1498_v29 }
 0x2c1   :  { %1373 = vmatpush.msra.mxu1 %v1297_v26  ;;  %v8396_v26 = vld [vmem:[%s10602_s3 + $0x6e8] sm:$0xff] }
 0x2c2   :  { %1551 = vmatpush.msrb.mxu0 %v1496_v35  ;;  %v1538_v13 = vunpack.c.l.bf16 %v8396_v26  ;;  %v8423_v35 = vld [vmem:[%s10604_s1 + $0x58] sm:$0xff] }
 0x2c3   :  { %1374 = vmatpush.msra.mxu1 %v1295_v0  ;;  %v8405_v0 = vld [vmem:[%s10602_s3 + $0x6e0] sm:$0xff] }
 0x2c4   :  { %1552 = vmatpush.msrb.mxu0 %v1494_v16  ;;  %v1536_v29 = vunpack.c.l.bf16 %v8405_v0  ;;  %v8429_v16 = vld [vmem:[%s10602_s3 + $0x6c8] sm:$0xff] }
 0x2c5   :  { %1375 = vmatpush.msra.mxu1 %v1293_v44  ;;  %v8411_v44 = vld [vmem:[%s10602_s3 + $0x6d8] sm:$0xff] }
 0x2c6   :  { %1553 = vmatpush.msrb.mxu0 %v1492_v52  ;;  %v8437_v52 = vld [vmem:[%s10602_s3 + $0x6c0] sm:$0xff] }
 0x2c7   :  { %1376 = vmatpush.msra.mxu1 %v1291_v23  ;;  %v8418_v23 = vld [vmem:[%s10602_s3 + $0x6d0] sm:$0xff] }
 0x2c8   :  { %1554 = vmatpush.msrb.mxu0 %v1490_v47  ;;  %v8443_v47 = vld [vmem:[%s10602_s3 + $0x6b8] sm:$0xff] }
 0x2c9   :  { %1377 = vmatpush.msra.mxu1 %v1289_v59  ;;  %v1534_v59 = vunpack.c.l.bf16 %v8411_v44 }
 0x2ca   :  { %1555 = vmatpush.msrb.mxu0 %v1488_v12  ;;  %v8449_v12 = vld [vmem:[%s10602_s3 + $0x6b0] sm:$0xff] }
 0x2cb   :  { %1378 = vmatpush.msra.mxu1 %v1287_v27  ;;  %v1532_v27 = vunpack.c.l.bf16 %v8418_v23 }
 0x2cc   :  { %1556 = vmatpush.msrb.mxu0 %v1486_v8  ;;  %v8455_v8 = vld [vmem:[%s10602_s3 + $0x6a8] sm:$0xff] }
 0x2cd   :  { %1379 = vmatpush.msra.mxu1 %v1285_v60  ;;  %v1530_v60 = vunpack.c.l.bf16 %v8429_v16 }
 0x2ce   :  { %1557 = vmatpush.msrb.mxu0 %v1484_v3  ;;  %v8461_v3 = vld [vmem:[%s10602_s3 + $0x6a0] sm:$0xff] }
 0x2cf   :  { %1380 = vmatpush.msra.mxu1 %v1283_v38  ;;  %v1528_v38 = vunpack.c.l.bf16 %v8437_v52 }
 0x2d0   :  { %1558 = vmatpush.msrb.mxu0 %v1482_v51  ;;  %v1520_v51 = vunpack.c.l.bf16 %v8461_v3 }
 0x2d1   :  { %1381 = vmatpush.msra.mxu1 %v1281_v39  ;;  %v1526_v39 = vunpack.c.l.bf16 %v8443_v47 }
 0x2d2   :  { %v1345_v41 = vpop.f32.mrf.mxu3  ;;  %1559 = vmatpush.msrb.mxu0 %v1480_v36 }
 0x2d3   :  { %v1346_v28 = vadd.f32 %v1345_v41, %v1325_v9  ;;  %1382 = vmatpush.msra.mxu1 %v1279_v48  ;;  %1560 = vmatmul.f32.vlgmr.msrb.gmra.mxu0 %v7952_v4  ;;  %v1524_v48 = vunpack.c.l.bf16 %v8449_v12  ;;  %v1522_v9 = vunpack.c.l.bf16 %v8455_v8  ;;  %v8473_v41 = vld [vmem:[%s10602_s3 + $0x690] sm:$0xff] }
 0x2d4   :  { %v1516_v36 = vunpack.c.l.bf16 %v8473_v41 }
 0x2d5   :  { %1383 = vmatpush.msra.mxu1 %v1277_v19  ;;  %1412 = vmatpush.msra.mxu2 %v1346_v28  ;;  %v8467_v19 = vld [vmem:[%s10602_s3 + $0x698] sm:$0xff] }
 0x2d6   :  { %1384 = vmatmul.f32.vlgmr.msra.gmra.mxu1 %v7824_v42  ;;  %5412 = vmatmul.msk.f32.vlgmr.msra.gmra.mxu2 %vm398_vm0, %v8389_v50  ;;  %v1518_v28 = vunpack.c.l.bf16 %v8467_v19 }
 0x2d7   :  { %1564 = vmatpush.msrb.mxu1 %v1542_v53  ;;  %v8479_v53 = vld [vmem:[%s10602_s3 + $0x688] sm:$0xff] }
 0x2d9   :  { %1565 = vmatpush.msrb.mxu1 %v1540_v56  ;;  %v8485_v56 = vld [vmem:[%s10602_s3 + $0x680] sm:$0xff] }
 0x2db   :  { %1566 = vmatpush.msrb.mxu1 %v1538_v13  ;;  %v1514_v13 = vunpack.c.l.bf16 %v8479_v53 }
 0x2dd   :  { %1567 = vmatpush.msrb.mxu1 %v1536_v29  ;;  %v1512_v29 = vunpack.c.l.bf16 %v8485_v56 }
 0x2de   :  { %5413 = vmatmul.msk.f32.gmra.mxu2 %vm398_vm0, %v8423_v35 }
 0x2df   :  { %1568 = vmatpush.msrb.mxu1 %v1534_v59  ;;  %v1511_v59 = vunpack.c.h.bf16 %v8264_v45  ;;  %v1499_v45 = vunpack.c.h.bf16 %v8311_v30  ;;  %v1487_v30 = vunpack.c.h.bf16 %v8353_v63 }
 0x2e1   :  { %1569 = vmatpush.msrb.mxu1 %v1532_v27  ;;  %1584 = vmatpush.msrb.mxu2 %v1511_v59  ;;  %v1509_v27 = vunpack.c.h.bf16 %v8274_v43  ;;  %v1497_v43 = vunpack.c.h.bf16 %v8318_v22  ;;  %v1485_v22 = vunpack.c.h.bf16 %v8360_v31  ;;  %v1541_v31 = vunpack.c.h.bf16 %v8379_v54  ;;  %v8535_v54 = vld [vmem:[%s10602_s3 + $0x768] sm:$0xff]  ;;  %v8542_v59 = vld [vmem:[%s10602_s3 + $0x760] sm:$0xff] }
 0x2e3   :  { %1570 = vmatpush.msrb.mxu1 %v1530_v60  ;;  %1585 = vmatpush.msrb.mxu2 %v1509_v27  ;;  %v1507_v60 = vunpack.c.h.bf16 %v8281_v17  ;;  %v1495_v17 = vunpack.c.h.bf16 %v8325_v20  ;;  %v1740_v27 = vunpack.c.l.bf16 %v8542_v59 }
 0x2e5   :  { %1571 = vmatpush.msrb.mxu1 %v1528_v38  ;;  %1586 = vmatpush.msrb.mxu2 %v1507_v60  ;;  %v1505_v38 = vunpack.c.h.bf16 %v8288_v21  ;;  %v1493_v21 = vunpack.c.h.bf16 %v8332_v55  ;;  %v1483_v55 = vunpack.c.h.bf16 %v8372_v34  ;;  %v1539_v34 = vunpack.c.h.bf16 %v8396_v26  ;;  %v8549_v60 = vld [vmem:[%s10602_s3 + $0x758] sm:$0xff] }
 0x2e6   :  { %v1535_v26 = vunpack.c.h.bf16 %v8411_v44  ;;  %v8558_v44 = vld [vmem:[%s10602_s3 + $0x750] sm:$0xff] }
 0x2e7   :  { %1572 = vmatpush.msrb.mxu1 %v1526_v39  ;;  %1587 = vmatpush.msrb.mxu2 %v1505_v38  ;;  %v1503_v39 = vunpack.c.h.bf16 %v8295_v5  ;;  %v1738_v38 = vunpack.c.l.bf16 %v8549_v60 }
 0x2e9   :  { %1573 = vmatpush.msrb.mxu1 %v1524_v48  ;;  %v8495_v48 = vpop.f32.mrf.mxu0  ;;  %1588 = vmatpush.msrb.mxu2 %v1503_v39  ;;  %v1531_v39 = vunpack.c.h.bf16 %v8429_v16  ;;  %v1527_v16 = vunpack.c.h.bf16 %v8443_v47  ;;  %v1523_v47 = vunpack.c.h.bf16 %v8455_v8  ;;  %v1519_v8 = vunpack.c.h.bf16 %v8467_v19 }
 0x2ea   :  { %v1515_v19 = vunpack.c.h.bf16 %v8479_v53 }
 0x2eb   :  { %1574 = vmatpush.msrb.mxu1 %v1522_v9  ;;  %v1501_v9 = vunpack.c.h.bf16 %v8304_v57 }
 0x2ed   :  { %1575 = vmatpush.msrb.mxu1 %v1520_v51  ;;  %1589 = vmatpush.msrb.mxu2 %v1501_v9  ;;  %v1491_v51 = vunpack.c.h.bf16 %v8339_v61  ;;  %v1481_v61 = vunpack.c.h.bf16 %v8384_v62  ;;  %v1736_v9 = vunpack.c.l.bf16 %v8558_v44 }
 0x2ef   :  { %1576 = vmatpush.msrb.mxu1 %v1518_v28  ;;  %1590 = vmatpush.msrb.mxu2 %v1499_v45  ;;  %v1489_v28 = vunpack.c.h.bf16 %v8346_v6  ;;  %v8518_v6 = vld [vmem:[%s10602_s3 + $0x778] sm:$0xff]  ;;  %v1529_v45 = vunpack.c.h.bf16 %v8437_v52  ;;  %v1525_v52 = vunpack.c.h.bf16 %v8449_v12  ;;  %v1521_v12 = vunpack.c.h.bf16 %v8461_v3 }
 0x2f0   :  { %v1746_v63 = vunpack.c.l.bf16 %v8518_v6  ;;  %v1517_v3 = vunpack.c.h.bf16 %v8473_v41  ;;  %v8626_v41 = vld [vmem:[%s10602_s3 + $0x708] sm:$0xff] }
 0x2f1   :  { %1577 = vmatpush.msrb.mxu1 %v1516_v36  ;;  %1591 = vmatpush.msrb.mxu2 %v1497_v43  ;;  %v8504_v5 = vpop.f32.mrf.mxu0  ;;  %v8572_v43 = vld [vmem:[%s10602_s3 + $0x740] sm:$0xff]  ;;  %v1718_v53 = vunpack.c.l.bf16 %v8626_v41 }
 0x2f3   :  { %1578 = vmatpush.msrb.mxu1 %v1514_v13  ;;  %1592 = vmatpush.msrb.mxu2 %v1495_v17  ;;  %v1732_v17 = vunpack.c.l.bf16 %v8572_v43 }
 0x2f5   :  { %1579 = vmatpush.msrb.mxu1 %v1512_v29  ;;  %1593 = vmatpush.msrb.mxu2 %v1493_v21  ;;  %v1543_v29 = vunpack.c.h.bf16 %v8367_v2  ;;  %v8528_v2 = vld [vmem:[%s10602_s3 + $0x770] sm:$0xff]  ;;  %v8579_v21 = vld [vmem:[%s10602_s3 + $0x738] sm:$0xff] }
 0x2f6   :  { %1580 = vmatmul.f32.vlgmr.msrb.gmra.mxu1 %v7824_v42  ;;  %v1744_v62 = vunpack.c.l.bf16 %v8528_v2 }
 0x2f7   :  { %1594 = vmatpush.msrb.mxu2 %v1491_v51  ;;  %v1730_v51 = vunpack.c.l.bf16 %v8579_v21 }
 0x2f9   :  { %1595 = vmatpush.msrb.mxu2 %v1489_v28  ;;  %v1365_v20 = vpop.f32.mrf.mxu0  ;;  %v8586_v28 = vld [vmem:[%s10602_s3 + $0x730] sm:$0xff] }
 0x2fb   :  { %1596 = vmatpush.msrb.mxu2 %v1487_v30  ;;  %v1728_v30 = vunpack.c.l.bf16 %v8586_v28 }
 0x2fd   :  { %1597 = vmatpush.msrb.mxu2 %v1485_v22  ;;  %v8593_v22 = vld [vmem:[%s10602_s3 + $0x728] sm:$0xff] }
 0x2ff   :  { %1598 = vmatpush.msrb.mxu2 %v1483_v55  ;;  %v8600_v55 = vld [vmem:[%s10602_s3 + $0x720] sm:$0xff] }
 0x301   :  { %1599 = vmatpush.msrb.mxu2 %v1481_v61  ;;  %v8614_v61 = vld [vmem:[%s10602_s3 + $0x710] sm:$0xff] }
 0x302   :  { %1600 = vmatmul.f32.vlgmr.msrb.gmra.mxu2 %v7952_v4  ;;  %v1742_v4 = vunpack.c.l.bf16 %v8535_v54 }
 0x303   :  { %1780 = vmatpush.msra.mxu2 %v1746_v63  ;;  %v1720_v63 = vunpack.c.l.bf16 %v8614_v61 }
 0x305   :  { %1781 = vmatpush.msra.mxu2 %v1744_v62  ;;  %v1513_v62 = vunpack.c.h.bf16 %v8485_v56  ;;  %v8643_v56 = vld [vmem:[%s10604_s1 + $0x60] sm:$0xff] }
 0x307   :  { %1782 = vmatpush.msra.mxu2 %v1742_v4  ;;  %v8633_v4 = vld [vmem:[%s10602_s3 + $0x7f0] sm:$0xff] }
 0x309   :  { %1783 = vmatpush.msra.mxu2 %v1740_v27 }
 0x30b   :  { %1784 = vmatpush.msra.mxu2 %v1738_v38 }
 0x30d   :  { %1785 = vmatpush.msra.mxu2 %v1736_v9  ;;  %v1776_v9 = vunpack.c.l.bf16 %v8633_v4 }
 0x333   :  { %v8498_v42 = vpop.f32.mrf.mxu1 }
 0x33b   :  { %v8507_v57 = vpop.f32.mrf.mxu1 }
 0x33c   :  { %10617 = vst [vmem:[#allocation4_spill] sm:$0xff] %v8507_v57 }
 0x353   :  { %v1385_v36 = vpop.f32.mrf.mxu1 }
 0x354   :  { %v1386_v13 = vadd.f32 %v1385_v36, %v1365_v20  ;;  %v1726_v20 = vunpack.c.l.bf16 %v8593_v22  ;;  %v1724_v36 = vunpack.c.l.bf16 %v8600_v55 }
 0x356   :  { %1435 = vmatpush.msra.mxu3 %v1386_v13  ;;  %v8607_v13 = vld [vmem:[%s10602_s3 + $0x718] sm:$0xff] }
 0x357   :  { %5414 = vmatmul.msk.f32.vlgmr.msra.gmra.mxu3 %vm398_vm0, %v8389_v50  ;;  %v1537_v50 = vunpack.c.h.bf16 %v8405_v0  ;;  %v1533_v0 = vunpack.c.h.bf16 %v8418_v23  ;;  %v8565_v23 = vld [vmem:[%s10602_s3 + $0x748] sm:$0xff] }
 0x358   :  { %1604 = vmatpush.msrb.mxu3 %v1543_v29  ;;  %v1722_v29 = vunpack.c.l.bf16 %v8607_v13 }
 0x35a   :  { %1605 = vmatpush.msrb.mxu3 %v1541_v31  ;;  %v1561_v31 = vpop.f32.mrf.mxu0 }
 0x35c   :  { %1606 = vmatpush.msrb.mxu3 %v1539_v34  ;;  %v8621_v34 = vld [vmem:[%s10602_s3 + $0x7f8] sm:$0xff] }
 0x35e   :  { %1607 = vmatpush.msrb.mxu3 %v1537_v50 }
 0x35f   :  { %5415 = vmatmul.msk.f32.gmra.mxu3 %vm398_vm0, %v8423_v35  ;;  %v1734_v35 = vunpack.c.l.bf16 %v8565_v23 }
 0x360   :  { %1608 = vmatpush.msrb.mxu3 %v1535_v26  ;;  %v8638_v26 = vld [vmem:[%s10602_s3 + $0x700] sm:$0xff] }
 0x361   :  { %1786 = vmatpush.msra.mxu2 %v1734_v35  ;;  %v1716_v38 = vunpack.c.l.bf16 %v8638_v26  ;;  %v8664_v35 = vld [vmem:[%s10602_s3 + $0x7e0] sm:$0xff] }
 0x362   :  { %1609 = vmatpush.msrb.mxu3 %v1533_v0  ;;  %v1778_v0 = vunpack.c.l.bf16 %v8621_v34 }
 0x363   :  { %1787 = vmatpush.msra.mxu2 %v1732_v17  ;;  %v8670_v17 = vld [vmem:[%s10602_s3 + $0x7d8] sm:$0xff] }
 0x364   :  { %1610 = vmatpush.msrb.mxu3 %v1531_v39  ;;  %v8650_v39 = vld [vmem:[%s10602_s3 + $0x7e8] sm:$0xff] }
 0x365   :  { %1788 = vmatpush.msra.mxu2 %v1730_v51  ;;  %v1772_v51 = vunpack.c.l.bf16 %v8664_v35 }
 0x366   :  { %1611 = vmatpush.msrb.mxu3 %v1529_v45  ;;  %v8656_v45 = vld [vmem:[%s10603_s0 + $0x8] sm:$0xff] }
 0x367   :  { %1789 = vmatpush.msra.mxu2 %v1728_v30  ;;  %v8687_v30 = vld [vmem:[%s10604_s1 + $0x68] sm:$0xff] }
 0x368   :  { %1612 = vmatpush.msrb.mxu3 %v1527_v16  ;;  %v1774_v16 = vunpack.c.l.bf16 %v8650_v39 }
 0x369   :  { %1790 = vmatpush.msra.mxu2 %v1726_v20  ;;  %v8693_v20 = vld [vmem:[%s10602_s3 + $0x7c8] sm:$0xff] }
 0x36a   :  { %1613 = vmatpush.msrb.mxu3 %v1525_v52  ;;  %v8675_v52 = vld [vmem:[%s10603_s0] sm:$0xff] }
 0x36b   :  { %1791 = vmatpush.msra.mxu2 %v1724_v36  ;;  %v8701_v36 = vld [vmem:[%s10602_s3 + $0x7c0] sm:$0xff] }
 0x36c   :  { %1614 = vmatpush.msrb.mxu3 %v1523_v47  ;;  %v8682_v47 = vld [vmem:[%s10602_s3 + $0x7d0] sm:$0xff] }
 0x36d   :  { %1792 = vmatpush.msra.mxu2 %v1722_v29  ;;  %v8707_v29 = vld [vmem:[%s10602_s3 + $0x7b8] sm:$0xff] }
 0x36e   :  { %1615 = vmatpush.msrb.mxu3 %v1521_v12  ;;  %v1770_v12 = vunpack.c.l.bf16 %v8670_v17 }
 0x36f   :  { %1793 = vmatpush.msra.mxu2 %v1720_v63  ;;  %v8713_v63 = vld [vmem:[%s10602_s3 + $0x7b0] sm:$0xff] }
 0x370   :  { %1616 = vmatpush.msrb.mxu3 %v1519_v8  ;;  %v1768_v8 = vunpack.c.l.bf16 %v8682_v47 }
 0x371   :  { %1794 = vmatpush.msra.mxu2 %v1718_v53  ;;  %v1760_v53 = vunpack.c.l.bf16 %v8713_v63 }
 0x372   :  { %1617 = vmatpush.msrb.mxu3 %v1517_v3  ;;  %v1766_v3 = vunpack.c.l.bf16 %v8693_v20 }
 0x373   :  { %v1581_v50 = vpop.f32.mrf.mxu1  ;;  %1795 = vmatpush.msra.mxu2 %v1716_v38 }
 0x374   :  { %v1582_v27 = vadd.f32 %v1581_v50, %v1561_v31  ;;  %1618 = vmatpush.msrb.mxu3 %v1515_v19  ;;  %1796 = vmatmul.f32.vlgmr.msra.gmra.mxu2 %v8675_v52  ;;  %v1764_v19 = vunpack.c.l.bf16 %v8701_v36  ;;  %v1762_v31 = vunpack.c.l.bf16 %v8707_v29  ;;  %v8725_v50 = vld [vmem:[%s10602_s3 + $0x7a0] sm:$0xff] }
 0x375   :  { %v1756_v38 = vunpack.c.l.bf16 %v8725_v50 }
 0x376   :  { %1619 = vmatpush.msrb.mxu3 %v1513_v62  ;;  %1648 = vmatpush.msra.mxu0 %v1582_v27  ;;  %v8719_v62 = vld [vmem:[%s10602_s3 + $0x7a8] sm:$0xff] }
 0x377   :  { %1620 = vmatmul.f32.vlgmr.msrb.gmra.mxu3 %v8656_v45  ;;  %5450 = vmatmul.msk.f32.vlgmr.msra.gmra.mxu0 %vm398_vm0, %v8643_v56  ;;  %v1758_v27 = vunpack.c.l.bf16 %v8719_v62 }
 0x378   :  { %1800 = vmatpush.msra.mxu3 %v1778_v0  ;;  %v8731_v0 = vld [vmem:[%s10602_s3 + $0x798] sm:$0xff] }
 0x37a   :  { %1801 = vmatpush.msra.mxu3 %v1776_v9  ;;  %v8737_v9 = vld [vmem:[%s10602_s3 + $0x790] sm:$0xff] }
 0x37c   :  { %1802 = vmatpush.msra.mxu3 %v1774_v16  ;;  %v1754_v16 = vunpack.c.l.bf16 %v8731_v0 }
 0x37e   :  { %1803 = vmatpush.msra.mxu3 %v1772_v51  ;;  %v8743_v51 = vld [vmem:[%s10602_s3 + $0x788] sm:$0xff] }
 0x37f   :  { %5451 = vmatmul.msk.f32.gmra.mxu0 %vm398_vm0, %v8687_v30 }
 0x380   :  { %1804 = vmatpush.msra.mxu3 %v1770_v12  ;;  %v1752_v12 = vunpack.c.l.bf16 %v8737_v9 }
 0x382   :  { %1805 = vmatpush.msra.mxu3 %v1768_v8  ;;  %v8749_v8 = vld [vmem:[%s10602_s3 + $0x780] sm:$0xff] }
 0x384   :  { %1806 = vmatpush.msra.mxu3 %v1766_v3  ;;  %v1750_v3 = vunpack.c.l.bf16 %v8743_v51 }
 0x386   :  { %1807 = vmatpush.msra.mxu3 %v1764_v19  ;;  %v1748_v19 = vunpack.c.l.bf16 %v8749_v8 }
 0x388   :  { %1808 = vmatpush.msra.mxu3 %v1762_v31  ;;  %v1747_v31 = vunpack.c.h.bf16 %v8518_v6  ;;  %v1735_v6 = vunpack.c.h.bf16 %v8565_v23  ;;  %v1723_v23 = vunpack.c.h.bf16 %v8607_v13 }
 0x38a   :  { %1809 = vmatpush.msra.mxu3 %v1760_v53  ;;  %1820 = vmatpush.msrb.mxu0 %v1747_v31  ;;  %v1745_v53 = vunpack.c.h.bf16 %v8528_v2  ;;  %v1733_v2 = vunpack.c.h.bf16 %v8572_v43  ;;  %v1727_v31 = vunpack.c.h.bf16 %v8593_v22  ;;  %v1721_v43 = vunpack.c.h.bf16 %v8614_v61 }
 0x38b   :  { %v1717_v22 = vunpack.c.h.bf16 %v8638_v26  ;;  %v1777_v61 = vunpack.c.h.bf16 %v8633_v4  ;;  %v8799_v4 = vld [vmem:[%s10602_s3 + $0x868] sm:$0xff] }
 0x38c   :  { %1810 = vmatpush.msra.mxu3 %v1758_v27  ;;  %1821 = vmatpush.msrb.mxu0 %v1745_v53  ;;  %v1743_v27 = vunpack.c.h.bf16 %v8535_v54  ;;  %v1731_v54 = vunpack.c.h.bf16 %v8579_v21  ;;  %v1725_v53 = vunpack.c.h.bf16 %v8600_v55  ;;  %v8782_v55 = vld [vmem:[%s10602_s3 + $0x878] sm:$0xff]  ;;  %v1979_v11 = vunpack.c.h.bf16 %v8799_v4 }
 0x38d   :  { %v1982_v13 = vunpack.c.l.bf16 %v8782_v55  ;;  %v1983_v57 = vunpack.c.h.bf16 %v8782_v55 }
 0x38e   :  { %1811 = vmatpush.msra.mxu3 %v1756_v38  ;;  %1822 = vmatpush.msrb.mxu0 %v1743_v27  ;;  %v1741_v38 = vunpack.c.h.bf16 %v8542_v59  ;;  %v1729_v59 = vunpack.c.h.bf16 %v8586_v28  ;;  %v1719_v28 = vunpack.c.h.bf16 %v8626_v41  ;;  %v1775_v41 = vunpack.c.h.bf16 %v8650_v39 }
 0x38f   :  { %v1771_v39 = vunpack.c.h.bf16 %v8670_v17  ;;  %v8822_v17 = vld [vmem:[%s10602_s3 + $0x850] sm:$0xff] }
 0x390   :  { %1812 = vmatpush.msra.mxu3 %v1754_v16  ;;  %1823 = vmatpush.msrb.mxu0 %v1741_v38  ;;  %v1739_v16 = vunpack.c.h.bf16 %v8549_v60 }
 0x392   :  { %1813 = vmatpush.msra.mxu3 %v1752_v12  ;;  %v8759_v12 = vpop.f32.mrf.mxu2  ;;  %1824 = vmatpush.msrb.mxu0 %v1739_v16  ;;  %v1779_v16 = vunpack.c.h.bf16 %v8621_v34  ;;  %v8792_v34 = vld [vmem:[%s10602_s3 + $0x870] sm:$0xff] }
 0x393   :  { %v1980_v26 = vunpack.c.l.bf16 %v8792_v34 }
 0x394   :  { %1814 = vmatpush.msra.mxu3 %v1750_v3  ;;  %v1737_v3 = vunpack.c.h.bf16 %v8558_v44 }
 0x396   :  { %1815 = vmatpush.msra.mxu3 %v1748_v19  ;;  %1825 = vmatpush.msrb.mxu0 %v1737_v3  ;;  %v1978_v3 = vunpack.c.l.bf16 %v8799_v4 }
 0x397   :  { %1816 = vmatmul.f32.vlgmr.msra.gmra.mxu3 %v8656_v45 }
 0x398   :  { %1826 = vmatpush.msrb.mxu0 %v1735_v6  ;;  %v8806_v6 = vld [vmem:[%s10602_s3 + $0x860] sm:$0xff] }
 0x39a   :  { %1827 = vmatpush.msrb.mxu0 %v1733_v2  ;;  %v8768_v60 = vpop.f32.mrf.mxu2  ;;  %v1976_v2 = vunpack.c.l.bf16 %v8806_v6 }
 0x39c   :  { %1828 = vmatpush.msrb.mxu0 %v1731_v54  ;;  %v8813_v54 = vld [vmem:[%s10602_s3 + $0x858] sm:$0xff] }
 0x39e   :  { %1829 = vmatpush.msrb.mxu0 %v1729_v59  ;;  %v1974_v59 = vunpack.c.l.bf16 %v8813_v54 }
 0x3a0   :  { %1830 = vmatpush.msrb.mxu0 %v1727_v31  ;;  %v1767_v31 = vunpack.c.h.bf16 %v8693_v20  ;;  %v1763_v20 = vunpack.c.h.bf16 %v8707_v29  ;;  %v1759_v29 = vunpack.c.h.bf16 %v8719_v62  ;;  %v1755_v62 = vunpack.c.h.bf16 %v8731_v0 }
 0x3a1   :  { %v1751_v0 = vunpack.c.h.bf16 %v8743_v51 }
 0x3a2   :  { %1831 = vmatpush.msrb.mxu0 %v1725_v53  ;;  %v1601_v21 = vpop.f32.mrf.mxu2  ;;  %v1972_v53 = vunpack.c.l.bf16 %v8822_v17 }
 0x3a4   :  { %1832 = vmatpush.msrb.mxu0 %v1723_v23  ;;  %v1765_v23 = vunpack.c.h.bf16 %v8701_v36  ;;  %v1761_v36 = vunpack.c.h.bf16 %v8713_v63  ;;  %v1757_v63 = vunpack.c.h.bf16 %v8725_v50  ;;  %v1753_v50 = vunpack.c.h.bf16 %v8737_v9  ;;  %v8890_v9 = vld [vmem:[%s10602_s3 + $0x808] sm:$0xff] }
 0x3a5   :  { %v1954_v51 = vunpack.c.l.bf16 %v8890_v9 }
 0x3a6   :  { %1833 = vmatpush.msrb.mxu0 %v1721_v43  ;;  %v8836_v43 = vld [vmem:[%s10602_s3 + $0x840] sm:$0xff] }
 0x3a7   :  { %v1969_v55 = vunpack.c.h.bf16 %v8836_v43 }
 0x3a8   :  { %1834 = vmatpush.msrb.mxu0 %v1719_v28  ;;  %v8843_v28 = vld [vmem:[%s10602_s3 + $0x838] sm:$0xff] }
 0x3aa   :  { %1835 = vmatpush.msrb.mxu0 %v1717_v22  ;;  %v8857_v22 = vld [vmem:[%s10602_s3 + $0x828] sm:$0xff] }
 0x3ab   :  { %1836 = vmatmul.f32.vlgmr.msrb.gmra.mxu0 %v8675_v52 }
 0x3ac   :  { %2016 = vmatpush.msra.mxu0 %v1982_v13  ;;  %v1962_v13 = vunpack.c.l.bf16 %v8857_v22 }
 0x3ae   :  { %2017 = vmatpush.msra.mxu0 %v1980_v26  ;;  %v8871_v26 = vld [vmem:[%s10602_s3 + $0x818] sm:$0xff] }
 0x3b0   :  { %2018 = vmatpush.msra.mxu0 %v1978_v3  ;;  %v8878_v3 = vld [vmem:[%s10602_s3 + $0x810] sm:$0xff] }
 0x3b2   :  { %2019 = vmatpush.msra.mxu0 %v1976_v2 }
 0x3b4   :  { %2020 = vmatpush.msra.mxu0 %v1974_v59  ;;  %v1749_v59 = vunpack.c.h.bf16 %v8749_v8  ;;  %v8907_v8 = vld [vmem:[%s10604_s1 + $0x70] sm:$0xff] }
 0x3b6   :  { %2021 = vmatpush.msra.mxu0 %v1972_v53  ;;  %v8897_v53 = vld [vmem:[%s10602_s3 + $0x8f0] sm:$0xff] }
 0x3da   :  { %v8762_v19 = vpop.f32.mrf.mxu3 }
 0x3e2   :  { %v8771_v44 = vpop.f32.mrf.mxu3 }
 0x3e3   :  { %10618 = vst [vmem:[#allocation5_spill] sm:$0xff] %v8771_v44 }
 0x3f4   :  { %v9013_v1 = vpop.f32.mrf.mxu0 }
 0x3f7   :  { %v1797_v2 = vpop.f32.mrf.mxu2 }
 0x3fa   :  { %v1621_v27 = vpop.f32.mrf.mxu3 }
 0x3fb   :  { %v1622_v38 = vadd.f32 %v1621_v27, %v1601_v21  ;;  %v1968_v21 = vunpack.c.l.bf16 %v8836_v43  ;;  %v1966_v27 = vunpack.c.l.bf16 %v8843_v28  ;;  %v1957_v43 = vunpack.c.h.bf16 %v8878_v3 }
 0x3fc   :  { %v9022_v4 = vpop.f32.mrf.mxu0 }
 0x3fd   :  { %1671 = vmatpush.msra.mxu1 %v1622_v38  ;;  %v8850_v38 = vld [vmem:[%s10602_s3 + $0x830] sm:$0xff] }
 0x3fe   :  { %5452 = vmatmul.msk.f32.vlgmr.msra.gmra.mxu1 %vm398_vm0, %v8643_v56  ;;  %v1773_v56 = vunpack.c.h.bf16 %v8664_v35  ;;  %v1769_v35 = vunpack.c.h.bf16 %v8682_v47  ;;  %v8829_v47 = vld [vmem:[%s10602_s3 + $0x848] sm:$0xff] }
 0x3ff   :  { %1840 = vmatpush.msrb.mxu1 %v1779_v16  ;;  %v1964_v16 = vunpack.c.l.bf16 %v8850_v38 }
 0x401   :  { %1841 = vmatpush.msrb.mxu1 %v1777_v61  ;;  %v8864_v61 = vld [vmem:[%s10602_s3 + $0x820] sm:$0xff] }
 0x403   :  { %1842 = vmatpush.msrb.mxu1 %v1775_v41  ;;  %v1960_v41 = vunpack.c.l.bf16 %v8864_v61 }
 0x405   :  { %1843 = vmatpush.msrb.mxu1 %v1773_v56  ;;  %v1958_v56 = vunpack.c.l.bf16 %v8871_v26 }
 0x406   :  { %5453 = vmatmul.msk.f32.gmra.mxu1 %vm398_vm0, %v8687_v30  ;;  %v1970_v30 = vunpack.c.l.bf16 %v8829_v47 }
 0x407   :  { %1844 = vmatpush.msrb.mxu1 %v1771_v39  ;;  %v1956_v39 = vunpack.c.l.bf16 %v8878_v3 }
 0x408   :  { %2022 = vmatpush.msra.mxu0 %v1970_v30 }
 0x409   :  { %1845 = vmatpush.msrb.mxu1 %v1769_v35  ;;  %v8885_v35 = vld [vmem:[%s10602_s3 + $0x8f8] sm:$0xff] }
 0x40a   :  { %2023 = vmatpush.msra.mxu0 %v1968_v21 }
 0x40b   :  { %1846 = vmatpush.msrb.mxu1 %v1767_v31 }
 0x40c   :  { %2024 = vmatpush.msra.mxu0 %v1966_v27  ;;  %v2012_v27 = vunpack.c.l.bf16 %v8897_v53 }
 0x40d   :  { %1847 = vmatpush.msrb.mxu1 %v1765_v23  ;;  %v8902_v23 = vld [vmem:[%s10602_s3 + $0x800] sm:$0xff] }
 0x40e   :  { %2025 = vmatpush.msra.mxu0 %v1964_v16  ;;  %v1952_v21 = vunpack.c.l.bf16 %v8902_v23 }
 0x40f   :  { %1848 = vmatpush.msrb.mxu1 %v1763_v20  ;;  %v2014_v20 = vunpack.c.l.bf16 %v8885_v35 }
 0x410   :  { %2026 = vmatpush.msra.mxu0 %v1962_v13 }
 0x411   :  { %1849 = vmatpush.msrb.mxu1 %v1761_v36  ;;  %v8914_v36 = vld [vmem:[%s10602_s3 + $0x8e8] sm:$0xff] }
 0x412   :  { %2027 = vmatpush.msra.mxu0 %v1960_v41  ;;  %v2010_v16 = vunpack.c.l.bf16 %v8914_v36  ;;  %v8941_v41 = vld [vmem:[%s10604_s1 + $0x78] sm:$0xff] }
 0x413   :  { %1850 = vmatpush.msrb.mxu1 %v1759_v29  ;;  %v8923_v29 = vld [vmem:[%s10602_s3 + $0x8e0] sm:$0xff] }
 0x414   :  { %2028 = vmatpush.msra.mxu0 %v1958_v56  ;;  %v2008_v13 = vunpack.c.l.bf16 %v8923_v29  ;;  %v8947_v56 = vld [vmem:[%s10602_s3 + $0x8c8] sm:$0xff]  ;;  %v2009_v3 = vunpack.c.h.bf16 %v8923_v29 }
 0x415   :  { %1851 = vmatpush.msrb.mxu1 %v1757_v63  ;;  %v8929_v63 = vld [vmem:[%s10602_s3 + $0x8d8] sm:$0xff] }
 0x416   :  { %2029 = vmatpush.msra.mxu0 %v1956_v39  ;;  %v8955_v39 = vld [vmem:[%s10602_s3 + $0x8c0] sm:$0xff] }
 0x417   :  { %1852 = vmatpush.msrb.mxu1 %v1755_v62  ;;  %v8936_v62 = vld [vmem:[%s10602_s3 + $0x8d0] sm:$0xff] }
 0x418   :  { %2030 = vmatpush.msra.mxu0 %v1954_v51  ;;  %v2000_v51 = vunpack.c.l.bf16 %v8955_v39 }
 0x419   :  { %1853 = vmatpush.msrb.mxu1 %v1753_v50  ;;  %v2006_v50 = vunpack.c.l.bf16 %v8929_v63 }
 0x41a   :  { %v1817_v31 = vpop.f32.mrf.mxu3  ;;  %2031 = vmatpush.msra.mxu0 %v1952_v21 }
 0x41b   :  { %v1818_v30 = vadd.f32 %v1817_v31, %v1797_v2  ;;  %1854 = vmatpush.msrb.mxu1 %v1751_v0  ;;  %2032 = vmatmul.f32.vlgmr.msra.gmra.mxu0 %v8675_v52  ;;  %v2004_v0 = vunpack.c.l.bf16 %v8936_v62  ;;  %v2002_v2 = vunpack.c.l.bf16 %v8947_v56  ;;  %v8967_v31 = vld [vmem:[%s10602_s3 + $0x8b0] sm:$0xff] }
 0x41c   :  { %v1996_v21 = vunpack.c.l.bf16 %v8967_v31  ;;  %v1997_v29 = vunpack.c.h.bf16 %v8967_v31 }
 0x41d   :  { %1855 = vmatpush.msrb.mxu1 %v1749_v59  ;;  %1884 = vmatpush.msrb.mxu2 %v1818_v30  ;;  %v8961_v59 = vld [vmem:[%s10602_s3 + $0x8b8] sm:$0xff] }
 0x41e   :  { %1856 = vmatmul.f32.vlgmr.msrb.gmra.mxu1 %v8656_v45  ;;  %5488 = vmatmul.msk.f32.vlgmr.msrb.gmra.mxu2 %vm398_vm0, %v8907_v8  ;;  %v1998_v30 = vunpack.c.l.bf16 %v8961_v59 }
 0x41f   :  { %2036 = vmatpush.msra.mxu1 %v2014_v20  ;;  %v8973_v20 = vld [vmem:[%s10602_s3 + $0x8a8] sm:$0xff]  ;;  %2056 = vmatpush.msra.mxu2 %v1983_v57  ;;  %v1971_v57 = vunpack.c.h.bf16 %v8829_v47  ;;  %v1959_v47 = vunpack.c.h.bf16 %v8871_v26  ;;  %v2011_v26 = vunpack.c.h.bf16 %v8914_v36  ;;  %v1999_v36 = vunpack.c.h.bf16 %v8961_v59 }
 0x421   :  { %2037 = vmatpush.msra.mxu1 %v2012_v27  ;;  %v8979_v27 = vld [vmem:[%s10602_s3 + $0x8a0] sm:$0xff] }
 0x423   :  { %2038 = vmatpush.msra.mxu1 %v2010_v16  ;;  %v1994_v16 = vunpack.c.l.bf16 %v8973_v20 }
 0x425   :  { %2039 = vmatpush.msra.mxu1 %v2008_v13  ;;  %v8985_v13 = vld [vmem:[%s10602_s3 + $0x898] sm:$0xff] }
 0x426   :  { %5489 = vmatmul.msk.f32.gmra.mxu2 %vm398_vm0, %v8941_v41 }
 0x427   :  { %2040 = vmatpush.msra.mxu1 %v2006_v50  ;;  %v1992_v50 = vunpack.c.l.bf16 %v8979_v27 }
 0x429   :  { %2041 = vmatpush.msra.mxu1 %v2004_v0  ;;  %v8991_v0 = vld [vmem:[%s10602_s3 + $0x890] sm:$0xff] }
 0x42b   :  { %2042 = vmatpush.msra.mxu1 %v2002_v2  ;;  %v1990_v2 = vunpack.c.l.bf16 %v8985_v13 }
 0x42d   :  { %2043 = vmatpush.msra.mxu1 %v2000_v51  ;;  %v8997_v51 = vld [vmem:[%s10602_s3 + $0x888] sm:$0xff] }
 0x42e   :  { %v1986_v44 = vunpack.c.l.bf16 %v8997_v51  ;;  %v1987_v59 = vunpack.c.h.bf16 %v8997_v51  ;;  %v475_v51 = vadd.f32 %v7756_v10, %v7778_v25 }
 0x42f   :  { %2044 = vmatpush.msra.mxu1 %v1998_v30  ;;  %v1988_v30 = vunpack.c.l.bf16 %v8991_v0 }
 0x431   :  { %2045 = vmatpush.msra.mxu1 %v1996_v21  ;;  %v9003_v21 = vld [vmem:[%s10602_s3 + $0x880] sm:$0xff] }
 0x433   :  { %2046 = vmatpush.msra.mxu1 %v1994_v16  ;;  %v1984_v16 = vunpack.c.l.bf16 %v9003_v21 }
 0x435   :  { %2047 = vmatpush.msra.mxu1 %v1992_v50  ;;  %v1981_v50 = vunpack.c.h.bf16 %v8792_v34  ;;  %v1965_v34 = vunpack.c.h.bf16 %v8850_v38  ;;  %v1955_v38 = vunpack.c.h.bf16 %v8890_v9  ;;  %v2005_v9 = vunpack.c.h.bf16 %v8936_v62 }
 0x436   :  { %v1995_v62 = vunpack.c.h.bf16 %v8973_v20  ;;  %v5524_v20 = vld [vmem:[%s10604_s1 + $0x80] sm:$0xff] }
 0x437   :  { %2048 = vmatpush.msra.mxu1 %v1990_v2  ;;  %2057 = vmatpush.msra.mxu2 %v1981_v50  ;;  %v1977_v2 = vunpack.c.h.bf16 %v8806_v6  ;;  %v1963_v6 = vunpack.c.h.bf16 %v8857_v22  ;;  %v1953_v22 = vunpack.c.h.bf16 %v8902_v23  ;;  %v7035_v23 = vmov 0  }
 0x438   :  { %6994 = vset.pattern.permute.xlu0 %v7035_v23  ;;  %6995 = vset.pattern.permute.xlu1 %v7035_v23 }
 0x439   :  { %2049 = vmatpush.msra.mxu1 %v1988_v30  ;;  %2058 = vmatpush.msra.mxu2 %v1979_v11  ;;  %v1975_v30 = vunpack.c.h.bf16 %v8813_v54  ;;  %v1967_v11 = vunpack.c.h.bf16 %v8843_v28  ;;  %v1837_v28 = vpop.f32.mrf.mxu0 }
 0x43a   :  { %6996 = vset.pattern.permute.xlu2 %v7035_v23 }
 0x43b   :  { %2050 = vmatpush.msra.mxu1 %v1986_v44  ;;  %2059 = vmatpush.msra.mxu2 %v1977_v2  ;;  %v1973_v44 = vunpack.c.h.bf16 %v8822_v17  ;;  %v1961_v17 = vunpack.c.h.bf16 %v8864_v61  ;;  %v2013_v61 = vunpack.c.h.bf16 %v8897_v53  ;;  %v2155_v53 = vld [vmem:[%s10605_s2] sm:$0xff] }
 0x43c   :  { %2159 = vperm.xlu0 %6994, %v2155_v53  }
 0x43d   :  { %2051 = vmatpush.msra.mxu1 %v1984_v16  ;;  %2060 = vmatpush.msra.mxu2 %v1975_v30  ;;  %v2015_v30 = vunpack.c.h.bf16 %v8885_v35  ;;  %v2007_v35 = vunpack.c.h.bf16 %v8929_v63  ;;  %v2156_v63 = vld [vmem:[%s10605_s2 + $0x8] sm:$0xff] }
 0x43e   :  { %2052 = vmatmul.f32.vlgmr.msra.gmra.mxu1 %v8656_v45 }
 0x43f   :  { %2061 = vmatpush.msra.mxu2 %v1973_v44  ;;  %v1985_v44 = vunpack.c.h.bf16 %v9003_v21 }
 0x441   :  { %2062 = vmatpush.msra.mxu2 %v1971_v57 }
 0x443   :  { %2063 = vmatpush.msra.mxu2 %v1969_v55 }
 0x444   :  { %2164 = vperm.xlu0 %6994, %v2156_v63  }
 0x445   :  { %2064 = vmatpush.msra.mxu2 %v1967_v11  ;;  %v735_v11 = vadd.f32 %v8000_v49, %v475_v51  ;;  %v6839_v51 = vld [vmem:[%s10608_s6 + $0xf0] sm:$0xff]  }
 0x447   :  { %2065 = vmatpush.msra.mxu2 %v1965_v34  ;;  %v971_v34 = vadd.f32 %v8241_v14, %v735_v11 }
 0x449   :  { %2066 = vmatpush.msra.mxu2 %v1963_v6  ;;  %v1207_v6 = vadd.f32 %v8495_v48, %v971_v34  ;;  %v6830_v34 = vld [vmem:[%s10608_s6 + $0xa8] sm:$0xff]  }
 0x44b   :  { %2067 = vmatpush.msra.mxu2 %v1961_v17  ;;  %v478_v17 = vadd.f32 %v7760_v46, %v7789_v58 }
 0x44d   :  { %2068 = vmatpush.msra.mxu2 %v1959_v47  ;;  %v1443_v47 = vadd.f32 %v8759_v12, %v1207_v6  ;;  %v737_v10 = vadd.f32 %v8004_v32, %v478_v17  ;;  %v6816_v6 = vld [vmem:[%s10608_s6 + $0x38] sm:$0xff]  }
 0x44e   :  { %v6824_v17 = vld [vmem:[%s10608_s6 + $0x78] sm:$0xff]  }
 0x44f   :  { %2069 = vmatpush.msra.mxu2 %v1957_v43  ;;  %v1679_v25 = vadd.f32 %v9013_v1, %v1443_v47 }
 0x451   :  { %2070 = vmatpush.msra.mxu2 %v1955_v38 }
 0x453   :  { %2071 = vmatpush.msra.mxu2 %v1953_v22 }
 0x454   :  { %2072 = vmatmul.f32.vlgmr.msra.gmra.mxu2 %v8675_v52  ;;  %v2003_v52 = vunpack.c.h.bf16 %v8947_v56  ;;  %v1991_v56 = vunpack.c.h.bf16 %v8985_v13  ;;  %v3676_v13 = vld [vmem:[%s10606_s5] sm:$0xff] }
 0x455   :  { %3682 = vperm.xlu0 %6994, %v3676_v13  }
 0x47b   :  { %v9016_v16 = vpop.f32.mrf.mxu1 }
 0x483   :  { %v9025_v54 = vpop.f32.mrf.mxu1 }
 0x498   :  { %v2033_v31 = vpop.f32.mrf.mxu0 }
 0x49b   :  { %v1857_v50 = vpop.f32.mrf.mxu1 }
 0x49c   :  { %v1858_v2 = vadd.f32 %v1857_v50, %v1837_v28  ;;  %v973_v50 = vadd.f32 %v8250_v18, %v737_v10  ;;  %v6213_v10 = vunpack.c.h.bf16 %v6839_v51 }
 0x49e   :  { %1907 = vmatpush.msrb.mxu3 %v1858_v2  ;;  %v1209_v14 = vadd.f32 %v8504_v5, %v973_v50  ;;  %v6177_v50 = vunpack.c.h.bf16 %v6830_v34 }
 0x49f   :  { %5490 = vmatmul.msk.f32.vlgmr.msrb.gmra.mxu3 %vm398_vm0, %v8907_v8  ;;  %v2001_v8 = vunpack.c.h.bf16 %v8955_v39  ;;  %v1989_v39 = vunpack.c.h.bf16 %v8991_v0 }
 0x4a0   :  { %2076 = vmatpush.msra.mxu3 %v2015_v30  ;;  %v1445_v48 = vadd.f32 %v8768_v60, %v1209_v14  ;;  %v498_v60 = vadd.f32 %v7758_v15, %v7780_v24  ;;  %v10621_v15 = vld [vmem:[#allocation4_spill] sm:$0xff] }
 0x4a1   :  { %v1886_v0 = vpop.f32.mrf.mxu2  ;;  %v9164_v14 = vld [vmem:[%s10608_s6 + $0x70] sm:$0xff]  }
 0x4a2   :  { %2077 = vmatpush.msra.mxu3 %v2013_v61  ;;  %v1915_v49 = vadd.f32 %v1886_v0, %v1679_v25  ;;  %v1681_v58 = vadd.f32 %v9022_v4, %v1445_v48  ;;  %v736_v4 = vadd.f32 %v7998_v40, %v498_v60  ;;  %v6840_v0 = vld [vmem:[%s10608_s6 + $0xf8] sm:$0xff]   ;;  %v6838_v25 = vld [vmem:[%s10608_s6 + $0xe8] sm:$0xff]   ;;  %v6120_v48 = vunpack.c.l.bf16 %v6816_v6 }
 0x4a3   :  { %v6216_v11 = vunpack.c.l.bf16 %v6840_v0  ;;  %v6208_v60 = vunpack.c.l.bf16 %v6838_v25 }
 0x4a4   :  { %2078 = vmatpush.msra.mxu3 %v2011_v26 }
 0x4a6   :  { %2079 = vmatpush.msra.mxu3 %v2009_v3  ;;  %v972_v3 = vadd.f32 %v8244_v37, %v736_v4  ;;  %v6828_v4 = vld [vmem:[%s10608_s6 + $0x98] sm:$0xff]  }
 0x4a7   :  { %5491 = vmatmul.msk.f32.gmra.mxu3 %vm398_vm0, %v8941_v41  ;;  %v1993_v41 = vunpack.c.h.bf16 %v8979_v27  ;;  %v5525_v27 = vld [vmem:[%s10604_s1 + $0x88] sm:$0xff] }
 0x4a8   :  { %2080 = vmatpush.msra.mxu3 %v2007_v35  ;;  %v1208_v35 = vadd.f32 %v8498_v42, %v972_v3 }
 0x4a9   :  { %v1889_v43 = vpop.f32.mrf.mxu2 }
 0x4aa   :  { %2081 = vmatpush.msra.mxu3 %v2005_v9  ;;  %v1917_v32 = vadd.f32 %v1889_v43, %v1681_v58  ;;  %v501_v9 = vadd.f32 %v7762_v7, %v7791_v33  ;;  %v1444_v53 = vadd.f32 %v8762_v19, %v1208_v35 }
 0x4ac   :  { %2082 = vmatpush.msra.mxu3 %v2003_v52  ;;  %v10619_v52 = vld [vmem:[#allocation2_spill] sm:$0xff] }
 0x4ad   :  { %v738_v23 = vadd.f32 %v10619_v52, %v501_v9 }
 0x4ae   :  { %2083 = vmatpush.msra.mxu3 %v2001_v8  ;;  %v2160_v38 = vpop.permute.xlu0 %2159  ;;  %v1680_v8 = vadd.f32 %v9016_v16, %v1444_v53  ;;  %v6836_v53 = vld [vmem:[%s10608_s6 + $0xd8] sm:$0xff]  }
 0x4b0   :  { %2084 = vmatpush.msra.mxu3 %v1999_v36  ;;  %v10620_v36 = vld [vmem:[#allocation3_spill] sm:$0xff] }
 0x4b2   :  { %2085 = vmatpush.msra.mxu3 %v1997_v29  ;;  %v974_v29 = vadd.f32 %v10620_v36, %v738_v23  ;;  %v6169_v23 = vunpack.c.h.bf16 %v6828_v4 }
 0x4b4   :  { %2086 = vmatpush.msra.mxu3 %v1995_v62  ;;  %v1210_v24 = vadd.f32 %v10621_v15, %v974_v29  ;;  %v6827_v29 = vld [vmem:[%s10608_s6 + $0x90] sm:$0xff]  }
 0x4b6   :  { %2087 = vmatpush.msra.mxu3 %v1993_v41  ;;  %v2165_v61 = vpop.permute.xlu0 %2164  ;;  %v10622_v41 = vld [vmem:[#allocation5_spill] sm:$0xff] }
 0x4b7   :  { %v1446_v37 = vadd.f32 %v10622_v41, %v1210_v24  ;;  %v6200_v41 = vunpack.c.l.bf16 %v6836_v53 }
 0x4b8   :  { %2088 = vmatpush.msra.mxu3 %v1991_v56 }
 0x4b9   :  { %v1682_v42 = vadd.f32 %v9025_v54, %v1446_v37 }
 0x4ba   :  { %2089 = vmatpush.msra.mxu3 %v1989_v39 }
 0x4bb   :  { %v2053_v57 = vpop.f32.mrf.mxu1 }
 0x4bc   :  { %v2054_v55 = vadd.f32 %v2053_v57, %v2033_v31  ;;  %2090 = vmatpush.msra.mxu3 %v1987_v59  ;;  %v7036_v59 = vmov 256.0   ;;  %v6832_v57 = vld [vmem:[%s10608_s6 + $0xb8] sm:$0xff]  }
 0x4bd   :  { %6997 = vrcp.f32 %v7036_v59  ;;  %v6184_v13 = vunpack.c.l.bf16 %v6832_v57 }
 0x4be   :  { %2091 = vmatpush.msra.mxu3 %v1985_v44  ;;  %2120 = vmatpush.msrb.mxu0 %v2054_v55  ;;  %v6831_v55 = vld [vmem:[%s10608_s6 + $0xb0] sm:$0xff]  }
 0x4bf   :  { %2092 = vmatmul.f32.vlgmr.msra.gmra.mxu3 %v8656_v45  ;;  %5526 = vmatmul.msk.f32.vlgmr.msrb.gmra.mxu0 %vm398_vm0, %v5524_v20  ;;  %v3679_v45 = vld [vmem:[%s10606_s5 + $0x18] sm:$0xff]  ;;  %v6180_v43 = vunpack.c.l.bf16 %v6831_v55 }
 0x4c0   :  { %3697 = vperm.xlu0 %6994, %v3679_v45   ;;  %v6181_v45 = vunpack.c.h.bf16 %v6831_v55  ;;  %v6848_v55 = vld [vmem:[%s10608_s6 + $0x138] sm:$0xff]  }
 0x4c3   :  { %v6998_v31 = vpop.eup %6997 }
 0x4c4   :  { %v2182_v44 = vmul.f32 256.0, %v6998_v31  ;;  %vm2186_vm1 = vweird.f32 %v6998_v31 }
 0x4c7   :  { %5527 = vmatmul.msk.f32.gmra.mxu0 %vm398_vm0, %v5525_v27 }
 0x4d7   :  { %v2073_v46 = vpop.f32.mrf.mxu2 }
 0x522   :  { %v1909_v21 = vpop.f32.mrf.mxu3 }
 0x523   :  { %v1916_v63 = vadd.f32 %v1909_v21, %v1680_v8  ;;  %v6217_v21 = vunpack.c.h.bf16 %v6840_v0 }
 0x52a   :  { %v1912_v28 = vpop.f32.mrf.mxu3 }
 0x52b   :  { %v1918_v33 = vadd.f32 %v1912_v28, %v1682_v42  ;;  %v6121_v28 = vunpack.c.h.bf16 %v6816_v6  ;;  %v6148_v6 = vunpack.c.l.bf16 %v9164_v14 }
 0x52d   :  { %2300 = vmatpush.msrb.mxu2 %v6121_v28 }
 0x52f   :  { %2301 = vmatpush.msrb.mxu2 %v6120_v48 }
 0x53c   :  { %v2122_v2 = vpop.f32.mrf.mxu0 }
 0x53d   :  { %v2151_v30 = vadd.f32 %v2122_v2, %v1915_v49  ;;  %v6212_v49 = vunpack.c.l.bf16 %v6839_v51  ;;  %v6153_v2 = vunpack.c.h.bf16 %v6824_v17  ;;  %v6835_v51 = vld [vmem:[%s10608_s6 + $0xd0] sm:$0xff]  }
 0x53f   :  { %v9087_v22 = vadd.f32 %v2160_v38, %v2151_v30  ;;  %v6829_v30 = vld [vmem:[%s10608_s6 + $0xa0] sm:$0xff]   ;;  %2323 = vmatpush.msrb.mxu3 %v6153_v2 }
 0x540   :  { %v6172_v35 = vunpack.c.l.bf16 %v6829_v30 }
 0x541   :  { %2171 = vst [vmem:[%s10607_s10] sm:$0xff] %v9087_v22 }
 0x542   :  { %v2093_v1 = vpop.f32.mrf.mxu3 }
 0x543   :  { %v2094_v18 = vadd.f32 %v2093_v1, %v2073_v46  ;;  %v6152_v46 = vunpack.c.l.bf16 %v6824_v17  ;;  %v6176_v1 = vunpack.c.l.bf16 %v6830_v34  ;;  %v6196_v17 = vunpack.c.l.bf16 %v6835_v51 }
 0x544   :  { %v2125_v12 = vpop.f32.mrf.mxu0 }
 0x545   :  { %v2153_v26 = vadd.f32 %v2125_v12, %v1917_v32  ;;  %2143 = vmatpush.msrb.mxu1 %v2094_v18  ;;  %v6209_v32 = vunpack.c.h.bf16 %v6838_v25  ;;  %v6837_v12 = vld [vmem:[%s10608_s6 + $0xe0] sm:$0xff]   ;;  %2324 = vmatpush.msrb.mxu3 %v6152_v46 }
 0x546   :  { %5528 = vmatmul.msk.f32.vlgmr.msrb.gmra.mxu1 %vm398_vm0, %v5524_v20  ;;  %v2183_v20 = vsub.f32 1.0, %v2182_v44  ;;  %v6205_v9 = vunpack.c.h.bf16 %v6837_v12  ;;  %v6204_v8 = vunpack.c.l.bf16 %v6837_v12  ;;  %v6833_v12 = vld [vmem:[%s10608_s6 + $0xc0] sm:$0xff]  }
 0x547   :  { %v9095_v5 = vadd.f32 %v2165_v61, %v2153_v26  ;;  %2438 = vmatpush.msra.mxu1 %v6217_v21  ;;  %v6173_v26 = vunpack.c.h.bf16 %v6829_v30  ;;  %v6197_v21 = vunpack.c.h.bf16 %v6835_v51 }
 0x548   :  { %v2184_v47 = vmul.f32 %v6998_v31, %v2183_v20 }
 0x549   :  { %2173 = vst [vmem:[%s10607_s10 + $0x10] sm:$0xff] %v9095_v5  ;;  %2439 = vmatpush.msra.mxu1 %v6216_v11 }
 0x54a   :  { %v2185_v58 = vadd.f32 %v6998_v31, %v2184_v47 }
 0x54b   :  { %2440 = vmatpush.msra.mxu1 %v6213_v10  ;;  %v6822_v10 = vld [vmem:[%s10608_s6 + $0x68] sm:$0xff]  }
 0x54c   :  { %v9177_v3 = vsel %vm2186_vm1, %v6998_v31, %v2185_v58  ;;  %v6145_v28 = vunpack.c.h.bf16 %v6822_v10  ;;  %v6144_v30 = vunpack.c.l.bf16 %v6822_v10  ;;  %v6813_v58 = vld [vmem:[%s10608_s6 + $0x20] sm:$0xff]  }
 0x54d   :  { %2441 = vmatpush.msra.mxu1 %v6212_v49  ;;  %v6091_v10 = vld [vmem:[%s10608_s6] sm:$0xff]  }
 0x54e   :  { %5529 = vmatmul.msk.f32.gmra.mxu1 %vm398_vm0, %v5525_v27  ;;  %v6185_v27 = vunpack.c.h.bf16 %v6832_v57 }
 0x54f   :  { %2442 = vmatpush.msra.mxu1 %v6209_v32  ;;  %v6109_v32 = vunpack.c.h.bf16 %v6813_v58 }
 0x550   :  { %2415 = vmatpush.msra.mxu0 %v6185_v27 }
 0x551   :  { %2443 = vmatpush.msra.mxu1 %v6208_v60 }
 0x552   :  { %2416 = vmatpush.msra.mxu0 %v6184_v13 }
 0x553   :  { %2444 = vmatpush.msra.mxu1 %v6205_v9  ;;  %v6188_v9 = vunpack.c.l.bf16 %v6833_v12 }
 0x554   :  { %2417 = vmatpush.msra.mxu0 %v6181_v45  ;;  %v6847_v45 = vld [vmem:[%s10608_s6 + $0x130] sm:$0xff]  }
 0x555   :  { %2445 = vmatpush.msra.mxu1 %v6204_v8  ;;  %v6245_v11 = vunpack.c.h.bf16 %v6847_v45  ;;  %v6244_v47 = vunpack.c.l.bf16 %v6847_v45  ;;  %v6856_v8 = vld [vmem:[%s10608_s6 + $0x178] sm:$0xff]  }
 0x556   :  { %2418 = vmatpush.msra.mxu0 %v6180_v43  ;;  %v6814_v43 = vld [vmem:[%s10608_s6 + $0x28] sm:$0xff]  }
 0x557   :  { %v6113_v25 = vunpack.c.h.bf16 %v6814_v43 }
 0x558   :  { %2419 = vmatpush.msra.mxu0 %v6177_v50  ;;  %v6846_v50 = vld [vmem:[%s10608_s6 + $0x128] sm:$0xff]  }
 0x559   :  { %v6241_v2 = vunpack.c.h.bf16 %v6846_v50  ;;  %v6240_v46 = vunpack.c.l.bf16 %v6846_v50 }
 0x55a   :  { %2420 = vmatpush.msra.mxu0 %v6176_v1  ;;  %v6821_v1 = vld [vmem:[%s10608_s6 + $0x60] sm:$0xff]  }
 0x55c   :  { %2421 = vmatpush.msra.mxu0 %v6173_v26  ;;  %v6189_v26 = vunpack.c.h.bf16 %v6833_v12  ;;  %v6851_v12 = vld [vmem:[%s10608_s6 + $0x150] sm:$0xff]  }
 0x55e   :  { %2422 = vmatpush.msra.mxu0 %v6172_v35  ;;  %v6140_v35 = vunpack.c.l.bf16 %v6821_v1 }
 0x560   :  { %2423 = vmatpush.msra.mxu0 %v6169_v23  ;;  %v6820_v23 = vld [vmem:[%s10608_s6 + $0x58] sm:$0xff]  }
 0x5c3   :  { %v2145_v62 = vpop.f32.mrf.mxu1 }
 0x5c4   :  { %v2152_v40 = vadd.f32 %v2145_v62, %v1916_v63  ;;  %v6168_v63 = vunpack.c.l.bf16 %v6828_v4  ;;  %v6201_v62 = vunpack.c.h.bf16 %v6836_v53  ;;  %v6108_v4 = vunpack.c.l.bf16 %v6813_v58 }
 0x5c6   :  { %v9115_v56 = vadd.f32 %v2160_v38, %v2152_v40  ;;  %v9159_v38 = vld [vmem:[%s10608_s6 + $0x30] sm:$0xff]   ;;  %v6165_v40 = vunpack.c.h.bf16 %v6827_v29  ;;  %2424 = vmatpush.msra.mxu0 %v6168_v63  ;;  %2446 = vmatpush.msra.mxu1 %v6201_v62  ;;  %v6281_v63 = vunpack.c.h.bf16 %v6856_v8  ;;  %v6844_v62 = vld [vmem:[%s10608_s6 + $0x118] sm:$0xff]  }
 0x5c7   :  { %v6117_v18 = vunpack.c.h.bf16 %v9159_v38  ;;  %v6116_v34 = vunpack.c.l.bf16 %v9159_v38  ;;  %v6834_v38 = vld [vmem:[%s10608_s6 + $0xc8] sm:$0xff]  }
 0x5c8   :  { %2172 = vst [vmem:[%s10607_s10 + $0x8] sm:$0xff] %v9115_v56  ;;  %v2175_v7 = vadd.f32 %v9115_v56, %v9087_v22  ;;  %2425 = vmatpush.msra.mxu0 %v6165_v40  ;;  %2447 = vmatpush.msra.mxu1 %v6200_v41  ;;  %v6193_v49 = vunpack.c.h.bf16 %v6834_v38  ;;  %v6192_v48 = vunpack.c.l.bf16 %v6834_v38  ;;  %v6233_v40 = vunpack.c.h.bf16 %v6844_v62 }
 0x5c9   :  { %2302 = vmatpush.msrb.mxu2 %v6117_v18  ;;  %v6141_v18 = vunpack.c.h.bf16 %v6821_v1  ;;  %v6093_v38 = vunpack.c.h.bf16 %v6091_v10  ;;  %v6852_v1 = vld [vmem:[%s10608_s6 + $0x158] sm:$0xff]  }
 0x5ca   :  { %2176 = vadd.xlane.f32.xlu1 %v2175_v7  ;;  %v6826_v7 = vld [vmem:[%s10608_s6 + $0x88] sm:$0xff]   ;;  %2448 = vmatpush.msra.mxu1 %v6197_v21 }
 0x5cb   :  { %v2148_v19 = vpop.f32.mrf.mxu1  ;;  %v6160_v59 = vunpack.c.l.bf16 %v6826_v7  ;;  %2303 = vmatpush.msrb.mxu2 %v6116_v34 }
 0x5cc   :  { %v2154_v16 = vadd.f32 %v2148_v19, %v1918_v33  ;;  %v6161_v19 = vunpack.c.h.bf16 %v6826_v7  ;;  %2449 = vmatpush.msra.mxu1 %v6196_v17  ;;  %v6232_v7 = vunpack.c.l.bf16 %v6844_v62 }
 0x5cd   :  { %2304 = vmatpush.msrb.mxu2 %v6113_v25  ;;  %v6817_v25 = vld [vmem:[%s10608_s6 + $0x40] sm:$0xff]  }
 0x5ce   :  { %v9124_v39 = vadd.f32 %v2165_v61, %v2154_v16  ;;  %v6149_v61 = vunpack.c.h.bf16 %v9164_v14  ;;  %v6112_v14 = vunpack.c.l.bf16 %v6814_v43  ;;  %2450 = vmatpush.msra.mxu1 %v6193_v49  ;;  %v6125_v50 = vunpack.c.h.bf16 %v6817_v25 }
 0x5d0   :  { %2174 = vst [vmem:[%s10607_s10 + $0x18] sm:$0xff] %v9124_v39  ;;  %v2178_v54 = vadd.f32 %v9124_v39, %v9095_v5  ;;  %2325 = vmatpush.msrb.mxu3 %v6149_v61  ;;  %2305 = vmatpush.msrb.mxu2 %v6112_v14  ;;  %v6845_v61 = vld [vmem:[%s10608_s6 + $0x120] sm:$0xff]  }
 0x5d1   :  { %2451 = vmatpush.msra.mxu1 %v6192_v48  ;;  %v6237_v60 = vunpack.c.h.bf16 %v6845_v61  ;;  %v6236_v53 = vunpack.c.l.bf16 %v6845_v61  ;;  %v6124_v48 = vunpack.c.l.bf16 %v6817_v25  ;;  %v6261_v61 = vunpack.c.h.bf16 %v6851_v12 }
 0x5d2   :  { %2179 = vadd.xlane.f32.xlu1 %v2178_v54  ;;  %v6825_v54 = vld [vmem:[%s10608_s6 + $0x80] sm:$0xff]   ;;  %2326 = vmatpush.msrb.mxu3 %v6148_v6 }
 0x5d3   :  { %v6157_v57 = vunpack.c.h.bf16 %v6825_v54  ;;  %v6156_v13 = vunpack.c.l.bf16 %v6825_v54  ;;  %2306 = vmatpush.msrb.mxu2 %v6109_v32  ;;  %2452 = vmatpush.msra.mxu1 %v6189_v26  ;;  %v6265_v32 = vunpack.c.h.bf16 %v6852_v1 }
 0x5d4   :  { %2327 = vmatpush.msrb.mxu3 %v6145_v28  ;;  %v6853_v28 = vld [vmem:[%s10608_s6 + $0x160] sm:$0xff]  }
 0x5d5   :  { %2307 = vmatpush.msrb.mxu2 %v6108_v4  ;;  %2453 = vmatpush.msra.mxu1 %v6188_v9  ;;  %v6269_v49 = vunpack.c.h.bf16 %v6853_v28  ;;  %v6260_v4 = vunpack.c.l.bf16 %v6851_v12  ;;  %v6850_v9 = vld [vmem:[%s10608_s6 + $0x148] sm:$0xff]  }
 0x5d6   :  { %2328 = vmatpush.msrb.mxu3 %v6144_v30  ;;  %v6092_v30 = vunpack.c.l.bf16 %v6091_v10 }
 0x5d7   :  { %2637 = vmatpush.msrb.mxu1 %v6281_v63 }
 0x5d8   :  { %2329 = vmatpush.msrb.mxu3 %v6141_v18  ;;  %v6264_v18 = vunpack.c.l.bf16 %v6852_v1 }
 0x5da   :  { %2330 = vmatpush.msrb.mxu3 %v6140_v35 }
 0x63d   :  { %v2177_v52 = vpop.xlane.xlu1 %2176 }
 0x63e   :  { %v2188_v36 = vmul.f32 %v9177_v3, %v2177_v52  ;;  %v6812_v52 = vld [vmem:[%s10608_s6 + $0x18] sm:$0xff]  }
 0x63f   :  { %v6104_v41 = vunpack.c.l.bf16 %v6812_v52 }
 0x640   :  { %v9187_v15 = vsub.f32 %v9087_v22, %v2188_v36  ;;  %v9190_v24 = vsub.f32 %v9115_v56, %v2188_v36  ;;  %v6164_v22 = vunpack.c.l.bf16 %v6827_v29  ;;  %v6105_v36 = vunpack.c.h.bf16 %v6812_v52 }
 0x641   :  { %v6137_v29 = vunpack.c.h.bf16 %v6820_v23  ;;  %v6256_v52 = vunpack.c.l.bf16 %v6850_v9 }
 0x642   :  { %v2194_v37 = vmul.f32 %v9187_v15, %v9187_v15  ;;  %v2195_v42 = vmul.f32 %v9190_v24, %v9190_v24  ;;  %2426 = vmatpush.msra.mxu0 %v6164_v22  ;;  %2308 = vmatpush.msrb.mxu2 %v6105_v36  ;;  %v6811_v22 = vld [vmem:[%s10608_s6 + $0x10] sm:$0xff]  }
 0x643   :  { %2331 = vmatpush.msrb.mxu3 %v6137_v29 }
 0x644   :  { %v2198_v33 = vadd.f32 %v2195_v42, %v2194_v37  ;;  %2427 = vmatpush.msra.mxu0 %v6161_v19  ;;  %v6136_v37 = vunpack.c.l.bf16 %v6820_v23  ;;  %v6280_v42 = vunpack.c.l.bf16 %v6856_v8  ;;  %2309 = vmatpush.msrb.mxu2 %v6104_v41  ;;  %v6101_v19 = vunpack.c.h.bf16 %v6811_v22  ;;  %v6849_v23 = vld [vmem:[%s10608_s6 + $0x140] sm:$0xff]  }
 0x645   :  { %v2180_v56 = vpop.xlane.xlu1 %2179  ;;  %v6253_v36 = vunpack.c.h.bf16 %v6849_v23  ;;  %v6252_v63 = vunpack.c.l.bf16 %v6849_v23 }
 0x646   :  { %v2189_v16 = vmul.f32 %v9177_v3, %v2180_v56  ;;  %2199 = vadd.xlane.f32.xlu2 %v2198_v33  ;;  %2428 = vmatpush.msra.mxu0 %v6160_v59  ;;  %v6819_v33 = vld [vmem:[%s10608_s6 + $0x50] sm:$0xff]  }
 0x647   :  { %v6855_v56 = vld [vmem:[%s10608_s6 + $0x170] sm:$0xff]   ;;  %2332 = vmatpush.msrb.mxu3 %v6136_v37  ;;  %2638 = vmatpush.msrb.mxu1 %v6280_v42 }
 0x648   :  { %v9204_v31 = vsub.f32 %v9095_v5, %v2189_v16  ;;  %v9207_v44 = vsub.f32 %v9124_v39, %v2189_v16  ;;  %v6249_v5 = vunpack.c.h.bf16 %v6848_v55  ;;  %2429 = vmatpush.msra.mxu0 %v6157_v57  ;;  %v6248_v39 = vunpack.c.l.bf16 %v6848_v55  ;;  %v6843_v59 = vld [vmem:[%s10608_s6 + $0x110] sm:$0xff]   ;;  %2310 = vmatpush.msrb.mxu2 %v6101_v19 }
 0x649   :  { %v6133_v16 = vunpack.c.h.bf16 %v6819_v33  ;;  %v6277_v54 = vunpack.c.h.bf16 %v6855_v56  ;;  %v6229_v57 = vunpack.c.h.bf16 %v6843_v59  ;;  %v6100_v55 = vunpack.c.l.bf16 %v6811_v22 }
 0x64a   :  { %v2196_v20 = vmul.f32 %v9204_v31, %v9204_v31  ;;  %v2197_v27 = vmul.f32 %v9207_v44, %v9207_v44  ;;  %2430 = vmatpush.msra.mxu0 %v6156_v13  ;;  %v6228_v13 = vunpack.c.l.bf16 %v6843_v59 }
 0x64b   :  { %2333 = vmatpush.msrb.mxu3 %v6133_v16  ;;  %2639 = vmatpush.msrb.mxu1 %v6277_v54 }
 0x64c   :  { %v2201_v0 = vadd.f32 %v2197_v27, %v2196_v20  ;;  %2614 = vmatpush.msrb.mxu0 %v6249_v5  ;;  %v6132_v20 = vunpack.c.l.bf16 %v6819_v33  ;;  %v6276_v27 = vunpack.c.l.bf16 %v6855_v56  ;;  %v6818_v5 = vld [vmem:[%s10608_s6 + $0x48] sm:$0xff]   ;;  %2311 = vmatpush.msrb.mxu2 %v6100_v55 }
 0x64d   :  { %v6129_v45 = vunpack.c.h.bf16 %v6818_v5  ;;  %v6128_v17 = vunpack.c.l.bf16 %v6818_v5 }
 0x64e   :  { %2202 = vadd.xlane.f32.xlu2 %v2201_v0  ;;  %2615 = vmatpush.msrb.mxu0 %v6248_v39  ;;  %v6810_v0 = vld [vmem:[%s10608_s6 + $0x8] sm:$0xff]  }
 0x64f   :  { %v6854_v39 = vld [vmem:[%s10608_s6 + $0x168] sm:$0xff]   ;;  %2334 = vmatpush.msrb.mxu3 %v6132_v20  ;;  %v6097_v51 = vunpack.c.h.bf16 %v6810_v0  ;;  %2640 = vmatpush.msrb.mxu1 %v6276_v27  ;;  %v6096_v6 = vunpack.c.l.bf16 %v6810_v0  ;;  %v6871_v0 = vld [vmem:[%s10608_s6 + $0x1f0] sm:$0xff]  }
 0x650   :  { %2616 = vmatpush.msrb.mxu0 %v6245_v11  ;;  %v6273_v21 = vunpack.c.h.bf16 %v6854_v39  ;;  %v6842_v11 = vld [vmem:[%s10608_s6 + $0x108] sm:$0xff]  }
 0x651   :  { %v6225_v34 = vunpack.c.h.bf16 %v6842_v11  ;;  %2312 = vmatpush.msrb.mxu2 %v6097_v51  ;;  %2335 = vmatpush.msrb.mxu3 %v6129_v45  ;;  %v6224_v43 = vunpack.c.l.bf16 %v6842_v11  ;;  %v6870_v51 = vld [vmem:[%s10608_s6 + $0x1e8] sm:$0xff]   ;;  %v6340_v11 = vunpack.c.l.bf16 %v6871_v0 }
 0x652   :  { %2617 = vmatpush.msrb.mxu0 %v6244_v47  ;;  %v6272_v47 = vunpack.c.l.bf16 %v6854_v39  ;;  %2641 = vmatpush.msrb.mxu1 %v6273_v21 }
 0x653   :  { %2313 = vmatpush.msrb.mxu2 %v6096_v6  ;;  %2336 = vmatpush.msrb.mxu3 %v6128_v17  ;;  %v6337_v17 = vunpack.c.h.bf16 %v6870_v51 }
 0x654   :  { %2618 = vmatpush.msrb.mxu0 %v6241_v2  ;;  %v6841_v2 = vld [vmem:[%s10608_s6 + $0x100] sm:$0xff]   ;;  %2642 = vmatpush.msrb.mxu1 %v6272_v47 }
 0x655   :  { %v6221_v14 = vunpack.c.h.bf16 %v6841_v2  ;;  %2314 = vmatpush.msrb.mxu2 %v6093_v38  ;;  %2337 = vmatpush.msrb.mxu3 %v6125_v50  ;;  %v6220_v58 = vunpack.c.l.bf16 %v6841_v2  ;;  %v6869_v47 = vld [vmem:[%s10608_s6 + $0x1e0] sm:$0xff]  }
 0x656   :  { %2619 = vmatpush.msrb.mxu0 %v6240_v46  ;;  %v6268_v46 = vunpack.c.l.bf16 %v6853_v28  ;;  %2643 = vmatpush.msrb.mxu1 %v6269_v49  ;;  %v6332_v10 = vunpack.c.l.bf16 %v6869_v47  ;;  %v6867_v28 = vld [vmem:[%s10608_s6 + $0x1d0] sm:$0xff]   ;;  %v6866_v49 = vld [vmem:[%s10608_s6 + $0x1c8] sm:$0xff]  }
 0x657   :  { %2315 = vmatpush.msrb.mxu2 %v6092_v30  ;;  %2338 = vmatpush.msrb.mxu3 %v6124_v48  ;;  %v6325_v50 = vunpack.c.h.bf16 %v6867_v28  ;;  %v6324_v2 = vunpack.c.l.bf16 %v6867_v28  ;;  %v6865_v30 = vld [vmem:[%s10608_s6 + $0x1c0] sm:$0xff]   ;;  %v6320_v48 = vunpack.c.l.bf16 %v6866_v49 }
 0x658   :  { %2620 = vmatpush.msrb.mxu0 %v6237_v60  ;;  %2644 = vmatpush.msrb.mxu1 %v6268_v46  ;;  %v6317_v46 = vunpack.c.h.bf16 %v6865_v30 }
 0x65a   :  { %2621 = vmatpush.msrb.mxu0 %v6236_v53  ;;  %2645 = vmatpush.msrb.mxu1 %v6265_v32  ;;  %v6257_v53 = vunpack.c.h.bf16 %v6850_v9  ;;  %v5565_v9 = vld [vmem:[%s10609_s4 + $0x38] sm:$0xff] }
 0x65c   :  { %2622 = vmatpush.msrb.mxu0 %v6233_v40  ;;  %2646 = vmatpush.msrb.mxu1 %v6264_v18 }
 0x65e   :  { %2623 = vmatpush.msrb.mxu0 %v6232_v7  ;;  %2647 = vmatpush.msrb.mxu1 %v6261_v61 }
 0x660   :  { %2624 = vmatpush.msrb.mxu0 %v6229_v57  ;;  %2648 = vmatpush.msrb.mxu1 %v6260_v4 }
 0x662   :  { %2625 = vmatpush.msrb.mxu0 %v6228_v13  ;;  %2649 = vmatpush.msrb.mxu1 %v6257_v53 }
 0x664   :  { %2626 = vmatpush.msrb.mxu0 %v6225_v34  ;;  %2650 = vmatpush.msrb.mxu1 %v6256_v52  ;;  %v6864_v52 = vld [vmem:[%s10608_s6 + $0x1b8] sm:$0xff]  }
 0x666   :  { %2627 = vmatpush.msrb.mxu0 %v6224_v43  ;;  %2651 = vmatpush.msrb.mxu1 %v6253_v36  ;;  %v6336_v43 = vunpack.c.l.bf16 %v6870_v51 }
 0x668   :  { %2628 = vmatpush.msrb.mxu0 %v6221_v14  ;;  %2652 = vmatpush.msrb.mxu1 %v6252_v63  ;;  %v6321_v14 = vunpack.c.h.bf16 %v6866_v49 }
 0x66a   :  { %2629 = vmatpush.msrb.mxu0 %v6220_v58  ;;  %v6316_v58 = vunpack.c.l.bf16 %v6865_v30 }
 0x6b9   :  { %v2200_v26 = vpop.xlane.xlu2 %2199 }
 0x6ba   :  { %v2204_v60 = vmul.f32 %v2200_v26, %v9177_v3 }
 0x6bc   :  { %v2206_v35 = vadd.f32 1e-05, %v2204_v60 }
 0x6be   :  { %6999 = vrsqrt.f32 %v2206_v35  ;;  %vm2214_vm3 = vweird.f32 %v2206_v35 }
 0x6c1   :  { %v2203_v8 = vpop.xlane.xlu2 %2202 }
 0x6c2   :  { %v2205_v29 = vmul.f32 %v2203_v8, %v9177_v3  ;;  %v6872_v3 = vld [vmem:[%s10608_s6 + $0x1f8] sm:$0xff]  }
 0x6c3   :  { %v6345_v27 = vunpack.c.h.bf16 %v6872_v3  ;;  %v6344_v5 = vunpack.c.l.bf16 %v6872_v3  ;;  %v6880_v3 = vld [vmem:[%s10608_s6 + $0x238] sm:$0xff]  }
 0x6c4   :  { %v7000_v62 = vpop.eup %6999  ;;  %v2207_v40 = vadd.f32 1e-05, %v2205_v29  ;;  %v6313_v29 = vunpack.c.h.bf16 %v6864_v52  ;;  %v6376_v51 = vunpack.c.l.bf16 %v6880_v3 }
 0x6c5   :  { %v2209_v41 = vmul.f32 %v7000_v62, %v2206_v35  ;;  %vm2215_vm2 = vweird.f32 %v7000_v62  ;;  %v5562_v35 = vld [vmem:[%s10609_s4 + $0x20] sm:$0xff] }
 0x6c6   :  { %7001 = vrsqrt.f32 %v2207_v40  ;;  %vm2216_vm4 = vmor %vm2214_vm3, %vm2215_vm2  ;;  %vm2224_vm6 = vweird.f32 %v2207_v40 }
 0x6c7   :  { %v2210_v37 = vmul.f32 %v7000_v62, %v2209_v41  ;;  %v6312_v41 = vunpack.c.l.bf16 %v6864_v52 }
 0x6c9   :  { %v2211_v42 = vmul.f32 0.5, %v2210_v37  ;;  %v5563_v37 = vld [vmem:[%s10609_s4 + $0x28] sm:$0xff] }
 0x6cb   :  { %v2212_v7 = vsub.f32 1.5, %v2211_v42  ;;  %v2346_v42 = vld [vmem:[%s10609_s4] sm:$0xff] }
 0x6cc   :  { %v7002_v22 = vpop.eup %7001 }
 0x6cd   :  { %v2213_v33 = vmul.f32 %v7000_v62, %v2212_v7  ;;  %v2219_v56 = vmul.f32 %v7002_v22, %v2207_v40  ;;  %vm2225_vm5 = vweird.f32 %v7002_v22  ;;  %v6863_v40 = vld [vmem:[%s10608_s6 + $0x1b0] sm:$0xff]  }
 0x6ce   :  { %vm2226_vm7 = vmor %vm2224_vm6, %vm2225_vm5  ;;  %v6309_v7 = vunpack.c.h.bf16 %v6863_v40 }
 0x6cf   :  { %v2217_v19 = vsel %vm2216_vm4, %v7000_v62, %v2213_v33  ;;  %v2220_v16 = vmul.f32 %v7002_v22, %v2219_v56  ;;  %v6308_v33 = vunpack.c.l.bf16 %v6863_v40  ;;  %v6873_v40 = vld [vmem:[%s10608_s6 + $0x200] sm:$0xff]  }
 0x6d0   :  { %v2228_v54 = vmul.f32 %v2217_v19, %v9187_v15  ;;  %v2229_v59 = vmul.f32 %v2217_v19, %v9190_v24  ;;  %v6341_v24 = vunpack.c.h.bf16 %v6871_v0  ;;  %v2347_v0 = vld [vmem:[%s10609_s4 + $0x8] sm:$0xff] }
 0x6d1   :  { %v2221_v57 = vmul.f32 0.5, %v2220_v16 }
 0x6d2   :  { %v9315_v55 = vmax.f32 %v2228_v54, 0.0  ;;  %v9317_v20 = vmax.f32 %v2229_v59, 0.0  ;;  %v6861_v54 = vld [vmem:[%s10608_s6 + $0x1a0] sm:$0xff]  }
 0x6d3   :  { %v2222_v13 = vsub.f32 1.5, %v2221_v57 }
 0x6d4   :  { %2316 = vmatmul.f32.vlgmr.msrb.gmra.mxu2 %v9315_v55  ;;  %2339 = vmatmul.f32.vlgmr.msrb.gmra.mxu3 %v9317_v20 }
 0x6d5   :  { %v2223_v15 = vmul.f32 %v7002_v22, %v2222_v13  ;;  %2431 = vmatmul.f32.vlgmr.msra.gmra.mxu0 %v9315_v55  ;;  %2454 = vmatmul.f32.vlgmr.msra.gmra.mxu1 %v9317_v20  ;;  %v5564_v13 = vld [vmem:[%s10609_s4 + $0x30] sm:$0xff] }
 0x6d6   :  { %2798 = vmatpush.msra.mxu0 %v6345_v27 }
 0x6d7   :  { %v2227_v39 = vsel %vm2226_vm7, %v7002_v22, %v2223_v15  ;;  %v6862_v22 = vld [vmem:[%s10608_s6 + $0x1a8] sm:$0xff]   ;;  %v6301_v15 = vunpack.c.h.bf16 %v6861_v54  ;;  %vm3928_vm7 = vcmask 261120  }
 0x6d8   :  { %v2230_v45 = vmul.f32 %v2227_v39, %v9204_v31  ;;  %v2231_v21 = vmul.f32 %v2227_v39, %v9207_v44  ;;  %2799 = vmatpush.msra.mxu0 %v6344_v5  ;;  %v6333_v31 = vunpack.c.h.bf16 %v6869_v47  ;;  %v6868_v44 = vld [vmem:[%s10608_s6 + $0x1d8] sm:$0xff]   ;;  %v6305_v19 = vunpack.c.h.bf16 %v6862_v22  ;;  %v6859_v47 = vld [vmem:[%s10608_s6 + $0x190] sm:$0xff]  }
 0x6d9   :  { %v6329_v25 = vunpack.c.h.bf16 %v6868_v44  ;;  %v6328_v38 = vunpack.c.l.bf16 %v6868_v44  ;;  %v6304_v57 = vunpack.c.l.bf16 %v6862_v22  ;;  %v6377_v5 = vunpack.c.h.bf16 %v6880_v3  ;;  %v6860_v39 = vld [vmem:[%s10608_s6 + $0x198] sm:$0xff]   ;;  %v2348_v44 = vld [vmem:[%s10609_s4 + $0x10] sm:$0xff] }
 0x6da   :  { %v9331_v34 = vmax.f32 %v2230_v45, 0.0  ;;  %v9333_v6 = vmax.f32 %v2231_v21, 0.0  ;;  %2800 = vmatpush.msra.mxu0 %v6341_v24  ;;  %v6879_v24 = vld [vmem:[%s10608_s6 + $0x230] sm:$0xff]   ;;  %v6300_v45 = vunpack.c.l.bf16 %v6861_v54  ;;  %v6293_v28 = vunpack.c.h.bf16 %v6859_v47 }
 0x6db   :  { %v6373_v21 = vunpack.c.h.bf16 %v6879_v24 }
 0x6dc   :  { %2801 = vmatpush.msra.mxu0 %v6340_v11  ;;  %2319 = vmatmul.f32.gmra.mxu2 %v9331_v34  ;;  %v6297_v11 = vunpack.c.h.bf16 %v6860_v39 }
 0x6dd   :  { %2342 = vmatmul.f32.gmra.mxu3 %v9333_v6  ;;  %2434 = vmatmul.f32.gmra.mxu0 %v9331_v34 }
 0x6de   :  { %2457 = vmatmul.f32.gmra.mxu1 %v9333_v6  ;;  %2802 = vmatpush.msra.mxu0 %v6337_v17  ;;  %v6878_v17 = vld [vmem:[%s10608_s6 + $0x228] sm:$0xff]  }
 0x6df   :  { %v6368_v49 = vunpack.c.l.bf16 %v6878_v17 }
 0x6e0   :  { %2803 = vmatpush.msra.mxu0 %v6336_v43  ;;  %v6372_v43 = vunpack.c.l.bf16 %v6879_v24  ;;  %v6902_v24 = vld [vmem:[%s10608_s6 + $0x2e8] sm:$0xff]  }
 0x6e2   :  { %2804 = vmatpush.msra.mxu0 %v6333_v31  ;;  %v6296_v31 = vunpack.c.l.bf16 %v6860_v39 }
 0x6e4   :  { %2805 = vmatpush.msra.mxu0 %v6332_v10  ;;  %v5606_v10 = vld [vmem:[%s10609_s4 + $0x40] sm:$0xff] }
 0x6e5   :  { %2630 = vmatmul.f32.vlgmr.msrb.gmra.mxu0 %v9315_v55 }
 0x6e6   :  { %2653 = vmatmul.f32.vlgmr.msrb.gmra.mxu1 %v9317_v20  ;;  %2806 = vmatpush.msra.mxu0 %v6329_v25  ;;  %v6369_v25 = vunpack.c.h.bf16 %v6878_v17  ;;  %v6901_v17 = vld [vmem:[%s10608_s6 + $0x2e0] sm:$0xff]  }
 0x6e8   :  { %2807 = vmatpush.msra.mxu0 %v6328_v38  ;;  %v6877_v38 = vld [vmem:[%s10608_s6 + $0x220] sm:$0xff]  }
 0x6ea   :  { %2808 = vmatpush.msra.mxu0 %v6325_v50  ;;  %v6858_v50 = vld [vmem:[%s10608_s6 + $0x188] sm:$0xff]  }
 0x6eb   :  { %v6289_v30 = vunpack.c.h.bf16 %v6858_v50 }
 0x6ec   :  { %2809 = vmatpush.msra.mxu0 %v6324_v2  ;;  %v6292_v2 = vunpack.c.l.bf16 %v6859_v47  ;;  %v6464_v47 = vunpack.c.l.bf16 %v6902_v24 }
 0x6ed   :  { %2633 = vmatmul.f32.gmra.mxu0 %v9331_v34 }
 0x6ee   :  { %2656 = vmatmul.f32.gmra.mxu1 %v9333_v6  ;;  %2810 = vmatpush.msra.mxu0 %v6321_v14  ;;  %v6365_v14 = vunpack.c.h.bf16 %v6877_v38 }
 0x6f0   :  { %2811 = vmatpush.msra.mxu0 %v6320_v48  ;;  %v6876_v48 = vld [vmem:[%s10608_s6 + $0x218] sm:$0xff]  }
 0x6f2   :  { %2812 = vmatpush.msra.mxu0 %v6317_v46  ;;  %v6857_v46 = vld [vmem:[%s10608_s6 + $0x180] sm:$0xff]  }
 0x6f4   :  { %2813 = vmatpush.msra.mxu0 %v6316_v58  ;;  %v6364_v58 = vunpack.c.l.bf16 %v6877_v38  ;;  %v6881_v38 = vld [vmem:[%s10608_s6 + $0x240] sm:$0xff]  }
 0x6f5   :  { %2814 = vmatmul.f32.vlgmr.msra.gmra.mxu0 %v9317_v20 }
 0x6fd   :  { %2817 = vmatmul.f32.gmra.mxu0 %v9333_v6 }
 0x752   :  { %v2432_v1 = vpop.f32.mrf.mxu0  ;;  %v2455_v32 = vpop.f32.mrf.mxu1 }
 0x753   :  { %v2456_v4 = vadd.f32 %v2455_v32, %v2432_v1  ;;  %v6288_v1 = vunpack.c.l.bf16 %v6858_v50  ;;  %v2349_v32 = vld [vmem:[%s10609_s4 + $0x18] sm:$0xff] }
 0x757   :  { %v2317_v18 = vpop.f32.mrf.mxu2  ;;  %v2340_v12 = vpop.f32.mrf.mxu3 }
 0x758   :  { %v2341_v63 = vadd.f32 %v2340_v12, %v2317_v18  ;;  %v5607_v18 = vld [vmem:[%s10609_s4 + $0x48] sm:$0xff]  ;;  %v6361_v12 = vunpack.c.h.bf16 %v6876_v48 }
 0x75a   :  { %v2435_v61 = vpop.f32.mrf.mxu0 }
 0x75b   :  { %v2458_v26 = vpop.f32.mrf.mxu1 }
 0x75c   :  { %v2459_v60 = vadd.f32 %v2458_v26, %v2435_v61  ;;  %v6285_v61 = vunpack.c.h.bf16 %v6857_v46  ;;  %v6888_v26 = vld [vmem:[%s10608_s6 + $0x278] sm:$0xff]  }
 0x75d   :  { %v6408_v52 = vunpack.c.l.bf16 %v6888_v26 }
 0x75e   :  { %2493 = vmatpush.msra.mxu2 %v2459_v60  ;;  %6988 = vmatpush.msra.mxu3 %v2459_v60  ;;  %v6875_v60 = vld [vmem:[%s10608_s6 + $0x210] sm:$0xff]  }
 0x75f   :  { %v2320_v53 = vpop.f32.mrf.mxu2 }
 0x760   :  { %2494 = vmatpush.msra.mxu2 %v2456_v4  ;;  %6989 = vmatpush.msra.mxu3 %v2456_v4  ;;  %v2343_v23 = vpop.f32.mrf.mxu3  ;;  %v6360_v4 = vunpack.c.l.bf16 %v6876_v48  ;;  %v6380_v48 = vunpack.c.l.bf16 %v6881_v38 }
 0x761   :  { %v2344_v8 = vadd.f32 %v2343_v23, %v2320_v53  ;;  %5566 = vmatmul.msk.f32.vlgmr.msra.gmra.mxu2 %vm2466_vm8, %v5562_v35  ;;  %5569 = vmatmul.msk.f32.vlgmr.msra.gmra.mxu3 %vm2466_vm8, %v5565_v9  ;;  %v6284_v35 = vunpack.c.l.bf16 %v6857_v46  ;;  %v6409_v9 = vunpack.c.h.bf16 %v6888_v26  ;;  %v6357_v53 = vunpack.c.h.bf16 %v6875_v60  ;;  %v6874_v23 = vld [vmem:[%s10608_s6 + $0x208] sm:$0xff]  }
 0x762   :  { %v2631_v36 = vpop.f32.mrf.mxu0 }
 0x763   :  { %v2654_v62 = vpop.f32.mrf.mxu1  ;;  %2534 = vmatpush.msrb.mxu3 %v2344_v8  ;;  %v6887_v8 = vld [vmem:[%s10608_s6 + $0x270] sm:$0xff]  }
 0x764   :  { %v2655_v27 = vadd.f32 %v2654_v62, %v2631_v36  ;;  %v6356_v36 = vunpack.c.l.bf16 %v6875_v60  ;;  %v6405_v62 = vunpack.c.h.bf16 %v6887_v8 }
 0x765   :  { %2535 = vmatpush.msrb.mxu3 %v2341_v63  ;;  %v6353_v63 = vunpack.c.h.bf16 %v6874_v23 }
 0x767   :  { %2775 = vmatpush.msra.mxu3 %v6313_v29  ;;  %v5608_v29 = vld [vmem:[%s10609_s4 + $0x50] sm:$0xff] }
 0x769   :  { %2776 = vmatpush.msra.mxu3 %v6312_v41  ;;  %5567 = vmatmul.msk.f32.gmra.mxu2 %vm2466_vm8, %v5563_v37  ;;  %v6886_v41 = vld [vmem:[%s10608_s6 + $0x268] sm:$0xff]   ;;  %v6352_v37 = vunpack.c.l.bf16 %v6874_v23 }
 0x76a   :  { %5570 = vmatmul.msk.f32.vlgmr.msrb.gmra.mxu3 %vm2466_vm8, %v2346_v42  ;;  %v2634_v56 = vpop.f32.mrf.mxu0  ;;  %v6404_v42 = vunpack.c.l.bf16 %v6887_v8  ;;  %v6401_v22 = vunpack.c.h.bf16 %v6886_v41 }
 0x76b   :  { %2777 = vmatpush.msra.mxu3 %v6309_v7  ;;  %v2657_v16 = vpop.f32.mrf.mxu1  ;;  %v6349_v7 = vunpack.c.h.bf16 %v6873_v40 }
 0x76c   :  { %v2658_v59 = vadd.f32 %v2657_v16, %v2634_v56  ;;  %v6885_v56 = vld [vmem:[%s10608_s6 + $0x260] sm:$0xff]   ;;  %v6400_v16 = vunpack.c.l.bf16 %v6886_v41 }
 0x76d   :  { %2778 = vmatpush.msra.mxu3 %v6308_v33  ;;  %v6904_v33 = vld [vmem:[%s10608_s6 + $0x2f8] sm:$0xff]   ;;  %v6397_v54 = vunpack.c.h.bf16 %v6885_v56 }
 0x76e   :  { %2691 = vmatpush.msrb.mxu2 %v2658_v59  ;;  %v6473_v3 = vunpack.c.h.bf16 %v6904_v33  ;;  %v6903_v59 = vld [vmem:[%s10608_s6 + $0x2f0] sm:$0xff]  }
 0x76f   :  { %2779 = vmatpush.msra.mxu3 %v6305_v19  ;;  %v6348_v19 = vunpack.c.l.bf16 %v6873_v40  ;;  %v6468_v39 = vunpack.c.l.bf16 %v6903_v59 }
 0x770   :  { %2692 = vmatpush.msrb.mxu2 %v2655_v27  ;;  %v6472_v27 = vunpack.c.l.bf16 %v6904_v33  ;;  %v5646_v33 = vld [vmem:[%s10609_s4 + $0x60] sm:$0xff] }
 0x771   :  { %2780 = vmatpush.msra.mxu3 %v6304_v57  ;;  %5568 = vmatmul.msk.f32.gmra.mxu2 %vm2466_vm8, %v5564_v13  ;;  %v5609_v57 = vld [vmem:[%s10609_s4 + $0x58] sm:$0xff] }
 0x772   :  { %5571 = vmatmul.msk.f32.gmra.mxu3 %vm2466_vm8, %v2347_v0  ;;  %2936 = vmatpush.msra.mxu2 %v6377_v5  ;;  %v6884_v13 = vld [vmem:[%s10608_s6 + $0x258] sm:$0xff]   ;;  %v6396_v0 = vunpack.c.l.bf16 %v6885_v56  ;;  %v6469_v5 = vunpack.c.h.bf16 %v6903_v59  ;;  %v6894_v59 = vld [vmem:[%s10608_s6 + $0x2a8] sm:$0xff]  }
 0x773   :  { %2781 = vmatpush.msra.mxu3 %v6301_v15  ;;  %v6393_v15 = vunpack.c.h.bf16 %v6884_v13 }
 0x774   :  { %2937 = vmatpush.msra.mxu2 %v6376_v51  ;;  %v6883_v51 = vld [vmem:[%s10608_s6 + $0x250] sm:$0xff]  }
 0x775   :  { %2782 = vmatpush.msra.mxu3 %v6300_v45  ;;  %v6392_v45 = vunpack.c.l.bf16 %v6884_v13  ;;  %v6433_v13 = vunpack.c.h.bf16 %v6894_v59 }
 0x776   :  { %2938 = vmatpush.msra.mxu2 %v6373_v21  ;;  %v6465_v21 = vunpack.c.h.bf16 %v6902_v24  ;;  %v6892_v24 = vld [vmem:[%s10608_s6 + $0x298] sm:$0xff]  }
 0x777   :  { %2783 = vmatpush.msra.mxu3 %v6297_v11  ;;  %v6389_v11 = vunpack.c.h.bf16 %v6883_v51 }
 0x778   :  { %2939 = vmatpush.msra.mxu2 %v6372_v43  ;;  %v6882_v43 = vld [vmem:[%s10608_s6 + $0x248] sm:$0xff]  }
 0x779   :  { %2784 = vmatpush.msra.mxu3 %v6296_v31  ;;  %5610 = vmatmul.msk.f32.vlgmr.msrb.gmra.mxu2 %vm2466_vm8, %v5606_v10  ;;  %v6388_v31 = vunpack.c.l.bf16 %v6883_v51  ;;  %v6385_v10 = vunpack.c.h.bf16 %v6882_v43  ;;  %v6384_v50 = vunpack.c.l.bf16 %v6882_v43 }
 0x77a   :  { %5572 = vmatmul.msk.f32.gmra.mxu3 %vm2466_vm8, %v2348_v44  ;;  %2940 = vmatpush.msra.mxu2 %v6369_v25  ;;  %v6461_v44 = vunpack.c.h.bf16 %v6901_v17  ;;  %v6900_v25 = vld [vmem:[%s10608_s6 + $0x2d8] sm:$0xff]  }
 0x77b   :  { %2785 = vmatpush.msra.mxu3 %v6293_v28  ;;  %v6460_v28 = vunpack.c.l.bf16 %v6901_v17  ;;  %v6891_v17 = vld [vmem:[%s10608_s6 + $0x290] sm:$0xff]  }
 0x77c   :  { %2941 = vmatpush.msra.mxu2 %v6368_v49  ;;  %v6457_v49 = vunpack.c.h.bf16 %v6900_v25  ;;  %v6421_v43 = vunpack.c.h.bf16 %v6891_v17 }
 0x77d   :  { %2786 = vmatpush.msra.mxu3 %v6292_v2  ;;  %v6381_v2 = vunpack.c.h.bf16 %v6881_v38 }
 0x77e   :  { %2942 = vmatpush.msra.mxu2 %v6365_v14  ;;  %v6899_v14 = vld [vmem:[%s10608_s6 + $0x2d0] sm:$0xff]  }
 0x77f   :  { %2787 = vmatpush.msra.mxu3 %v6289_v30  ;;  %v6456_v30 = vunpack.c.l.bf16 %v6900_v25  ;;  %v6453_v46 = vunpack.c.h.bf16 %v6899_v14 }
 0x780   :  { %2943 = vmatpush.msra.mxu2 %v6364_v58  ;;  %v6898_v58 = vld [vmem:[%s10608_s6 + $0x2c8] sm:$0xff]  }
 0x781   :  { %2788 = vmatpush.msra.mxu3 %v6288_v1  ;;  %5611 = vmatmul.msk.f32.gmra.mxu2 %vm2466_vm8, %v5607_v18  ;;  %v6452_v1 = vunpack.c.l.bf16 %v6899_v14  ;;  %v6897_v18 = vld [vmem:[%s10608_s6 + $0x2c0] sm:$0xff]  }
 0x782   :  { %5573 = vmatmul.msk.f32.gmra.mxu3 %vm2466_vm8, %v2349_v32  ;;  %2944 = vmatpush.msra.mxu2 %v6361_v12  ;;  %v6449_v32 = vunpack.c.h.bf16 %v6898_v58  ;;  %v6448_v12 = vunpack.c.l.bf16 %v6898_v58  ;;  %v6444_v26 = vunpack.c.l.bf16 %v6897_v18 }
 0x783   :  { %2789 = vmatpush.msra.mxu3 %v6285_v61  ;;  %v6445_v61 = vunpack.c.h.bf16 %v6897_v18 }
 0x784   :  { %2945 = vmatpush.msra.mxu2 %v6360_v4 }
 0x785   :  { %2790 = vmatpush.msra.mxu3 %v6284_v35 }
 0x786   :  { %2946 = vmatpush.msra.mxu2 %v6357_v53 }
 0x787   :  { %2959 = vmatpush.msrb.mxu3 %v6409_v9 }
 0x788   :  { %2947 = vmatpush.msra.mxu2 %v6356_v36 }
 0x789   :  { %2960 = vmatpush.msrb.mxu3 %v6408_v52  ;;  %5612 = vmatmul.msk.f32.gmra.mxu2 %vm2466_vm8, %v5608_v29 }
 0x78a   :  { %2791 = vmatmul.f32.vlgmr.msra.gmra.mxu3 %v9315_v55  ;;  %2948 = vmatpush.msra.mxu2 %v6353_v63  ;;  %v2815_v63 = vpop.f32.mrf.mxu0 }
 0x78b   :  { %2961 = vmatpush.msrb.mxu3 %v6405_v62 }
 0x78c   :  { %2949 = vmatpush.msra.mxu2 %v6352_v37 }
 0x78d   :  { %2962 = vmatpush.msrb.mxu3 %v6404_v42  ;;  %v6896_v42 = vld [vmem:[%s10608_s6 + $0x2b8] sm:$0xff]  }
 0x78e   :  { %2950 = vmatpush.msra.mxu2 %v6349_v7  ;;  %v6441_v56 = vunpack.c.h.bf16 %v6896_v42 }
 0x78f   :  { %2963 = vmatpush.msrb.mxu3 %v6401_v22 }
 0x790   :  { %2951 = vmatpush.msra.mxu2 %v6348_v19  ;;  %v6895_v19 = vld [vmem:[%s10608_s6 + $0x2b0] sm:$0xff]  }
 0x791   :  { %2964 = vmatpush.msrb.mxu3 %v6400_v16  ;;  %5613 = vmatmul.msk.f32.gmra.mxu2 %vm2466_vm8, %v5609_v57  ;;  %v6440_v16 = vunpack.c.l.bf16 %v6896_v42  ;;  %v6436_v57 = vunpack.c.l.bf16 %v6895_v19 }
 0x792   :  { %3120 = vmatpush.msrb.mxu2 %v6473_v3  ;;  %2794 = vmatmul.f32.gmra.mxu3 %v9331_v34  ;;  %v2818_v41 = vpop.f32.mrf.mxu0  ;;  %v6437_v3 = vunpack.c.h.bf16 %v6895_v19  ;;  %v6909_v19 = vld [vmem:[%s10608_s6 + $0x320] sm:$0xff]  }
 0x793   :  { %2965 = vmatpush.msrb.mxu3 %v6397_v54 }
 0x794   :  { %3121 = vmatpush.msrb.mxu2 %v6472_v27  ;;  %v5647_v27 = vld [vmem:[%s10609_s4 + $0x68] sm:$0xff] }
 0x795   :  { %2966 = vmatpush.msrb.mxu3 %v6396_v0  ;;  %v6893_v0 = vld [vmem:[%s10608_s6 + $0x2a0] sm:$0xff]  }
 0x796   :  { %3122 = vmatpush.msrb.mxu2 %v6469_v5  ;;  %v6432_v5 = vunpack.c.l.bf16 %v6894_v59  ;;  %v6493_v59 = vunpack.c.h.bf16 %v6909_v19 }
 0x797   :  { %2967 = vmatpush.msrb.mxu3 %v6393_v15  ;;  %v6429_v15 = vunpack.c.h.bf16 %v6893_v0 }
 0x798   :  { %3123 = vmatpush.msrb.mxu2 %v6468_v39  ;;  %v6428_v39 = vunpack.c.l.bf16 %v6893_v0  ;;  %v6492_v0 = vunpack.c.l.bf16 %v6909_v19 }
 0x799   :  { %2968 = vmatpush.msrb.mxu3 %v6392_v45  ;;  %2952 = vmatmul.f32.vlgmr.msra.gmra.mxu2 %v9315_v55  ;;  %v5648_v45 = vld [vmem:[%s10609_s4 + $0x70] sm:$0xff] }
 0x79a   :  { %3124 = vmatpush.msrb.mxu2 %v6465_v21  ;;  %v6425_v21 = vunpack.c.h.bf16 %v6892_v24 }
 0x79b   :  { %2969 = vmatpush.msrb.mxu3 %v6389_v11 }
 0x79c   :  { %3125 = vmatpush.msrb.mxu2 %v6464_v47  ;;  %v6424_v47 = vunpack.c.l.bf16 %v6892_v24 }
 0x79d   :  { %2970 = vmatpush.msrb.mxu3 %v6388_v31  ;;  %v6890_v31 = vld [vmem:[%s10608_s6 + $0x288] sm:$0xff]  }
 0x79e   :  { %3126 = vmatpush.msrb.mxu2 %v6461_v44  ;;  %v6420_v44 = vunpack.c.l.bf16 %v6891_v17  ;;  %v6417_v25 = vunpack.c.h.bf16 %v6890_v31  ;;  %v6416_v14 = vunpack.c.l.bf16 %v6890_v31  ;;  %v6906_v31 = vld [vmem:[%s10608_s6 + $0x308] sm:$0xff]  }
 0x79f   :  { %2971 = vmatpush.msrb.mxu3 %v6385_v10  ;;  %v5649_v10 = vld [vmem:[%s10609_s4 + $0x78] sm:$0xff] }
 0x7a0   :  { %3127 = vmatpush.msrb.mxu2 %v6460_v28 }
 0x7a1   :  { %2972 = vmatpush.msrb.mxu3 %v6384_v50  ;;  %2955 = vmatmul.f32.gmra.mxu2 %v9331_v34  ;;  %v6889_v50 = vld [vmem:[%s10608_s6 + $0x280] sm:$0xff]  }
 0x7a2   :  { %3128 = vmatpush.msrb.mxu2 %v6457_v49  ;;  %v6912_v49 = vld [vmem:[%s10608_s6 + $0x338] sm:$0xff]   ;;  %v6412_v18 = vunpack.c.l.bf16 %v6889_v50 }
 0x7a3   :  { %2973 = vmatpush.msrb.mxu3 %v6381_v2  ;;  %v6505_v58 = vunpack.c.h.bf16 %v6912_v49 }
 0x7a4   :  { %3129 = vmatpush.msrb.mxu2 %v6456_v30 }
 0x7a5   :  { %2974 = vmatpush.msrb.mxu3 %v6380_v48  ;;  %v5686_v48 = vld [vmem:[%s10609_s4 + $0x80] sm:$0xff] }
 0x7a6   :  { %3130 = vmatpush.msrb.mxu2 %v6453_v46  ;;  %2975 = vmatmul.f32.vlgmr.msrb.gmra.mxu3 %v9317_v20  ;;  %v6413_v46 = vunpack.c.h.bf16 %v6889_v50 }
 0x7a8   :  { %3131 = vmatpush.msrb.mxu2 %v6452_v1  ;;  %v6920_v1 = vld [vmem:[%s10608_s6 + $0x378] sm:$0xff]  }
 0x7aa   :  { %3132 = vmatpush.msrb.mxu2 %v6449_v32  ;;  %v6911_v32 = vld [vmem:[%s10608_s6 + $0x330] sm:$0xff]  }
 0x7ac   :  { %3133 = vmatpush.msrb.mxu2 %v6448_v12  ;;  %v6504_v12 = vunpack.c.l.bf16 %v6912_v49  ;;  %v6905_v49 = vld [vmem:[%s10608_s6 + $0x300] sm:$0xff]  }
 0x7ae   :  { %3134 = vmatpush.msrb.mxu2 %v6445_v61  ;;  %2978 = vmatmul.f32.gmra.mxu3 %v9333_v6  ;;  %v6537_v61 = vunpack.c.h.bf16 %v6920_v1 }
 0x7b0   :  { %3135 = vmatpush.msrb.mxu2 %v6444_v26  ;;  %v6501_v26 = vunpack.c.h.bf16 %v6911_v32 }
 0x7b1   :  { %3136 = vmatmul.f32.vlgmr.msrb.gmra.mxu2 %v9317_v20 }
 0x7b9   :  { %3139 = vmatmul.f32.gmra.mxu2 %v9333_v6 }
 0x7e4   :  { %v9512_v60 = vpop.f32.mrf.mxu2  ;;  %v9514_v4 = vpop.f32.mrf.mxu3 }
 0x7ec   :  { %v9516_v35 = vpop.f32.mrf.mxu2 }
 0x7ed   :  { %v9518_v9 = vpop.f32.mrf.mxu3 }
 0x7f4   :  { %v9520_v53 = vpop.f32.mrf.mxu2 }
 0x7f5   :  { %v9522_v52 = vpop.f32.mrf.mxu3 }
 0x7fc   :  { %v9526_v8 = vpop.f32.mrf.mxu2 }
 0x7fd   :  { %v9524_v23 = vpop.f32.mrf.mxu3 }
 0x804   :  { %v9530_v29 = vpop.f32.mrf.mxu2 }
 0x805   :  { %v9528_v36 = vpop.f32.mrf.mxu3 }
 0x80c   :  { %v9532_v40 = vpop.f32.mrf.mxu2 }
 0x80d   :  { %v2792_v62 = vpop.f32.mrf.mxu3 }
 0x80e   :  { %v2816_v22 = vadd.f32 %v2815_v63, %v2792_v62  ;;  %v6919_v63 = vld [vmem:[%s10608_s6 + $0x370] sm:$0xff]   ;;  %v6536_v62 = vunpack.c.l.bf16 %v6920_v1  ;;  %v6476_v1 = vunpack.c.l.bf16 %v6905_v49 }
 0x80f   :  { %v6533_v42 = vunpack.c.h.bf16 %v6919_v63 }
 0x814   :  { %v9544_v54 = vpop.f32.mrf.mxu2 }
 0x815   :  { %v2795_v37 = vpop.f32.mrf.mxu3 }
 0x816   :  { %v2819_v7 = vadd.f32 %v2818_v41, %v2795_v37  ;;  %v6910_v41 = vld [vmem:[%s10608_s6 + $0x328] sm:$0xff]   ;;  %v6500_v37 = vunpack.c.l.bf16 %v6911_v32 }
 0x818   :  { %2852 = vmatpush.msra.mxu1 %v2819_v7  ;;  %v5687_v7 = vld [vmem:[%s10609_s4 + $0x88] sm:$0xff] }
 0x81a   :  { %2853 = vmatpush.msra.mxu1 %v2816_v22  ;;  %v6497_v22 = vunpack.c.h.bf16 %v6910_v41 }
 0x81b   :  { %5650 = vmatmul.msk.f32.vlgmr.msra.gmra.mxu1 %vm2466_vm8, %v5646_v33  ;;  %v6918_v33 = vld [vmem:[%s10608_s6 + $0x368] sm:$0xff]  }
 0x81c   :  { %3097 = vmatpush.msrb.mxu1 %v6441_v56  ;;  %v2953_v51 = vpop.f32.mrf.mxu2  ;;  %v6532_v56 = vunpack.c.l.bf16 %v6919_v63 }
 0x81e   :  { %3098 = vmatpush.msrb.mxu1 %v6440_v16  ;;  %v6496_v16 = vunpack.c.l.bf16 %v6910_v41 }
 0x820   :  { %3099 = vmatpush.msrb.mxu1 %v6437_v3  ;;  %v6529_v3 = vunpack.c.h.bf16 %v6918_v33 }
 0x822   :  { %3100 = vmatpush.msrb.mxu1 %v6436_v57  ;;  %v6917_v57 = vld [vmem:[%s10608_s6 + $0x360] sm:$0xff]  }
 0x823   :  { %5651 = vmatmul.msk.f32.gmra.mxu1 %vm2466_vm8, %v5647_v27  ;;  %v6528_v27 = vunpack.c.l.bf16 %v6918_v33  ;;  %v6932_v33 = vld [vmem:[%s10608_s6 + $0x3d8] sm:$0xff]  }
 0x824   :  { %3101 = vmatpush.msrb.mxu1 %v6433_v13  ;;  %v2956_v28 = vpop.f32.mrf.mxu2  ;;  %v6908_v13 = vld [vmem:[%s10608_s6 + $0x318] sm:$0xff]   ;;  %v6585_v19 = vunpack.c.h.bf16 %v6932_v33 }
 0x825   :  { %v6489_v24 = vunpack.c.h.bf16 %v6908_v13 }
 0x826   :  { %3102 = vmatpush.msrb.mxu1 %v6432_v5  ;;  %v6525_v5 = vunpack.c.h.bf16 %v6917_v57 }
 0x828   :  { %3103 = vmatpush.msrb.mxu1 %v6429_v15  ;;  %v5688_v15 = vld [vmem:[%s10609_s4 + $0x90] sm:$0xff] }
 0x829   :  { %v2976_v11 = vpop.f32.mrf.mxu3 }
 0x82a   :  { %3104 = vmatpush.msrb.mxu1 %v6428_v39  ;;  %v2977_v30 = vadd.f32 %v2976_v11, %v2953_v51  ;;  %v6916_v39 = vld [vmem:[%s10608_s6 + $0x358] sm:$0xff]   ;;  %v6524_v51 = vunpack.c.l.bf16 %v6917_v57  ;;  %v6930_v57 = vld [vmem:[%s10608_s6 + $0x3c8] sm:$0xff]  }
 0x82b   :  { %5652 = vmatmul.msk.f32.gmra.mxu1 %vm2466_vm8, %v5648_v45  ;;  %v6907_v45 = vld [vmem:[%s10608_s6 + $0x310] sm:$0xff]   ;;  %v6521_v11 = vunpack.c.h.bf16 %v6916_v39 }
 0x82c   :  { %3105 = vmatpush.msrb.mxu1 %v6425_v21  ;;  %v6488_v21 = vunpack.c.l.bf16 %v6908_v13  ;;  %v6485_v17 = vunpack.c.h.bf16 %v6907_v45  ;;  %v6577_v13 = vunpack.c.h.bf16 %v6930_v57 }
 0x82e   :  { %3106 = vmatpush.msrb.mxu1 %v6424_v47  ;;  %v6915_v47 = vld [vmem:[%s10608_s6 + $0x350] sm:$0xff]  }
 0x82f   :  { %v6516_v50 = vunpack.c.l.bf16 %v6915_v47 }
 0x830   :  { %3107 = vmatpush.msrb.mxu1 %v6421_v43  ;;  %v6520_v43 = vunpack.c.l.bf16 %v6916_v39 }
 0x831   :  { %v2979_v38 = vpop.f32.mrf.mxu3 }
 0x832   :  { %v2980_v2 = vadd.f32 %v2979_v38, %v2956_v28  ;;  %3108 = vmatpush.msrb.mxu1 %v6420_v44  ;;  %v6484_v44 = vunpack.c.l.bf16 %v6907_v45  ;;  %v6481_v28 = vunpack.c.h.bf16 %v6906_v31  ;;  %v6914_v38 = vld [vmem:[%s10608_s6 + $0x348] sm:$0xff]  }
 0x833   :  { %5653 = vmatmul.msk.f32.gmra.mxu1 %vm2466_vm8, %v5649_v10  ;;  %v6517_v10 = vunpack.c.h.bf16 %v6915_v47 }
 0x834   :  { %3109 = vmatpush.msrb.mxu1 %v6417_v25  ;;  %3013 = vmatpush.msrb.mxu0 %v2980_v2  ;;  %v5689_v25 = vld [vmem:[%s10609_s4 + $0x98] sm:$0xff]  ;;  %v6480_v2 = vunpack.c.l.bf16 %v6906_v31 }
 0x836   :  { %3110 = vmatpush.msrb.mxu1 %v6416_v14  ;;  %3014 = vmatpush.msrb.mxu0 %v2977_v30  ;;  %v6513_v14 = vunpack.c.h.bf16 %v6914_v38  ;;  %v6477_v30 = vunpack.c.h.bf16 %v6905_v49 }
 0x837   :  { %5690 = vmatmul.msk.f32.vlgmr.msrb.gmra.mxu0 %vm2466_vm8, %v5686_v48  ;;  %v6913_v48 = vld [vmem:[%s10608_s6 + $0x340] sm:$0xff]  }
 0x838   :  { %3111 = vmatpush.msrb.mxu1 %v6413_v46  ;;  %3258 = vmatpush.msra.mxu0 %v6505_v58  ;;  %v6936_v46 = vld [vmem:[%s10608_s6 + $0x3f8] sm:$0xff]   ;;  %v6512_v58 = vunpack.c.l.bf16 %v6914_v38  ;;  %v6509_v32 = vunpack.c.h.bf16 %v6913_v48 }
 0x83a   :  { %3112 = vmatpush.msrb.mxu1 %v6412_v18  ;;  %3259 = vmatpush.msra.mxu0 %v6504_v12  ;;  %v6601_v18 = vunpack.c.h.bf16 %v6936_v46  ;;  %v6935_v12 = vld [vmem:[%s10608_s6 + $0x3f0] sm:$0xff]  }
 0x83b   :  { %3113 = vmatmul.f32.vlgmr.msrb.gmra.mxu1 %v9315_v55  ;;  %v6597_v63 = vunpack.c.h.bf16 %v6935_v12  ;;  %v6596_v41 = vunpack.c.l.bf16 %v6935_v12 }
 0x83c   :  { %3281 = vmatpush.msra.mxu1 %v6537_v61  ;;  %3260 = vmatpush.msra.mxu0 %v6501_v26  ;;  %v6508_v61 = vunpack.c.l.bf16 %v6913_v48  ;;  %v6600_v26 = vunpack.c.l.bf16 %v6936_v46  ;;  %v6926_v48 = vld [vmem:[%s10608_s6 + $0x3a8] sm:$0xff]  }
 0x83d   :  { %v6560_v12 = vunpack.c.l.bf16 %v6926_v48 }
 0x83e   :  { %3282 = vmatpush.msra.mxu1 %v6536_v62  ;;  %3261 = vmatpush.msra.mxu0 %v6500_v37  ;;  %v6934_v62 = vld [vmem:[%s10608_s6 + $0x3e8] sm:$0xff]  }
 0x83f   :  { %5691 = vmatmul.msk.f32.gmra.mxu0 %vm2466_vm8, %v5687_v7  ;;  %v6593_v37 = vunpack.c.h.bf16 %v6934_v62  ;;  %v6592_v7 = vunpack.c.l.bf16 %v6934_v62  ;;  %v5728_v62 = vld [vmem:[%s10609_s4 + $0xb0] sm:$0xff] }
 0x840   :  { %3283 = vmatpush.msra.mxu1 %v6533_v42  ;;  %3262 = vmatpush.msra.mxu0 %v6497_v22  ;;  %v6933_v42 = vld [vmem:[%s10608_s6 + $0x3e0] sm:$0xff]  }
 0x841   :  { %v6589_v22 = vunpack.c.h.bf16 %v6933_v42 }
 0x842   :  { %3284 = vmatpush.msra.mxu1 %v6532_v56  ;;  %3263 = vmatpush.msra.mxu0 %v6496_v16  ;;  %v6588_v56 = vunpack.c.l.bf16 %v6933_v42  ;;  %v6931_v16 = vld [vmem:[%s10608_s6 + $0x3d0] sm:$0xff]  }
 0x843   :  { %3116 = vmatmul.f32.gmra.mxu1 %v9331_v34  ;;  %v6923_v42 = vld [vmem:[%s10608_s6 + $0x390] sm:$0xff]  }
 0x844   :  { %3285 = vmatpush.msra.mxu1 %v6529_v3  ;;  %3264 = vmatpush.msra.mxu0 %v6493_v59  ;;  %v6584_v3 = vunpack.c.l.bf16 %v6932_v33  ;;  %v6581_v59 = vunpack.c.h.bf16 %v6931_v16  ;;  %v6549_v33 = vunpack.c.h.bf16 %v6923_v42 }
 0x846   :  { %3286 = vmatpush.msra.mxu1 %v6528_v27  ;;  %3265 = vmatpush.msra.mxu0 %v6492_v0  ;;  %v6580_v27 = vunpack.c.l.bf16 %v6931_v16  ;;  %v6929_v0 = vld [vmem:[%s10608_s6 + $0x3c0] sm:$0xff]   ;;  %v5729_v16 = vld [vmem:[%s10609_s4 + $0xb8] sm:$0xff] }
 0x847   :  { %5692 = vmatmul.msk.f32.gmra.mxu0 %vm2466_vm8, %v5688_v15  ;;  %v6573_v15 = vunpack.c.h.bf16 %v6929_v0 }
 0x848   :  { %3287 = vmatpush.msra.mxu1 %v6525_v5  ;;  %3266 = vmatpush.msra.mxu0 %v6489_v24  ;;  %v6576_v5 = vunpack.c.l.bf16 %v6930_v57  ;;  %v6572_v24 = vunpack.c.l.bf16 %v6929_v0  ;;  %v6944_v0 = vld [vmem:[%s10608_s6 + $0x438] sm:$0xff]  }
 0x84a   :  { %3288 = vmatpush.msra.mxu1 %v6524_v51  ;;  %3267 = vmatpush.msra.mxu0 %v6488_v21 }
 0x84c   :  { %3289 = vmatpush.msra.mxu1 %v6521_v11  ;;  %3268 = vmatpush.msra.mxu0 %v6485_v17  ;;  %v3137_v17 = vpop.f32.mrf.mxu2 }
 0x84e   :  { %3290 = vmatpush.msra.mxu1 %v6520_v43  ;;  %3269 = vmatpush.msra.mxu0 %v6484_v44 }
 0x84f   :  { %5693 = vmatmul.msk.f32.gmra.mxu0 %vm2466_vm8, %v5689_v25 }
 0x850   :  { %3291 = vmatpush.msra.mxu1 %v6517_v10  ;;  %3270 = vmatpush.msra.mxu0 %v6481_v28  ;;  %v6928_v10 = vld [vmem:[%s10608_s6 + $0x3b8] sm:$0xff]  }
 0x851   :  { %v6569_v49 = vunpack.c.h.bf16 %v6928_v10 }
 0x852   :  { %3292 = vmatpush.msra.mxu1 %v6516_v50  ;;  %3271 = vmatpush.msra.mxu0 %v6480_v2  ;;  %v5726_v50 = vld [vmem:[%s10609_s4 + $0xa0] sm:$0xff]  ;;  %v6927_v2 = vld [vmem:[%s10608_s6 + $0x3b0] sm:$0xff]  }
 0x853   :  { %v6564_v46 = vunpack.c.l.bf16 %v6927_v2 }
 0x854   :  { %3293 = vmatpush.msra.mxu1 %v6513_v14  ;;  %3272 = vmatpush.msra.mxu0 %v6477_v30  ;;  %v3140_v31 = vpop.f32.mrf.mxu2  ;;  %v6568_v14 = vunpack.c.l.bf16 %v6928_v10  ;;  %v6565_v30 = vunpack.c.h.bf16 %v6927_v2  ;;  %v6632_v10 = vunpack.c.l.bf16 %v6944_v0 }
 0x856   :  { %3294 = vmatpush.msra.mxu1 %v6512_v58  ;;  %3273 = vmatpush.msra.mxu0 %v6476_v1  ;;  %v5727_v1 = vld [vmem:[%s10609_s4 + $0xa8] sm:$0xff] }
 0x857   :  { %3274 = vmatmul.f32.vlgmr.msra.gmra.mxu0 %v9315_v55 }
 0x858   :  { %3295 = vmatpush.msra.mxu1 %v6509_v32  ;;  %3442 = vmatpush.msrb.mxu0 %v6601_v18  ;;  %v6561_v32 = vunpack.c.h.bf16 %v6926_v48  ;;  %v6925_v18 = vld [vmem:[%s10608_s6 + $0x3a0] sm:$0xff]  }
 0x85a   :  { %3296 = vmatpush.msra.mxu1 %v6508_v61  ;;  %3443 = vmatpush.msrb.mxu0 %v6600_v26  ;;  %v6557_v61 = vunpack.c.h.bf16 %v6925_v18  ;;  %v6924_v26 = vld [vmem:[%s10608_s6 + $0x398] sm:$0xff]  }
 0x85b   :  { %3297 = vmatmul.f32.vlgmr.msra.gmra.mxu1 %v9317_v20 }
 0x85c   :  { %3444 = vmatpush.msrb.mxu0 %v6597_v63  ;;  %v6556_v63 = vunpack.c.l.bf16 %v6925_v18 }
 0x85e   :  { %3445 = vmatpush.msrb.mxu0 %v6596_v41  ;;  %v6553_v41 = vunpack.c.h.bf16 %v6924_v26 }
 0x85f   :  { %3277 = vmatmul.f32.gmra.mxu0 %v9331_v34 }
 0x860   :  { %3446 = vmatpush.msrb.mxu0 %v6593_v37 }
 0x862   :  { %3447 = vmatpush.msrb.mxu0 %v6592_v7  ;;  %v6552_v7 = vunpack.c.l.bf16 %v6924_v26 }
 0x863   :  { %3300 = vmatmul.f32.gmra.mxu1 %v9333_v6 }
 0x864   :  { %3448 = vmatpush.msrb.mxu0 %v6589_v22 }
 0x866   :  { %3449 = vmatpush.msrb.mxu0 %v6588_v56  ;;  %v6922_v56 = vld [vmem:[%s10608_s6 + $0x388] sm:$0xff]  }
 0x867   :  { %v6544_v57 = vunpack.c.l.bf16 %v6922_v56 }
 0x868   :  { %3450 = vmatpush.msrb.mxu0 %v6585_v19  ;;  %v6548_v19 = vunpack.c.l.bf16 %v6923_v42  ;;  %v6937_v42 = vld [vmem:[%s10608_s6 + $0x400] sm:$0xff]  }
 0x86a   :  { %3451 = vmatpush.msrb.mxu0 %v6584_v3  ;;  %v6545_v3 = vunpack.c.h.bf16 %v6922_v56 }
 0x86c   :  { %3452 = vmatpush.msrb.mxu0 %v6581_v59  ;;  %v6921_v59 = vld [vmem:[%s10608_s6 + $0x380] sm:$0xff]  }
 0x86e   :  { %3453 = vmatpush.msrb.mxu0 %v6580_v27 }
 0x870   :  { %3454 = vmatpush.msrb.mxu0 %v6577_v13 }
 0x872   :  { %3455 = vmatpush.msrb.mxu0 %v6576_v5 }
 0x874   :  { %3456 = vmatpush.msrb.mxu0 %v6573_v15  ;;  %v6541_v15 = vunpack.c.h.bf16 %v6921_v59 }
 0x876   :  { %3457 = vmatpush.msrb.mxu0 %v6572_v24 }
 0x877   :  { %3458 = vmatmul.f32.vlgmr.msrb.gmra.mxu0 %v9317_v20 }
 0x87f   :  { %3461 = vmatmul.f32.gmra.mxu0 %v9333_v6 }
 0x898   :  { %v9672_v39 = vpop.f32.mrf.mxu1 }
 0x8a0   :  { %v9674_v51 = vpop.f32.mrf.mxu1 }
 0x8a8   :  { %v9676_v45 = vpop.f32.mrf.mxu1 }
 0x8b0   :  { %v9678_v21 = vpop.f32.mrf.mxu1 }
 0x8b4   :  { %v9680_v11 = vpop.f32.mrf.mxu0 }
 0x8b8   :  { %v3114_v47 = vpop.f32.mrf.mxu1 }
 0x8b9   :  { %v3138_v28 = vadd.f32 %v3137_v17, %v3114_v47  ;;  %v5766_v17 = vld [vmem:[%s10609_s4 + $0xc0] sm:$0xff]  ;;  %v6540_v47 = vunpack.c.l.bf16 %v6921_v59 }
 0x8bc   :  { %v9682_v43 = vpop.f32.mrf.mxu0 }
 0x8c0   :  { %v3117_v44 = vpop.f32.mrf.mxu1 }
 0x8c1   :  { %v3141_v25 = vadd.f32 %v3140_v31, %v3117_v44  ;;  %v6633_v31 = vunpack.c.h.bf16 %v6944_v0  ;;  %v6943_v44 = vld [vmem:[%s10608_s6 + $0x430] sm:$0xff]   ;;  %v6952_v0 = vld [vmem:[%s10608_s6 + $0x478] sm:$0xff]  }
 0x8c3   :  { %3174 = vmatpush.msra.mxu3 %v3141_v25  ;;  %v6629_v25 = vunpack.c.h.bf16 %v6943_v44 }
 0x8c4   :  { %v9687_v38 = vpop.f32.mrf.mxu0 }
 0x8c5   :  { %3175 = vmatpush.msra.mxu3 %v3138_v28  ;;  %v6942_v28 = vld [vmem:[%s10608_s6 + $0x428] sm:$0xff]  }
 0x8c6   :  { %5730 = vmatmul.msk.f32.vlgmr.msra.gmra.mxu3 %vm2466_vm8, %v5726_v50  ;;  %v6628_v50 = vunpack.c.l.bf16 %v6943_v44  ;;  %v6625_v2 = vunpack.c.h.bf16 %v6942_v28 }
 0x8c7   :  { %3419 = vmatpush.msrb.mxu3 %v6569_v49  ;;  %v5767_v49 = vld [vmem:[%s10609_s4 + $0xc8] sm:$0xff] }
 0x8c9   :  { %3420 = vmatpush.msrb.mxu3 %v6568_v14  ;;  %v6941_v14 = vld [vmem:[%s10608_s6 + $0x420] sm:$0xff]  }
 0x8ca   :  { %v6621_v48 = vunpack.c.h.bf16 %v6941_v14 }
 0x8cb   :  { %3421 = vmatpush.msrb.mxu3 %v6565_v30  ;;  %v6624_v30 = vunpack.c.l.bf16 %v6942_v28  ;;  %v6949_v28 = vld [vmem:[%s10608_s6 + $0x460] sm:$0xff]  }
 0x8cc   :  { %v9699_v58 = vpop.f32.mrf.mxu0 }
 0x8cd   :  { %3422 = vmatpush.msrb.mxu3 %v6564_v46  ;;  %v6940_v46 = vld [vmem:[%s10608_s6 + $0x418] sm:$0xff]  }
 0x8ce   :  { %5731 = vmatmul.msk.f32.gmra.mxu3 %vm2466_vm8, %v5727_v1  ;;  %v6620_v1 = vunpack.c.l.bf16 %v6941_v14  ;;  %v6617_v18 = vunpack.c.h.bf16 %v6940_v46  ;;  %v6652_v14 = vunpack.c.l.bf16 %v6949_v28 }
 0x8cf   :  { %3423 = vmatpush.msrb.mxu3 %v6561_v32  ;;  %v5768_v32 = vld [vmem:[%s10609_s4 + $0xd0] sm:$0xff] }
 0x8d1   :  { %3424 = vmatpush.msrb.mxu3 %v6560_v12  ;;  %v6939_v12 = vld [vmem:[%s10608_s6 + $0x410] sm:$0xff]  }
 0x8d2   :  { %v6613_v26 = vunpack.c.h.bf16 %v6939_v12 }
 0x8d3   :  { %3425 = vmatpush.msrb.mxu3 %v6557_v61  ;;  %v6616_v61 = vunpack.c.l.bf16 %v6940_v46  ;;  %v6947_v46 = vld [vmem:[%s10608_s6 + $0x450] sm:$0xff]  }
 0x8d4   :  { %v3275_v37 = vpop.f32.mrf.mxu0 }
 0x8d5   :  { %3426 = vmatpush.msrb.mxu3 %v6556_v63  ;;  %v6938_v63 = vld [vmem:[%s10608_s6 + $0x408] sm:$0xff]  }
 0x8d6   :  { %5732 = vmatmul.msk.f32.gmra.mxu3 %vm2466_vm8, %v5728_v62  ;;  %v6612_v62 = vunpack.c.l.bf16 %v6939_v12  ;;  %v6644_v12 = vunpack.c.l.bf16 %v6947_v46 }
 0x8d7   :  { %3427 = vmatpush.msrb.mxu3 %v6553_v41  ;;  %v5769_v41 = vld [vmem:[%s10609_s4 + $0xd8] sm:$0xff] }
 0x8d8   :  { %v3298_v22 = vpop.f32.mrf.mxu1 }
 0x8d9   :  { %3428 = vmatpush.msrb.mxu3 %v6552_v7  ;;  %v3299_v24 = vadd.f32 %v3298_v22, %v3275_v37  ;;  %v6609_v37 = vunpack.c.h.bf16 %v6938_v63  ;;  %v6608_v7 = vunpack.c.l.bf16 %v6938_v63  ;;  %v6605_v22 = vunpack.c.h.bf16 %v6937_v42  ;;  %v6945_v63 = vld [vmem:[%s10608_s6 + $0x440] sm:$0xff]  }
 0x8db   :  { %3429 = vmatpush.msrb.mxu3 %v6549_v33  ;;  %v6604_v33 = vunpack.c.l.bf16 %v6937_v42 }
 0x8dc   :  { %v3278_v27 = vpop.f32.mrf.mxu0 }
 0x8dd   :  { %3430 = vmatpush.msrb.mxu3 %v6548_v19 }
 0x8de   :  { %5733 = vmatmul.msk.f32.gmra.mxu3 %vm2466_vm8, %v5729_v16 }
 0x8df   :  { %3431 = vmatpush.msrb.mxu3 %v6545_v3 }
 0x8e0   :  { %v3301_v13 = vpop.f32.mrf.mxu1 }
 0x8e1   :  { %v3302_v5 = vadd.f32 %v3301_v13, %v3278_v27  ;;  %3432 = vmatpush.msrb.mxu3 %v6544_v57 }
 0x8e3   :  { %3335 = vmatpush.msra.mxu2 %v3302_v5  ;;  %3433 = vmatpush.msrb.mxu3 %v6541_v15  ;;  %v6665_v15 = vunpack.c.h.bf16 %v6952_v0 }
 0x8e5   :  { %3336 = vmatpush.msra.mxu2 %v3299_v24  ;;  %3434 = vmatpush.msrb.mxu3 %v6540_v47  ;;  %v6951_v24 = vld [vmem:[%s10608_s6 + $0x470] sm:$0xff]  }
 0x8e6   :  { %5770 = vmatmul.msk.f32.vlgmr.msra.gmra.mxu2 %vm2466_vm8, %v5766_v17  ;;  %3435 = vmatmul.f32.vlgmr.msrb.gmra.mxu3 %v9315_v55  ;;  %v6664_v17 = vunpack.c.l.bf16 %v6952_v0  ;;  %v6661_v47 = vunpack.c.h.bf16 %v6951_v24  ;;  %v6660_v44 = vunpack.c.l.bf16 %v6951_v24 }
 0x8e7   :  { %3580 = vmatpush.msrb.mxu2 %v6633_v31  ;;  %v6950_v31 = vld [vmem:[%s10608_s6 + $0x468] sm:$0xff]  }
 0x8e9   :  { %3581 = vmatpush.msrb.mxu2 %v6632_v10  ;;  %v5807_v10 = vld [vmem:[%s10609_s4 + $0xe8] sm:$0xff] }
 0x8eb   :  { %3582 = vmatpush.msrb.mxu2 %v6629_v25  ;;  %v6657_v25 = vunpack.c.h.bf16 %v6950_v31 }
 0x8ed   :  { %3583 = vmatpush.msrb.mxu2 %v6628_v50  ;;  %v6656_v50 = vunpack.c.l.bf16 %v6950_v31  ;;  %v5848_v31 = vld [vmem:[%s10609_s4 + $0x110] sm:$0xff] }
 0x8ee   :  { %5771 = vmatmul.msk.f32.gmra.mxu2 %vm2466_vm8, %v5767_v49  ;;  %3438 = vmatmul.f32.gmra.mxu3 %v9331_v34  ;;  %v6653_v49 = vunpack.c.h.bf16 %v6949_v28 }
 0x8ef   :  { %3584 = vmatpush.msrb.mxu2 %v6625_v2  ;;  %v6948_v2 = vld [vmem:[%s10608_s6 + $0x458] sm:$0xff]  }
 0x8f1   :  { %3585 = vmatpush.msrb.mxu2 %v6624_v30  ;;  %v5808_v30 = vld [vmem:[%s10609_s4 + $0xf0] sm:$0xff] }
 0x8f3   :  { %3586 = vmatpush.msrb.mxu2 %v6621_v48  ;;  %v6649_v48 = vunpack.c.h.bf16 %v6948_v2 }
 0x8f4   :  { %v3459_v59 = vpop.f32.mrf.mxu0 }
 0x8f5   :  { %3587 = vmatpush.msrb.mxu2 %v6620_v1  ;;  %v6648_v1 = vunpack.c.l.bf16 %v6948_v2 }
 0x8f6   :  { %5772 = vmatmul.msk.f32.gmra.mxu2 %vm2466_vm8, %v5768_v32  ;;  %v6645_v32 = vunpack.c.h.bf16 %v6947_v46 }
 0x8f7   :  { %3588 = vmatpush.msrb.mxu2 %v6617_v18  ;;  %v6946_v18 = vld [vmem:[%s10608_s6 + $0x448] sm:$0xff]  }
 0x8f9   :  { %3589 = vmatpush.msrb.mxu2 %v6616_v61  ;;  %v5809_v61 = vld [vmem:[%s10609_s4 + $0xf8] sm:$0xff] }
 0x8fb   :  { %3590 = vmatpush.msrb.mxu2 %v6613_v26  ;;  %v6641_v26 = vunpack.c.h.bf16 %v6946_v18 }
 0x8fc   :  { %v3462_v27 = vpop.f32.mrf.mxu0 }
 0x8fd   :  { %3591 = vmatpush.msrb.mxu2 %v6612_v62  ;;  %v6640_v62 = vunpack.c.l.bf16 %v6946_v18 }
 0x8fe   :  { %5773 = vmatmul.msk.f32.gmra.mxu2 %vm2466_vm8, %v5769_v41  ;;  %v6637_v41 = vunpack.c.h.bf16 %v6945_v63 }
 0x8ff   :  { %3592 = vmatpush.msrb.mxu2 %v6609_v37  ;;  %v6636_v37 = vunpack.c.l.bf16 %v6945_v63 }
 0x901   :  { %3593 = vmatpush.msrb.mxu2 %v6608_v7 }
 0x903   :  { %3594 = vmatpush.msrb.mxu2 %v6605_v22 }
 0x905   :  { %3595 = vmatpush.msrb.mxu2 %v6604_v33 }
 0x906   :  { %3596 = vmatmul.f32.vlgmr.msrb.gmra.mxu2 %v9315_v55 }
 0x90e   :  { %3599 = vmatmul.f32.gmra.mxu2 %v9331_v34  ;;  %v5806_v34 = vld [vmem:[%s10609_s4 + $0xe0] sm:$0xff] }
 0x949   :  { %v9772_v56 = vpop.f32.mrf.mxu3 }
 0x951   :  { %v9774_v19 = vpop.f32.mrf.mxu3 }
 0x959   :  { %v9776_v16 = vpop.f32.mrf.mxu3 }
 0x961   :  { %v9778_v3 = vpop.f32.mrf.mxu3 }
 0x969   :  { %v3436_v57 = vpop.f32.mrf.mxu3  ;;  %v3338_v42 = vpop.f32.mrf.mxu2 }
 0x96a   :  { %v3460_v55 = vadd.f32 %v3459_v59, %v3436_v57 }
 0x971   :  { %v3439_v13 = vpop.f32.mrf.mxu3  ;;  %v3341_v7 = vpop.f32.mrf.mxu2 }
 0x972   :  { %v3463_v5 = vadd.f32 %v3462_v27, %v3439_v13 }
 0x974   :  { %3496 = vmatpush.msra.mxu3 %v3463_v5  ;;  %v3677_v5 = vld [vmem:[%s10606_s5 + $0x8] sm:$0xff] }
 0x975   :  { %3687 = vperm.xlu1 %6995, %v3677_v5  }
 0x976   :  { %3497 = vmatpush.msra.mxu3 %v3460_v55 }
 0x977   :  { %5810 = vmatmul.msk.f32.vlgmr.msra.gmra.mxu3 %vm2466_vm8, %v5806_v34 }
 0x978   :  { %3603 = vmatpush.msrb.mxu3 %v6665_v15 }
 0x979   :  { %v3344_v59 = vpop.f32.mrf.mxu2 }
 0x97a   :  { %3604 = vmatpush.msrb.mxu3 %v6664_v17  ;;  %v5846_v17 = vld [vmem:[%s10609_s4 + $0x100] sm:$0xff] }
 0x97c   :  { %3605 = vmatpush.msrb.mxu3 %v6661_v47  ;;  %v5847_v47 = vld [vmem:[%s10609_s4 + $0x108] sm:$0xff] }
 0x97e   :  { %3606 = vmatpush.msrb.mxu3 %v6660_v44  ;;  %v5849_v44 = vld [vmem:[%s10609_s4 + $0x118] sm:$0xff] }
 0x97f   :  { %5811 = vmatmul.msk.f32.gmra.mxu3 %vm2466_vm8, %v5807_v10  ;;  %v2538_v10 = vadd.f32 %v9518_v9, %v9512_v60 }
 0x980   :  { %3607 = vmatpush.msrb.mxu3 %v6657_v25 }
 0x981   :  { %v9822_v27 = vpop.f32.mrf.mxu2  ;;  %v2706_v25 = vadd.f32 %v9526_v8, %v2538_v10  ;;  %v3683_v8 = vpop.permute.xlu0 %3682 }
 0x982   :  { %3608 = vmatpush.msrb.mxu3 %v6656_v50 }
 0x983   :  { %v2867_v28 = vadd.f32 %v9672_v39, %v2706_v25  ;;  %v2544_v39 = vadd.f32 %v9524_v23, %v9520_v53 }
 0x984   :  { %3609 = vmatpush.msrb.mxu3 %v6653_v49  ;;  %v2541_v49 = vadd.f32 %v9522_v52, %v9516_v35 }
 0x985   :  { %v3028_v50 = vadd.f32 %v9680_v11, %v2867_v28  ;;  %v2708_v52 = vadd.f32 %v9532_v40, %v2544_v39  ;;  %v2547_v40 = vadd.f32 %v9528_v36, %v9514_v4  ;;  %v4960_v39 = vld [vmem:[%s10611_s8 + $0x28] sm:$0xff] }
 0x986   :  { %3610 = vmatpush.msrb.mxu3 %v6652_v14  ;;  %v2707_v14 = vadd.f32 %v9530_v29, %v2541_v49 }
 0x987   :  { %5812 = vmatmul.msk.f32.gmra.mxu3 %vm2466_vm8, %v5808_v30  ;;  %v3189_v2 = vadd.f32 %v9772_v56, %v3028_v50 }
 0x988   :  { %3611 = vmatpush.msrb.mxu3 %v6649_v48  ;;  %v2868_v48 = vadd.f32 %v9674_v51, %v2707_v14  ;;  %v2869_v51 = vadd.f32 %v9676_v45, %v2708_v52  ;;  %v4961_v52 = vld [vmem:[%s10611_s8 + $0x30] sm:$0xff] }
 0x989   :  { %v3597_v0 = vpop.f32.mrf.mxu2  ;;  %v3350_v30 = vadd.f32 %v3338_v42, %v3189_v2 }
 0x98a   :  { %3612 = vmatpush.msrb.mxu3 %v6648_v1  ;;  %v3029_v60 = vadd.f32 %v9682_v43, %v2868_v48  ;;  %v3030_v53 = vadd.f32 %v9687_v38, %v2869_v51  ;;  %v6959_v51 = vld [vmem:[%s10612_s9 + $0x38] sm:$0xff]  }
 0x98c   :  { %3613 = vmatpush.msrb.mxu3 %v6645_v32  ;;  %v3190_v11 = vadd.f32 %v9774_v19, %v3029_v60  ;;  %v3191_v19 = vadd.f32 %v9776_v16, %v3030_v53  ;;  %v4955_v60 = vld [vmem:[%s10611_s8] sm:$0xff]  ;;  %v6696_v53 = vunpack.c.l.bf16 %v6959_v51 }
 0x98e   :  { %3614 = vmatpush.msrb.mxu3 %v6644_v12  ;;  %v3351_v56 = vadd.f32 %v3341_v7, %v3190_v11  ;;  %v4957_v11 = vld [vmem:[%s10611_s8 + $0x10] sm:$0xff] }
 0x98f   :  { %5813 = vmatmul.msk.f32.gmra.mxu3 %vm2466_vm8, %v5809_v61  ;;  %v2709_v61 = vadd.f32 %v9544_v54, %v2547_v40  ;;  %v6958_v40 = vld [vmem:[%s10612_s9 + $0x30] sm:$0xff]  }
 0x990   :  { %3615 = vmatpush.msrb.mxu3 %v6641_v26  ;;  %v3352_v26 = vadd.f32 %v3344_v59, %v3191_v19  ;;  %v7037_v59 = vmov 64.0  }
 0x991   :  { %v2870_v38 = vadd.f32 %v9678_v21, %v2709_v61  ;;  %7003 = vrcp.f32 %v7037_v59  ;;  %v6963_v59 = vld [vmem:[%s10612_s9 + $0x58] sm:$0xff]  }
 0x992   :  { %3616 = vmatpush.msrb.mxu3 %v6640_v62 }
 0x993   :  { %v3031_v4 = vadd.f32 %v9699_v58, %v2870_v38  ;;  %v6957_v38 = vld [vmem:[%s10612_s9 + $0x28] sm:$0xff]  }
 0x994   :  { %3617 = vmatpush.msrb.mxu3 %v6637_v41 }
 0x995   :  { %v3192_v16 = vadd.f32 %v9778_v3, %v3031_v4  ;;  %v6688_v4 = vunpack.c.l.bf16 %v6957_v38 }
 0x996   :  { %3618 = vmatpush.msrb.mxu3 %v6636_v37 }
 0x997   :  { %3619 = vmatmul.f32.vlgmr.msrb.gmra.mxu3 %v9317_v20  ;;  %v3678_v20 = vld [vmem:[%s10606_s5 + $0x10] sm:$0xff]  ;;  %v3353_v37 = vadd.f32 %v9822_v27, %v3192_v16  ;;  %v6956_v16 = vld [vmem:[%s10612_s9 + $0x20] sm:$0xff]  }
 0x998   :  { %3692 = vperm.xlu2 %6996, %v3678_v20  }
 0x99f   :  { %3622 = vmatmul.f32.gmra.mxu3 %v9333_v6  ;;  %v3600_v6 = vpop.f32.mrf.mxu2 }
 0x9e7   :  { %v3688_v18 = vpop.permute.xlu1 %3687 }
 0x9f2   :  { %v3693_v41 = vpop.permute.xlu2 %3692 }
 0x9fa   :  { %v3499_v22 = vpop.f32.mrf.mxu3 }
 0x9fb   :  { %v3511_v46 = vadd.f32 %v3499_v22, %v3350_v30 }
 0xa02   :  { %v3502_v33 = vpop.f32.mrf.mxu3 }
 0xa03   :  { %v3512_v43 = vadd.f32 %v3502_v33, %v3351_v56  ;;  %v3698_v33 = vpop.permute.xlu0 %3697  ;;  %v4962_v56 = vld [vmem:[%s10611_s8 + $0x38] sm:$0xff] }
 0xa0a   :  { %v3505_v57 = vpop.f32.mrf.mxu3 }
 0xa0b   :  { %v3513_v63 = vadd.f32 %v3505_v57, %v3352_v26  ;;  %v7004_v57 = vpop.eup %7003  ;;  %v6692_v26 = vunpack.c.l.bf16 %v6958_v40 }
 0xa0c   :  { %v3722_v27 = vmul.f32 64.0, %v7004_v57  ;;  %vm3726_vm10 = vweird.f32 %v7004_v57 }
 0xa12   :  { %v9824_v13 = vpop.f32.mrf.mxu3 }
 0xa13   :  { %v3514_v21 = vadd.f32 %v9824_v13, %v3353_v37  ;;  %v6685_v37 = vunpack.c.h.bf16 %v6956_v16 }
 0xa1a   :  { %v3620_v55 = vpop.f32.mrf.mxu3 }
 0xa1b   :  { %v3621_v24 = vadd.f32 %v3620_v55, %v3597_v0  ;;  %v3723_v0 = vsub.f32 1.0, %v3722_v27 }
 0xa1d   :  { %v3724_v5 = vmul.f32 %v7004_v57, %v3723_v0 }
 0xa1f   :  { %v3725_v55 = vadd.f32 %v7004_v57, %v3724_v5 }
 0xa21   :  { %v9894_v13 = vsel %vm3726_vm10, %v7004_v57, %v3725_v55  ;;  %v6713_v57 = vunpack.c.h.bf16 %v6963_v59  ;;  %v6712_v55 = vunpack.c.l.bf16 %v6963_v59 }
 0xa22   :  { %v3623_v34 = vpop.f32.mrf.mxu3 }
 0xa23   :  { %v3624_v15 = vadd.f32 %v3623_v34, %v3600_v6 }
 0xa25   :  { %3657 = vmatpush.msra.mxu0 %v3624_v15 }
 0xa27   :  { %3658 = vmatpush.msra.mxu0 %v3621_v24 }
 0xa28   :  { %5850 = vmatmul.msk.f32.vlgmr.msra.gmra.mxu0 %vm2466_vm8, %v5846_v17 }
 0xa30   :  { %5851 = vmatmul.msk.f32.gmra.mxu0 %vm2466_vm8, %v5847_v47 }
 0xa38   :  { %5852 = vmatmul.msk.f32.gmra.mxu0 %vm2466_vm8, %v5848_v31 }
 0xa40   :  { %5853 = vmatmul.msk.f32.gmra.mxu0 %vm2466_vm8, %v5849_v44 }
 0xaa5   :  { %v3660_v1 = vpop.f32.mrf.mxu0 }
 0xaa6   :  { %v3672_v9 = vadd.f32 %v3660_v1, %v3511_v46 }
 0xaa8   :  { %v3700_v35 = vadd.f32 %v3683_v8, %v3672_v9  ;;  %v4958_v9 = vld [vmem:[%s10611_s8 + $0x18] sm:$0xff]  ;;  %v4956_v8 = vld [vmem:[%s10611_s8 + $0x8] sm:$0xff] }
 0xaaa   :  { %3705 = vst.msk [vmem:[%s10610_s11] sm:$0xff] %vm3704_vm9, %v3700_v35  ;;  %v3709_v29 = vsel %vm3704_vm9, %v3700_v35, 0.0 }
 0xaab   :  { %3710 = vadd.xlane.f32.xlu0 %v3709_v29  ;;  %v6955_v29 = vld [vmem:[%s10612_s9 + $0x18] sm:$0xff]  }
 0xaad   :  { %v3663_v32 = vpop.f32.mrf.mxu0 }
 0xaae   :  { %v3673_v23 = vadd.f32 %v3663_v32, %v3512_v43  ;;  %v6681_v43 = vunpack.c.h.bf16 %v6955_v29  ;;  %v6697_v32 = vunpack.c.h.bf16 %v6959_v51 }
 0xab0   :  { %v3701_v12 = vadd.f32 %v3688_v18, %v3673_v23  ;;  %3844 = vmatpush.msrb.mxu1 %v6681_v43  ;;  %3898 = vmatpush.msra.mxu2 %v6697_v32  ;;  %v6680_v18 = vunpack.c.l.bf16 %v6955_v29  ;;  %v6954_v23 = vld [vmem:[%s10612_s9 + $0x10] sm:$0xff]  }
 0xab1   :  { %v6677_v19 = vunpack.c.h.bf16 %v6954_v23  ;;  %v6676_v61 = vunpack.c.l.bf16 %v6954_v23 }
 0xab2   :  { %3706 = vst.msk [vmem:[%s10610_s11 + $0x8] sm:$0xff] %vm3704_vm9, %v3701_v12  ;;  %v3712_v45 = vsel %vm3704_vm9, %v3701_v12, 0.0  ;;  %3845 = vmatpush.msrb.mxu1 %v6680_v18  ;;  %3899 = vmatpush.msra.mxu2 %v6696_v53 }
 0xab3   :  { %3713 = vadd.xlane.f32.xlu2 %v3712_v45  ;;  %v6953_v45 = vld [vmem:[%s10612_s9 + $0x8] sm:$0xff]  }
 0xab4   :  { %3846 = vmatpush.msrb.mxu1 %v6677_v19 }
 0xab5   :  { %v3666_v62 = vpop.f32.mrf.mxu0 }
 0xab6   :  { %v3674_v36 = vadd.f32 %v3666_v62, %v3513_v63  ;;  %3847 = vmatpush.msrb.mxu1 %v6676_v61  ;;  %v6673_v63 = vunpack.c.h.bf16 %v6953_v45  ;;  %v6689_v62 = vunpack.c.h.bf16 %v6957_v38 }
 0xab8   :  { %v3702_v54 = vadd.f32 %v3693_v41, %v3674_v36  ;;  %3848 = vmatpush.msrb.mxu1 %v6673_v63  ;;  %v6672_v41 = vunpack.c.l.bf16 %v6953_v45  ;;  %v6667_v36 = vld [vmem:[%s10612_s9] sm:$0xff]  }
 0xaba   :  { %3707 = vst.msk [vmem:[%s10610_s11 + $0x10] sm:$0xff] %vm3704_vm9, %v3702_v54  ;;  %v3715_v42 = vsel %vm3704_vm9, %v3702_v54, 0.0  ;;  %3849 = vmatpush.msrb.mxu1 %v6672_v41 }
 0xabb   :  { %3716 = vadd.xlane.f32.xlu1 %v3715_v42  ;;  %v6668_v42 = vunpack.c.l.bf16 %v6667_v36 }
 0xabd   :  { %v3669_v7 = vpop.f32.mrf.mxu0 }
 0xabe   :  { %v3675_v22 = vadd.f32 %v3669_v7, %v3514_v21  ;;  %v6684_v21 = vunpack.c.l.bf16 %v6956_v16 }
 0xac0   :  { %v3703_v58 = vadd.f32 %v3698_v33, %v3675_v22 }
 0xac2   :  { %3708 = vst.msk [vmem:[%s10610_s11 + $0x18] sm:$0xff] %vm3704_vm9, %v3703_v58  ;;  %v3718_v3 = vsel %vm3704_vm9, %v3703_v58, 0.0 }
 0xac3   :  { %3719 = vadd.xlane.f32.xlu0 %v3718_v3 }
 0xb1e   :  { %v3711_v20 = vpop.xlane.xlu0 %3710 }
 0xb1f   :  { %v3728_v6 = vmul.f32 %v9894_v13, %v3711_v20  ;;  %v6962_v20 = vld [vmem:[%s10612_s9 + $0x50] sm:$0xff]  }
 0xb21   :  { %v9897_v34 = vsub.f32 %v3700_v35, %v3728_v6  ;;  %v4959_v35 = vld [vmem:[%s10611_s8 + $0x20] sm:$0xff] }
 0xb23   :  { %v3736_v15 = vmul.f32 %v9897_v34, %v9897_v34 }
 0xb25   :  { %v3740_v24 = vsel %vm3704_vm9, %v3736_v15, 0.0  ;;  %v6709_v15 = vunpack.c.h.bf16 %v6962_v20 }
 0xb26   :  { %3741 = vadd.xlane.f32.xlu2 %v3740_v24  ;;  %v3714_v17 = vpop.xlane.xlu2 %3713 }
 0xb27   :  { %v3729_v47 = vmul.f32 %v9894_v13, %v3714_v17 }
 0xb29   :  { %v9903_v31 = vsub.f32 %v3701_v12, %v3729_v47  ;;  %v6693_v12 = vunpack.c.h.bf16 %v6958_v40  ;;  %v6708_v47 = vunpack.c.l.bf16 %v6962_v20 }
 0xb2b   :  { %v3737_v44 = vmul.f32 %v9903_v31, %v9903_v31  ;;  %3900 = vmatpush.msra.mxu2 %v6693_v12 }
 0xb2d   :  { %v3743_v10 = vsel %vm3704_vm9, %v3737_v44, 0.0  ;;  %3901 = vmatpush.msra.mxu2 %v6692_v26 }
 0xb2e   :  { %3744 = vadd.xlane.f32.xlu0 %v3743_v10  ;;  %v3717_v25 = vpop.xlane.xlu1 %3716  ;;  %v6961_v10 = vld [vmem:[%s10612_s9 + $0x48] sm:$0xff]  }
 0xb2f   :  { %v3730_v28 = vmul.f32 %v9894_v13, %v3717_v25  ;;  %3902 = vmatpush.msra.mxu2 %v6689_v62 }
 0xb31   :  { %v9909_v50 = vsub.f32 %v3702_v54, %v3730_v28  ;;  %3903 = vmatpush.msra.mxu2 %v6688_v4  ;;  %v6669_v54 = vunpack.c.h.bf16 %v6667_v36  ;;  %v6705_v28 = vunpack.c.h.bf16 %v6961_v10  ;;  %v6967_v4 = vld [vmem:[%s10612_s9 + $0x78] sm:$0xff]  }
 0xb32   :  { %v6729_v16 = vunpack.c.h.bf16 %v6967_v4 }
 0xb33   :  { %v3738_v49 = vmul.f32 %v9909_v50, %v9909_v50  ;;  %3850 = vmatpush.msrb.mxu1 %v6669_v54  ;;  %3904 = vmatpush.msra.mxu2 %v6685_v37  ;;  %v6728_v54 = vunpack.c.l.bf16 %v6967_v4  ;;  %v5875_v4 = vld [vmem:[%s10613_s7 + $0x68] sm:$0xff] }
 0xb35   :  { %v3746_v2 = vsel %vm3704_vm9, %v3738_v49, 0.0  ;;  %3851 = vmatpush.msrb.mxu1 %v6668_v42  ;;  %3905 = vmatpush.msra.mxu2 %v6684_v21 }
 0xb36   :  { %v3720_v14 = vpop.xlane.xlu0 %3719  ;;  %3747 = vadd.xlane.f32.xlu1 %v3746_v2 }
 0xb37   :  { %v3731_v30 = vmul.f32 %v9894_v13, %v3720_v14  ;;  %4084 = vmatpush.msra.mxu1 %v6713_v57  ;;  %v6704_v14 = vunpack.c.l.bf16 %v6961_v10  ;;  %v5870_v10 = vld [vmem:[%s10613_s7 + $0x40] sm:$0xff] }
 0xb39   :  { %v9915_v48 = vsub.f32 %v3703_v58, %v3731_v30  ;;  %4085 = vmatpush.msra.mxu1 %v6712_v55  ;;  %v6960_v30 = vld [vmem:[%s10612_s9 + $0x40] sm:$0xff]  }
 0xb3b   :  { %v3739_v46 = vmul.f32 %v9915_v48, %v9915_v48  ;;  %4086 = vmatpush.msra.mxu1 %v6709_v15 }
 0xb3d   :  { %v3749_v1 = vsel %vm3704_vm9, %v3739_v46, 0.0  ;;  %4087 = vmatpush.msra.mxu1 %v6708_v47 }
 0xb3e   :  { %3750 = vadd.xlane.f32.xlu2 %v3749_v1 }
 0xb3f   :  { %4088 = vmatpush.msra.mxu1 %v6705_v28 }
 0xb41   :  { %4089 = vmatpush.msra.mxu1 %v6704_v14  ;;  %v6971_v14 = vld [vmem:[%s10612_s9 + $0x98] sm:$0xff]  }
 0xb42   :  { %4965 = vperm.xlu0 %6994, %v4955_v60   ;;  %v6701_v60 = vunpack.c.h.bf16 %v6960_v30 }
 0xb44   :  { %4090 = vmatpush.msra.mxu1 %v6701_v60  ;;  %v6970_v60 = vld [vmem:[%s10612_s9 + $0x90] sm:$0xff]  }
 0xb4a   :  { %4980 = vperm.xlu0 %6994, %v4958_v9  }
 0xb4f   :  { %4970 = vperm.xlu1 %6995, %v4956_v8  }
 0xb52   :  { %4990 = vperm.xlu0 %6994, %v4960_v39  }
 0xb56   :  { %4975 = vperm.xlu2 %6996, %v4957_v11  }
 0xb57   :  { %4985 = vperm.xlu1 %6995, %v4959_v35  }
 0xb5e   :  { %4995 = vperm.xlu2 %6996, %v4961_v52   ;;  %v6700_v52 = vunpack.c.l.bf16 %v6960_v30  ;;  %v6745_v30 = vunpack.c.h.bf16 %v6971_v14 }
 0xb5f   :  { %5000 = vperm.xlu1 %6995, %v4962_v56  }
 0xb60   :  { %4091 = vmatpush.msra.mxu1 %v6700_v52 }
 0xb99   :  { %v3742_v7 = vpop.xlane.xlu2 %3741 }
 0xb9a   :  { %v3752_v22 = vmul.f32 %v3742_v7, %v9894_v13 }
 0xb9c   :  { %v3756_v33 = vadd.f32 1e-05, %v3752_v22 }
 0xb9e   :  { %7005 = vrsqrt.f32 %v3756_v33  ;;  %vm3766_vm12 = vweird.f32 %v3756_v33 }
 0xba1   :  { %v3745_v58 = vpop.xlane.xlu0 %3744 }
 0xba2   :  { %v3753_v3 = vmul.f32 %v3745_v58, %v9894_v13  ;;  %v6965_v58 = vld [vmem:[%s10612_s9 + $0x68] sm:$0xff]  }
 0xba3   :  { %v6720_v59 = vunpack.c.l.bf16 %v6965_v58 }
 0xba4   :  { %v7006_v27 = vpop.eup %7005  ;;  %v3757_v0 = vadd.f32 1e-05, %v3753_v3  ;;  %v6721_v3 = vunpack.c.h.bf16 %v6965_v58 }
 0xba5   :  { %v3761_v5 = vmul.f32 %v7006_v27, %v3756_v33  ;;  %vm3767_vm11 = vweird.f32 %v7006_v27 }
 0xba6   :  { %7007 = vrsqrt.f32 %v3757_v0  ;;  %vm3768_vm13 = vmor %vm3766_vm12, %vm3767_vm11  ;;  %vm3776_vm15 = vweird.f32 %v3757_v0 }
 0xba7   :  { %v3762_v6 = vmul.f32 %v7006_v27, %v3761_v5 }
 0xba9   :  { %v3763_v24 = vmul.f32 0.5, %v3762_v6  ;;  %v3748_v17 = vpop.xlane.xlu1 %3747 }
 0xbaa   :  { %v3754_v44 = vmul.f32 %v3748_v17, %v9894_v13  ;;  %v3865_v17 = vld [vmem:[%s10613_s7] sm:$0xff] }
 0xbab   :  { %v3764_v25 = vsub.f32 1.5, %v3763_v24 }
 0xbac   :  { %v7008_v49 = vpop.eup %7007  ;;  %v3758_v2 = vadd.f32 1e-05, %v3754_v44 }
 0xbad   :  { %v3765_v46 = vmul.f32 %v7006_v27, %v3764_v25  ;;  %v3771_v1 = vmul.f32 %v7008_v49, %v3757_v0  ;;  %vm3777_vm14 = vweird.f32 %v7008_v49  ;;  %v3866_v25 = vld [vmem:[%s10613_s7 + $0x8] sm:$0xff] }
 0xbae   :  { %7009 = vrsqrt.f32 %v3758_v2  ;;  %vm3778_vm0 = vmor %vm3776_vm15, %vm3777_vm14  ;;  %vm3786_vm2 = vweird.f32 %v3758_v2 }
 0xbaf   :  { %v3769_v9 = vsel %vm3768_vm13, %v7006_v27, %v3765_v46  ;;  %v3772_v8 = vmul.f32 %v7008_v49, %v3771_v1  ;;  %v6744_v1 = vunpack.c.l.bf16 %v6971_v14 }
 0xbb0   :  { %v3800_v39 = vmul.f32 %v3769_v9, %v9897_v34  ;;  %v6741_v9 = vunpack.c.h.bf16 %v6970_v60 }
 0xbb1   :  { %v3773_v11 = vmul.f32 0.5, %v3772_v8  ;;  %v3751_v35 = vpop.xlane.xlu2 %3750  ;;  %v5872_v8 = vld [vmem:[%s10613_s7 + $0x50] sm:$0xff] }
 0xbb2   :  { %v9984_v56 = vmax.f32 %v3800_v39, 0.0  ;;  %v3755_v29 = vmul.f32 %v3751_v35, %v9894_v13  ;;  %v3868_v39 = vld [vmem:[%s10613_s7 + $0x18] sm:$0xff]  ;;  %v6969_v35 = vld [vmem:[%s10612_s9 + $0x88] sm:$0xff]  }
 0xbb3   :  { %v3774_v51 = vsub.f32 1.5, %v3773_v11  ;;  %v6740_v11 = vunpack.c.l.bf16 %v6970_v60  ;;  %v6737_v52 = vunpack.c.h.bf16 %v6969_v35 }
 0xbb4   :  { %v7010_v43 = vpop.eup %7009  ;;  %v3759_v32 = vadd.f32 1e-05, %v3755_v29  ;;  %5854 = vmatmul.msk.f32.vlgmr.msrb.gmra.mxu1 %vm3704_vm9, %v9984_v56  ;;  %5866 = vmatmul.msk.f32.vlgmr.msra.gmra.mxu2 %vm3704_vm9, %v9984_v56 }
 0xbb5   :  { %v3775_v34 = vmul.f32 %v7008_v49, %v3774_v51  ;;  %v3781_v18 = vmul.f32 %v7010_v43, %v3758_v2  ;;  %vm3787_vm1 = vweird.f32 %v7010_v43  ;;  %4212 = vmatpush.msrb.mxu1 %v6729_v16  ;;  %v3867_v2 = vld [vmem:[%s10613_s7 + $0x10] sm:$0xff]  ;;  %v6736_v51 = vunpack.c.l.bf16 %v6969_v35 }
 0xbb6   :  { %7011 = vrsqrt.f32 %v3759_v32  ;;  %vm3788_vm3 = vmor %vm3786_vm2, %vm3787_vm1  ;;  %vm3796_vm5 = vweird.f32 %v3759_v32  ;;  %v5908_v16 = vld [vmem:[%s10613_s7 + $0x90] sm:$0xff] }
 0xbb7   :  { %v3779_v53 = vsel %vm3778_vm0, %v7008_v49, %v3775_v34  ;;  %v3782_v23 = vmul.f32 %v7010_v43, %v3781_v18  ;;  %4213 = vmatpush.msrb.mxu1 %v6728_v54  ;;  %v5871_v49 = vld [vmem:[%s10613_s7 + $0x48] sm:$0xff]  ;;  %v5873_v34 = vld [vmem:[%s10613_s7 + $0x58] sm:$0xff] }
 0xbb8   :  { %v3801_v13 = vmul.f32 %v3779_v53, %v9903_v31  ;;  %v3869_v53 = vld [vmem:[%s10613_s7 + $0x20] sm:$0xff] }
 0xbb9   :  { %v3783_v40 = vmul.f32 0.5, %v3782_v23  ;;  %v5906_v23 = vld [vmem:[%s10613_s7 + $0x80] sm:$0xff] }
 0xbba   :  { %v9992_v19 = vmax.f32 %v3801_v13, 0.0 }
 0xbbb   :  { %v3784_v12 = vsub.f32 1.5, %v3783_v40 }
 0xbbc   :  { %v7012_v61 = vpop.eup %7011  ;;  %5855 = vmatmul.msk.f32.gmra.mxu1 %vm3704_vm9, %v9992_v19  ;;  %5867 = vmatmul.msk.f32.gmra.mxu2 %vm3704_vm9, %v9992_v19 }
 0xbbd   :  { %v3785_v26 = vmul.f32 %v7010_v43, %v3784_v12  ;;  %v3791_v45 = vmul.f32 %v7012_v61, %v3759_v32  ;;  %vm3797_vm4 = vweird.f32 %v7012_v61  ;;  %v6968_v32 = vld [vmem:[%s10612_s9 + $0x80] sm:$0xff]  }
 0xbbe   :  { %vm3798_vm6 = vmor %vm3796_vm5, %vm3797_vm4  ;;  %v6733_v18 = vunpack.c.h.bf16 %v6968_v32  ;;  %v6732_v40 = vunpack.c.l.bf16 %v6968_v32 }
 0xbbf   :  { %v3789_v38 = vsel %vm3788_vm3, %v7010_v43, %v3785_v26  ;;  %v3792_v63 = vmul.f32 %v7012_v61, %v3791_v45  ;;  %v6975_v43 = vld [vmem:[%s10612_s9 + $0xb8] sm:$0xff]   ;;  %v5874_v26 = vld [vmem:[%s10613_s7 + $0x60] sm:$0xff]  ;;  %v3870_v45 = vld [vmem:[%s10613_s7 + $0x28] sm:$0xff] }
 0xbc0   :  { %v3802_v31 = vmul.f32 %v3789_v38, %v9909_v50  ;;  %v6966_v50 = vld [vmem:[%s10612_s9 + $0x70] sm:$0xff]   ;;  %v6761_v13 = vunpack.c.h.bf16 %v6975_v43  ;;  %v5907_v38 = vld [vmem:[%s10613_s7 + $0x88] sm:$0xff] }
 0xbc1   :  { %v3793_v62 = vmul.f32 0.5, %v3792_v63  ;;  %v6725_v42 = vunpack.c.h.bf16 %v6966_v50  ;;  %v6724_v7 = vunpack.c.l.bf16 %v6966_v50 }
 0xbc2   :  { %v9999_v41 = vmax.f32 %v3802_v31, 0.0  ;;  %v6974_v31 = vld [vmem:[%s10612_s9 + $0xb0] sm:$0xff]  }
 0xbc3   :  { %v3794_v36 = vsub.f32 1.5, %v3793_v62  ;;  %4214 = vmatpush.msrb.mxu1 %v6725_v42  ;;  %v6757_v62 = vunpack.c.h.bf16 %v6974_v31  ;;  %v6756_v50 = vunpack.c.l.bf16 %v6974_v31  ;;  %v3872_v42 = vld [vmem:[%s10613_s7 + $0x38] sm:$0xff] }
 0xbc4   :  { %5856 = vmatmul.msk.f32.gmra.mxu1 %vm3704_vm9, %v9999_v41  ;;  %5868 = vmatmul.msk.f32.gmra.mxu2 %vm3704_vm9, %v9999_v41 }
 0xbc5   :  { %v3795_v37 = vmul.f32 %v7012_v61, %v3794_v36  ;;  %4215 = vmatpush.msrb.mxu1 %v6724_v7  ;;  %v3871_v36 = vld [vmem:[%s10613_s7 + $0x30] sm:$0xff]  ;;  %v6973_v7 = vld [vmem:[%s10612_s9 + $0xa8] sm:$0xff]  }
 0xbc7   :  { %v3799_v21 = vsel %vm3798_vm6, %v7012_v61, %v3795_v37  ;;  %4216 = vmatpush.msrb.mxu1 %v6721_v3  ;;  %v6760_v61 = vunpack.c.l.bf16 %v6975_v43  ;;  %v5876_v37 = vld [vmem:[%s10613_s7 + $0x70] sm:$0xff]  ;;  %v6752_v3 = vunpack.c.l.bf16 %v6973_v7 }
 0xbc8   :  { %v3803_v22 = vmul.f32 %v3799_v21, %v9915_v48  ;;  %v6964_v48 = vld [vmem:[%s10612_s9 + $0x60] sm:$0xff]   ;;  %v5909_v21 = vld [vmem:[%s10613_s7 + $0x98] sm:$0xff] }
 0xbc9   :  { %v6717_v57 = vunpack.c.h.bf16 %v6964_v48  ;;  %4217 = vmatpush.msrb.mxu1 %v6720_v59  ;;  %v6716_v27 = vunpack.c.l.bf16 %v6964_v48  ;;  %v6972_v59 = vld [vmem:[%s10612_s9 + $0xa0] sm:$0xff]  }
 0xbca   :  { %v10012_v33 = vmax.f32 %v3803_v22, 0.0  ;;  %v6753_v22 = vunpack.c.h.bf16 %v6973_v7  ;;  %v6749_v48 = vunpack.c.h.bf16 %v6972_v59 }
 0xbcb   :  { %4218 = vmatpush.msrb.mxu1 %v6717_v57  ;;  %v5877_v57 = vld [vmem:[%s10613_s7 + $0x78] sm:$0xff] }
 0xbcc   :  { %5857 = vmatmul.msk.f32.gmra.mxu1 %vm3704_vm9, %v10012_v33  ;;  %5869 = vmatmul.msk.f32.gmra.mxu2 %vm3704_vm9, %v10012_v33 }
 0xbcd   :  { %4219 = vmatpush.msrb.mxu1 %v6716_v27  ;;  %v5910_v27 = vld [vmem:[%s10613_s7 + $0xa0] sm:$0xff] }
 0xbd4   :  { %5902 = vmatmul.msk.f32.vlgmr.msra.gmra.mxu1 %vm3704_vm9, %v9984_v56 }
 0xbdc   :  { %5903 = vmatmul.msk.f32.gmra.mxu1 %vm3704_vm9, %v9992_v19 }
 0xbe4   :  { %5904 = vmatmul.msk.f32.gmra.mxu1 %vm3704_vm9, %v9999_v41 }
 0xbec   :  { %5905 = vmatmul.msk.f32.gmra.mxu1 %vm3704_vm9, %v10012_v33 }
 0xbf4   :  { %5930 = vmatmul.msk.f32.vlgmr.msrb.gmra.mxu1 %vm3704_vm9, %v9984_v56 }
 0xbfc   :  { %5931 = vmatmul.msk.f32.gmra.mxu1 %vm3704_vm9, %v9992_v19 }
 0xc04   :  { %5932 = vmatmul.msk.f32.gmra.mxu1 %vm3704_vm9, %v9999_v41 }
 0xc0c   :  { %5933 = vmatmul.msk.f32.gmra.mxu1 %vm3704_vm9, %v10012_v33 }
 0xc31   :  { %v3853_v0 = vpop.f32.mrf.mxu1 }
 0xc37   :  { %v3907_v5 = vpop.f32.mrf.mxu2 }
 0xc39   :  { %v3856_v55 = vpop.f32.mrf.mxu1 }
 0xc3f   :  { %v3910_v20 = vpop.f32.mrf.mxu2 }
 0xc41   :  { %v3859_v6 = vpop.f32.mrf.mxu1 }
 0xc47   :  { %v3913_v15 = vpop.f32.mrf.mxu2 }
 0xc49   :  { %v3862_v24 = vpop.f32.mrf.mxu1 }
 0xc4a   :  { %4030 = vmatpush.msrb.mxu0 %v3862_v24 }
 0xc4c   :  { %4031 = vmatpush.msrb.mxu0 %v3859_v6  ;;  %v5912_v6 = vld [vmem:[%s10613_s7 + $0xb0] sm:$0xff] }
 0xc4e   :  { %4032 = vmatpush.msrb.mxu0 %v3856_v55  ;;  %v5911_v55 = vld [vmem:[%s10613_s7 + $0xa8] sm:$0xff] }
 0xc4f   :  { %v3916_v47 = vpop.f32.mrf.mxu2 }
 0xc50   :  { %3965 = vmatpush.msra.mxu3 %v3916_v47  ;;  %4033 = vmatpush.msrb.mxu0 %v3853_v0  ;;  %v6748_v0 = vunpack.c.l.bf16 %v6972_v59  ;;  %v6978_v47 = vld [vmem:[%s10612_s9 + $0xd0] sm:$0xff]  }
 0xc51   :  { %5886 = vmatmul.msk.f32.vlgmr.msrb.gmra.mxu0 %vm3928_vm7, %v3865_v17  ;;  %v4093_v44 = vpop.f32.mrf.mxu1 }
 0xc52   :  { %3966 = vmatpush.msra.mxu3 %v3913_v15  ;;  %4340 = vmatpush.msra.mxu0 %v6745_v30  ;;  %v6979_v15 = vld [vmem:[%s10612_s9 + $0xd8] sm:$0xff]   ;;  %v6976_v30 = vld [vmem:[%s10612_s9 + $0xc0] sm:$0xff]  }
 0xc53   :  { %v6777_v24 = vunpack.c.h.bf16 %v6979_v15  ;;  %v6776_v17 = vunpack.c.l.bf16 %v6979_v15  ;;  %v6764_v60 = vunpack.c.l.bf16 %v6976_v30 }
 0xc54   :  { %3967 = vmatpush.msra.mxu3 %v3910_v20  ;;  %4341 = vmatpush.msra.mxu0 %v6744_v1  ;;  %v5935_v20 = vld [vmem:[%s10613_s7 + $0xc8] sm:$0xff]  ;;  %v6765_v1 = vunpack.c.h.bf16 %v6976_v30  ;;  %v6982_v30 = vld [vmem:[%s10612_s9 + $0xf0] sm:$0xff]  }
 0xc56   :  { %3968 = vmatpush.msra.mxu3 %v3907_v5  ;;  %4342 = vmatpush.msra.mxu0 %v6741_v9  ;;  %v5934_v5 = vld [vmem:[%s10613_s7 + $0xc0] sm:$0xff] }
 0xc57   :  { %5878 = vmatmul.msk.f32.vlgmr.msra.gmra.mxu3 %vm3928_vm7, %v5870_v10  ;;  %v5936_v10 = vld [vmem:[%s10613_s7 + $0xd0] sm:$0xff]  ;;  %v5938_v9 = vld [vmem:[%s10613_s7 + $0xe0] sm:$0xff] }
 0xc58   :  { %4343 = vmatpush.msra.mxu0 %v6740_v11  ;;  %v5941_v11 = vld [vmem:[%s10613_s7 + $0xf8] sm:$0xff] }
 0xc59   :  { %5887 = vmatmul.msk.f32.gmra.mxu0 %vm3928_vm7, %v3866_v25  ;;  %v4096_v28 = vpop.f32.mrf.mxu1  ;;  %v5913_v25 = vld [vmem:[%s10613_s7 + $0xb8] sm:$0xff] }
 0xc5a   :  { %4344 = vmatpush.msra.mxu0 %v6737_v52 }
 0xc5c   :  { %4345 = vmatpush.msra.mxu0 %v6736_v51 }
 0xc5e   :  { %4346 = vmatpush.msra.mxu0 %v6733_v18 }
 0xc5f   :  { %5879 = vmatmul.msk.f32.gmra.mxu3 %vm3928_vm7, %v5871_v49  ;;  %v6977_v49 = vld [vmem:[%s10612_s9 + $0xc8] sm:$0xff]  }
 0xc60   :  { %4347 = vmatpush.msra.mxu0 %v6732_v40  ;;  %v6768_v14 = vunpack.c.l.bf16 %v6977_v49 }
 0xc61   :  { %5888 = vmatmul.msk.f32.gmra.mxu0 %vm3928_vm7, %v3867_v2  ;;  %v4099_v46 = vpop.f32.mrf.mxu1  ;;  %v6769_v2 = vunpack.c.h.bf16 %v6977_v49  ;;  %v6983_v49 = vld [vmem:[%s10612_s9 + $0xf8] sm:$0xff]  }
 0xc67   :  { %5880 = vmatmul.msk.f32.gmra.mxu3 %vm3928_vm7, %v5872_v8  ;;  %v5939_v8 = vld [vmem:[%s10613_s7 + $0xe8] sm:$0xff] }
 0xc69   :  { %5889 = vmatmul.msk.f32.gmra.mxu0 %vm3928_vm7, %v3868_v39  ;;  %v4102_v29 = vpop.f32.mrf.mxu1  ;;  %v5940_v39 = vld [vmem:[%s10613_s7 + $0xf0] sm:$0xff] }
 0xc6a   :  { %4150 = vmatpush.msrb.mxu2 %v4102_v29 }
 0xc6c   :  { %4151 = vmatpush.msrb.mxu2 %v4099_v46  ;;  %v5937_v46 = vld [vmem:[%s10613_s7 + $0xd8] sm:$0xff] }
 0xc6e   :  { %4152 = vmatpush.msrb.mxu2 %v4096_v28  ;;  %v6772_v28 = vunpack.c.l.bf16 %v6978_v47 }
 0xc6f   :  { %5881 = vmatmul.msk.f32.gmra.mxu3 %vm3928_vm7, %v5873_v34 }
 0xc70   :  { %4153 = vmatpush.msrb.mxu2 %v4093_v44  ;;  %v6773_v44 = vunpack.c.h.bf16 %v6978_v47 }
 0xc71   :  { %5890 = vmatmul.msk.f32.gmra.mxu0 %vm3928_vm7, %v3869_v53  ;;  %5914 = vmatmul.msk.f32.vlgmr.msrb.gmra.mxu2 %vm3928_vm7, %v5906_v23  ;;  %v4221_v12 = vpop.f32.mrf.mxu1 }
 0xc72   :  { %4468 = vmatpush.msra.mxu2 %v6761_v13 }
 0xc74   :  { %4469 = vmatpush.msra.mxu2 %v6760_v61 }
 0xc76   :  { %4470 = vmatpush.msra.mxu2 %v6757_v62 }
 0xc77   :  { %5882 = vmatmul.msk.f32.gmra.mxu3 %vm3928_vm7, %v5874_v26 }
 0xc78   :  { %4471 = vmatpush.msra.mxu2 %v6756_v50 }
 0xc79   :  { %5891 = vmatmul.msk.f32.gmra.mxu0 %vm3928_vm7, %v3870_v45  ;;  %5915 = vmatmul.msk.f32.gmra.mxu2 %vm3928_vm7, %v5907_v38  ;;  %v4224_v63 = vpop.f32.mrf.mxu1 }
 0xc7a   :  { %4472 = vmatpush.msra.mxu2 %v6753_v22 }
 0xc7c   :  { %4473 = vmatpush.msra.mxu2 %v6752_v3 }
 0xc7e   :  { %4474 = vmatpush.msra.mxu2 %v6749_v48 }
 0xc7f   :  { %5883 = vmatmul.msk.f32.gmra.mxu3 %vm3928_vm7, %v5875_v4 }
 0xc80   :  { %4475 = vmatpush.msra.mxu2 %v6748_v0 }
 0xc81   :  { %5892 = vmatmul.msk.f32.gmra.mxu0 %vm3928_vm7, %v3871_v36  ;;  %5916 = vmatmul.msk.f32.gmra.mxu2 %vm3928_vm7, %v5908_v16  ;;  %v4227_v54 = vpop.f32.mrf.mxu1 }
 0xc82   :  { %4596 = vmatpush.msrb.mxu2 %v6777_v24  ;;  %v5962_v24 = vld [vmem:[%s10613_s7 + $0x100] sm:$0xff] }
 0xc84   :  { %4597 = vmatpush.msrb.mxu2 %v6776_v17 }
 0xc86   :  { %4598 = vmatpush.msrb.mxu2 %v6773_v44  ;;  %v5963_v44 = vld [vmem:[%s10613_s7 + $0x108] sm:$0xff] }
 0xc87   :  { %5884 = vmatmul.msk.f32.gmra.mxu3 %vm3928_vm7, %v5876_v37 }
 0xc88   :  { %4599 = vmatpush.msrb.mxu2 %v6772_v28 }
 0xc89   :  { %5893 = vmatmul.msk.f32.gmra.mxu0 %vm3928_vm7, %v3872_v42  ;;  %5917 = vmatmul.msk.f32.gmra.mxu2 %vm3928_vm7, %v5909_v21  ;;  %v4230_v58 = vpop.f32.mrf.mxu1 }
 0xc8a   :  { %4278 = vmatpush.msrb.mxu3 %v4230_v58  ;;  %4600 = vmatpush.msrb.mxu2 %v6769_v2  ;;  %v6793_v2 = vunpack.c.h.bf16 %v6983_v49 }
 0xc8c   :  { %4279 = vmatpush.msrb.mxu3 %v4227_v54  ;;  %4601 = vmatpush.msrb.mxu2 %v6768_v14  ;;  %v6792_v14 = vunpack.c.l.bf16 %v6983_v49 }
 0xc8e   :  { %4280 = vmatpush.msrb.mxu3 %v4224_v63  ;;  %4602 = vmatpush.msrb.mxu2 %v6765_v1  ;;  %v5965_v1 = vld [vmem:[%s10613_s7 + $0x118] sm:$0xff] }
 0xc8f   :  { %5885 = vmatmul.msk.f32.gmra.mxu3 %vm3928_vm7, %v5877_v57 }
 0xc90   :  { %4281 = vmatpush.msrb.mxu3 %v4221_v12  ;;  %4603 = vmatpush.msrb.mxu2 %v6764_v60  ;;  %v6788_v60 = vunpack.c.l.bf16 %v6982_v30 }
 0xc91   :  { %5918 = vmatmul.msk.f32.gmra.mxu2 %vm3928_vm7, %v5910_v27  ;;  %5958 = vmatmul.msk.f32.vlgmr.msra.gmra.mxu0 %vm3704_vm9, %v9984_v56 }
 0xc97   :  { %5942 = vmatmul.msk.f32.vlgmr.msrb.gmra.mxu3 %vm3928_vm7, %v5934_v5 }
 0xc99   :  { %5919 = vmatmul.msk.f32.gmra.mxu2 %vm3928_vm7, %v5911_v55  ;;  %5959 = vmatmul.msk.f32.gmra.mxu0 %vm3704_vm9, %v9992_v19 }
 0xc9f   :  { %5943 = vmatmul.msk.f32.gmra.mxu3 %vm3928_vm7, %v5935_v20 }
 0xca1   :  { %5920 = vmatmul.msk.f32.gmra.mxu2 %vm3928_vm7, %v5912_v6  ;;  %5960 = vmatmul.msk.f32.gmra.mxu0 %vm3704_vm9, %v9999_v41 }
 0xca7   :  { %5944 = vmatmul.msk.f32.gmra.mxu3 %vm3928_vm7, %v5936_v10 }
 0xca9   :  { %5921 = vmatmul.msk.f32.gmra.mxu2 %vm3928_vm7, %v5913_v25  ;;  %5961 = vmatmul.msk.f32.gmra.mxu0 %vm3704_vm9, %v10012_v33  ;;  %v5964_v25 = vld [vmem:[%s10613_s7 + $0x110] sm:$0xff] }
 0xcaf   :  { %5945 = vmatmul.msk.f32.gmra.mxu3 %vm3928_vm7, %v5937_v46  ;;  %v6789_v46 = vunpack.c.h.bf16 %v6982_v30 }
 0xcb1   :  { %5986 = vmatmul.msk.f32.vlgmr.msra.gmra.mxu2 %vm3704_vm9, %v9984_v56 }
 0xcb7   :  { %5946 = vmatmul.msk.f32.gmra.mxu3 %vm3928_vm7, %v5938_v9 }
 0xcb9   :  { %5987 = vmatmul.msk.f32.gmra.mxu2 %vm3704_vm9, %v9992_v19 }
 0xcbf   :  { %5947 = vmatmul.msk.f32.gmra.mxu3 %vm3928_vm7, %v5939_v8  ;;  %v6981_v8 = vld [vmem:[%s10612_s9 + $0xe8] sm:$0xff]  }
 0xcc1   :  { %5988 = vmatmul.msk.f32.gmra.mxu2 %vm3704_vm9, %v9999_v41 }
 0xcc7   :  { %5948 = vmatmul.msk.f32.gmra.mxu3 %vm3928_vm7, %v5940_v39  ;;  %v6785_v39 = vunpack.c.h.bf16 %v6981_v8 }
 0xcc9   :  { %5989 = vmatmul.msk.f32.gmra.mxu2 %vm3704_vm9, %v10012_v33 }
 0xcce   :  { %v4035_v35 = vpop.f32.mrf.mxu0 }
 0xccf   :  { %5949 = vmatmul.msk.f32.gmra.mxu3 %vm3928_vm7, %v5941_v11  ;;  %v6784_v11 = vunpack.c.l.bf16 %v6981_v8 }
 0xcd1   :  { %6014 = vmatmul.msk.f32.vlgmr.msrb.gmra.mxu2 %vm3704_vm9, %v9984_v56 }
 0xcd6   :  { %v4038_v52 = vpop.f32.mrf.mxu0 }
 0xcd9   :  { %6015 = vmatmul.msk.f32.gmra.mxu2 %vm3704_vm9, %v9992_v19 }
 0xcda   :  { %v3970_v29 = vpop.f32.mrf.mxu3 }
 0xcdb   :  { %v4036_v51 = vadd.f32 %v4035_v35, %v3970_v29  ;;  %v6980_v35 = vld [vmem:[%s10612_s9 + $0xe0] sm:$0xff]  }
 0xcdc   :  { %v5966_v29 = vld [vmem:[%s10613_s7 + $0x120] sm:$0xff] }
 0xcde   :  { %v4041_v43 = vpop.f32.mrf.mxu0 }
 0xce1   :  { %6016 = vmatmul.msk.f32.gmra.mxu2 %vm3704_vm9, %v9999_v41 }
 0xce2   :  { %v3973_v32 = vpop.f32.mrf.mxu3 }
 0xce3   :  { %v4039_v34 = vadd.f32 %v4038_v52, %v3973_v32  ;;  %v6781_v52 = vunpack.c.h.bf16 %v6980_v35  ;;  %v6987_v32 = vld [vmem:[%s10612_s9 + $0x118] sm:$0xff]  }
 0xce6   :  { %v4044_v18 = vpop.f32.mrf.mxu0 }
 0xce9   :  { %6017 = vmatmul.msk.f32.gmra.mxu2 %vm3704_vm9, %v10012_v33 }
 0xcea   :  { %v3976_v53 = vpop.f32.mrf.mxu3 }
 0xceb   :  { %v4042_v23 = vadd.f32 %v4041_v43, %v3976_v53  ;;  %v5967_v53 = vld [vmem:[%s10613_s7 + $0x128] sm:$0xff] }
 0xcee   :  { %v4047_v13 = vpop.f32.mrf.mxu0 }
 0xcf2   :  { %v3979_v40 = vpop.f32.mrf.mxu3 }
 0xcf3   :  { %v4045_v12 = vadd.f32 %v4044_v18, %v3979_v40  ;;  %v6809_v18 = vunpack.c.h.bf16 %v6987_v32  ;;  %v5991_v40 = vld [vmem:[%s10613_s7 + $0x148] sm:$0xff] }
 0xcf4   :  { %v4155_v61 = vpop.f32.mrf.mxu2 }
 0xcf5   :  { %v10228_v26 = vadd.f32 %v4155_v61, %v4036_v51  ;;  %v6780_v51 = vunpack.c.l.bf16 %v6980_v35 }
 0xcf6   :  { %v4050_v45 = vpop.f32.mrf.mxu0 }
 0xcfa   :  { %v3982_v38 = vpop.f32.mrf.mxu3 }
 0xcfb   :  { %v4048_v63 = vadd.f32 %v4047_v13, %v3982_v38  ;;  %v6808_v13 = vunpack.c.l.bf16 %v6987_v32 }
 0xcfc   :  { %v4158_v31 = vpop.f32.mrf.mxu2 }
 0xcfd   :  { %v10230_v62 = vadd.f32 %v4158_v31, %v4039_v34  ;;  %v5990_v34 = vld [vmem:[%s10613_s7 + $0x140] sm:$0xff]  ;;  %v5969_v31 = vld [vmem:[%s10613_s7 + $0x138] sm:$0xff] }
 0xcfe   :  { %v4053_v4 = vpop.f32.mrf.mxu0 }
 0xd02   :  { %v3985_v36 = vpop.f32.mrf.mxu3 }
 0xd03   :  { %v4051_v16 = vadd.f32 %v4050_v45, %v3985_v36  ;;  %v6986_v45 = vld [vmem:[%s10612_s9 + $0x110] sm:$0xff]  }
 0xd04   :  { %v4161_v54 = vpop.f32.mrf.mxu2  ;;  %v6805_v38 = vunpack.c.h.bf16 %v6986_v45  ;;  %v6804_v36 = vunpack.c.l.bf16 %v6986_v45 }
 0xd05   :  { %v10232_v50 = vadd.f32 %v4161_v54, %v4042_v23  ;;  %v6985_v54 = vld [vmem:[%s10612_s9 + $0x108] sm:$0xff]  }
 0xd06   :  { %v4056_v37 = vpop.f32.mrf.mxu0 }
 0xd0a   :  { %v3988_v42 = vpop.f32.mrf.mxu3 }
 0xd0b   :  { %v4054_v21 = vadd.f32 %v4053_v4, %v3988_v42 }
 0xd0c   :  { %v4164_v7 = vpop.f32.mrf.mxu2 }
 0xd0d   :  { %v10234_v22 = vadd.f32 %v4164_v7, %v4045_v12  ;;  %v5968_v12 = vld [vmem:[%s10613_s7 + $0x130] sm:$0xff]  ;;  %v6984_v7 = vld [vmem:[%s10612_s9 + $0x100] sm:$0xff]  }
 0xd0e   :  { %v4349_v58 = vpop.f32.mrf.mxu0 }
 0xd12   :  { %v3991_v3 = vpop.f32.mrf.mxu3 }
 0xd13   :  { %v4057_v59 = vadd.f32 %v4056_v37, %v3991_v3  ;;  %v6801_v37 = vunpack.c.h.bf16 %v6985_v54  ;;  %v6796_v3 = vunpack.c.l.bf16 %v6984_v7 }
 0xd14   :  { %v4167_v48 = vpop.f32.mrf.mxu2 }
 0xd15   :  { %v10236_v57 = vadd.f32 %v4167_v48, %v4048_v63  ;;  %v5992_v63 = vld [vmem:[%s10613_s7 + $0x150] sm:$0xff]  ;;  %v6018_v48 = vld [vmem:[%s10613_s7 + $0x180] sm:$0xff] }
 0xd16   :  { %v4352_v27 = vpop.f32.mrf.mxu0 }
 0xd1c   :  { %v4170_v0 = vpop.f32.mrf.mxu2 }
 0xd1d   :  { %v10238_v5 = vadd.f32 %v4170_v0, %v4051_v16  ;;  %v5993_v16 = vld [vmem:[%s10613_s7 + $0x158] sm:$0xff]  ;;  %v6019_v0 = vld [vmem:[%s10613_s7 + $0x188] sm:$0xff] }
 0xd1e   :  { %v4355_v55 = vpop.f32.mrf.mxu0 }
 0xd24   :  { %v4173_v20 = vpop.f32.mrf.mxu2 }
 0xd25   :  { %v10240_v6 = vadd.f32 %v4173_v20, %v4054_v21  ;;  %v6800_v21 = vunpack.c.l.bf16 %v6985_v54  ;;  %v6020_v20 = vld [vmem:[%s10613_s7 + $0x190] sm:$0xff] }
 0xd26   :  { %v4358_v15 = vpop.f32.mrf.mxu0 }
 0xd27   :  { %4406 = vmatpush.msra.mxu1 %v4358_v15  ;;  %v5997_v15 = vld [vmem:[%s10613_s7 + $0x178] sm:$0xff] }
 0xd29   :  { %4407 = vmatpush.msra.mxu1 %v4355_v55  ;;  %v5996_v55 = vld [vmem:[%s10613_s7 + $0x170] sm:$0xff] }
 0xd2b   :  { %4408 = vmatpush.msra.mxu1 %v4352_v27  ;;  %v5995_v27 = vld [vmem:[%s10613_s7 + $0x168] sm:$0xff] }
 0xd2c   :  { %v4176_v17 = vpop.f32.mrf.mxu2 }
 0xd2d   :  { %v10245_v47 = vadd.f32 %v4176_v17, %v4057_v59  ;;  %4409 = vmatpush.msra.mxu1 %v4349_v58  ;;  %v6797_v58 = vunpack.c.h.bf16 %v6984_v7  ;;  %v5994_v59 = vld [vmem:[%s10613_s7 + $0x160] sm:$0xff] }
 0xd2e   :  { %5970 = vmatmul.msk.f32.vlgmr.msra.gmra.mxu1 %vm3928_vm7, %v5962_v24  ;;  %v6021_v24 = vld [vmem:[%s10613_s7 + $0x198] sm:$0xff]  ;;  %v6022_v17 = vld [vmem:[%s10613_s7 + $0x1a0] sm:$0xff] }
 0xd2f   :  { %4724 = vmatpush.msrb.mxu1 %v6793_v2 }
 0xd31   :  { %4725 = vmatpush.msrb.mxu1 %v6792_v14 }
 0xd33   :  { %4726 = vmatpush.msrb.mxu1 %v6789_v46 }
 0xd34   :  { %v4477_v10 = vpop.f32.mrf.mxu2 }
 0xd35   :  { %4727 = vmatpush.msrb.mxu1 %v6788_v60 }
 0xd36   :  { %5971 = vmatmul.msk.f32.gmra.mxu1 %vm3928_vm7, %v5963_v44  ;;  %v4283_v44 = vpop.f32.mrf.mxu3 }
 0xd37   :  { %4728 = vmatpush.msrb.mxu1 %v6785_v39  ;;  %v4307_v49 = vadd.f32 %v4283_v44, %v10228_v26  ;;  %v6074_v44 = vld [vmem:[%s10613_s7 + $0x200] sm:$0xff] }
 0xd39   :  { %4729 = vmatpush.msrb.mxu1 %v6784_v11 }
 0xd3b   :  { %4730 = vmatpush.msrb.mxu1 %v6781_v52 }
 0xd3c   :  { %v4480_v28 = vpop.f32.mrf.mxu2 }
 0xd3d   :  { %4731 = vmatpush.msrb.mxu1 %v6780_v51 }
 0xd3e   :  { %5972 = vmatmul.msk.f32.gmra.mxu1 %vm3928_vm7, %v5964_v25  ;;  %v6024_v25 = vld [vmem:[%s10613_s7 + $0x1b0] sm:$0xff] }
 0xd44   :  { %v4483_v9 = vpop.f32.mrf.mxu2 }
 0xd46   :  { %5973 = vmatmul.msk.f32.gmra.mxu1 %vm3928_vm7, %v5965_v1 }
 0xd4c   :  { %v4486_v43 = vpop.f32.mrf.mxu2 }
 0xd4d   :  { %4534 = vmatpush.msrb.mxu0 %v4486_v43 }
 0xd4e   :  { %5974 = vmatmul.msk.f32.gmra.mxu1 %vm3928_vm7, %v5966_v29 }
 0xd4f   :  { %4535 = vmatpush.msrb.mxu0 %v4483_v9 }
 0xd51   :  { %4536 = vmatpush.msrb.mxu0 %v4480_v28  ;;  %v4286_v28 = vpop.f32.mrf.mxu3 }
 0xd52   :  { %v4308_v30 = vadd.f32 %v4286_v28, %v10230_v62  ;;  %v6052_v28 = vld [vmem:[%s10613_s7 + $0x1f0] sm:$0xff] }
 0xd53   :  { %4537 = vmatpush.msrb.mxu0 %v4477_v10  ;;  %v6023_v10 = vld [vmem:[%s10613_s7 + $0x1a8] sm:$0xff] }
 0xd54   :  { %5998 = vmatmul.msk.f32.vlgmr.msrb.gmra.mxu0 %vm3928_vm7, %v5990_v34  ;;  %v4605_v23 = vpop.f32.mrf.mxu2 }
 0xd55   :  { %4852 = vmatpush.msra.mxu0 %v6809_v18 }
 0xd56   :  { %5975 = vmatmul.msk.f32.gmra.mxu1 %vm3928_vm7, %v5967_v53 }
 0xd57   :  { %4853 = vmatpush.msra.mxu0 %v6808_v13 }
 0xd59   :  { %4854 = vmatpush.msra.mxu0 %v6805_v38 }
 0xd5b   :  { %4855 = vmatpush.msra.mxu0 %v6804_v36 }
 0xd5c   :  { %5999 = vmatmul.msk.f32.gmra.mxu0 %vm3928_vm7, %v5991_v40  ;;  %v4608_v61 = vpop.f32.mrf.mxu2 }
 0xd5d   :  { %4856 = vmatpush.msra.mxu0 %v6801_v37 }
 0xd5e   :  { %5976 = vmatmul.msk.f32.gmra.mxu1 %vm3928_vm7, %v5968_v12 }
 0xd5f   :  { %4857 = vmatpush.msra.mxu0 %v6800_v21 }
 0xd61   :  { %4858 = vmatpush.msra.mxu0 %v6797_v58  ;;  %v6046_v58 = vld [vmem:[%s10613_s7 + $0x1c0] sm:$0xff] }
 0xd63   :  { %4859 = vmatpush.msra.mxu0 %v6796_v3 }
 0xd64   :  { %6000 = vmatmul.msk.f32.gmra.mxu0 %vm3928_vm7, %v5992_v63  ;;  %v4611_v4 = vpop.f32.mrf.mxu2 }
 0xd66   :  { %5977 = vmatmul.msk.f32.gmra.mxu1 %vm3928_vm7, %v5969_v31 }
 0xd6c   :  { %6001 = vmatmul.msk.f32.gmra.mxu0 %vm3928_vm7, %v5993_v16  ;;  %v4614_v42 = vpop.f32.mrf.mxu2 }
 0xd6d   :  { %4662 = vmatpush.msra.mxu3 %v4614_v42 }
 0xd6e   :  { %6042 = vmatmul.msk.f32.vlgmr.msrb.gmra.mxu1 %vm3704_vm9, %v9984_v56 }
 0xd6f   :  { %4663 = vmatpush.msra.mxu3 %v4611_v4 }
 0xd71   :  { %4664 = vmatpush.msra.mxu3 %v4608_v61 }
 0xd73   :  { %4665 = vmatpush.msra.mxu3 %v4605_v23 }
 0xd74   :  { %6002 = vmatmul.msk.f32.gmra.mxu0 %vm3928_vm7, %v5994_v59  ;;  %6026 = vmatmul.msk.f32.vlgmr.msra.gmra.mxu3 %vm3928_vm7, %v6018_v48  ;;  %v6047_v48 = vld [vmem:[%s10613_s7 + $0x1c8] sm:$0xff] }
 0xd76   :  { %6043 = vmatmul.msk.f32.gmra.mxu1 %vm3704_vm9, %v9992_v19 }
 0xd7c   :  { %6003 = vmatmul.msk.f32.gmra.mxu0 %vm3928_vm7, %v5995_v27  ;;  %6027 = vmatmul.msk.f32.gmra.mxu3 %vm3928_vm7, %v6019_v0  ;;  %v6048_v0 = vld [vmem:[%s10613_s7 + $0x1d0] sm:$0xff] }
 0xd7e   :  { %6044 = vmatmul.msk.f32.gmra.mxu1 %vm3704_vm9, %v9999_v41 }
 0xd84   :  { %6004 = vmatmul.msk.f32.gmra.mxu0 %vm3928_vm7, %v5996_v55  ;;  %6028 = vmatmul.msk.f32.gmra.mxu3 %vm3928_vm7, %v6020_v20  ;;  %v6049_v20 = vld [vmem:[%s10613_s7 + $0x1d8] sm:$0xff] }
 0xd86   :  { %6045 = vmatmul.msk.f32.gmra.mxu1 %vm3704_vm9, %v10012_v33 }
 0xd8c   :  { %6005 = vmatmul.msk.f32.gmra.mxu0 %vm3928_vm7, %v5997_v15  ;;  %6029 = vmatmul.msk.f32.gmra.mxu3 %vm3928_vm7, %v6021_v24  ;;  %v6050_v24 = vld [vmem:[%s10613_s7 + $0x1e0] sm:$0xff] }
 0xd94   :  { %6030 = vmatmul.msk.f32.gmra.mxu3 %vm3928_vm7, %v6022_v17  ;;  %6070 = vmatmul.msk.f32.vlgmr.msra.gmra.mxu0 %vm3704_vm9, %v9984_v56  ;;  %v6025_v56 = vld [vmem:[%s10613_s7 + $0x1b8] sm:$0xff] }
 0xd9c   :  { %6031 = vmatmul.msk.f32.gmra.mxu3 %vm3928_vm7, %v6023_v10  ;;  %6071 = vmatmul.msk.f32.gmra.mxu0 %vm3704_vm9, %v9992_v19  ;;  %v4289_v19 = vpop.f32.mrf.mxu3  ;;  %v6051_v10 = vld [vmem:[%s10613_s7 + $0x1e8] sm:$0xff] }
 0xda4   :  { %6032 = vmatmul.msk.f32.gmra.mxu3 %vm3928_vm7, %v6024_v25  ;;  %6072 = vmatmul.msk.f32.gmra.mxu0 %vm3704_vm9, %v9999_v41  ;;  %v4292_v60 = vpop.f32.mrf.mxu3  ;;  %v4309_v41 = vadd.f32 %v4289_v19, %v10232_v50  ;;  %v6075_v25 = vld [vmem:[%s10613_s7 + $0x208] sm:$0xff] }
 0xda5   :  { %v4310_v26 = vadd.f32 %v4292_v60, %v10234_v22  ;;  %v6079_v19 = vld [vmem:[%s10613_s7 + $0x228] sm:$0xff] }
 0xdab   :  { %v4411_v2 = vpop.f32.mrf.mxu1 }
 0xdac   :  { %v4435_v14 = vadd.f32 %v4411_v2, %v4307_v49  ;;  %6033 = vmatmul.msk.f32.gmra.mxu3 %vm3928_vm7, %v6025_v56  ;;  %6073 = vmatmul.msk.f32.gmra.mxu0 %vm3704_vm9, %v10012_v33  ;;  %v4295_v39 = vpop.f32.mrf.mxu3  ;;  %v6076_v56 = vld [vmem:[%s10613_s7 + $0x210] sm:$0xff]  ;;  %v6053_v49 = vld [vmem:[%s10613_s7 + $0x1f8] sm:$0xff] }
 0xdad   :  { %v4311_v52 = vadd.f32 %v4295_v39, %v10236_v57  ;;  %v6077_v2 = vld [vmem:[%s10613_s7 + $0x218] sm:$0xff] }
 0xdb3   :  { %v4414_v46 = vpop.f32.mrf.mxu1 }
 0xdb4   :  { %v4436_v1 = vadd.f32 %v4414_v46, %v4308_v30  ;;  %v4298_v29 = vpop.f32.mrf.mxu3  ;;  %v6080_v30 = vld [vmem:[%s10613_s7 + $0x230] sm:$0xff]  ;;  %v6081_v46 = vld [vmem:[%s10613_s7 + $0x238] sm:$0xff] }
 0xdb5   :  { %v4312_v62 = vadd.f32 %v4298_v29, %v10238_v5 }
 0xdbb   :  { %v4417_v9 = vpop.f32.mrf.mxu1 }
 0xdbc   :  { %v4437_v8 = vadd.f32 %v4417_v9, %v4309_v41  ;;  %v4301_v50 = vpop.f32.mrf.mxu3 }
 0xdbd   :  { %v4313_v23 = vadd.f32 %v4301_v50, %v10240_v6  ;;  %v4971_v50 = vpop.permute.xlu1 %4970 }
 0xdc3   :  { %v4420_v11 = vpop.f32.mrf.mxu1 }
 0xdc4   :  { %v4438_v35 = vadd.f32 %v4420_v11, %v4310_v26  ;;  %v4304_v12 = vpop.f32.mrf.mxu3 }
 0xdc5   :  { %v4314_v61 = vadd.f32 %v4304_v12, %v10245_v47 }
 0xdcb   :  { %v4423_v51 = vpop.f32.mrf.mxu1 }
 0xdcc   :  { %v4439_v33 = vadd.f32 %v4423_v51, %v4311_v52  ;;  %v4966_v52 = vpop.permute.xlu0 %4965 }
 0xdd1   :  { %v4539_v43 = vpop.f32.mrf.mxu0 }
 0xdd2   :  { %v10386_v32 = vadd.f32 %v4539_v43, %v4435_v14  ;;  %v6078_v14 = vld [vmem:[%s10613_s7 + $0x220] sm:$0xff] }
 0xdd3   :  { %v4426_v34 = vpop.f32.mrf.mxu1 }
 0xdd4   :  { %v4440_v18 = vadd.f32 %v4426_v34, %v4312_v62 }
 0xdd9   :  { %v4542_v53 = vpop.f32.mrf.mxu0 }
 0xdda   :  { %v10389_v13 = vadd.f32 %v4542_v53, %v4436_v1 }
 0xddb   :  { %v4429_v22 = vpop.f32.mrf.mxu1 }
 0xddc   :  { %v4441_v40 = vadd.f32 %v4429_v22, %v4313_v23 }
 0xde1   :  { %v4545_v57 = vpop.f32.mrf.mxu0 }
 0xde2   :  { %v10392_v45 = vadd.f32 %v4545_v57, %v4437_v8 }
 0xde3   :  { %v4432_v38 = vpop.f32.mrf.mxu1 }
 0xde4   :  { %v4442_v5 = vadd.f32 %v4432_v38, %v4314_v61  ;;  %v4976_v61 = vpop.permute.xlu2 %4975 }
 0xde9   :  { %v4548_v63 = vpop.f32.mrf.mxu0 }
 0xdea   :  { %v10394_v31 = vadd.f32 %v4548_v63, %v4438_v35 }
 0xdeb   :  { %v4733_v4 = vpop.f32.mrf.mxu1 }
 0xdf1   :  { %v4551_v36 = vpop.f32.mrf.mxu0 }
 0xdf2   :  { %v10396_v16 = vadd.f32 %v4551_v36, %v4439_v33 }
 0xdf3   :  { %v4736_v6 = vpop.f32.mrf.mxu1 }
 0xdf7   :  { %v4667_v1 = vpop.f32.mrf.mxu3 }
 0xdf8   :  { %v4691_v8 = vadd.f32 %v4667_v1, %v10386_v32 }
 0xdf9   :  { %v4554_v54 = vpop.f32.mrf.mxu0 }
 0xdfa   :  { %v10398_v37 = vadd.f32 %v4554_v54, %v4440_v18 }
 0xdfb   :  { %v4739_v42 = vpop.f32.mrf.mxu1 }
 0xdff   :  { %v4670_v41 = vpop.f32.mrf.mxu3 }
 0xe00   :  { %v4692_v33 = vadd.f32 %v4670_v41, %v10389_v13 }
 0xe01   :  { %v4557_v21 = vpop.f32.mrf.mxu0 }
 0xe02   :  { %v10400_v7 = vadd.f32 %v4557_v21, %v4441_v40 }
 0xe03   :  { %v4742_v47 = vpop.f32.mrf.mxu1 }
 0xe04   :  { %4790 = vmatpush.msra.mxu2 %v4742_v47 }
 0xe06   :  { %4791 = vmatpush.msra.mxu2 %v4739_v42  ;;  %v4981_v42 = vpop.permute.xlu0 %4980 }
 0xe07   :  { %v4673_v26 = vpop.f32.mrf.mxu3 }
 0xe08   :  { %4792 = vmatpush.msra.mxu2 %v4736_v6  ;;  %v4693_v22 = vadd.f32 %v4673_v26, %v10392_v45 }
 0xe09   :  { %v4560_v3 = vpop.f32.mrf.mxu0 }
 0xe0a   :  { %v10405_v59 = vadd.f32 %v4560_v3, %v4442_v5  ;;  %4793 = vmatpush.msra.mxu2 %v4733_v4 }
 0xe0b   :  { %6054 = vmatmul.msk.f32.vlgmr.msra.gmra.mxu2 %vm3928_vm7, %v6046_v58 }
 0xe0f   :  { %v4676_v53 = vpop.f32.mrf.mxu3 }
 0xe10   :  { %v4694_v63 = vadd.f32 %v4676_v53, %v10394_v31 }
 0xe11   :  { %v4861_v27 = vpop.f32.mrf.mxu0 }
 0xe13   :  { %6055 = vmatmul.msk.f32.gmra.mxu2 %vm3928_vm7, %v6047_v48 }
 0xe17   :  { %v4679_v5 = vpop.f32.mrf.mxu3 }
 0xe18   :  { %v4695_v47 = vadd.f32 %v4679_v5, %v10396_v16 }
 0xe19   :  { %v4864_v55 = vpop.f32.mrf.mxu0 }
 0xe1b   :  { %6056 = vmatmul.msk.f32.gmra.mxu2 %vm3928_vm7, %v6048_v0 }
 0xe1f   :  { %v4682_v3 = vpop.f32.mrf.mxu3 }
 0xe21   :  { %v4867_v15 = vpop.f32.mrf.mxu0 }
 0xe23   :  { %6057 = vmatmul.msk.f32.gmra.mxu2 %vm3928_vm7, %v6049_v20 }
 0xe27   :  { %v4685_v16 = vpop.f32.mrf.mxu3 }
 0xe29   :  { %v4870_v17 = vpop.f32.mrf.mxu0 }
 0xe2a   :  { %4918 = vmatpush.msra.mxu1 %v4870_v17 }
 0xe2b   :  { %6058 = vmatmul.msk.f32.gmra.mxu2 %vm3928_vm7, %v6050_v24 }
 0xe2c   :  { %4919 = vmatpush.msra.mxu1 %v4867_v15  ;;  %v4696_v15 = vadd.f32 %v4682_v3, %v10398_v37  ;;  %v4996_v37 = vpop.permute.xlu2 %4995 }
 0xe2e   :  { %4920 = vmatpush.msra.mxu1 %v4864_v55  ;;  %v4986_v55 = vpop.permute.xlu1 %4985 }
 0xe30   :  { %4921 = vmatpush.msra.mxu1 %v4861_v27 }
 0xe31   :  { %6082 = vmatmul.msk.f32.vlgmr.msra.gmra.mxu1 %vm3928_vm7, %v6074_v44 }
 0xe33   :  { %6059 = vmatmul.msk.f32.gmra.mxu2 %vm3928_vm7, %v6051_v10 }
 0xe39   :  { %6083 = vmatmul.msk.f32.gmra.mxu1 %vm3928_vm7, %v6075_v25  ;;  %v4991_v25 = vpop.permute.xlu0 %4990 }
 0xe3b   :  { %6060 = vmatmul.msk.f32.gmra.mxu2 %vm3928_vm7, %v6052_v28 }
 0xe41   :  { %6084 = vmatmul.msk.f32.gmra.mxu1 %vm3928_vm7, %v6076_v56 }
 0xe43   :  { %6061 = vmatmul.msk.f32.gmra.mxu2 %vm3928_vm7, %v6053_v49  ;;  %v4697_v49 = vadd.f32 %v4685_v16, %v10400_v7 }
 0xe49   :  { %6085 = vmatmul.msk.f32.gmra.mxu1 %vm3928_vm7, %v6077_v2 }
 0xe51   :  { %6086 = vmatmul.msk.f32.gmra.mxu1 %vm3928_vm7, %v6078_v14 }
 0xe59   :  { %6087 = vmatmul.msk.f32.gmra.mxu1 %vm3928_vm7, %v6079_v19 }
 0xe61   :  { %6088 = vmatmul.msk.f32.gmra.mxu1 %vm3928_vm7, %v6080_v30 }
 0xe69   :  { %6089 = vmatmul.msk.f32.gmra.mxu1 %vm3928_vm7, %v6081_v46  ;;  %v4688_v46 = vpop.f32.mrf.mxu3 }
 0xe6a   :  { %v4698_v41 = vadd.f32 %v4688_v46, %v10405_v59 }
 0xe8e   :  { %v4795_v60 = vpop.f32.mrf.mxu2 }
 0xe8f   :  { %v4819_v39 = vadd.f32 %v4795_v60, %v4691_v8 }
 0xe96   :  { %v4798_v9 = vpop.f32.mrf.mxu2 }
 0xe97   :  { %v4820_v62 = vadd.f32 %v4798_v9, %v4692_v33 }
 0xe9e   :  { %v4801_v29 = vpop.f32.mrf.mxu2 }
 0xe9f   :  { %v4821_v12 = vadd.f32 %v4801_v29, %v4693_v22 }
 0xea6   :  { %v4804_v23 = vpop.f32.mrf.mxu2 }
 0xea7   :  { %v4822_v6 = vadd.f32 %v4804_v23, %v4694_v63 }
 0xeae   :  { %v4923_v11 = vpop.f32.mrf.mxu1  ;;  %v4807_v36 = vpop.f32.mrf.mxu2 }
 0xeaf   :  { %v4947_v35 = vadd.f32 %v4923_v11, %v4819_v39  ;;  %v4823_v48 = vadd.f32 %v4807_v36, %v4695_v47  ;;  %v5001_v11 = vpop.permute.xlu1 %5000 }
 0xeb1   :  { %v10469_v51 = vadd.f32 %v4966_v52, %v4947_v35  ;;  %v7038_v52 = vmov 16.0  }
 0xeb2   :  { %7013 = vrcp.f32 %v7038_v52 }
 0xeb3   :  { %v5011_v43 = vsel %vm2466_vm8, %v10469_v51, 0.0 }
 0xeb4   :  { %5012 = vadd.xlane.f32.xlu0 %v5011_v43 }
 0xeb6   :  { %v4926_v34 = vpop.f32.mrf.mxu1  ;;  %v4810_v31 = vpop.f32.mrf.mxu2 }
 0xeb7   :  { %v4948_v18 = vadd.f32 %v4926_v34, %v4820_v62  ;;  %v4824_v17 = vadd.f32 %v4810_v31, %v4696_v15 }
 0xeb8   :  { %v7014_v29 = vpop.eup %7013 }
 0xeb9   :  { %v10474_v32 = vadd.f32 %v4971_v50, %v4948_v18  ;;  %v5036_v33 = vmul.f32 16.0, %v7014_v29  ;;  %vm5040_vm9 = vweird.f32 %v7014_v29 }
 0xebb   :  { %v5014_v40 = vsel %vm2466_vm8, %v10474_v32, 0.0  ;;  %v5037_v43 = vsub.f32 1.0, %v5036_v33 }
 0xebc   :  { %5015 = vadd.xlane.f32.xlu2 %v5014_v40 }
 0xebd   :  { %v5038_v62 = vmul.f32 %v7014_v29, %v5037_v43 }
 0xebe   :  { %v4929_v13 = vpop.f32.mrf.mxu1  ;;  %v4813_v28 = vpop.f32.mrf.mxu2 }
 0xebf   :  { %v4949_v57 = vadd.f32 %v4929_v13, %v4821_v12  ;;  %v4825_v14 = vadd.f32 %v4813_v28, %v4697_v49  ;;  %v5039_v34 = vadd.f32 %v7014_v29, %v5038_v62 }
 0xec1   :  { %v10479_v38 = vadd.f32 %v4976_v61, %v4949_v57  ;;  %v10499_v59 = vsel %vm5040_vm9, %v7014_v29, %v5039_v34 }
 0xec3   :  { %v5017_v4 = vsel %vm2466_vm8, %v10479_v38, 0.0 }
 0xec4   :  { %5018 = vadd.xlane.f32.xlu1 %v5017_v4 }
 0xec6   :  { %v4932_v45 = vpop.f32.mrf.mxu1  ;;  %v4816_v60 = vpop.f32.mrf.mxu2 }
 0xec7   :  { %v4950_v54 = vadd.f32 %v4932_v45, %v4822_v6  ;;  %v4826_v8 = vadd.f32 %v4816_v60, %v4698_v41 }
 0xec9   :  { %v10484_v21 = vadd.f32 %v4981_v42, %v4950_v54 }
 0xecb   :  { %v5020_v58 = vsel %vm2466_vm8, %v10484_v21, 0.0 }
 0xecc   :  { %5021 = vadd.xlane.f32.xlu0 %v5020_v58 }
 0xece   :  { %v4935_v27 = vpop.f32.mrf.mxu1 }
 0xecf   :  { %v4951_v0 = vadd.f32 %v4935_v27, %v4823_v48 }
 0xed1   :  { %v10489_v20 = vadd.f32 %v4986_v55, %v4951_v0 }
 0xed3   :  { %v5023_v24 = vsel %vm2466_vm8, %v10489_v20, 0.0 }
 0xed4   :  { %5024 = vadd.xlane.f32.xlu2 %v5023_v24 }
 0xed6   :  { %v4938_v44 = vpop.f32.mrf.mxu1 }
 0xed7   :  { %v4952_v10 = vadd.f32 %v4938_v44, %v4824_v17 }
 0xed9   :  { %v5008_v56 = vadd.f32 %v4991_v25, %v4952_v10 }
 0xedb   :  { %v5026_v2 = vsel %vm2466_vm8, %v5008_v56, 0.0 }
 0xedc   :  { %5027 = vadd.xlane.f32.xlu1 %v5026_v2 }
 0xede   :  { %v4941_v19 = vpop.f32.mrf.mxu1 }
 0xedf   :  { %v4953_v30 = vadd.f32 %v4941_v19, %v4825_v14 }
 0xee1   :  { %v5009_v1 = vadd.f32 %v4996_v37, %v4953_v30 }
 0xee3   :  { %v5029_v9 = vsel %vm2466_vm8, %v5009_v1, 0.0 }
 0xee4   :  { %5030 = vadd.xlane.f32.xlu0 %v5029_v9 }
 0xee6   :  { %v4944_v39 = vpop.f32.mrf.mxu1 }
 0xee7   :  { %v4954_v26 = vadd.f32 %v4944_v39, %v4826_v8 }
 0xee9   :  { %v5010_v7 = vadd.f32 %v5001_v11, %v4954_v26 }
 0xeeb   :  { %v5032_v35 = vsel %vm2466_vm8, %v5010_v7, 0.0 }
 0xeec   :  { %5033 = vadd.xlane.f32.xlu2 %v5032_v35 }
 0xf27   :  { %v5013_v18 = vpop.xlane.xlu0 %5012 }
 0xf28   :  { %v5042_v50 = vmul.f32 %v10499_v59, %v5013_v18 }
 0xf2a   :  { %v10503_v53 = vsub.f32 %v10469_v51, %v5042_v50 }
 0xf2c   :  { %v5058_v23 = vmul.f32 %v10503_v53, %v10503_v53 }
 0xf2e   :  { %v5066_v22 = vsel %vm2466_vm8, %v5058_v23, 0.0 }
 0xf2f   :  { %5067 = vadd.xlane.f32.xlu1 %v5066_v22  ;;  %v5016_v40 = vpop.xlane.xlu2 %5015 }
 0xf30   :  { %v5043_v12 = vmul.f32 %v10499_v59, %v5016_v40 }
 0xf32   :  { %v10510_v13 = vsub.f32 %v10474_v32, %v5043_v12 }
 0xf34   :  { %v5059_v57 = vmul.f32 %v10510_v13, %v10510_v13 }
 0xf36   :  { %v5069_v61 = vsel %vm2466_vm8, %v5059_v57, 0.0 }
 0xf37   :  { %5070 = vadd.xlane.f32.xlu0 %v5069_v61  ;;  %v5019_v51 = vpop.xlane.xlu1 %5018 }
 0xf38   :  { %v5044_v5 = vmul.f32 %v10499_v59, %v5019_v51 }
 0xf3a   :  { %v10517_v63 = vsub.f32 %v10479_v38, %v5044_v5 }
 0xf3c   :  { %v5060_v4 = vmul.f32 %v10517_v63, %v10517_v63 }
 0xf3e   :  { %v5072_v36 = vsel %vm2466_vm8, %v5060_v4, 0.0 }
 0xf3f   :  { %v5022_v6 = vpop.xlane.xlu0 %5021  ;;  %5073 = vadd.xlane.f32.xlu2 %v5072_v36 }
 0xf40   :  { %v5045_v32 = vmul.f32 %v10499_v59, %v5022_v6 }
 0xf42   :  { %v10524_v45 = vsub.f32 %v10484_v21, %v5045_v32 }
 0xf44   :  { %v5061_v54 = vmul.f32 %v10524_v45, %v10524_v45 }
 0xf46   :  { %v5075_v42 = vsel %vm2466_vm8, %v5061_v54, 0.0 }
 0xf47   :  { %5076 = vadd.xlane.f32.xlu1 %v5075_v42  ;;  %v5025_v38 = vpop.xlane.xlu2 %5024 }
 0xf48   :  { %v5046_v47 = vmul.f32 %v10499_v59, %v5025_v38 }
 0xf4a   :  { %v10531_v58 = vsub.f32 %v10489_v20, %v5046_v47 }
 0xf4c   :  { %v5062_v3 = vmul.f32 %v10531_v58, %v10531_v58 }
 0xf4e   :  { %v5078_v48 = vsel %vm2466_vm8, %v5062_v3, 0.0 }
 0xf4f   :  { %5079 = vadd.xlane.f32.xlu0 %v5078_v48  ;;  %v5028_v21 = vpop.xlane.xlu1 %5027 }
 0xf50   :  { %v5047_v31 = vmul.f32 %v10499_v59, %v5028_v21 }
 0xf52   :  { %v10537_v27 = vsub.f32 %v5008_v56, %v5047_v31 }
 0xf54   :  { %v5063_v0 = vmul.f32 %v10537_v27, %v10537_v27 }
 0xf56   :  { %v5081_v55 = vsel %vm2466_vm8, %v5063_v0, 0.0 }
 0xf57   :  { %v5031_v15 = vpop.xlane.xlu0 %5030  ;;  %5082 = vadd.xlane.f32.xlu2 %v5081_v55 }
 0xf58   :  { %v5048_v20 = vmul.f32 %v10499_v59, %v5031_v15 }
 0xf5a   :  { %v10543_v24 = vsub.f32 %v5009_v1, %v5048_v20 }
 0xf5c   :  { %v5064_v17 = vmul.f32 %v10543_v24, %v10543_v24 }
 0xf5e   :  { %v5084_v16 = vsel %vm2466_vm8, %v5064_v17, 0.0 }
 0xf5f   :  { %5085 = vadd.xlane.f32.xlu1 %v5084_v16  ;;  %v5034_v44 = vpop.xlane.xlu2 %5033 }
 0xf60   :  { %v5049_v10 = vmul.f32 %v10499_v59, %v5034_v44 }
 0xf62   :  { %v10549_v25 = vsub.f32 %v5010_v7, %v5049_v10 }
 0xf64   :  { %v5065_v28 = vmul.f32 %v10549_v25, %v10549_v25 }
 0xf66   :  { %v5087_v56 = vsel %vm2466_vm8, %v5065_v28, 0.0 }
 0xf67   :  { %5088 = vadd.xlane.f32.xlu0 %v5087_v56 }
 0xfa2   :  { %v5068_v49 = vpop.xlane.xlu1 %5067 }
 0xfa3   :  { %v5090_v2 = vmul.f32 %v5068_v49, %v10499_v59 }
 0xfa5   :  { %v5098_v14 = vadd.f32 1e-05, %v5090_v2 }
 0xfa7   :  { %7015 = vrsqrt.f32 %v5098_v14  ;;  %vm5112_vm11 = vweird.f32 %v5098_v14 }
 0xfaa   :  { %v5071_v19 = vpop.xlane.xlu0 %5070 }
 0xfab   :  { %v5091_v30 = vmul.f32 %v5071_v19, %v10499_v59 }
 0xfad   :  { %v7016_v37 = vpop.eup %7015  ;;  %v5099_v46 = vadd.f32 1e-05, %v5091_v30 }
 0xfae   :  { %v5107_v1 = vmul.f32 %v7016_v37, %v5098_v14  ;;  %vm5113_vm10 = vweird.f32 %v7016_v37 }
 0xfaf   :  { %7017 = vrsqrt.f32 %v5099_v46  ;;  %vm5114_vm12 = vmor %vm5112_vm11, %vm5113_vm10  ;;  %vm5122_vm14 = vweird.f32 %v5099_v46 }
 0xfb0   :  { %v5108_v60 = vmul.f32 %v7016_v37, %v5107_v1 }
 0xfb2   :  { %v5109_v41 = vmul.f32 0.5, %v5108_v60  ;;  %v5074_v9 = vpop.xlane.xlu2 %5073 }
 0xfb3   :  { %v5092_v8 = vmul.f32 %v5074_v9, %v10499_v59 }
 0xfb4   :  { %v5110_v39 = vsub.f32 1.5, %v5109_v41 }
 0xfb5   :  { %v7018_v26 = vpop.eup %7017  ;;  %v5100_v11 = vadd.f32 1e-05, %v5092_v8 }
 0xfb6   :  { %v5111_v7 = vmul.f32 %v7016_v37, %v5110_v39  ;;  %v5117_v35 = vmul.f32 %v7018_v26, %v5099_v46  ;;  %vm5123_vm13 = vweird.f32 %v7018_v26 }
 0xfb7   :  { %7019 = vrsqrt.f32 %v5100_v11  ;;  %vm5124_vm15 = vmor %vm5122_vm14, %vm5123_vm13  ;;  %vm5132_vm1 = vweird.f32 %v5100_v11 }
 0xfb8   :  { %v5115_v52 = vsel %vm5114_vm12, %v7016_v37, %v5111_v7  ;;  %v5118_v29 = vmul.f32 %v7018_v26, %v5117_v35 }
 0xfb9   :  { %v5186_v33 = vmul.f32 %v5115_v52, %v10503_v53 }
 0xfba   :  { %v5119_v43 = vmul.f32 0.5, %v5118_v29  ;;  %v5077_v62 = vpop.xlane.xlu1 %5076 }
 0xfbb   :  { %v5194_v34 = vmax.f32 %v5186_v33, 0.0  ;;  %v5093_v18 = vmul.f32 %v5077_v62, %v10499_v59 }
 0xfbc   :  { %v5120_v50 = vsub.f32 1.5, %v5119_v43 }
 0xfbd   :  { %v7020_v23 = vpop.eup %7019  ;;  %5202 = vst.msk [vmem:[%s10614_s12] sm:$0xff] %vm2466_vm8, %v5194_v34  ;;  %v5101_v22 = vadd.f32 1e-05, %v5093_v18 }
 0xfbe   :  { %v5121_v40 = vmul.f32 %v7018_v26, %v5120_v50  ;;  %v5127_v12 = vmul.f32 %v7020_v23, %v5100_v11  ;;  %vm5133_vm0 = vweird.f32 %v7020_v23 }
 0xfbf   :  { %7021 = vrsqrt.f32 %v5101_v22  ;;  %vm5134_vm2 = vmor %vm5132_vm1, %vm5133_vm0  ;;  %vm5142_vm4 = vweird.f32 %v5101_v22 }
 0xfc0   :  { %v5125_v53 = vsel %vm5124_vm15, %v7018_v26, %v5121_v40  ;;  %v5128_v57 = vmul.f32 %v7020_v23, %v5127_v12 }
 0xfc1   :  { %v5187_v61 = vmul.f32 %v5125_v53, %v10510_v13 }
 0xfc2   :  { %v5129_v51 = vmul.f32 0.5, %v5128_v57  ;;  %v5080_v5 = vpop.xlane.xlu0 %5079 }
 0xfc3   :  { %v5195_v4 = vmax.f32 %v5187_v61, 0.0  ;;  %v5094_v36 = vmul.f32 %v5080_v5, %v10499_v59 }
 0xfc4   :  { %v5130_v6 = vsub.f32 1.5, %v5129_v51 }
 0xfc5   :  { %v7022_v32 = vpop.eup %7021  ;;  %5203 = vst.msk [vmem:[%s10614_s12 + $0x8] sm:$0xff] %vm2466_vm8, %v5195_v4  ;;  %v5102_v54 = vadd.f32 1e-05, %v5094_v36 }
 0xfc6   :  { %v5131_v42 = vmul.f32 %v7020_v23, %v5130_v6  ;;  %v5137_v38 = vmul.f32 %v7022_v32, %v5101_v22  ;;  %vm5143_vm3 = vweird.f32 %v7022_v32 }
 0xfc7   :  { %7023 = vrsqrt.f32 %v5102_v54  ;;  %vm5144_vm5 = vmor %vm5142_vm4, %vm5143_vm3  ;;  %vm5152_vm7 = vweird.f32 %v5102_v54 }
 0xfc8   :  { %v5135_v13 = vsel %vm5134_vm2, %v7020_v23, %v5131_v42  ;;  %v5138_v47 = vmul.f32 %v7022_v32, %v5137_v38 }
 0xfc9   :  { %v5188_v3 = vmul.f32 %v5135_v13, %v10517_v63 }
 0xfca   :  { %v5139_v48 = vmul.f32 0.5, %v5138_v47  ;;  %v5083_v21 = vpop.xlane.xlu2 %5082 }
 0xfcb   :  { %v5196_v31 = vmax.f32 %v5188_v3, 0.0  ;;  %v5095_v0 = vmul.f32 %v5083_v21, %v10499_v59 }
 0xfcc   :  { %v5140_v55 = vsub.f32 1.5, %v5139_v48 }
 0xfcd   :  { %v7024_v15 = vpop.eup %7023  ;;  %5204 = vst.msk [vmem:[%s10614_s12 + $0x10] sm:$0xff] %vm2466_vm8, %v5196_v31  ;;  %v5103_v20 = vadd.f32 1e-05, %v5095_v0 }
 0xfce   :  { %v5141_v17 = vmul.f32 %v7022_v32, %v5140_v55  ;;  %v5147_v16 = vmul.f32 %v7024_v15, %v5102_v54  ;;  %vm5153_vm6 = vweird.f32 %v7024_v15 }
 0xfcf   :  { %7025 = vrsqrt.f32 %v5103_v20  ;;  %vm5154_vm9 = vmor %vm5152_vm7, %vm5153_vm6  ;;  %vm5162_vm11 = vweird.f32 %v5103_v20 }
 0xfd0   :  { %v5145_v63 = vsel %vm5144_vm5, %v7022_v32, %v5141_v17  ;;  %v5148_v44 = vmul.f32 %v7024_v15, %v5147_v16 }
 0xfd1   :  { %v5189_v10 = vmul.f32 %v5145_v63, %v10524_v45 }
 0xfd2   :  { %v5149_v28 = vmul.f32 0.5, %v5148_v44  ;;  %v5086_v56 = vpop.xlane.xlu1 %5085 }
 0xfd3   :  { %v5197_v49 = vmax.f32 %v5189_v10, 0.0  ;;  %v5096_v2 = vmul.f32 %v5086_v56, %v10499_v59 }
 0xfd4   :  { %v5150_v14 = vsub.f32 1.5, %v5149_v28 }
 0xfd5   :  { %v7026_v19 = vpop.eup %7025  ;;  %5205 = vst.msk [vmem:[%s10614_s12 + $0x18] sm:$0xff] %vm2466_vm8, %v5197_v49  ;;  %v5104_v30 = vadd.f32 1e-05, %v5096_v2 }
 0xfd6   :  { %v5151_v37 = vmul.f32 %v7024_v15, %v5150_v14  ;;  %v5157_v46 = vmul.f32 %v7026_v19, %v5103_v20  ;;  %vm5163_vm10 = vweird.f32 %v7026_v19 }
 0xfd7   :  { %7027 = vrsqrt.f32 %v5104_v30  ;;  %vm5164_vm12 = vmor %vm5162_vm11, %vm5163_vm10  ;;  %vm5172_vm14 = vweird.f32 %v5104_v30 }
 0xfd8   :  { %v5155_v45 = vsel %vm5154_vm9, %v7024_v15, %v5151_v37  ;;  %v5158_v1 = vmul.f32 %v7026_v19, %v5157_v46 }
 0xfd9   :  { %v5190_v60 = vmul.f32 %v5155_v45, %v10531_v58 }
 0xfda   :  { %v5159_v41 = vmul.f32 0.5, %v5158_v1  ;;  %v5089_v9 = vpop.xlane.xlu0 %5088 }
 0xfdb   :  { %v5198_v8 = vmax.f32 %v5190_v60, 0.0  ;;  %v5097_v39 = vmul.f32 %v5089_v9, %v10499_v59 }
 0xfdc   :  { %v5160_v26 = vsub.f32 1.5, %v5159_v41 }
 0xfdd   :  { %v7028_v11 = vpop.eup %7027  ;;  %5206 = vst.msk [vmem:[%s10614_s12 + $0x20] sm:$0xff] %vm2466_vm8, %v5198_v8  ;;  %v5105_v7 = vadd.f32 1e-05, %v5097_v39 }
 0xfde   :  { %v5161_v35 = vmul.f32 %v7026_v19, %v5160_v26  ;;  %v5167_v52 = vmul.f32 %v7028_v11, %v5104_v30  ;;  %vm5173_vm13 = vweird.f32 %v7028_v11 }
 0xfdf   :  { %7029 = vrsqrt.f32 %v5105_v7  ;;  %vm5174_vm15 = vmor %vm5172_vm14, %vm5173_vm13  ;;  %vm5182_vm1 = vweird.f32 %v5105_v7 }
 0xfe0   :  { %v5165_v58 = vsel %vm5164_vm12, %v7026_v19, %v5161_v35  ;;  %v5168_v29 = vmul.f32 %v7028_v11, %v5167_v52 }
 0xfe1   :  { %v5191_v33 = vmul.f32 %v5165_v58, %v10537_v27 }
 0xfe2   :  { %v5169_v43 = vmul.f32 0.5, %v5168_v29 }
 0xfe3   :  { %v5199_v59 = vmax.f32 %v5191_v33, 0.0 }
 0xfe4   :  { %v5170_v62 = vsub.f32 1.5, %v5169_v43 }
 0xfe5   :  { %v7030_v34 = vpop.eup %7029  ;;  %5207 = vst.msk [vmem:[%s10614_s12 + $0x28] sm:$0xff] %vm2466_vm8, %v5199_v59 }
 0xfe6   :  { %v5171_v18 = vmul.f32 %v7028_v11, %v5170_v62  ;;  %v5177_v50 = vmul.f32 %v7030_v34, %v5105_v7  ;;  %vm5183_vm0 = vweird.f32 %v7030_v34 }
 0xfe7   :  { %vm5184_vm2 = vmor %vm5182_vm1, %vm5183_vm0 }
 0xfe8   :  { %v5175_v23 = vsel %vm5174_vm15, %v7028_v11, %v5171_v18  ;;  %v5178_v22 = vmul.f32 %v7030_v34, %v5177_v50 }
 0xfe9   :  { %v5192_v40 = vmul.f32 %v5175_v23, %v10543_v24 }
 0xfea   :  { %v5179_v12 = vmul.f32 0.5, %v5178_v22 }
 0xfeb   :  { %v5200_v27 = vmax.f32 %v5192_v40, 0.0 }
 0xfec   :  { %v5180_v53 = vsub.f32 1.5, %v5179_v12 }
 0xfed   :  { %5208 = vst.msk [vmem:[%s10614_s12 + $0x30] sm:$0xff] %vm2466_vm8, %v5200_v27 }
 0xfee   :  { %v5181_v57 = vmul.f32 %v7030_v34, %v5180_v53 }
 0xff0   :  { %v5185_v61 = vsel %vm5184_vm2, %v7030_v34, %v5181_v57 }
 0xff1   :  { %v5193_v51 = vmul.f32 %v5185_v61, %v10549_v25 }
 0xff3   :  { %v5201_v5 = vmax.f32 %v5193_v51, 0.0 }
 0xff5   :  { %5209 = vst.msk [vmem:[%s10614_s12 + $0x38] sm:$0xff] %vm2466_vm8, %v5201_v5 }

</bundles_post_ra>
